<compile_context>
chip_gen: v6e
topology: v6e:2x2x1
jax: 0.10.0
libtpu: 0.0.40
codegen_flags: <defaults>
</compile_context>

<pallas_src>
import functools

import jax
import jax.numpy as jnp
from jax import lax
from jax.experimental import pallas as pl
from jax.experimental.pallas import tpu as pltpu

LN_EPS = 1e-5  # nn.LayerNorm default

PARAM_ORDER = ["norm1_w", "norm1_b", "q_w", "kv_w", "proj_w", "proj_b",
               "attn_norm_w", "attn_norm_b", "norm2_w", "norm2_b",
               "fc1_w", "fc1_b", "dw_w", "dw_b", "fc2_w", "fc2_b"]
BF16_PARAMS = {"q_w", "kv_w", "proj_w", "fc1_w", "fc2_w"}

# A @ B.T contraction.
_TRANS_B = (((1,), (1,)), ((), ()))


def _layernorm(x, w, b):
    mu = jnp.mean(x, axis=-1, keepdims=True)
    var = jnp.mean(jnp.square(x - mu), axis=-1, keepdims=True)
    return (x - mu) * lax.rsqrt(var + LN_EPS) * w + b


def _gelu(x):
    # tanh-based GELU (EUP) instead of a VALU erf polynomial; |err| ~3e-4.
    c = 0.7978845608028654  # sqrt(2/pi)
    return 0.5 * x * (1.0 + jnp.tanh(c * (x + 0.044715 * (x * x * x))))


def _iota_f(shape, dim):
    return lax.broadcasted_iota(jnp.int32, shape, dim).astype(jnp.float32)


def _fdiv(x, m):
    # floor(x / m) for small non-negative integer-valued f32 x.  The +0.5 keeps
    # the quotient >= 0.5/m away from integer boundaries so a 1-ulp division
    # error can never flip the floor at exact multiples.
    return jnp.floor((x + 0.5) / float(m))


def _fmod(x, m):
    return x - _fdiv(x, m) * float(m)


def block_kernel(H, W, num_heads,
                 x_ref,
                 n1w, n1b, qw, kvw, pw, pb, anw, anb, n2w, n2b,
                 f1w, f1b, dww, dwb, f2w, f2b,
                 out_ref, mp_ref, pad_ref):
    R, C = x_ref.shape                 # R = Bt * N token rows
    N = H * W + 1
    L = N - 1
    Bt = R // N
    NH = num_heads
    hd = C // NH
    BH = Bt * NH                       # per-key-group column width
    scale = float(hd) ** -0.5
    f32 = jnp.float32
    bf16 = jnp.bfloat16

    x = x_ref[...]                                        # (R, C)
    x1 = _layernorm(x, n1w[...], n1b[...])                # norm1, all rows
    x1_bf = x1.astype(bf16)

    # ---- q projection for every token in one bf16 MXU call ----
    q = jnp.dot(x1_bf, qw[...], preferred_element_type=f32)          # (R, C)

    # ---- batched get_featmap_for_select + simFeats_fusion (block-diagonal) ----
    b_i = _iota_f((Bt, R), 0)                 # sample index b (rows)
    r_i = _iota_f((Bt, R), 1)                 # token row index r (lanes)
    sid = _fdiv(r_i, N)                       # sample id of token row r
    rmod = r_i - sid * float(N)               # within-sample token index
    sel_wt = (r_i == b_i * float(N)).astype(f32)                       # wt rows
    valid_img = jnp.logical_and(sid == b_i, rmod >= 0.5).astype(f32)   # own image tokens

    wt_tok = jnp.dot(sel_wt, x1, preferred_element_type=f32)           # (Bt, C)
    mw = lax.dot_general(wt_tok, x1, _TRANS_B,
                         preferred_element_type=f32)                   # (Bt, R), f32
    prob = jax.nn.sigmoid(mw)
    mask_raw = (prob > 0.5).astype(f32) * valid_img
    cnt = jnp.sum(mask_raw, axis=1, keepdims=True)                     # (Bt, 1)
    mask = jnp.where(cnt == 0.0, valid_img, mask_raw)                  # fixed mask
    coef_po = mask * mw                                                # zero off-block
    coef_ne = (valid_img - mask) * mw
    poneg = jnp.dot(jnp.concatenate([coef_po, coef_ne], axis=0), x1,
                    preferred_element_type=f32)                        # (2Bt, C)

    # mask/prob packed lane-dense as (Bt, 2L) = [mask | prob]
    rows = []
    for b in range(Bt):
        lo = b * N + 1
        rows.append(jnp.concatenate(
            [mask[b:b + 1, lo:lo + L], prob[b:b + 1, lo:lo + L]], axis=1))
    mp_ref[...] = jnp.concatenate(rows, axis=0)

    # ---- kv on the fused tokens: rows [0,Bt)=wt, [Bt,2Bt)=po, [2Bt,3Bt)=ne ----
    xf = _layernorm(jnp.concatenate([wt_tok, poneg], axis=0), anw[...], anb[...])
    kv = jnp.dot(xf.astype(bf16), kvw[...], preferred_element_type=f32)  # (3Bt, 2C)

    # ---- block-diagonal batched multi-head attention (3 MXU calls) ----
    # Expanded key/value row j = m*BH + b*NH + h  (source kv row = j // NH),
    # channel-masked to head h, so per-head logits are one big (R, 3BH) matmul.
    J = 3 * BH
    j_e = _iota_f((J, 3 * Bt), 0)
    i_e = _iota_f((J, 3 * Bt), 1)
    expand = (i_e == _fdiv(j_e, NH)).astype(f32)                        # (J, 3Bt)
    kv2 = jnp.dot(expand, kv, preferred_element_type=f32)               # (J, 2C)
    j_c = _iota_f((J, C), 0)
    c_c = _iota_f((J, C), 1)
    hsel = (_fdiv(c_c, hd) == _fmod(j_c, NH)).astype(f32)               # head mask
    k2 = kv2[:, :C] * hsel
    v2 = kv2[:, C:] * hsel

    logits = lax.dot_general(q, k2, _TRANS_B,
                             preferred_element_type=f32) * scale        # (R, J)
    l0 = logits[:, 0:BH]
    l1 = logits[:, BH:2 * BH]
    l2 = logits[:, 2 * BH:3 * BH]
    mx = jnp.maximum(jnp.maximum(l0, l1), l2)
    e0 = jnp.exp(l0 - mx)
    e1 = jnp.exp(l1 - mx)
    e2 = jnp.exp(l2 - mx)
    inv = pl.reciprocal(e0 + e1 + e2, approx=True)
    # Kill cross-sample columns AFTER normalization (denominator stays finite).
    r_s = _iota_f((R, BH), 0)
    j_s = _iota_f((R, BH), 1)
    smask = (_fdiv(j_s, NH) == _fdiv(r_s, N)).astype(f32)
    pfull = jnp.concatenate(
        [e0 * inv * smask, e1 * inv * smask, e2 * inv * smask], axis=1)  # (R, J)
    attn = jnp.dot(pfull, v2, preferred_element_type=f32)                # (R, C)

    proj = jnp.dot(attn.astype(bf16), pw[...], preferred_element_type=f32) + pb[...]
    xr = x + proj                                         # residual 1 (drop_path = Id)

    # ---- MLP: fc1, depthwise 3x3 conv in-place on the (R, hidden) slab ----
    y = _layernorm(xr, n2w[...], n2b[...])                # norm2
    h1 = jnp.dot(y.astype(bf16), f1w[...], preferred_element_type=f32) + f1b[...]
    hidden = h1.shape[1]

    # Stage h1 into a zero-headroom scratch; each shifted tap is a static slice.
    HEAD = ((W + 1 + 7) // 8) * 8
    pad_ref[0:HEAD, :] = jnp.zeros((HEAD, hidden), f32)
    pad_ref[HEAD:HEAD + R, :] = h1
    tail = pad_ref.shape[0] - (HEAD + R)
    pad_ref[HEAD + R:, :] = jnp.zeros((tail, hidden), f32)

    rid = _iota_f((R, 1), 0)
    sidr = _fdiv(rid, N)
    rmodr = rid - sidr * float(N)
    is_img = rmodr >= 0.5                      # row 0 of each sample is the wt token
    nl = jnp.maximum(rmodr - 1.0, 0.0)         # flat y*W + x index within the image
    tx = _fmod(nl, W)
    c_top = nl >= float(W)
    c_bot = nl < float(L - W)
    c_left = tx >= 1.0
    c_right = tx < float(W - 1)

    dwwv = dww[...]
    conv = None
    for dy in (-1, 0, 1):
        for dx in (-1, 0, 1):
            off = dy * W + dx
            m = is_img
            if dy == -1:
                m = jnp.logical_and(m, c_top)
            elif dy == 1:
                m = jnp.logical_and(m, c_bot)
            if dx == -1:
                m = jnp.logical_and(m, c_left)
            elif dx == 1:
                m = jnp.logical_and(m, c_right)
            mf = m.astype(f32)                                   # (R, 1)
            tap = h1 if off == 0 else pad_ref[HEAD + off:HEAD + off + R, :]
            widx = (dy + 1) * 3 + (dx + 1)
            t = (tap * mf) * dwwv[widx:widx + 1, :]
            conv = t if conv is None else conv + t
    h2 = jnp.where(is_img, conv + dwb[...], h1)            # wt rows bypass the conv

    act = _gelu(h2)
    mlp = jnp.dot(act.astype(bf16), f2w[...], preferred_element_type=f32) + f2b[...]
    out_ref[...] = xr + mlp                                # residual 2


def block_forward(x, params, H, W, num_heads, batch_tile=None,
                  vmem_limit_bytes=None):
    B, N, C = x.shape
    L = N - 1
    assert N == H * W + 1 and C % num_heads == 0
    if batch_tile is None:
        # (Bt*N) must be a multiple of 8 (or Bt == B) for the sublane rule on
        # the (Bt*N, C) block; with odd N that means Bt % 8 == 0.  Prefer >=2
        # grid steps (v7x megacore) with tiles of up to 32 samples.
        batch_tile = B
        if B % 8 == 0 and B >= 16:
            for cand in (32, 24, 16, 8):
                if B % cand == 0 and B // cand >= 2:
                    batch_tile = cand
                    break
    assert B % batch_tile == 0
    Bt = batch_tile
    assert Bt == B or (Bt * N) % 8 == 0
    assert B * N < (1 << 24)          # in-kernel f32 index math must stay exact
    grid = (B // Bt,)
    R = Bt * N

    x_flat = x.reshape(B * N, C)
    plist = [params[k].astype(jnp.bfloat16) if k in BF16_PARAMS else params[k]
             for k in PARAM_ORDER]
    hidden = params["fc1_w"].shape[1]

    kernel = functools.partial(block_kernel, H, W, num_heads)

    def full_spec(p):
        nd = p.ndim
        return pl.BlockSpec(p.shape, lambda g, _nd=nd: (0,) * _nd)

    in_specs = ([pl.BlockSpec((R, C), lambda g: (g, 0))]
                + [full_spec(p) for p in plist])
    out_shape = (jax.ShapeDtypeStruct((B * N, C), jnp.float32),
                 jax.ShapeDtypeStruct((B, 2 * L), jnp.float32))
    out_specs = [pl.BlockSpec((R, C), lambda g: (g, 0)),
                 pl.BlockSpec((Bt, 2 * L), lambda g: (g, 0))]

    HEAD = ((W + 1 + 7) // 8) * 8
    pad_rows = ((HEAD + R + W + 1 + 7) // 8) * 8
    scratch_shapes = [pltpu.VMEM((pad_rows, hidden), jnp.float32)]

    cp = dict(dimension_semantics=("parallel",))
    if vmem_limit_bytes is not None:   # raise for large production tiles
        cp["vmem_limit_bytes"] = vmem_limit_bytes

    out_flat, mp2d = pl.pallas_call(
        kernel,
        out_shape=out_shape,
        grid_spec=pltpu.PrefetchScalarGridSpec(
            num_scalar_prefetch=0,
            grid=grid,
            in_specs=in_specs,
            out_specs=out_specs,
            scratch_shapes=scratch_shapes),
        compiler_params=pltpu.CompilerParams(**cp),
    )(x_flat, *plist)

    out = out_flat.reshape(B, N, C)
    mask = mp2d[:, :L][:, :, None]      # back to the module's (B, L, 1) layout
    prob = mp2d[:, L:][:, :, None]
    return out, mask, prob


def block_reference(x, params, H, W, num_heads):
    """Pure-JAX reference mirroring the PyTorch Block (sr_ratio > 1)."""
    B, N, C = x.shape
    hd = C // num_heads
    scale = float(hd) ** -0.5
    x1 = _layernorm(x, params["norm1_w"], params["norm1_b"])
    wt, tok = x1[:, :1, :], x1[:, 1:, :]
    mw = jnp.sum(tok * wt, axis=-1, keepdims=True)
    prob = jax.nn.sigmoid(mw)
    mask = (prob > 0.5).astype(jnp.float32)
    cnt = jnp.sum(mask, axis=(1, 2))
    mask = jnp.where((cnt == 0)[:, None, None], jnp.ones_like(mask), mask)
    q = x1 @ params["q_w"]
    x_po_f = jnp.sum((tok * mask) * (mw * mask), axis=1, keepdims=True)
    x_ne_f = jnp.sum((tok * (1 - mask)) * (mw * (1 - mask)), axis=1, keepdims=True)
    xf = jnp.concatenate([wt, x_po_f, x_ne_f], axis=1)
    xf = _layernorm(xf, params["attn_norm_w"], params["attn_norm_b"])
    kv = xf @ params["kv_w"]
    k, v = kv[..., :C], kv[..., C:]
    qh = q.reshape(B, N, num_heads, hd).transpose(0, 2, 1, 3)
    kh = k.reshape(B, -1, num_heads, hd).transpose(0, 2, 1, 3)
    vh = v.reshape(B, -1, num_heads, hd).transpose(0, 2, 1, 3)
    a = jax.nn.softmax((qh @ kh.transpose(0, 1, 3, 2)) * scale, axis=-1)
    o = (a @ vh).transpose(0, 2, 1, 3).reshape(B, N, C)
    o = o @ params["proj_w"] + params["proj_b"]
    xr = x + o
    y = _layernorm(xr, params["norm2_w"], params["norm2_b"])
    h1 = y @ params["fc1_w"] + params["fc1_b"]
    wt_h = h1[:, :1, :]
    img = h1[:, 1:, :].reshape(B, H, W, -1)
    pad = jnp.pad(img, ((0, 0), (1, 1), (1, 1), (0, 0)))
    conv = jnp.zeros_like(img)
    for ky in range(3):
        for kx in range(3):
            conv = conv + pad[:, ky:ky + H, kx:kx + W, :] * params["dw_w"][ky * 3 + kx]
    conv = conv + params["dw_b"]
    h2 = jnp.concatenate([wt_h, conv.reshape(B, H * W, -1)], axis=1)
    mlp_out = jax.nn.gelu(h2, approximate=False) @ params["fc2_w"] + params["fc2_b"]
    return xr + mlp_out, mask, prob


if __name__ == "__main__":
    # dim=32, heads=4, mlp_ratio=2, sr_ratio=2 (>1 branch), H=W=8, N = H*W + 1.
    H = W = 8
    C = 32
    num_heads = 4
    hidden = int(C * 2.0)
    N = H * W + 1

    key = jax.random.PRNGKey(0)
    keys = jax.random.split(key, 8)
    params = {
        "norm1_w": jnp.ones((1, C), jnp.float32),
        "norm1_b": jnp.zeros((1, C), jnp.float32),
        "q_w": 0.02 * jax.random.normal(keys[0], (C, C), jnp.float32),
        "kv_w": 0.02 * jax.random.normal(keys[1], (C, 2 * C), jnp.float32),
        "proj_w": 0.02 * jax.random.normal(keys[2], (C, C), jnp.float32),
        "proj_b": jnp.zeros((1, C), jnp.float32),
        "attn_norm_w": jnp.ones((1, C), jnp.float32),
        "attn_norm_b": jnp.zeros((1, C), jnp.float32),
        "norm2_w": jnp.ones((1, C), jnp.float32),
        "norm2_b": jnp.zeros((1, C), jnp.float32),
        "fc1_w": 0.02 * jax.random.normal(keys[3], (C, hidden), jnp.float32),
        "fc1_b": jnp.zeros((1, hidden), jnp.float32),
        "dw_w": (2.0 / 9.0) ** 0.5 * jax.random.normal(keys[4], (9, hidden), jnp.float32),
        "dw_b": jnp.zeros((1, hidden), jnp.float32),
        "fc2_w": 0.02 * jax.random.normal(keys[5], (hidden, C), jnp.float32),
        "fc2_b": jnp.zeros((1, C), jnp.float32),
    }

    def run_case(B, xkey):
        x = jax.random.normal(xkey, (B, N, C), jnp.float32)
        out, mask, prob = block_forward(x, params, H, W, num_heads)
        jax.block_until_ready((out, mask, prob))
        ref_out, ref_mask, ref_prob = block_reference(x, params, H, W, num_heads)
        assert out.shape == (B, N, C)
        assert mask.shape == (B, N - 1, 1) and prob.shape == (B, N - 1, 1)
        assert bool(jnp.all(jnp.isfinite(out)))
        assert bool(jnp.allclose(prob, ref_prob, atol=1e-3, rtol=1e-3))
        near_thresh = jnp.abs(ref_prob - 0.5) < 1e-3
        assert bool(jnp.all((mask == ref_mask) | near_thresh))
        assert bool(jnp.allclose(out, ref_out, atol=2e-2, rtol=2e-2))

    run_case(2, keys[6])     # single grid step (Bt = B = 2)
    run_case(16, keys[7])    # multi-step grid (Bt = 8, grid = (2,))
    print("KERNEL_OK")
</pallas_src>

<mosaic_0001>
module attributes {stable_mosaic.version = 11 : i64} {
  func.func @block_kernel(%arg0: i32, %arg1: memref<130x32xf32, #tpu.memory_space<vmem>>, %arg2: memref<1x32xf32, #tpu.memory_space<vmem>>, %arg3: memref<1x32xf32, #tpu.memory_space<vmem>>, %arg4: memref<32x32xbf16, #tpu.memory_space<vmem>>, %arg5: memref<32x64xbf16, #tpu.memory_space<vmem>>, %arg6: memref<32x32xbf16, #tpu.memory_space<vmem>>, %arg7: memref<1x32xf32, #tpu.memory_space<vmem>>, %arg8: memref<1x32xf32, #tpu.memory_space<vmem>>, %arg9: memref<1x32xf32, #tpu.memory_space<vmem>>, %arg10: memref<1x32xf32, #tpu.memory_space<vmem>>, %arg11: memref<1x32xf32, #tpu.memory_space<vmem>>, %arg12: memref<32x64xbf16, #tpu.memory_space<vmem>>, %arg13: memref<1x64xf32, #tpu.memory_space<vmem>>, %arg14: memref<9x64xf32, #tpu.memory_space<vmem>>, %arg15: memref<1x64xf32, #tpu.memory_space<vmem>>, %arg16: memref<64x32xbf16, #tpu.memory_space<vmem>>, %arg17: memref<1x32xf32, #tpu.memory_space<vmem>>, %arg18: memref<130x32xf32, #tpu.memory_space<vmem>>, %arg19: memref<2x128xf32, #tpu.memory_space<vmem>>, %arg20: memref<160x64xf32, #tpu.memory_space<vmem>>) attributes {dimension_semantics = [#tpu.dimension_semantics<parallel>], iteration_bounds = array<i64: 1>, scalar_prefetch = 0 : i64, scratch_operands = 1 : i64, tpu.core_type = #tpu.core_type<tc>, window_params = [{transform_indices = @transform_0, window_bounds = array<i64: 130, 32>}, {pipeline_mode = #tpu.pipeline_mode<synchronous>, transform_indices = @transform_1, window_bounds = array<i64: 1, 32>}, {pipeline_mode = #tpu.pipeline_mode<synchronous>, transform_indices = @transform_2, window_bounds = array<i64: 1, 32>}, {pipeline_mode = #tpu.pipeline_mode<synchronous>, transform_indices = @transform_3, window_bounds = array<i64: 32, 32>}, {pipeline_mode = #tpu.pipeline_mode<synchronous>, transform_indices = @transform_4, window_bounds = array<i64: 32, 64>}, {pipeline_mode = #tpu.pipeline_mode<synchronous>, transform_indices = @transform_5, window_bounds = array<i64: 32, 32>}, {pipeline_mode = #tpu.pipeline_mode<synchronous>, transform_indices = @transform_6, window_bounds = array<i64: 1, 32>}, {pipeline_mode = #tpu.pipeline_mode<synchronous>, transform_indices = @transform_7, window_bounds = array<i64: 1, 32>}, {pipeline_mode = #tpu.pipeline_mode<synchronous>, transform_indices = @transform_8, window_bounds = array<i64: 1, 32>}, {pipeline_mode = #tpu.pipeline_mode<synchronous>, transform_indices = @transform_9, window_bounds = array<i64: 1, 32>}, {pipeline_mode = #tpu.pipeline_mode<synchronous>, transform_indices = @transform_10, window_bounds = array<i64: 1, 32>}, {pipeline_mode = #tpu.pipeline_mode<synchronous>, transform_indices = @transform_11, window_bounds = array<i64: 32, 64>}, {pipeline_mode = #tpu.pipeline_mode<synchronous>, transform_indices = @transform_12, window_bounds = array<i64: 1, 64>}, {pipeline_mode = #tpu.pipeline_mode<synchronous>, transform_indices = @transform_13, window_bounds = array<i64: 9, 64>}, {pipeline_mode = #tpu.pipeline_mode<synchronous>, transform_indices = @transform_14, window_bounds = array<i64: 1, 64>}, {pipeline_mode = #tpu.pipeline_mode<synchronous>, transform_indices = @transform_15, window_bounds = array<i64: 64, 32>}, {pipeline_mode = #tpu.pipeline_mode<synchronous>, transform_indices = @transform_16, window_bounds = array<i64: 1, 32>}, {transform_indices = @transform_17, window_bounds = array<i64: 130, 32>}, {transform_indices = @transform_18, window_bounds = array<i64: 2, 128>}]} {
    %c0 = arith.constant 0 : index
    %c0_0 = arith.constant 0 : index
    %0 = vector.load %arg1[%c0, %c0_0] : memref<130x32xf32, #tpu.memory_space<vmem>>, vector<130x32xf32>
    %c0_1 = arith.constant 0 : index
    %c0_2 = arith.constant 0 : index
    %1 = vector.load %arg2[%c0_1, %c0_2] : memref<1x32xf32, #tpu.memory_space<vmem>>, vector<1x32xf32>
    %c0_3 = arith.constant 0 : index
    %c0_4 = arith.constant 0 : index
    %2 = vector.load %arg3[%c0_3, %c0_4] : memref<1x32xf32, #tpu.memory_space<vmem>>, vector<1x32xf32>
    %cst = arith.constant dense<0.000000e+00> : vector<130xf32>
    %3 = vector.multi_reduction <add>, %0, %cst [1] : vector<130x32xf32> to vector<130xf32>
    %4 = vector.shape_cast %3 : vector<130xf32> to vector<130x1xf32>
    %cst_5 = arith.constant 3.200000e+01 : f32
    %5 = vector.broadcast %cst_5 : f32 to vector<130x1xf32>
    %6 = arith.divf %4, %5 : vector<130x1xf32>
    %7 = vector.broadcast %6 : vector<130x1xf32> to vector<130x32xf32>
    %8 = arith.subf %0, %7 : vector<130x32xf32>
    %9 = arith.mulf %8, %8 : vector<130x32xf32>
    %cst_6 = arith.constant dense<0.000000e+00> : vector<130xf32>
    %10 = vector.multi_reduction <add>, %9, %cst_6 [1] : vector<130x32xf32> to vector<130xf32>
    %11 = vector.shape_cast %10 : vector<130xf32> to vector<130x1xf32>
    %cst_7 = arith.constant 3.200000e+01 : f32
    %12 = vector.broadcast %cst_7 : f32 to vector<130x1xf32>
    %13 = arith.divf %11, %12 : vector<130x1xf32>
    %14 = vector.broadcast %6 : vector<130x1xf32> to vector<130x32xf32>
    %15 = arith.subf %0, %14 : vector<130x32xf32>
    %cst_8 = arith.constant 9.99999974E-6 : f32
    %16 = vector.broadcast %cst_8 : f32 to vector<130x1xf32>
    %17 = arith.addf %13, %16 : vector<130x1xf32>
    %18 = math.rsqrt %17 : vector<130x1xf32>
    %19 = vector.broadcast %18 : vector<130x1xf32> to vector<130x32xf32>
    %20 = arith.mulf %15, %19 : vector<130x32xf32>
    %21 = vector.broadcast %1 : vector<1x32xf32> to vector<130x32xf32>
    %22 = arith.mulf %20, %21 : vector<130x32xf32>
    %23 = vector.broadcast %2 : vector<1x32xf32> to vector<130x32xf32>
    %24 = arith.addf %22, %23 : vector<130x32xf32>
    %25 = arith.truncf %24 : vector<130x32xf32> to vector<130x32xbf16>
    %c0_9 = arith.constant 0 : index
    %c0_10 = arith.constant 0 : index
    %26 = vector.load %arg4[%c0_9, %c0_10] : memref<32x32xbf16, #tpu.memory_space<vmem>>, vector<32x32xbf16>
    %cst_11 = arith.constant dense<0.000000e+00> : vector<130x32xf32>
    %27 = tpu.matmul %25, %26, %cst_11 {dimension_numbers = #tpu.dot_dimension_numbers<[1], [0], [0], [1], [0, 0, 1, 1], [], []>} : vector<130x32xbf16>, vector<32x32xbf16>, vector<130x32xf32> -> vector<130x32xf32>
    %28 = tpu.iota {dimensions = array<i32: 0>} : vector<2x130xi32>
    %29 = arith.sitofp %28 : vector<2x130xi32> to vector<2x130xf32>
    %30 = tpu.iota {dimensions = array<i32: 1>} : vector<2x130xi32>
    %31 = arith.sitofp %30 : vector<2x130xi32> to vector<2x130xf32>
    %cst_12 = arith.constant 5.000000e-01 : f32
    %32 = vector.broadcast %cst_12 : f32 to vector<2x130xf32>
    %33 = arith.addf %31, %32 : vector<2x130xf32>
    %cst_13 = arith.constant 6.500000e+01 : f32
    %34 = vector.broadcast %cst_13 : f32 to vector<2x130xf32>
    %35 = arith.divf %33, %34 : vector<2x130xf32>
    %36 = math.floor %35 : vector<2x130xf32>
    %cst_14 = arith.constant 6.500000e+01 : f32
    %37 = vector.broadcast %cst_14 : f32 to vector<2x130xf32>
    %38 = arith.mulf %36, %37 : vector<2x130xf32>
    %39 = arith.subf %31, %38 : vector<2x130xf32>
    %cst_15 = arith.constant 6.500000e+01 : f32
    %40 = vector.broadcast %cst_15 : f32 to vector<2x130xf32>
    %41 = arith.mulf %29, %40 : vector<2x130xf32>
    %42 = arith.cmpf oeq, %31, %41 : vector<2x130xf32>
    %43 = arith.extui %42 : vector<2x130xi1> to vector<2x130xi32>
    %44 = arith.sitofp %43 : vector<2x130xi32> to vector<2x130xf32>
    %45 = arith.cmpf oeq, %36, %29 : vector<2x130xf32>
    %cst_16 = arith.constant 5.000000e-01 : f32
    %46 = vector.broadcast %cst_16 : f32 to vector<2x130xf32>
    %47 = arith.cmpf oge, %39, %46 : vector<2x130xf32>
    %48 = arith.andi %45, %47 : vector<2x130xi1>
    %49 = arith.extui %48 : vector<2x130xi1> to vector<2x130xi32>
    %50 = arith.sitofp %49 : vector<2x130xi32> to vector<2x130xf32>
    %cst_17 = arith.constant dense<0.000000e+00> : vector<2x32xf32>
    %51 = tpu.matmul %44, %24, %cst_17 {dimension_numbers = #tpu.dot_dimension_numbers<[1], [0], [0], [1], [0, 0, 1, 1], [], []>} : vector<2x130xf32>, vector<130x32xf32>, vector<2x32xf32> -> vector<2x32xf32>
    %cst_18 = arith.constant dense<0.000000e+00> : vector<2x130xf32>
    %52 = tpu.matmul %51, %24, %cst_18 {dimension_numbers = #tpu.dot_dimension_numbers<[1], [1], [0], [0], [0, 0, 1, 0], [], []>} : vector<2x32xf32>, vector<130x32xf32>, vector<2x130xf32> -> vector<2x130xf32>
    %53 = arith.negf %52 : vector<2x130xf32>
    %54 = math.exp %53 : vector<2x130xf32>
    %cst_19 = arith.constant 1.000000e+00 : f32
    %55 = vector.broadcast %cst_19 : f32 to vector<2x130xf32>
    %56 = arith.addf %55, %54 : vector<2x130xf32>
    %57 = arith.divf %55, %56 : vector<2x130xf32>
    %cst_20 = arith.constant 5.000000e-01 : f32
    %58 = vector.broadcast %cst_20 : f32 to vector<2x130xf32>
    %59 = arith.cmpf ogt, %57, %58 : vector<2x130xf32>
    %60 = arith.extui %59 : vector<2x130xi1> to vector<2x130xi32>
    %61 = arith.sitofp %60 : vector<2x130xi32> to vector<2x130xf32>
    %62 = arith.mulf %61, %50 : vector<2x130xf32>
    %cst_21 = arith.constant dense<0.000000e+00> : vector<2xf32>
    %63 = vector.multi_reduction <add>, %62, %cst_21 [1] : vector<2x130xf32> to vector<2xf32>
    %64 = vector.shape_cast %63 : vector<2xf32> to vector<2x1xf32>
    %cst_22 = arith.constant 0.000000e+00 : f32
    %65 = vector.broadcast %cst_22 : f32 to vector<2x1xf32>
    %66 = arith.cmpf oeq, %64, %65 : vector<2x1xf32>
    %67 = vector.shape_cast %66 : vector<2x1xi1> to vector<2x1xi1>
    %68 = vector.broadcast %67 : vector<2x1xi1> to vector<2x130xi1>
    %69 = arith.select %68, %50, %62 : vector<2x130xi1>, vector<2x130xf32>
    %70 = arith.mulf %69, %52 : vector<2x130xf32>
    %71 = arith.subf %50, %69 : vector<2x130xf32>
    %72 = arith.mulf %71, %52 : vector<2x130xf32>
    %73 = tpu.concatenate %70, %72 in 0 : vector<2x130xf32>, vector<2x130xf32> -> vector<4x130xf32>
    %cst_23 = arith.constant dense<0.000000e+00> : vector<4x32xf32>
    %74 = tpu.matmul %73, %24, %cst_23 {dimension_numbers = #tpu.dot_dimension_numbers<[1], [0], [0], [1], [0, 0, 1, 1], [], []>} : vector<4x130xf32>, vector<130x32xf32>, vector<4x32xf32> -> vector<4x32xf32>
    %75 = vector.extract_strided_slice %69 {offsets = [0, 1], sizes = [1, 64], strides = [1, 1]} : vector<2x130xf32> to vector<1x64xf32>
    %76 = vector.extract_strided_slice %57 {offsets = [0, 1], sizes = [1, 64], strides = [1, 1]} : vector<2x130xf32> to vector<1x64xf32>
    %77 = tpu.concatenate %75, %76 in 1 : vector<1x64xf32>, vector<1x64xf32> -> vector<1x128xf32>
    %78 = vector.extract_strided_slice %69 {offsets = [1, 66], sizes = [1, 64], strides = [1, 1]} : vector<2x130xf32> to vector<1x64xf32>
    %79 = vector.extract_strided_slice %57 {offsets = [1, 66], sizes = [1, 64], strides = [1, 1]} : vector<2x130xf32> to vector<1x64xf32>
    %80 = tpu.concatenate %78, %79 in 1 : vector<1x64xf32>, vector<1x64xf32> -> vector<1x128xf32>
    %81 = tpu.concatenate %77, %80 in 0 : vector<1x128xf32>, vector<1x128xf32> -> vector<2x128xf32>
    %c0_24 = arith.constant 0 : index
    %c0_25 = arith.constant 0 : index
    %82 = vector.load %arg19[%c0_24, %c0_25] : memref<2x128xf32, #tpu.memory_space<vmem>>, vector<2x128xf32>
    tpu.vector_store %arg19[%c0_24, %c0_25], %81 {strides = array<i32>} : memref<2x128xf32, #tpu.memory_space<vmem>>, vector<2x128xf32>,
    %83 = tpu.concatenate %51, %74 in 0 : vector<2x32xf32>, vector<4x32xf32> -> vector<6x32xf32>
    %c0_26 = arith.constant 0 : index
    %c0_27 = arith.constant 0 : index
    %84 = vector.load %arg8[%c0_26, %c0_27] : memref<1x32xf32, #tpu.memory_space<vmem>>, vector<1x32xf32>
    %c0_28 = arith.constant 0 : index
    %c0_29 = arith.constant 0 : index
    %85 = vector.load %arg9[%c0_28, %c0_29] : memref<1x32xf32, #tpu.memory_space<vmem>>, vector<1x32xf32>
    %cst_30 = arith.constant dense<0.000000e+00> : vector<6xf32>
    %86 = vector.multi_reduction <add>, %83, %cst_30 [1] : vector<6x32xf32> to vector<6xf32>
    %87 = vector.shape_cast %86 : vector<6xf32> to vector<6x1xf32>
    %cst_31 = arith.constant 3.200000e+01 : f32
    %88 = vector.broadcast %cst_31 : f32 to vector<6x1xf32>
    %89 = arith.divf %87, %88 : vector<6x1xf32>
    %90 = vector.broadcast %89 : vector<6x1xf32> to vector<6x32xf32>
    %91 = arith.subf %83, %90 : vector<6x32xf32>
    %92 = arith.mulf %91, %91 : vector<6x32xf32>
    %cst_32 = arith.constant dense<0.000000e+00> : vector<6xf32>
    %93 = vector.multi_reduction <add>, %92, %cst_32 [1] : vector<6x32xf32> to vector<6xf32>
    %94 = vector.shape_cast %93 : vector<6xf32> to vector<6x1xf32>
    %cst_33 = arith.constant 3.200000e+01 : f32
    %95 = vector.broadcast %cst_33 : f32 to vector<6x1xf32>
    %96 = arith.divf %94, %95 : vector<6x1xf32>
    %97 = vector.broadcast %89 : vector<6x1xf32> to vector<6x32xf32>
    %98 = arith.subf %83, %97 : vector<6x32xf32>
    %cst_34 = arith.constant 9.99999974E-6 : f32
    %99 = vector.broadcast %cst_34 : f32 to vector<6x1xf32>
    %100 = arith.addf %96, %99 : vector<6x1xf32>
    %101 = math.rsqrt %100 : vector<6x1xf32>
    %102 = vector.broadcast %101 : vector<6x1xf32> to vector<6x32xf32>
    %103 = arith.mulf %98, %102 : vector<6x32xf32>
    %104 = vector.broadcast %84 : vector<1x32xf32> to vector<6x32xf32>
    %105 = arith.mulf %103, %104 : vector<6x32xf32>
    %106 = vector.broadcast %85 : vector<1x32xf32> to vector<6x32xf32>
    %107 = arith.addf %105, %106 : vector<6x32xf32>
    %108 = arith.truncf %107 : vector<6x32xf32> to vector<6x32xbf16>
    %c0_35 = arith.constant 0 : index
    %c0_36 = arith.constant 0 : index
    %109 = vector.load %arg5[%c0_35, %c0_36] : memref<32x64xbf16, #tpu.memory_space<vmem>>, vector<32x64xbf16>
    %cst_37 = arith.constant dense<0.000000e+00> : vector<6x64xf32>
    %110 = tpu.matmul %108, %109, %cst_37 {dimension_numbers = #tpu.dot_dimension_numbers<[1], [0], [0], [1], [0, 0, 1, 1], [], []>} : vector<6x32xbf16>, vector<32x64xbf16>, vector<6x64xf32> -> vector<6x64xf32>
    %111 = tpu.iota {dimensions = array<i32: 0>} : vector<24x6xi32>
    %112 = arith.sitofp %111 : vector<24x6xi32> to vector<24x6xf32>
    %113 = tpu.iota {dimensions = array<i32: 1>} : vector<24x6xi32>
    %114 = arith.sitofp %113 : vector<24x6xi32> to vector<24x6xf32>
    %cst_38 = arith.constant 5.000000e-01 : f32
    %115 = vector.broadcast %cst_38 : f32 to vector<24x6xf32>
    %116 = arith.addf %112, %115 : vector<24x6xf32>
    %cst_39 = arith.constant 4.000000e+00 : f32
    %117 = vector.broadcast %cst_39 : f32 to vector<24x6xf32>
    %118 = arith.divf %116, %117 : vector<24x6xf32>
    %119 = math.floor %118 : vector<24x6xf32>
    %120 = arith.cmpf oeq, %114, %119 : vector<24x6xf32>
    %121 = arith.extui %120 : vector<24x6xi1> to vector<24x6xi32>
    %122 = arith.sitofp %121 : vector<24x6xi32> to vector<24x6xf32>
    %cst_40 = arith.constant dense<0.000000e+00> : vector<24x64xf32>
    %123 = tpu.matmul %122, %110, %cst_40 {dimension_numbers = #tpu.dot_dimension_numbers<[1], [0], [0], [1], [0, 0, 1, 1], [], []>} : vector<24x6xf32>, vector<6x64xf32>, vector<24x64xf32> -> vector<24x64xf32>
    %124 = tpu.iota {dimensions = array<i32: 0>} : vector<24x32xi32>
    %125 = arith.sitofp %124 : vector<24x32xi32> to vector<24x32xf32>
    %126 = tpu.iota {dimensions = array<i32: 1>} : vector<24x32xi32>
    %127 = arith.sitofp %126 : vector<24x32xi32> to vector<24x32xf32>
    %cst_41 = arith.constant 5.000000e-01 : f32
    %128 = vector.broadcast %cst_41 : f32 to vector<24x32xf32>
    %129 = arith.addf %127, %128 : vector<24x32xf32>
    %cst_42 = arith.constant 8.000000e+00 : f32
    %130 = vector.broadcast %cst_42 : f32 to vector<24x32xf32>
    %131 = arith.divf %129, %130 : vector<24x32xf32>
    %132 = math.floor %131 : vector<24x32xf32>
    %cst_43 = arith.constant 5.000000e-01 : f32
    %133 = vector.broadcast %cst_43 : f32 to vector<24x32xf32>
    %134 = arith.addf %125, %133 : vector<24x32xf32>
    %cst_44 = arith.constant 4.000000e+00 : f32
    %135 = vector.broadcast %cst_44 : f32 to vector<24x32xf32>
    %136 = arith.divf %134, %135 : vector<24x32xf32>
    %137 = math.floor %136 : vector<24x32xf32>
    %cst_45 = arith.constant 4.000000e+00 : f32
    %138 = vector.broadcast %cst_45 : f32 to vector<24x32xf32>
    %139 = arith.mulf %137, %138 : vector<24x32xf32>
    %140 = arith.subf %125, %139 : vector<24x32xf32>
    %141 = arith.cmpf oeq, %132, %140 : vector<24x32xf32>
    %142 = arith.extui %141 : vector<24x32xi1> to vector<24x32xi32>
    %143 = arith.sitofp %142 : vector<24x32xi32> to vector<24x32xf32>
    %144 = vector.extract_strided_slice %123 {offsets = [0, 0], sizes = [24, 32], strides = [1, 1]} : vector<24x64xf32> to vector<24x32xf32>
    %145 = arith.mulf %144, %143 : vector<24x32xf32>
    %146 = vector.extract_strided_slice %123 {offsets = [0, 32], sizes = [24, 32], strides = [1, 1]} : vector<24x64xf32> to vector<24x32xf32>
    %147 = arith.mulf %146, %143 : vector<24x32xf32>
    %cst_46 = arith.constant dense<0.000000e+00> : vector<130x24xf32>
    %148 = tpu.matmul %27, %145, %cst_46 {dimension_numbers = #tpu.dot_dimension_numbers<[1], [1], [0], [0], [0, 0, 1, 0], [], []>} : vector<130x32xf32>, vector<24x32xf32>, vector<130x24xf32> -> vector<130x24xf32>
    %cst_47 = arith.constant 0.353553385 : f32
    %149 = vector.broadcast %cst_47 : f32 to vector<130x24xf32>
    %150 = arith.mulf %148, %149 : vector<130x24xf32>
    %151 = vector.extract_strided_slice %150 {offsets = [0, 0], sizes = [130, 8], strides = [1, 1]} : vector<130x24xf32> to vector<130x8xf32>
    %152 = vector.extract_strided_slice %150 {offsets = [0, 8], sizes = [130, 8], strides = [1, 1]} : vector<130x24xf32> to vector<130x8xf32>
    %153 = vector.extract_strided_slice %150 {offsets = [0, 16], sizes = [130, 8], strides = [1, 1]} : vector<130x24xf32> to vector<130x8xf32>
    %154 = arith.maximumf %151, %152 : vector<130x8xf32>
    %155 = arith.maximumf %154, %153 : vector<130x8xf32>
    %156 = arith.subf %151, %155 : vector<130x8xf32>
    %157 = math.exp %156 : vector<130x8xf32>
    %158 = arith.subf %152, %155 : vector<130x8xf32>
    %159 = math.exp %158 : vector<130x8xf32>
    %160 = arith.subf %153, %155 : vector<130x8xf32>
    %161 = math.exp %160 : vector<130x8xf32>
    %162 = arith.addf %157, %159 : vector<130x8xf32>
    %163 = arith.addf %162, %161 : vector<130x8xf32>
    %164 = tpu.reciprocal %163 {approx = true} : vector<130x8xf32> -> vector<130x8xf32>
    %165 = tpu.iota {dimensions = array<i32: 0>} : vector<130x8xi32>
    %166 = arith.sitofp %165 : vector<130x8xi32> to vector<130x8xf32>
    %167 = tpu.iota {dimensions = array<i32: 1>} : vector<130x8xi32>
    %168 = arith.sitofp %167 : vector<130x8xi32> to vector<130x8xf32>
    %cst_48 = arith.constant 5.000000e-01 : f32
    %169 = vector.broadcast %cst_48 : f32 to vector<130x8xf32>
    %170 = arith.addf %168, %169 : vector<130x8xf32>
    %cst_49 = arith.constant 4.000000e+00 : f32
    %171 = vector.broadcast %cst_49 : f32 to vector<130x8xf32>
    %172 = arith.divf %170, %171 : vector<130x8xf32>
    %173 = math.floor %172 : vector<130x8xf32>
    %cst_50 = arith.constant 5.000000e-01 : f32
    %174 = vector.broadcast %cst_50 : f32 to vector<130x8xf32>
    %175 = arith.addf %166, %174 : vector<130x8xf32>
    %cst_51 = arith.constant 6.500000e+01 : f32
    %176 = vector.broadcast %cst_51 : f32 to vector<130x8xf32>
    %177 = arith.divf %175, %176 : vector<130x8xf32>
    %178 = math.floor %177 : vector<130x8xf32>
    %179 = arith.cmpf oeq, %173, %178 : vector<130x8xf32>
    %180 = arith.extui %179 : vector<130x8xi1> to vector<130x8xi32>
    %181 = arith.sitofp %180 : vector<130x8xi32> to vector<130x8xf32>
    %182 = arith.mulf %157, %164 : vector<130x8xf32>
    %183 = arith.mulf %182, %181 : vector<130x8xf32>
    %184 = arith.mulf %159, %164 : vector<130x8xf32>
    %185 = arith.mulf %184, %181 : vector<130x8xf32>
    %186 = arith.mulf %161, %164 : vector<130x8xf32>
    %187 = arith.mulf %186, %181 : vector<130x8xf32>
    %188 = tpu.concatenate %183, %185, %187 in 1 : vector<130x8xf32>, vector<130x8xf32>, vector<130x8xf32> -> vector<130x24xf32>
    %cst_52 = arith.constant dense<0.000000e+00> : vector<130x32xf32>
    %189 = tpu.matmul %188, %147, %cst_52 {dimension_numbers = #tpu.dot_dimension_numbers<[1], [0], [0], [1], [0, 0, 1, 1], [], []>} : vector<130x24xf32>, vector<24x32xf32>, vector<130x32xf32> -> vector<130x32xf32>
    %190 = arith.truncf %189 : vector<130x32xf32> to vector<130x32xbf16>
    %c0_53 = arith.constant 0 : index
    %c0_54 = arith.constant 0 : index
    %191 = vector.load %arg6[%c0_53, %c0_54] : memref<32x32xbf16, #tpu.memory_space<vmem>>, vector<32x32xbf16>
    %cst_55 = arith.constant dense<0.000000e+00> : vector<130x32xf32>
    %192 = tpu.matmul %190, %191, %cst_55 {dimension_numbers = #tpu.dot_dimension_numbers<[1], [0], [0], [1], [0, 0, 1, 1], [], []>} : vector<130x32xbf16>, vector<32x32xbf16>, vector<130x32xf32> -> vector<130x32xf32>
    %c0_56 = arith.constant 0 : index
    %c0_57 = arith.constant 0 : index
    %193 = vector.load %arg7[%c0_56, %c0_57] : memref<1x32xf32, #tpu.memory_space<vmem>>, vector<1x32xf32>
    %194 = vector.broadcast %193 : vector<1x32xf32> to vector<130x32xf32>
    %195 = arith.addf %192, %194 : vector<130x32xf32>
    %196 = arith.addf %0, %195 : vector<130x32xf32>
    %c0_58 = arith.constant 0 : index
    %c0_59 = arith.constant 0 : index
    %197 = vector.load %arg10[%c0_58, %c0_59] : memref<1x32xf32, #tpu.memory_space<vmem>>, vector<1x32xf32>
    %c0_60 = arith.constant 0 : index
    %c0_61 = arith.constant 0 : index
    %198 = vector.load %arg11[%c0_60, %c0_61] : memref<1x32xf32, #tpu.memory_space<vmem>>, vector<1x32xf32>
    %cst_62 = arith.constant dense<0.000000e+00> : vector<130xf32>
    %199 = vector.multi_reduction <add>, %196, %cst_62 [1] : vector<130x32xf32> to vector<130xf32>
    %200 = vector.shape_cast %199 : vector<130xf32> to vector<130x1xf32>
    %cst_63 = arith.constant 3.200000e+01 : f32
    %201 = vector.broadcast %cst_63 : f32 to vector<130x1xf32>
    %202 = arith.divf %200, %201 : vector<130x1xf32>
    %203 = vector.broadcast %202 : vector<130x1xf32> to vector<130x32xf32>
    %204 = arith.subf %196, %203 : vector<130x32xf32>
    %205 = arith.mulf %204, %204 : vector<130x32xf32>
    %cst_64 = arith.constant dense<0.000000e+00> : vector<130xf32>
    %206 = vector.multi_reduction <add>, %205, %cst_64 [1] : vector<130x32xf32> to vector<130xf32>
    %207 = vector.shape_cast %206 : vector<130xf32> to vector<130x1xf32>
    %cst_65 = arith.constant 3.200000e+01 : f32
    %208 = vector.broadcast %cst_65 : f32 to vector<130x1xf32>
    %209 = arith.divf %207, %208 : vector<130x1xf32>
    %210 = vector.broadcast %202 : vector<130x1xf32> to vector<130x32xf32>
    %211 = arith.subf %196, %210 : vector<130x32xf32>
    %cst_66 = arith.constant 9.99999974E-6 : f32
    %212 = vector.broadcast %cst_66 : f32 to vector<130x1xf32>
    %213 = arith.addf %209, %212 : vector<130x1xf32>
    %214 = math.rsqrt %213 : vector<130x1xf32>
    %215 = vector.broadcast %214 : vector<130x1xf32> to vector<130x32xf32>
    %216 = arith.mulf %211, %215 : vector<130x32xf32>
    %217 = vector.broadcast %197 : vector<1x32xf32> to vector<130x32xf32>
    %218 = arith.mulf %216, %217 : vector<130x32xf32>
    %219 = vector.broadcast %198 : vector<1x32xf32> to vector<130x32xf32>
    %220 = arith.addf %218, %219 : vector<130x32xf32>
    %221 = arith.truncf %220 : vector<130x32xf32> to vector<130x32xbf16>
    %c0_67 = arith.constant 0 : index
    %c0_68 = arith.constant 0 : index
    %222 = vector.load %arg12[%c0_67, %c0_68] : memref<32x64xbf16, #tpu.memory_space<vmem>>, vector<32x64xbf16>
    %cst_69 = arith.constant dense<0.000000e+00> : vector<130x64xf32>
    %223 = tpu.matmul %221, %222, %cst_69 {dimension_numbers = #tpu.dot_dimension_numbers<[1], [0], [0], [1], [0, 0, 1, 1], [], []>} : vector<130x32xbf16>, vector<32x64xbf16>, vector<130x64xf32> -> vector<130x64xf32>
    %c0_70 = arith.constant 0 : index
    %c0_71 = arith.constant 0 : index
    %224 = vector.load %arg13[%c0_70, %c0_71] : memref<1x64xf32, #tpu.memory_space<vmem>>, vector<1x64xf32>
    %225 = vector.broadcast %224 : vector<1x64xf32> to vector<130x64xf32>
    %226 = arith.addf %223, %225 : vector<130x64xf32>
    %cst_72 = arith.constant 0.000000e+00 : f32
    %227 = vector.broadcast %cst_72 : f32 to vector<16x64xf32>
    %c0_73 = arith.constant 0 : index
    %c0_74 = arith.constant 0 : index
    %228 = vector.load %arg20[%c0_73, %c0_74] : memref<160x64xf32, #tpu.memory_space<vmem>>, vector<16x64xf32>
    tpu.vector_store %arg20[%c0_73, %c0_74], %227 {strides = array<i32>} : memref<160x64xf32, #tpu.memory_space<vmem>>, vector<16x64xf32>,
    %c16 = arith.constant 16 : index
    %c0_75 = arith.constant 0 : index
    %229 = vector.load %arg20[%c16, %c0_75] : memref<160x64xf32, #tpu.memory_space<vmem>>, vector<130x64xf32>
    tpu.vector_store %arg20[%c16, %c0_75], %226 {strides = array<i32>} : memref<160x64xf32, #tpu.memory_space<vmem>>, vector<130x64xf32>,
    %cst_76 = arith.constant 0.000000e+00 : f32
    %230 = vector.broadcast %cst_76 : f32 to vector<14x64xf32>
    %c146 = arith.constant 146 : index
    %c0_77 = arith.constant 0 : index
    %231 = vector.load %arg20[%c146, %c0_77] : memref<160x64xf32, #tpu.memory_space<vmem>>, vector<14x64xf32>
    tpu.vector_store %arg20[%c146, %c0_77], %230 {strides = array<i32>} : memref<160x64xf32, #tpu.memory_space<vmem>>, vector<14x64xf32>,
    %232 = tpu.iota {dimensions = array<i32: 0>} : vector<130x1xi32>
    %233 = arith.sitofp %232 : vector<130x1xi32> to vector<130x1xf32>
    %cst_78 = arith.constant 5.000000e-01 : f32
    %234 = vector.broadcast %cst_78 : f32 to vector<130x1xf32>
    %235 = arith.addf %233, %234 : vector<130x1xf32>
    %cst_79 = arith.constant 6.500000e+01 : f32
    %236 = vector.broadcast %cst_79 : f32 to vector<130x1xf32>
    %237 = arith.divf %235, %236 : vector<130x1xf32>
    %238 = math.floor %237 : vector<130x1xf32>
    %cst_80 = arith.constant 6.500000e+01 : f32
    %239 = vector.broadcast %cst_80 : f32 to vector<130x1xf32>
    %240 = arith.mulf %238, %239 : vector<130x1xf32>
    %241 = arith.subf %233, %240 : vector<130x1xf32>
    %cst_81 = arith.constant 5.000000e-01 : f32
    %242 = vector.broadcast %cst_81 : f32 to vector<130x1xf32>
    %243 = arith.cmpf oge, %241, %242 : vector<130x1xf32>
    %cst_82 = arith.constant 1.000000e+00 : f32
    %244 = vector.broadcast %cst_82 : f32 to vector<130x1xf32>
    %245 = arith.subf %241, %244 : vector<130x1xf32>
    %cst_83 = arith.constant 0.000000e+00 : f32
    %246 = vector.broadcast %cst_83 : f32 to vector<130x1xf32>
    %247 = arith.maximumf %245, %246 : vector<130x1xf32>
    %cst_84 = arith.constant 5.000000e-01 : f32
    %248 = vector.broadcast %cst_84 : f32 to vector<130x1xf32>
    %249 = arith.addf %247, %248 : vector<130x1xf32>
    %cst_85 = arith.constant 8.000000e+00 : f32
    %250 = vector.broadcast %cst_85 : f32 to vector<130x1xf32>
    %251 = arith.divf %249, %250 : vector<130x1xf32>
    %252 = math.floor %251 : vector<130x1xf32>
    %cst_86 = arith.constant 8.000000e+00 : f32
    %253 = vector.broadcast %cst_86 : f32 to vector<130x1xf32>
    %254 = arith.mulf %252, %253 : vector<130x1xf32>
    %255 = arith.subf %247, %254 : vector<130x1xf32>
    %cst_87 = arith.constant 8.000000e+00 : f32
    %256 = vector.broadcast %cst_87 : f32 to vector<130x1xf32>
    %257 = arith.cmpf oge, %247, %256 : vector<130x1xf32>
    %cst_88 = arith.constant 5.600000e+01 : f32
    %258 = vector.broadcast %cst_88 : f32 to vector<130x1xf32>
    %259 = arith.cmpf olt, %247, %258 : vector<130x1xf32>
    %cst_89 = arith.constant 1.000000e+00 : f32
    %260 = vector.broadcast %cst_89 : f32 to vector<130x1xf32>
    %261 = arith.cmpf oge, %255, %260 : vector<130x1xf32>
    %cst_90 = arith.constant 7.000000e+00 : f32
    %262 = vector.broadcast %cst_90 : f32 to vector<130x1xf32>
    %263 = arith.cmpf olt, %255, %262 : vector<130x1xf32>
    %c0_91 = arith.constant 0 : index
    %c0_92 = arith.constant 0 : index
    %264 = vector.load %arg14[%c0_91, %c0_92] : memref<9x64xf32, #tpu.memory_space<vmem>>, vector<9x64xf32>
    %265 = arith.andi %243, %257 : vector<130x1xi1>
    %266 = arith.andi %265, %261 : vector<130x1xi1>
    %267 = arith.extui %266 : vector<130x1xi1> to vector<130x1xi32>
    %268 = arith.sitofp %267 : vector<130x1xi32> to vector<130x1xf32>
    %c7 = arith.constant 7 : index
    %c0_93 = arith.constant 0 : index
    %269 = vector.load %arg20[%c7, %c0_93] : memref<160x64xf32, #tpu.memory_space<vmem>>, vector<130x64xf32>
    %270 = vector.broadcast %268 : vector<130x1xf32> to vector<130x64xf32>
    %271 = arith.mulf %269, %270 : vector<130x64xf32>
    %272 = vector.extract_strided_slice %264 {offsets = [0, 0], sizes = [1, 64], strides = [1, 1]} : vector<9x64xf32> to vector<1x64xf32>
    %273 = vector.broadcast %272 : vector<1x64xf32> to vector<130x64xf32>
    %274 = arith.mulf %271, %273 : vector<130x64xf32>
    %275 = arith.andi %243, %257 : vector<130x1xi1>
    %276 = arith.extui %275 : vector<130x1xi1> to vector<130x1xi32>
    %277 = arith.sitofp %276 : vector<130x1xi32> to vector<130x1xf32>
    %c8 = arith.constant 8 : index
    %c0_94 = arith.constant 0 : index
    %278 = vector.load %arg20[%c8, %c0_94] : memref<160x64xf32, #tpu.memory_space<vmem>>, vector<130x64xf32>
    %279 = vector.broadcast %277 : vector<130x1xf32> to vector<130x64xf32>
    %280 = arith.mulf %278, %279 : vector<130x64xf32>
    %281 = vector.extract_strided_slice %264 {offsets = [1, 0], sizes = [1, 64], strides = [1, 1]} : vector<9x64xf32> to vector<1x64xf32>
    %282 = vector.broadcast %281 : vector<1x64xf32> to vector<130x64xf32>
    %283 = arith.mulf %280, %282 : vector<130x64xf32>
    %284 = arith.addf %274, %283 : vector<130x64xf32>
    %285 = arith.andi %243, %257 : vector<130x1xi1>
    %286 = arith.andi %285, %263 : vector<130x1xi1>
    %287 = arith.extui %286 : vector<130x1xi1> to vector<130x1xi32>
    %288 = arith.sitofp %287 : vector<130x1xi32> to vector<130x1xf32>
    %c9 = arith.constant 9 : index
    %c0_95 = arith.constant 0 : index
    %289 = vector.load %arg20[%c9, %c0_95] : memref<160x64xf32, #tpu.memory_space<vmem>>, vector<130x64xf32>
    %290 = vector.broadcast %288 : vector<130x1xf32> to vector<130x64xf32>
    %291 = arith.mulf %289, %290 : vector<130x64xf32>
    %292 = vector.extract_strided_slice %264 {offsets = [2, 0], sizes = [1, 64], strides = [1, 1]} : vector<9x64xf32> to vector<1x64xf32>
    %293 = vector.broadcast %292 : vector<1x64xf32> to vector<130x64xf32>
    %294 = arith.mulf %291, %293 : vector<130x64xf32>
    %295 = arith.addf %284, %294 : vector<130x64xf32>
    %296 = arith.andi %243, %261 : vector<130x1xi1>
    %297 = arith.extui %296 : vector<130x1xi1> to vector<130x1xi32>
    %298 = arith.sitofp %297 : vector<130x1xi32> to vector<130x1xf32>
    %c15 = arith.constant 15 : index
    %c0_96 = arith.constant 0 : index
    %299 = vector.load %arg20[%c15, %c0_96] : memref<160x64xf32, #tpu.memory_space<vmem>>, vector<130x64xf32>
    %300 = vector.broadcast %298 : vector<130x1xf32> to vector<130x64xf32>
    %301 = arith.mulf %299, %300 : vector<130x64xf32>
    %302 = vector.extract_strided_slice %264 {offsets = [3, 0], sizes = [1, 64], strides = [1, 1]} : vector<9x64xf32> to vector<1x64xf32>
    %303 = vector.broadcast %302 : vector<1x64xf32> to vector<130x64xf32>
    %304 = arith.mulf %301, %303 : vector<130x64xf32>
    %305 = arith.addf %295, %304 : vector<130x64xf32>
    %306 = arith.extui %243 : vector<130x1xi1> to vector<130x1xi32>
    %307 = arith.sitofp %306 : vector<130x1xi32> to vector<130x1xf32>
    %308 = vector.broadcast %307 : vector<130x1xf32> to vector<130x64xf32>
    %309 = arith.mulf %226, %308 : vector<130x64xf32>
    %310 = vector.extract_strided_slice %264 {offsets = [4, 0], sizes = [1, 64], strides = [1, 1]} : vector<9x64xf32> to vector<1x64xf32>
    %311 = vector.broadcast %310 : vector<1x64xf32> to vector<130x64xf32>
    %312 = arith.mulf %309, %311 : vector<130x64xf32>
    %313 = arith.addf %305, %312 : vector<130x64xf32>
    %314 = arith.andi %243, %263 : vector<130x1xi1>
    %315 = arith.extui %314 : vector<130x1xi1> to vector<130x1xi32>
    %316 = arith.sitofp %315 : vector<130x1xi32> to vector<130x1xf32>
    %c17 = arith.constant 17 : index
    %c0_97 = arith.constant 0 : index
    %317 = vector.load %arg20[%c17, %c0_97] : memref<160x64xf32, #tpu.memory_space<vmem>>, vector<130x64xf32>
    %318 = vector.broadcast %316 : vector<130x1xf32> to vector<130x64xf32>
    %319 = arith.mulf %317, %318 : vector<130x64xf32>
    %320 = vector.extract_strided_slice %264 {offsets = [5, 0], sizes = [1, 64], strides = [1, 1]} : vector<9x64xf32> to vector<1x64xf32>
    %321 = vector.broadcast %320 : vector<1x64xf32> to vector<130x64xf32>
    %322 = arith.mulf %319, %321 : vector<130x64xf32>
    %323 = arith.addf %313, %322 : vector<130x64xf32>
    %324 = arith.andi %243, %259 : vector<130x1xi1>
    %325 = arith.andi %324, %261 : vector<130x1xi1>
    %326 = arith.extui %325 : vector<130x1xi1> to vector<130x1xi32>
    %327 = arith.sitofp %326 : vector<130x1xi32> to vector<130x1xf32>
    %c23 = arith.constant 23 : index
    %c0_98 = arith.constant 0 : index
    %328 = vector.load %arg20[%c23, %c0_98] : memref<160x64xf32, #tpu.memory_space<vmem>>, vector<130x64xf32>
    %329 = vector.broadcast %327 : vector<130x1xf32> to vector<130x64xf32>
    %330 = arith.mulf %328, %329 : vector<130x64xf32>
    %331 = vector.extract_strided_slice %264 {offsets = [6, 0], sizes = [1, 64], strides = [1, 1]} : vector<9x64xf32> to vector<1x64xf32>
    %332 = vector.broadcast %331 : vector<1x64xf32> to vector<130x64xf32>
    %333 = arith.mulf %330, %332 : vector<130x64xf32>
    %334 = arith.addf %323, %333 : vector<130x64xf32>
    %335 = arith.andi %243, %259 : vector<130x1xi1>
    %336 = arith.extui %335 : vector<130x1xi1> to vector<130x1xi32>
    %337 = arith.sitofp %336 : vector<130x1xi32> to vector<130x1xf32>
    %c24 = arith.constant 24 : index
    %c0_99 = arith.constant 0 : index
    %338 = vector.load %arg20[%c24, %c0_99] : memref<160x64xf32, #tpu.memory_space<vmem>>, vector<130x64xf32>
    %339 = vector.broadcast %337 : vector<130x1xf32> to vector<130x64xf32>
    %340 = arith.mulf %338, %339 : vector<130x64xf32>
    %341 = vector.extract_strided_slice %264 {offsets = [7, 0], sizes = [1, 64], strides = [1, 1]} : vector<9x64xf32> to vector<1x64xf32>
    %342 = vector.broadcast %341 : vector<1x64xf32> to vector<130x64xf32>
    %343 = arith.mulf %340, %342 : vector<130x64xf32>
    %344 = arith.addf %334, %343 : vector<130x64xf32>
    %345 = arith.andi %243, %259 : vector<130x1xi1>
    %346 = arith.andi %345, %263 : vector<130x1xi1>
    %347 = arith.extui %346 : vector<130x1xi1> to vector<130x1xi32>
    %348 = arith.sitofp %347 : vector<130x1xi32> to vector<130x1xf32>
    %c25 = arith.constant 25 : index
    %c0_100 = arith.constant 0 : index
    %349 = vector.load %arg20[%c25, %c0_100] : memref<160x64xf32, #tpu.memory_space<vmem>>, vector<130x64xf32>
    %350 = vector.broadcast %348 : vector<130x1xf32> to vector<130x64xf32>
    %351 = arith.mulf %349, %350 : vector<130x64xf32>
    %352 = vector.extract_strided_slice %264 {offsets = [8, 0], sizes = [1, 64], strides = [1, 1]} : vector<9x64xf32> to vector<1x64xf32>
    %353 = vector.broadcast %352 : vector<1x64xf32> to vector<130x64xf32>
    %354 = arith.mulf %351, %353 : vector<130x64xf32>
    %355 = arith.addf %344, %354 : vector<130x64xf32>
    %c0_101 = arith.constant 0 : index
    %c0_102 = arith.constant 0 : index
    %356 = vector.load %arg15[%c0_101, %c0_102] : memref<1x64xf32, #tpu.memory_space<vmem>>, vector<1x64xf32>
    %357 = vector.broadcast %356 : vector<1x64xf32> to vector<130x64xf32>
    %358 = arith.addf %355, %357 : vector<130x64xf32>
    %359 = vector.shape_cast %243 : vector<130x1xi1> to vector<130x1xi1>
    %360 = vector.broadcast %359 : vector<130x1xi1> to vector<130x64xi1>
    %361 = arith.select %360, %358, %226 : vector<130x64xi1>, vector<130x64xf32>
    %cst_103 = arith.constant 5.000000e-01 : f32
    %362 = vector.broadcast %cst_103 : f32 to vector<130x64xf32>
    %363 = arith.mulf %362, %361 : vector<130x64xf32>
    %364 = arith.mulf %361, %361 : vector<130x64xf32>
    %365 = arith.mulf %364, %361 : vector<130x64xf32>
    %cst_104 = arith.constant 4.471500e-02 : f32
    %366 = vector.broadcast %cst_104 : f32 to vector<130x64xf32>
    %367 = arith.mulf %366, %365 : vector<130x64xf32>
    %368 = arith.addf %361, %367 : vector<130x64xf32>
    %cst_105 = arith.constant 0.797884583 : f32
    %369 = vector.broadcast %cst_105 : f32 to vector<130x64xf32>
    %370 = arith.mulf %369, %368 : vector<130x64xf32>
    %371 = math.tanh %370 : vector<130x64xf32>
    %cst_106 = arith.constant 1.000000e+00 : f32
    %372 = vector.broadcast %cst_106 : f32 to vector<130x64xf32>
    %373 = arith.addf %372, %371 : vector<130x64xf32>
    %374 = arith.mulf %363, %373 : vector<130x64xf32>
    %375 = arith.truncf %374 : vector<130x64xf32> to vector<130x64xbf16>
    %c0_107 = arith.constant 0 : index
    %c0_108 = arith.constant 0 : index
    %376 = vector.load %arg16[%c0_107, %c0_108] : memref<64x32xbf16, #tpu.memory_space<vmem>>, vector<64x32xbf16>
    %cst_109 = arith.constant dense<0.000000e+00> : vector<130x32xf32>
    %377 = tpu.matmul %375, %376, %cst_109 {dimension_numbers = #tpu.dot_dimension_numbers<[1], [0], [0], [1], [0, 0, 1, 1], [], []>} : vector<130x64xbf16>, vector<64x32xbf16>, vector<130x32xf32> -> vector<130x32xf32>
    %c0_110 = arith.constant 0 : index
    %c0_111 = arith.constant 0 : index
    %378 = vector.load %arg17[%c0_110, %c0_111] : memref<1x32xf32, #tpu.memory_space<vmem>>, vector<1x32xf32>
    %379 = vector.broadcast %378 : vector<1x32xf32> to vector<130x32xf32>
    %380 = arith.addf %377, %379 : vector<130x32xf32>
    %381 = arith.addf %196, %380 : vector<130x32xf32>
    %c0_112 = arith.constant 0 : index
    %c0_113 = arith.constant 0 : index
    %382 = vector.load %arg18[%c0_112, %c0_113] : memref<130x32xf32, #tpu.memory_space<vmem>>, vector<130x32xf32>
    tpu.vector_store %arg18[%c0_112, %c0_113], %381 {strides = array<i32>} : memref<130x32xf32, #tpu.memory_space<vmem>>, vector<130x32xf32>,
    return
  }
  func.func @transform_0(%arg0: i32) -> (i32, i32) {
    %c0_i32 = arith.constant 0 : i32
    %c0_i32_0 = arith.constant 0 : i32
    return %arg0, %c0_i32 : i32, i32
  }
  func.func @transform_1(%arg0: i32) -> (i32, i32) {
    %c0_i32 = arith.constant 0 : i32
    %c0_i32_0 = arith.constant 0 : i32
    %c0_i32_1 = arith.constant 0 : i32
    return %c0_i32, %c0_i32_0 : i32, i32
  }
  func.func @transform_2(%arg0: i32) -> (i32, i32) {
    %c0_i32 = arith.constant 0 : i32
    %c0_i32_0 = arith.constant 0 : i32
    %c0_i32_1 = arith.constant 0 : i32
    return %c0_i32, %c0_i32_0 : i32, i32
  }
  func.func @transform_3(%arg0: i32) -> (i32, i32) {
    %c0_i32 = arith.constant 0 : i32
    %c0_i32_0 = arith.constant 0 : i32
    %c0_i32_1 = arith.constant 0 : i32
    return %c0_i32, %c0_i32_0 : i32, i32
  }
  func.func @transform_4(%arg0: i32) -> (i32, i32) {
    %c0_i32 = arith.constant 0 : i32
    %c0_i32_0 = arith.constant 0 : i32
    %c0_i32_1 = arith.constant 0 : i32
    return %c0_i32, %c0_i32_0 : i32, i32
  }
  func.func @transform_5(%arg0: i32) -> (i32, i32) {
    %c0_i32 = arith.constant 0 : i32
    %c0_i32_0 = arith.constant 0 : i32
    %c0_i32_1 = arith.constant 0 : i32
    return %c0_i32, %c0_i32_0 : i32, i32
  }
  func.func @transform_6(%arg0: i32) -> (i32, i32) {
    %c0_i32 = arith.constant 0 : i32
    %c0_i32_0 = arith.constant 0 : i32
    %c0_i32_1 = arith.constant 0 : i32
    return %c0_i32, %c0_i32_0 : i32, i32
  }
  func.func @transform_7(%arg0: i32) -> (i32, i32) {
    %c0_i32 = arith.constant 0 : i32
    %c0_i32_0 = arith.constant 0 : i32
    %c0_i32_1 = arith.constant 0 : i32
    return %c0_i32, %c0_i32_0 : i32, i32
  }
  func.func @transform_8(%arg0: i32) -> (i32, i32) {
    %c0_i32 = arith.constant 0 : i32
    %c0_i32_0 = arith.constant 0 : i32
    %c0_i32_1 = arith.constant 0 : i32
    return %c0_i32, %c0_i32_0 : i32, i32
  }
  func.func @transform_9(%arg0: i32) -> (i32, i32) {
    %c0_i32 = arith.constant 0 : i32
    %c0_i32_0 = arith.constant 0 : i32
    %c0_i32_1 = arith.constant 0 : i32
    return %c0_i32, %c0_i32_0 : i32, i32
  }
  func.func @transform_10(%arg0: i32) -> (i32, i32) {
    %c0_i32 = arith.constant 0 : i32
    %c0_i32_0 = arith.constant 0 : i32
    %c0_i32_1 = arith.constant 0 : i32
    return %c0_i32, %c0_i32_0 : i32, i32
  }
  func.func @transform_11(%arg0: i32) -> (i32, i32) {
    %c0_i32 = arith.constant 0 : i32
    %c0_i32_0 = arith.constant 0 : i32
    %c0_i32_1 = arith.constant 0 : i32
    return %c0_i32, %c0_i32_0 : i32, i32
  }
  func.func @transform_12(%arg0: i32) -> (i32, i32) {
    %c0_i32 = arith.constant 0 : i32
    %c0_i32_0 = arith.constant 0 : i32
    %c0_i32_1 = arith.constant 0 : i32
    return %c0_i32, %c0_i32_0 : i32, i32
  }
  func.func @transform_13(%arg0: i32) -> (i32, i32) {
    %c0_i32 = arith.constant 0 : i32
    %c0_i32_0 = arith.constant 0 : i32
    %c0_i32_1 = arith.constant 0 : i32
    return %c0_i32, %c0_i32_0 : i32, i32
  }
  func.func @transform_14(%arg0: i32) -> (i32, i32) {
    %c0_i32 = arith.constant 0 : i32
    %c0_i32_0 = arith.constant 0 : i32
    %c0_i32_1 = arith.constant 0 : i32
    return %c0_i32, %c0_i32_0 : i32, i32
  }
  func.func @transform_15(%arg0: i32) -> (i32, i32) {
    %c0_i32 = arith.constant 0 : i32
    %c0_i32_0 = arith.constant 0 : i32
    %c0_i32_1 = arith.constant 0 : i32
    return %c0_i32, %c0_i32_0 : i32, i32
  }
  func.func @transform_16(%arg0: i32) -> (i32, i32) {
    %c0_i32 = arith.constant 0 : i32
    %c0_i32_0 = arith.constant 0 : i32
    %c0_i32_1 = arith.constant 0 : i32
    return %c0_i32, %c0_i32_0 : i32, i32
  }
  func.func @transform_17(%arg0: i32) -> (i32, i32) {
    %c0_i32 = arith.constant 0 : i32
    %c0_i32_0 = arith.constant 0 : i32
    return %arg0, %c0_i32 : i32, i32
  }
  func.func @transform_18(%arg0: i32) -> (i32, i32) {
    %c0_i32 = arith.constant 0 : i32
    %c0_i32_0 = arith.constant 0 : i32
    return %arg0, %c0_i32 : i32, i32
  }
}

</mosaic_0001>

<bundles_post_ra>
// kernel: tpu_custom_call.1
= control target key start
LH: loop header
LB: loop body
LE: loop exit
PB: predicated region body
PF: predicated region fallthrough
CT: control target
= control target key end

     0   :  { %s11258_s0 = inlined_call_operand.vmem [shape: f32[130,32], index: 0, kind: input, shape index: {}]   ;;  %s11259_s1 = inlined_call_operand.vmem [shape: f32[1,32], index: 1, kind: input, shape index: {}]   ;;  %s11260_s2 = inlined_call_operand.vmem [shape: f32[1,32], index: 2, kind: input, shape index: {}]   ;;  %s11261_s3 = inlined_call_operand.vmem [shape: bf16[32,32], index: 3, kind: input, shape index: {}]   ;;  %s11262_s4 = inlined_call_operand.vmem [shape: bf16[32,64], index: 4, kind: input, shape index: {}]   ;;  %s11263_s5 = inlined_call_operand.vmem [shape: bf16[32,32], index: 5, kind: input, shape index: {}]   ;;  %s11264_s6 = inlined_call_operand.vmem [shape: f32[1,32], index: 6, kind: input, shape index: {}]   ;;  %s11265_s7 = inlined_call_operand.vmem [shape: f32[1,32], index: 7, kind: input, shape index: {}]   ;;  %s11266_s8 = inlined_call_operand.vmem [shape: f32[1,32], index: 8, kind: input, shape index: {}]   ;;  %s11267_s9 = inlined_call_operand.vmem [shape: f32[1,32], index: 9, kind: input, shape index: {}]   ;;  %s11268_s10 = inlined_call_operand.vmem [shape: f32[1,32], index: 10, kind: input, shape index: {}]   ;;  %s11269_s11 = inlined_call_operand.vmem [shape: bf16[32,64], index: 11, kind: input, shape index: {}]   ;;  %s11270_s12 = inlined_call_operand.vmem [shape: f32[1,64], index: 12, kind: input, shape index: {}]   ;;  %s11271_s13 = inlined_call_operand.vmem [shape: f32[9,64], index: 13, kind: input, shape index: {}]   ;;  %s11272_s14 = inlined_call_operand.vmem [shape: f32[1,64], index: 14, kind: input, shape index: {}]   ;;  %s11273_s15 = inlined_call_operand.vmem [shape: bf16[64,32], index: 15, kind: input, shape index: {}]   ;;  %s11274_s16 = inlined_call_operand.vmem [shape: f32[1,32], index: 16, kind: input, shape index: {}]   ;;  %s11275_s17 = inlined_call_operand.vmem [shape: f32[130,32], index: 17, kind: output, shape index: {0}]   ;;  %s11276_s18 = inlined_call_operand.hbm [shape: f32[2,128], index: 18, kind: output, shape index: {1}]  }
   0x1   :  { %11467 = sst [smem:[#allocation144_spill]] %s11258_s0 }
   0x2   :  { %11468 = sst [smem:[#allocation145_spill]] %s11259_s1 }
   0x3   :  { %11469 = sst [smem:[#allocation146_spill]] %s11260_s2 }
   0x4   :  { %s11470_s29 = sld [smem:[#allocation144_spill]]  ;;  %vm11379_vm0 = vcmask 261120  }
   0xa   :  { %v75_v0 = vld [vmem:[%s11470_s29 + $0x78] sm:$0xff]  ;;  %v6222_v1 = vld [vmem:[%s11470_s29 + $0x70] sm:$0xff]  ;;  %v73_v2 = vld [vmem:[%s11470_s29 + $0x68] sm:$0xff] }
   0xb   :  { %v125_v3 = vsel %vm11379_vm0, %v75_v0, 0.0  ;;  %v119_v4 = vsel %vm11379_vm0, %v73_v2, 0.0  ;;  %v72_v5 = vld [vmem:[%s11470_s29 + $0x60] sm:$0xff]  ;;  %v6235_v6 = vld [vmem:[%s11470_s29 + $0x58] sm:$0xff]  ;;  %v6240_v7 = vld [vmem:[%s11470_s29 + $0x50] sm:$0xff]  ;;  %v122_v8 = vsel %vm11379_vm0, %v6222_v1, 0.0 }
   0xc   :  { %126 = vadd.xlane.f32.xlu0 %v125_v3  ;;  %120 = vadd.xlane.f32.xlu1 %v119_v4  ;;  %v116_v9 = vsel %vm11379_vm0, %v72_v5, 0.0  ;;  %v6248_v10 = vld [vmem:[%s11470_s29 + $0x48] sm:$0xff]  ;;  %v6253_v11 = vld [vmem:[%s11470_s29 + $0x40] sm:$0xff]  ;;  %v113_v12 = vsel %vm11379_vm0, %v6235_v6, 0.0  ;;  %v110_v13 = vsel %vm11379_vm0, %v6240_v7, 0.0  ;;  %v6266_v16 = vld [vmem:[%s11470_s29 + $0x38] sm:$0xff] }
   0xd   :  { %v107_v14 = vsel %vm11379_vm0, %v6248_v10, 0.0  ;;  %v104_v15 = vsel %vm11379_vm0, %v6253_v11, 0.0  ;;  %v6271_v17 = vld [vmem:[%s11470_s29 + $0x30] sm:$0xff] }
  0x10   :  { %123 = vadd.xlane.f32.xlu0 %v122_v8  ;;  %117 = vadd.xlane.f32.xlu1 %v116_v9 }
  0x14   :  { %114 = vadd.xlane.f32.xlu0 %v113_v12  ;;  %111 = vadd.xlane.f32.xlu1 %v110_v13 }
  0x18   :  { %108 = vadd.xlane.f32.xlu0 %v107_v14  ;;  %105 = vadd.xlane.f32.xlu1 %v104_v15 }
  0x19   :  { %24 = vsyncpa [#allocation4], 0  ;;  %v101_v18 = vsel %vm11379_vm0, %v6266_v16, 0.0  ;;  %v98_v19 = vsel %vm11379_vm0, %v6271_v17, 0.0  ;;  %v6280_v20 = vld [vmem:[%s11470_s29 + $0x28] sm:$0xff]  ;;  %v6285_v21 = vld [vmem:[%s11470_s29 + $0x20] sm:$0xff] }
  0x1a   :  { %v95_v22 = vsel %vm11379_vm0, %v6280_v20, 0.0  ;;  %v92_v23 = vsel %vm11379_vm0, %v6285_v21, 0.0  ;;  %v6294_v24 = vld [vmem:[%s11470_s29 + $0x18] sm:$0xff]  ;;  %v6299_v25 = vld [vmem:[%s11470_s29 + $0x10] sm:$0xff]  ;;  %v6308_v28 = vld [vmem:[%s11470_s29 + $0x8] sm:$0xff]  ;;  %vm11373_vm1 = vcmask 254976  }
  0x1b   :  { %v89_v26 = vsel %vm11379_vm0, %v6294_v24, 0.0  ;;  %v86_v27 = vsel %vm11379_vm0, %v6299_v25, 0.0  ;;  %v6313_v29 = vld [vmem:[%s11470_s29] sm:$0xff]  ;;  %v83_v30 = vsel %vm11379_vm0, %v6308_v28, 0.0  ;;  %vm11380_vm2 = vmmov 0   ;;  %s11473_s24 = sld [smem:[#allocation145_spill]] }
  0x1c   :  { %102 = vadd.xlane.f32.xlu0 %v101_v18  ;;  %99 = vadd.xlane.f32.xlu1 %v98_v19  ;;  %v80_v31 = vsel %vm11379_vm0, %v6313_v29, 0.0  ;;  %v6322_v32 = vld [vmem:[%s11470_s29 + $0x80] sm:$0x3]  ;;  %vm541_vm4 = vcmask 15360   ;;  %s11474_s27 = sld [smem:[#allocation146_spill]]  ;;  %vm545_vm5 = vcmask 1041408  }
  0x1d   :  { %v129_v33 = vsel %vm11373_vm1, %v6322_v32, 0.0  ;;  %vm764_vm15 = vcmask 9216   ;;  %s6113_s2 = smov 8   ;;  %s6115_s23 = smov 96  }
  0x1e   :  { %s6119_s28 = smov 63  }
  0x20   :  { %96 = vadd.xlane.f32.xlu0 %v95_v22  ;;  %93 = vadd.xlane.f32.xlu1 %v92_v23 }
  0x24   :  { %90 = vadd.xlane.f32.xlu0 %v89_v26  ;;  %87 = vadd.xlane.f32.xlu1 %v86_v27 }
  0x28   :  { %84 = vadd.xlane.f32.xlu0 %v83_v30  ;;  %81 = vadd.xlane.f32.xlu1 %v80_v31 }
  0x2c   :  { %130 = vadd.xlane.f32.xlu0 %v129_v33 }
  0x95   :  { %v127_v34 = vpop.xlane.xlu0 %126  ;;  %v121_v35 = vpop.xlane.xlu1 %120 }
  0x96   :  { %v148_v36 = vmul.f32 0.03125, %v127_v34  ;;  %v146_v37 = vmul.f32 0.03125, %v121_v35 }
  0x98   :  { %v6326_v38 = vsub.f32 %v75_v0, %v148_v36  ;;  %v6328_v39 = vsub.f32 %v73_v2, %v146_v37 }
  0x99   :  { %v124_v40 = vpop.xlane.xlu0 %123  ;;  %v118_v41 = vpop.xlane.xlu1 %117 }
  0x9a   :  { %v147_v42 = vmul.f32 0.03125, %v124_v40  ;;  %v145_v43 = vmul.f32 0.03125, %v118_v41  ;;  %v182_v44 = vmul.f32 %v6326_v38, %v6326_v38  ;;  %v180_v45 = vmul.f32 %v6328_v39, %v6328_v39 }
  0x9c   :  { %v6335_v46 = vsub.f32 %v6222_v1, %v147_v42  ;;  %v6337_v47 = vsub.f32 %v72_v5, %v145_v43  ;;  %v229_v48 = vsel %vm11379_vm0, %v182_v44, 0.0  ;;  %v223_v51 = vsel %vm11379_vm0, %v180_v45, 0.0 }
  0x9d   :  { %v115_v49 = vpop.xlane.xlu0 %114  ;;  %230 = vadd.xlane.f32.xlu1 %v229_v48  ;;  %v112_v50 = vpop.xlane.xlu1 %111 }
  0x9e   :  { %v144_v52 = vmul.f32 0.03125, %v115_v49  ;;  %v143_v53 = vmul.f32 0.03125, %v112_v50  ;;  %v181_v54 = vmul.f32 %v6335_v46, %v6335_v46  ;;  %v179_v55 = vmul.f32 %v6337_v47, %v6337_v47 }
  0xa0   :  { %v6346_v56 = vsub.f32 %v6235_v6, %v144_v52  ;;  %v6349_v57 = vsub.f32 %v6240_v7, %v143_v53  ;;  %v226_v58 = vsel %vm11379_vm0, %v181_v54, 0.0  ;;  %v220_v61 = vsel %vm11379_vm0, %v179_v55, 0.0 }
  0xa1   :  { %v109_v59 = vpop.xlane.xlu0 %108  ;;  %227 = vadd.xlane.f32.xlu0 %v226_v58  ;;  %224 = vadd.xlane.f32.xlu1 %v223_v51  ;;  %v106_v60 = vpop.xlane.xlu1 %105 }
  0xa2   :  { %v142_v62 = vmul.f32 0.03125, %v109_v59  ;;  %v141_v63 = vmul.f32 0.03125, %v106_v60  ;;  %v178_v0 = vmul.f32 %v6346_v56, %v6346_v56  ;;  %v177_v1 = vmul.f32 %v6349_v57, %v6349_v57 }
  0xa4   :  { %v6358_v2 = vsub.f32 %v6248_v10, %v142_v62  ;;  %v6361_v3 = vsub.f32 %v6253_v11, %v141_v63  ;;  %v217_v4 = vsel %vm11379_vm0, %v178_v0, 0.0  ;;  %v214_v7 = vsel %vm11379_vm0, %v177_v1, 0.0 }
  0xa5   :  { %v103_v5 = vpop.xlane.xlu0 %102  ;;  %221 = vadd.xlane.f32.xlu0 %v220_v61  ;;  %218 = vadd.xlane.f32.xlu1 %v217_v4  ;;  %v100_v6 = vpop.xlane.xlu1 %99  ;;  %v11280_v62 = vmov 0.0   ;;  %v505_v63 = vlaneseq  ;;  %v5806_v4 = vld [vmem:[%s11261_s3] sm:$0xff]  }
  0xa6   :  { %v140_v8 = vmul.f32 0.03125, %v103_v5  ;;  %v139_v9 = vmul.f32 0.03125, %v100_v6  ;;  %v176_v12 = vmul.f32 %v6358_v2, %v6358_v2  ;;  %v175_v10 = vmul.f32 %v6361_v3, %v6361_v3  ;;  %549 = vmatprep.subr.mxu1 %v11280_v62  ;;  %5413 = vmatprep.subr.bf16.mxu0 %v11280_v62 }
  0xa7   :  { %v6430_v0 = vshrl.u32 %v505_v63, 7  ;;  %v6432_v1 = vand.u32 127, %v505_v63  ;;  %5417 = vmatprep.mubr.msk.bf16.mxu0 %vm11380_vm2, %v11280_v62 }
  0xa8   :  { %v6370_v13 = vsub.f32 %v6266_v16, %v140_v8  ;;  %v6373_v11 = vsub.f32 %v6271_v17, %v139_v9  ;;  %v211_v14 = vsel %vm11379_vm0, %v176_v12, 0.0  ;;  %v208_v19 = vsel %vm11379_vm0, %v175_v10, 0.0 }
  0xa9   :  { %v97_v15 = vpop.xlane.xlu0 %96  ;;  %215 = vadd.xlane.f32.xlu0 %v214_v7  ;;  %212 = vadd.xlane.f32.xlu1 %v211_v14  ;;  %v94_v18 = vpop.xlane.xlu1 %93  ;;  %11471 = vst [vmem:[#allocation6_spill] sm:$0xff] %v6430_v0  ;;  %v6439_v5 = vcvt.s32.f32 %v6430_v0  ;;  %v510_v6 = vadd.s32 128, %v6432_v1 }
  0xaa   :  { %v138_v22 = vmul.f32 0.03125, %v97_v15  ;;  %v137_v23 = vmul.f32 0.03125, %v94_v18  ;;  %v174_v26 = vmul.f32 %v6370_v13, %v6370_v13  ;;  %v173_v16 = vmul.f32 %v6373_v11, %v6373_v11 }
  0xab   :  { %11472 = vst [vmem:[#allocation7_spill] sm:$0xff] %v6439_v5  ;;  %v6442_v7 = vcvt.s32.f32 %v510_v6  ;;  %v6445_v8 = vmul.f32 65.0, %v6439_v5 }
  0xac   :  { %v6382_v27 = vsub.f32 %v6280_v20, %v138_v22  ;;  %v6385_v17 = vsub.f32 %v6285_v21, %v137_v23  ;;  %v205_v30 = vsel %vm11379_vm0, %v174_v26, 0.0  ;;  %v202_v34 = vsel %vm11379_vm0, %v173_v16, 0.0 }
  0xad   :  { %v91_v31 = vpop.xlane.xlu0 %90  ;;  %209 = vadd.xlane.f32.xlu0 %v208_v19  ;;  %206 = vadd.xlane.f32.xlu1 %v205_v30  ;;  %v88_v33 = vpop.xlane.xlu1 %87  ;;  %vm526_vm3 = vcmp.eq.f32.partialorder %v6442_v7, %v6445_v8 }
  0xae   :  { %v136_v35 = vmul.f32 0.03125, %v91_v31  ;;  %v135_v36 = vmul.f32 0.03125, %v88_v33  ;;  %v172_v37 = vmul.f32 %v6382_v27, %v6382_v27  ;;  %v171_v20 = vmul.f32 %v6385_v17, %v6385_v17 }
  0xaf   :  { %v5009_v9 = vsel %vm526_vm3, 1.0, %v11280_v62 }
  0xb0   :  { %v6394_v40 = vsub.f32 %v6294_v24, %v136_v35  ;;  %v6397_v21 = vsub.f32 %v6299_v25, %v135_v36  ;;  %v199_v41 = vsel %vm11379_vm0, %v172_v37, 0.0  ;;  %v196_v43 = vsel %vm11379_vm0, %v171_v20, 0.0  ;;  %5013 = vmatprep.mubr.msk.f32.mxu1 %vm541_vm4, %v5009_v9 }
  0xb1   :  { %203 = vadd.xlane.f32.xlu0 %v202_v34  ;;  %v85_v42 = vpop.xlane.xlu0 %84  ;;  %200 = vadd.xlane.f32.xlu1 %v199_v41  ;;  %v82_v44 = vpop.xlane.xlu1 %81 }
  0xb2   :  { %v134_v45 = vmul.f32 0.03125, %v85_v42  ;;  %v170_v48 = vmul.f32 %v6394_v40, %v6394_v40  ;;  %v133_v49 = vmul.f32 0.03125, %v82_v44  ;;  %v169_v24 = vmul.f32 %v6397_v21, %v6397_v21 }
  0xb4   :  { %v6406_v50 = vsub.f32 %v6308_v28, %v134_v45  ;;  %v193_v25 = vsel %vm11379_vm0, %v170_v48, 0.0  ;;  %v6410_v51 = vsub.f32 %v6313_v29, %v133_v49  ;;  %v190_v54 = vsel %vm11379_vm0, %v169_v24, 0.0 }
  0xb5   :  { %197 = vadd.xlane.f32.xlu0 %v196_v43  ;;  %v131_v52 = vpop.xlane.xlu0 %130  ;;  %194 = vadd.xlane.f32.xlu1 %v193_v25  ;;  %v6457_v25 = vld [vmem:[%s11473_s24] ss:$0 sm:$0xff] }
  0xb6   :  { %v149_v53 = vmul.f32 0.03125, %v131_v52  ;;  %v168_v55 = vmul.f32 %v6406_v50, %v6406_v50  ;;  %v167_v58 = vmul.f32 %v6410_v51, %v6410_v51 }
  0xb8   :  { %v6418_v28 = vsub.f32 %v6322_v32, %v149_v53  ;;  %v187_v59 = vsel %vm11379_vm0, %v168_v55, 0.0  ;;  %v184_v60 = vsel %vm11379_vm0, %v167_v58, 0.0  ;;  %v5805_v32 = vld [vmem:[%s11261_s3 + $0x8] sm:$0xff]   ;;  %s6114_s3 = smov 32  }
  0xb9   :  { %191 = vadd.xlane.f32.xlu0 %v190_v54  ;;  %188 = vadd.xlane.f32.xlu1 %v187_v59  ;;  %v6463_v59 = vld [vmem:[%s11474_s27] ss:$0 sm:$0xff]  ;;  %s6117_s27 = smov 126  }
  0xba   :  { %v183_v29 = vmul.f32 %v6418_v28, %v6418_v28  ;;  %5414 = vmatpush3.bf16.msra.mxu0 %v5805_v32 }
  0xbb   :  { %5415 = vmatprep.subr.bf16.mxu0 %v11280_v62 }
  0xbc   :  { %v232_v61 = vsel %vm11373_vm1, %v183_v29, 0.0 }
  0xbd   :  { %233 = vadd.xlane.f32.xlu1 %v232_v61  ;;  %185 = vadd.xlane.f32.xlu0 %v184_v60 }
  0xbe   :  { %5416 = vmatpush3.bf16.msra.mxu0 %v5806_v4 }
  0xbf   :  { %672 = vmatprep.subr.mxu0 %v11280_v62 }
 0x126   :  { %v231_v12 = vpop.xlane.xlu1 %230 }
 0x127   :  { %v250_v10 = vmul.f32 0.03125, %v231_v12 }
 0x129   :  { %v267_v14 = vadd.f32 1e-05, %v250_v10 }
 0x12a   :  { %v228_v15 = vpop.xlane.xlu0 %227  ;;  %v225_v18 = vpop.xlane.xlu1 %224 }
 0x12b   :  { %5817 = vrsqrt.f32 %v267_v14  ;;  %v249_v19 = vmul.f32 0.03125, %v228_v15  ;;  %v248_v22 = vmul.f32 0.03125, %v225_v18 }
 0x12d   :  { %v266_v23 = vadd.f32 1e-05, %v249_v19  ;;  %v265_v26 = vadd.f32 1e-05, %v248_v22 }
 0x12e   :  { %v222_v16 = vpop.xlane.xlu0 %221  ;;  %v219_v30 = vpop.xlane.xlu1 %218 }
 0x12f   :  { %5819 = vrsqrt.f32 %v266_v23  ;;  %v247_v31 = vmul.f32 0.03125, %v222_v16  ;;  %v246_v33 = vmul.f32 0.03125, %v219_v30 }
 0x130   :  { %5821 = vrsqrt.f32 %v265_v26 }
 0x131   :  { %v264_v34 = vadd.f32 1e-05, %v247_v31  ;;  %v263_v35 = vadd.f32 1e-05, %v246_v33 }
 0x132   :  { %v216_v36 = vpop.xlane.xlu0 %215  ;;  %v213_v37 = vpop.xlane.xlu1 %212 }
 0x133   :  { %5823 = vrsqrt.f32 %v264_v34  ;;  %v245_v20 = vmul.f32 0.03125, %v216_v36  ;;  %v244_v41 = vmul.f32 0.03125, %v213_v37 }
 0x134   :  { %5825 = vrsqrt.f32 %v263_v35 }
 0x135   :  { %v262_v42 = vadd.f32 1e-05, %v245_v20  ;;  %v261_v43 = vadd.f32 1e-05, %v244_v41 }
 0x136   :  { %v210_v44 = vpop.xlane.xlu0 %209  ;;  %v207_v45 = vpop.xlane.xlu1 %206 }
 0x137   :  { %5827 = vrsqrt.f32 %v262_v42  ;;  %v243_v48 = vmul.f32 0.03125, %v210_v44  ;;  %v242_v49 = vmul.f32 0.03125, %v207_v45 }
 0x138   :  { %v5818_v24 = vpop.eup %5817  ;;  %5829 = vrsqrt.f32 %v261_v43 }
 0x139   :  { %v260_v52 = vadd.f32 1e-05, %v243_v48  ;;  %v259_v53 = vadd.f32 1e-05, %v242_v49  ;;  %v301_v54 = vmul.f32 %v5818_v24, %v6326_v38 }
 0x13a   :  { %v204_v55 = vpop.xlane.xlu0 %203  ;;  %v201_v58 = vpop.xlane.xlu1 %200 }
 0x13b   :  { %5831 = vrsqrt.f32 %v260_v52  ;;  %v241_v29 = vmul.f32 0.03125, %v204_v55  ;;  %v240_v60 = vmul.f32 0.03125, %v201_v58  ;;  %v324_v61 = vmul.f32 %v6457_v25, %v301_v54 }
 0x13c   :  { %v5820_v32 = vpop.eup %5819  ;;  %5833 = vrsqrt.f32 %v259_v53 }
 0x13d   :  { %v5822_v63 = vpop.eup %5821  ;;  %v258_v4 = vadd.f32 1e-05, %v241_v29  ;;  %v257_v6 = vadd.f32 1e-05, %v240_v60  ;;  %v6467_v9 = vadd.f32 %v6463_v59, %v324_v61  ;;  %v300_v38 = vmul.f32 %v5820_v32, %v6335_v46 }
 0x13e   :  { %v198_v12 = vpop.xlane.xlu0 %197  ;;  %v195_v10 = vpop.xlane.xlu1 %194  ;;  %v299_v14 = vmul.f32 %v5822_v63, %v6328_v39 }
 0x13f   :  { %5835 = vrsqrt.f32 %v258_v4  ;;  %v239_v15 = vmul.f32 0.03125, %v198_v12  ;;  %v238_v18 = vmul.f32 0.03125, %v195_v10  ;;  %550 = vmatpush1.msra.mxu1 %v6467_v9  ;;  %v323_v19 = vmul.f32 %v6457_v25, %v300_v38 }
 0x140   :  { %v5824_v22 = vpop.eup %5823  ;;  %5837 = vrsqrt.f32 %v257_v6  ;;  %551 = vmatprep.subr.mxu1 %v11280_v62  ;;  %v322_v23 = vmul.f32 %v6457_v25, %v299_v14 }
 0x141   :  { %v5826_v26 = vpop.eup %5825  ;;  %v256_v16 = vadd.f32 1e-05, %v239_v15  ;;  %v255_v46 = vadd.f32 1e-05, %v238_v18  ;;  %v6476_v30 = vadd.f32 %v6463_v59, %v323_v19  ;;  %v298_v39 = vmul.f32 %v5824_v22, %v6337_v47 }
 0x142   :  { %v192_v31 = vpop.xlane.xlu0 %191  ;;  %v189_v33 = vpop.xlane.xlu1 %188  ;;  %v6480_v34 = vadd.f32 %v6463_v59, %v322_v23  ;;  %v297_v35 = vmul.f32 %v5826_v26, %v6346_v56 }
 0x143   :  { %5839 = vrsqrt.f32 %v256_v16  ;;  %v237_v36 = vmul.f32 0.03125, %v192_v31  ;;  %v236_v37 = vmul.f32 0.03125, %v189_v33  ;;  %552 = vmatpush1.msra.mxu1 %v6476_v30  ;;  %v321_v20 = vmul.f32 %v6457_v25, %v298_v39 }
 0x144   :  { %v5828_v41 = vpop.eup %5827  ;;  %5841 = vrsqrt.f32 %v255_v46  ;;  %553 = vmatprep.subr.mxu1 %v11280_v62  ;;  %v320_v47 = vmul.f32 %v6457_v25, %v297_v35  ;;  %v356_v42 = vpack.c.bf16 %v6467_v9, %v6476_v30 }
 0x145   :  { %v5830_v43 = vpop.eup %5829  ;;  %v254_v44 = vadd.f32 1e-05, %v237_v36  ;;  %v253_v45 = vadd.f32 1e-05, %v236_v37  ;;  %554 = vmatpush1.msra.mxu1 %v6480_v34  ;;  %v6491_v56 = vadd.f32 %v6463_v59, %v321_v20  ;;  %v296_v48 = vmul.f32 %v5828_v41, %v6349_v57 }
 0x146   :  { %v186_v49 = vpop.xlane.xlu0 %185  ;;  %555 = vmatprep.subr.mxu1 %v11280_v62  ;;  %v234_v24 = vpop.xlane.xlu1 %233  ;;  %v6496_v52 = vadd.f32 %v6463_v59, %v320_v47  ;;  %v295_v53 = vmul.f32 %v5830_v43, %v6358_v2 }
 0x147   :  { %5843 = vrsqrt.f32 %v254_v44  ;;  %v235_v54 = vmul.f32 0.03125, %v186_v49  ;;  %v251_v55 = vmul.f32 0.03125, %v234_v24  ;;  %556 = vmatpush1.msra.mxu1 %v6491_v56  ;;  %v319_v58 = vmul.f32 %v6457_v25, %v296_v48 }
 0x148   :  { %v5832_v29 = vpop.eup %5831  ;;  %5845 = vrsqrt.f32 %v253_v45  ;;  %557 = vmatprep.subr.mxu1 %v11280_v62  ;;  %v318_v57 = vmul.f32 %v6457_v25, %v295_v53  ;;  %v355_v60 = vpack.c.bf16 %v6480_v34, %v6491_v56  ;;  %v6574_v24 = vcvt.s32.f32 %v6432_v1 }
 0x149   :  { %v5834_v61 = vpop.eup %5833  ;;  %v252_v32 = vadd.f32 1e-05, %v235_v54  ;;  %v268_v63 = vadd.f32 1e-05, %v251_v55  ;;  %558 = vmatpush1.msra.mxu1 %v6496_v52  ;;  %v6507_v2 = vadd.f32 %v6463_v59, %v319_v58  ;;  %v294_v4 = vmul.f32 %v5832_v29, %v6361_v3 }
 0x14a   :  { %559 = vmatprep.subr.mxu1 %v11280_v62  ;;  %v293_v6 = vmul.f32 %v5834_v61, %v6370_v13  ;;  %v6514_v38 = vadd.f32 %v6463_v59, %v318_v57  ;;  %vm525_vm6 = vcmp.eq.f32.partialorder %v6574_v24, %v6445_v8 }
 0x14b   :  { %5847 = vrsqrt.f32 %v252_v32  ;;  %560 = vmatpush1.msra.mxu1 %v6507_v2  ;;  %v317_v12 = vmul.f32 %v6457_v25, %v294_v4  ;;  %v354_v58 = vpack.c.bf16 %v6496_v52, %v6507_v2 }
 0x14c   :  { %v5836_v10 = vpop.eup %5835  ;;  %5849 = vrsqrt.f32 %v268_v63  ;;  %561 = vmatprep.subr.mxu1 %v11280_v62  ;;  %v316_v14 = vmul.f32 %v6457_v25, %v293_v6 }
 0x14d   :  { %v5838_v15 = vpop.eup %5837  ;;  %562 = vmatpush1.msra.mxu1 %v6514_v38  ;;  %v6521_v3 = vadd.f32 %v6463_v59, %v317_v12  ;;  %v292_v13 = vmul.f32 %v5836_v10, %v6373_v11 }
 0x14e   :  { %563 = vmatprep.subr.mxu1 %v11280_v62  ;;  %v291_v18 = vmul.f32 %v5838_v15, %v6382_v27  ;;  %v6528_v19 = vadd.f32 %v6463_v59, %v316_v14 }
 0x14f   :  { %564 = vmatpush1.msra.mxu1 %v6521_v3  ;;  %v315_v22 = vmul.f32 %v6457_v25, %v292_v13  ;;  %v353_v55 = vpack.c.bf16 %v6514_v38, %v6521_v3 }
 0x150   :  { %v5840_v23 = vpop.eup %5839  ;;  %565 = vmatprep.subr.mxu1 %v11280_v62  ;;  %v314_v26 = vmul.f32 %v6457_v25, %v291_v18 }
 0x151   :  { %v5842_v16 = vpop.eup %5841  ;;  %566 = vmatpush1.msra.mxu1 %v6528_v19  ;;  %v6535_v11 = vadd.f32 %v6463_v59, %v315_v22  ;;  %v290_v27 = vmul.f32 %v5840_v23, %v6385_v17 }
 0x152   :  { %567 = vmatprep.subr.mxu1 %v11280_v62  ;;  %v289_v46 = vmul.f32 %v5842_v16, %v6394_v40  ;;  %v6542_v39 = vadd.f32 %v6463_v59, %v314_v26 }
 0x153   :  { %568 = vmatpush1.msra.mxu1 %v6535_v11  ;;  %v313_v31 = vmul.f32 %v6457_v25, %v290_v27  ;;  %v352_v54 = vpack.c.bf16 %v6528_v19, %v6535_v11 }
 0x154   :  { %v5844_v33 = vpop.eup %5843  ;;  %569 = vmatprep.subr.mxu1 %v11280_v62  ;;  %v312_v35 = vmul.f32 %v6457_v25, %v289_v46 }
 0x155   :  { %v5846_v36 = vpop.eup %5845  ;;  %570 = vmatpush1.msra.mxu1 %v6542_v39  ;;  %v6549_v17 = vadd.f32 %v6463_v59, %v313_v31  ;;  %v288_v40 = vmul.f32 %v5844_v33, %v6397_v21 }
 0x156   :  { %571 = vmatprep.subr.mxu1 %v11280_v62  ;;  %v287_v37 = vmul.f32 %v5846_v36, %v6406_v50  ;;  %v6556_v20 = vadd.f32 %v6463_v59, %v312_v35 }
 0x157   :  { %572 = vmatpush1.msra.mxu1 %v6549_v17  ;;  %v311_v41 = vmul.f32 %v6457_v25, %v288_v40 }
 0x158   :  { %v5848_v47 = vpop.eup %5847  ;;  %573 = vmatprep.subr.mxu1 %v11280_v62  ;;  %v310_v43 = vmul.f32 %v6457_v25, %v287_v37 }
 0x159   :  { %v5850_v44 = vpop.eup %5849  ;;  %574 = vmatpush1.msra.mxu1 %v6556_v20  ;;  %v6563_v21 = vadd.f32 %v6463_v59, %v311_v41  ;;  %v286_v50 = vmul.f32 %v5848_v47, %v6410_v51 }
 0x15a   :  { %575 = vmatprep.subr.mxu1 %v11280_v62  ;;  %v302_v45 = vmul.f32 %v5850_v44, %v6418_v28  ;;  %v6570_v48 = vadd.f32 %v6463_v59, %v310_v43  ;;  %v6766_v44 = vadd.f32 0.5, %v6574_v24 }
 0x15b   :  { %576 = vmatpush1.msra.mxu1 %v6563_v21  ;;  %v309_v49 = vmul.f32 %v6457_v25, %v286_v50  ;;  %v350_v8 = vpack.c.bf16 %v6556_v20, %v6563_v21 }
 0x15c   :  { %577 = vmatprep.subr.mxu1 %v11280_v62  ;;  %v325_v53 = vmul.f32 %v6457_v25, %v302_v45  ;;  %v6109_v25 = vmov 1.0   ;;  %v516_v50 = vmul.f32 0.015384615, %v6766_v44 }
 0x15d   :  { %578 = vmatpush1.msra.mxu1 %v6570_v48  ;;  %v6580_v51 = vadd.f32 %v6463_v59, %v309_v49 }
 0x15e   :  { %579 = vmatprep.subr.mxu1 %v11280_v62  ;;  %v6587_v1 = vadd.f32 %v6463_v59, %v325_v53  ;;  %v351_v59 = vpack.c.bf16 %v6542_v39, %v6549_v17 }
 0x15f   :  { %580 = vmatpush1.msra.mxu1 %v6580_v51  ;;  %v349_v28 = vpack.c.bf16 %v6570_v48, %v6580_v51 }
 0x160   :  { %611 = vmatprep.subr.mxu1 %v11280_v62 }
 0x161   :  { %5418 = vmatmul.mubr.msk.bf16.vlgmr.msra.gmra.mxu0 %vm11379_vm0, %v349_v28  ;;  %5012 = vmatpush2.msk.msra.mxu1 %vm545_vm5, %v6587_v1 }
 0x162   :  { %5015 = vmatpush1.xpose.msk.msra.mxu0 %vm11379_vm0, %v6467_v9  ;;  %5014 = vmatmul.mubr.msk.f32.vlgmr.msra.gmra.mxu1 %vm525_vm6, %v6109_v25  ;;  %vm897_vm6 = vcmask 259072  }
 0x163   :  { %791 = vmatprep.subr.mxu1 %v11280_v62  ;;  %674 = vmatprep.subr.mxu0 %v11280_v62 }
 0x164   :  { %792 = vmatpush1.msra.mxu1 %v6467_v9  ;;  %5421 = vmatprep.mubr.msk.bf16.mxu0 %vm11380_vm2, %v11280_v62 }
 0x165   :  { %793 = vmatprep.subr.mxu1 %v11280_v62 }
 0x166   :  { %5016 = vmatpush1.xpose.msk.msra.mxu0 %vm11379_vm0, %v6476_v30  ;;  %794 = vmatpush1.msra.mxu1 %v6476_v30 }
 0x167   :  { %795 = vmatprep.subr.mxu1 %v11280_v62  ;;  %676 = vmatprep.subr.mxu0 %v11280_v62 }
 0x168   :  { %796 = vmatpush1.msra.mxu1 %v6480_v34 }
 0x169   :  { %797 = vmatprep.subr.mxu1 %v11280_v62  ;;  %5422 = vmatmul.mubr.msk.bf16.gmra.mxu0 %vm11379_vm0, %v350_v8 }
 0x16a   :  { %5017 = vmatpush1.xpose.msk.msra.mxu0 %vm11379_vm0, %v6480_v34  ;;  %798 = vmatpush1.msra.mxu1 %v6491_v56  ;;  %v357_v34 = vpack.c.bf16 %v6587_v1, %v6587_v1 }
 0x16b   :  { %799 = vmatprep.subr.mxu1 %v11280_v62  ;;  %678 = vmatprep.subr.mxu0 %v11280_v62 }
 0x16c   :  { %800 = vmatpush1.msra.mxu1 %v6496_v52  ;;  %5425 = vmatprep.mubr.msk.bf16.mxu0 %vm11380_vm2, %v11280_v62 }
 0x16d   :  { %801 = vmatprep.subr.mxu1 %v11280_v62 }
 0x16e   :  { %5018 = vmatpush1.xpose.msk.msra.mxu0 %vm11379_vm0, %v6491_v56  ;;  %802 = vmatpush1.msra.mxu1 %v6507_v2 }
 0x16f   :  { %803 = vmatprep.subr.mxu1 %v11280_v62  ;;  %680 = vmatprep.subr.mxu0 %v11280_v62 }
 0x170   :  { %804 = vmatpush1.msra.mxu1 %v6514_v38 }
 0x171   :  { %805 = vmatprep.subr.mxu1 %v11280_v62  ;;  %5426 = vmatmul.mubr.msk.bf16.gmra.mxu0 %vm11379_vm0, %v351_v59 }
 0x172   :  { %5019 = vmatpush1.xpose.msk.msra.mxu0 %vm11379_vm0, %v6496_v52  ;;  %806 = vmatpush1.msra.mxu1 %v6521_v3 }
 0x173   :  { %807 = vmatprep.subr.mxu1 %v11280_v62  ;;  %682 = vmatprep.subr.mxu0 %v11280_v62 }
 0x174   :  { %808 = vmatpush1.msra.mxu1 %v6528_v19  ;;  %5429 = vmatprep.mubr.msk.bf16.mxu0 %vm11380_vm2, %v11280_v62 }
 0x175   :  { %809 = vmatprep.subr.mxu1 %v11280_v62 }
 0x176   :  { %5020 = vmatpush1.xpose.msk.msra.mxu0 %vm11379_vm0, %v6507_v2  ;;  %810 = vmatpush1.msra.mxu1 %v6535_v11 }
 0x177   :  { %811 = vmatprep.subr.mxu1 %v11280_v62  ;;  %684 = vmatprep.subr.mxu0 %v11280_v62 }
 0x178   :  { %812 = vmatpush1.msra.mxu1 %v6542_v39 }
 0x179   :  { %813 = vmatprep.subr.mxu1 %v11280_v62  ;;  %5430 = vmatmul.mubr.msk.bf16.gmra.mxu0 %vm11379_vm0, %v352_v54 }
 0x17a   :  { %5021 = vmatpush1.xpose.msk.msra.mxu0 %vm11379_vm0, %v6514_v38  ;;  %814 = vmatpush1.msra.mxu1 %v6549_v17 }
 0x17b   :  { %815 = vmatprep.subr.mxu1 %v11280_v62  ;;  %686 = vmatprep.subr.mxu0 %v11280_v62 }
 0x17c   :  { %816 = vmatpush1.msra.mxu1 %v6556_v20  ;;  %5433 = vmatprep.mubr.msk.bf16.mxu0 %vm11380_vm2, %v11280_v62 }
 0x17d   :  { %817 = vmatprep.subr.mxu1 %v11280_v62 }
 0x17e   :  { %5022 = vmatpush1.xpose.msk.msra.mxu0 %vm11379_vm0, %v6521_v3  ;;  %818 = vmatpush1.msra.mxu1 %v6563_v21 }
 0x17f   :  { %819 = vmatprep.subr.mxu1 %v11280_v62  ;;  %688 = vmatprep.subr.mxu0 %v11280_v62 }
 0x180   :  { %820 = vmatpush1.msra.mxu1 %v6570_v48 }
 0x181   :  { %821 = vmatprep.subr.mxu1 %v11280_v62  ;;  %5434 = vmatmul.mubr.msk.bf16.gmra.mxu0 %vm11379_vm0, %v353_v55 }
 0x182   :  { %5023 = vmatpush1.xpose.msk.msra.mxu0 %vm11379_vm0, %v6528_v19  ;;  %822 = vmatpush1.msra.mxu1 %v6580_v51 }
 0x183   :  { %853 = vmatprep.subr.mxu1 %v11280_v62  ;;  %690 = vmatprep.subr.mxu0 %v11280_v62 }
 0x184   :  { %5037 = vmatpush2.msk.msra.mxu1 %vm545_vm5, %v6587_v1  ;;  %5437 = vmatprep.mubr.msk.bf16.mxu0 %vm11380_vm2, %v11280_v62 }
 0x185   :  { %5453 = vmatprep.subr.bf16.mxu1 %v11280_v62 }
 0x186   :  { %5024 = vmatpush1.xpose.msk.msra.mxu0 %vm11379_vm0, %v6535_v11 }
 0x187   :  { %692 = vmatprep.subr.mxu0 %v11280_v62 }
 0x189   :  { %5438 = vmatmul.mubr.msk.bf16.gmra.mxu0 %vm11379_vm0, %v354_v58 }
 0x18a   :  { %5025 = vmatpush1.xpose.msk.msra.mxu0 %vm11379_vm0, %v6542_v39  ;;  %5441 = vmatprep.mubr.msk.bf16.mxu0 %vm11380_vm2, %v11280_v62 }
 0x18b   :  { %694 = vmatprep.subr.mxu0 %v11280_v62 }
 0x18e   :  { %5026 = vmatpush1.xpose.msk.msra.mxu0 %vm11379_vm0, %v6549_v17 }
 0x18f   :  { %696 = vmatprep.subr.mxu0 %v11280_v62 }
 0x191   :  { %5442 = vmatmul.mubr.msk.bf16.gmra.mxu0 %vm11379_vm0, %v355_v60 }
 0x192   :  { %5027 = vmatpush1.xpose.msk.msra.mxu0 %vm11379_vm0, %v6556_v20  ;;  %5445 = vmatprep.mubr.msk.bf16.mxu0 %vm11380_vm2, %v11280_v62 }
 0x193   :  { %698 = vmatprep.subr.mxu0 %v11280_v62 }
 0x196   :  { %5028 = vmatpush1.xpose.msk.msra.mxu0 %vm11379_vm0, %v6563_v21  ;;  %v514_v21 = vadd.f32 0.5, %v6442_v7 }
 0x197   :  { %700 = vmatprep.subr.mxu0 %v11280_v62 }
 0x198   :  { %v517_v45 = vmul.f32 0.015384615, %v514_v21 }
 0x199   :  { %5446 = vmatmul.mubr.msk.bf16.gmra.mxu0 %vm11379_vm0, %v356_v42 }
 0x19a   :  { %5029 = vmatpush1.xpose.msk.msra.mxu0 %vm11379_vm0, %v6570_v48  ;;  %5449 = vmatprep.mubr.msk.bf16.mxu0 %vm11380_vm2, %v11280_v62  ;;  %v518_v48 = vfloor.f32 %v516_v50  ;;  %v519_v53 = vfloor.f32 %v517_v45 }
 0x19b   :  { %702 = vmatprep.subr.mxu0 %v11280_v62 }
 0x19c   :  { %v521_v8 = vmul.f32 65.0, %v519_v53  ;;  %vm531_vm7 = vcmp.eq.f32.partialorder %v518_v48, %v6439_v5  ;;  %vm532_vm9 = vcmp.eq.f32.partialorder %v519_v53, %v6439_v5 }
 0x19e   :  { %5030 = vmatpush1.xpose.msk.msra.mxu0 %vm11379_vm0, %v6580_v51  ;;  %v523_v54 = vsub.f32 %v6442_v7, %v521_v8 }
 0x19f   :  { %734 = vmatprep.subr.mxu0 %v11280_v62 }
 0x1a0   :  { %vm534_vm10 = vcmp.ge.f32.partialorder %v523_v54, 0.5 }
 0x1a1   :  { %5450 = vmatmul.mubr.msk.bf16.gmra.mxu0 %vm11379_vm0, %v357_v34  ;;  %vm536_vm12 = vmand %vm532_vm9, %vm534_vm10 }
 0x1a2   :  { %5031 = vmatpush2.xpose.msk.msra.mxu0 %vm11379_vm0, %v6587_v1  ;;  %736 = vmatprep.mubr.f32.mxu0 %v11280_v62  ;;  %v520_v1 = vmul.f32 65.0, %v518_v48 }
 0x1a3   :  { %5461 = vmatprep.subr.mxu0 %v11280_v62 }
 0x1a4   :  { %v522_v59 = vsub.f32 %v6574_v24, %v520_v1 }
 0x1a6   :  { %vm533_vm8 = vcmp.ge.f32.partialorder %v522_v59, 0.5  ;;  %v5039_v59 = vld [vmem:[%s11265_s7] ss:$0 sm:$0xff]  ;;  %s6111_s7 = smov 120  }
 0x1a7   :  { %vm535_vm11 = vmand %vm531_vm7, %vm533_vm8  ;;  %vm1008_vm7 = vcmask 48128  }
 0x1a8   :  { %v5010_v58 = vsel %vm535_vm11, 1.0, %v11280_v62 }
 0x221   :  { %v6725_v9 = vpop.f32.mrf.mxu0 }
 0x222   :  { %v6727_v30 = vpop.f32.mrf.mxu1 }
 0x223   :  { %v5419_v42 = vpop.f32.mrf.mxu0  ;;  %5032 = vmatmul.mubr.msk.f32.vlgmr.msra.gmra.mxu0 %vm11379_vm0, %v6727_v30 }
 0x224   :  { %v617_v56 = vpop.f32.mrf.mxu1  ;;  %5463 = vmatprep.mubr.msk.f32.mxu0 %vm11380_vm2, %v11280_v62  ;;  %v5011_v42 = vsel %vm536_vm12, 1.0, %v11280_v62 }
 0x225   :  { %v6733_v52 = vpop.f32.mrf.mxu0 }
 0x227   :  { %v5420_v29 = vpop.f32.mrf.mxu0 }
 0x229   :  { %v6735_v57 = vpop.f32.mrf.mxu0 }
 0x22b   :  { %v5423_v60 = vpop.f32.mrf.mxu0 }
 0x22d   :  { %v6737_v61 = vpop.f32.mrf.mxu0 }
 0x22f   :  { %v5424_v32 = vpop.f32.mrf.mxu0 }
 0x231   :  { %v6739_v63 = vpop.f32.mrf.mxu0 }
 0x233   :  { %v5427_v2 = vpop.f32.mrf.mxu0 }
 0x235   :  { %v6741_v4 = vpop.f32.mrf.mxu0 }
 0x237   :  { %v5428_v6 = vpop.f32.mrf.mxu0 }
 0x239   :  { %v6743_v38 = vpop.f32.mrf.mxu0 }
 0x23b   :  { %v5431_v12 = vpop.f32.mrf.mxu0 }
 0x23d   :  { %v6745_v10 = vpop.f32.mrf.mxu0 }
 0x23f   :  { %v5432_v14 = vpop.f32.mrf.mxu0 }
 0x241   :  { %v6747_v15 = vpop.f32.mrf.mxu0 }
 0x243   :  { %v5435_v3 = vpop.f32.mrf.mxu0 }
 0x245   :  { %v6749_v13 = vpop.f32.mrf.mxu0 }
 0x247   :  { %v5436_v18 = vpop.f32.mrf.mxu0 }
 0x249   :  { %v6751_v19 = vpop.f32.mrf.mxu0 }
 0x24b   :  { %v5439_v22 = vpop.f32.mrf.mxu0 }
 0x24d   :  { %v6753_v23 = vpop.f32.mrf.mxu0 }
 0x24f   :  { %v5440_v26 = vpop.f32.mrf.mxu0 }
 0x251   :  { %v6755_v16 = vpop.f32.mrf.mxu0 }
 0x253   :  { %v5443_v11 = vpop.f32.mrf.mxu0 }
 0x255   :  { %v6757_v27 = vpop.f32.mrf.mxu0 }
 0x257   :  { %v5444_v46 = vpop.f32.mrf.mxu0 }
 0x259   :  { %v6759_v39 = vpop.f32.mrf.mxu0 }
 0x25b   :  { %v5447_v31 = vpop.f32.mrf.mxu0 }
 0x25d   :  { %v6761_v33 = vpop.f32.mrf.mxu0 }
 0x25f   :  { %v5448_v35 = vpop.f32.mrf.mxu0 }
 0x261   :  { %v6763_v36 = vpop.f32.mrf.mxu0 }
 0x263   :  { %v5451_v17 = vpop.f32.mrf.mxu0 }
 0x265   :  { %v502_v40 = vpop.f32.mrf.mxu0 }
 0x267   :  { %v5452_v37 = vpop.f32.mrf.mxu0 }
 0x2e3   :  { %v738_v20 = vpop.f32.mrf.mxu0 }
 0x2e4   :  { %v5033_v41 = vmul.f32 -1.442695, %v738_v20 }
 0x2e5   :  { %v740_v47 = vpop.f32.mrf.mxu0 }
 0x2e6   :  { %5851 = vpow2.f32 %v5033_v41  ;;  %v5034_v43 = vmul.f32 -1.442695, %v740_v47 }
 0x2e8   :  { %5853 = vpow2.f32 %v5034_v43 }
 0x2f3   :  { %v5852_v49 = vpop.eup %5851 }
 0x2f4   :  { %v749_v51 = vadd.f32 1.0, %v5852_v49 }
 0x2f5   :  { %v5854_v28 = vpop.eup %5853 }
 0x2f6   :  { %5855 = vrcp.f32 %v749_v51  ;;  %v750_v25 = vadd.f32 1.0, %v5854_v28  ;;  %v5807_v51 = vld [vmem:[%s11262_s4 + $0x8] sm:$0xff]   ;;  %v5808_v28 = vld [vmem:[%s11262_s4] sm:$0xff]   ;;  %s6110_s4 = smov 112  }
 0x2f8   :  { %5857 = vrcp.f32 %v750_v25 }
 0x303   :  { %v6774_v55 = vpop.eup %5855 }
 0x304   :  { %11475 = vst [vmem:[#allocation8_spill] sm:$0xff] %v6774_v55  ;;  %vm755_vm13 = vcmp.gt.f32.partialorder %v6774_v55, 0.5 }
 0x305   :  { %v6778_v34 = vpop.eup %5857  ;;  %v5035_v7 = vsel %vm755_vm13, 1.0, %v11280_v62 }
 0x306   :  { %11476 = vst [vmem:[#allocation9_spill] sm:$0xff] %v6778_v34  ;;  %vm756_vm14 = vcmp.gt.f32.partialorder %v6778_v34, 0.5  ;;  %v761_v56 = vmul.f32 %v5035_v7, %v5010_v58 }
 0x307   :  { %v5036_v29 = vsel %vm756_vm14, 1.0, %v11280_v62 }
 0x308   :  { %v762_v60 = vmul.f32 %v5036_v29, %v5011_v42  ;;  %v763_v32 = vsel %vm545_vm5, %v761_v56, 0.0  ;;  %v985_v29 = vadd.s32 8, %v6430_v0 }
 0x30a   :  { %v765_v2 = vsel %vm764_vm15, %v762_v60, 0.0 }
 0x30b   :  { %v766_v6 = vadd.f32 %v765_v2, %v763_v32  ;;  %v6821_v32 = vcvt.s32.f32 %v985_v29  ;;  %v986_v2 = vadd.s32 16, %v6430_v0 }
 0x30d   :  { %767 = vadd.xlane.f32.xlu0 %v766_v6  ;;  %11479 = vst [vmem:[#allocation12_spill] sm:$0xff] %v6821_v32 }
 0x396   :  { %v768_v12 = vpop.xlane.xlu0 %767 }
 0x397   :  { %vm769_vm3 = vcmp.eq.f32.partialorder %v768_v12, 0.0  ;;  %v6826_v12 = vadd.f32 0.5, %v6821_v32 }
 0x398   :  { %v6785_v14 = vsel %vm769_vm3, %v5010_v58, %v761_v56  ;;  %v6787_v3 = vsel %vm769_vm3, %v5011_v42, %v762_v60  ;;  %v6819_v60 = vadd.f32 0.5, %v6439_v5 }
 0x399   :  { %11477 = vst [vmem:[#allocation10_spill] sm:$0xff] %v6785_v14  ;;  %11478 = vst [vmem:[#allocation11_spill] sm:$0xff] %v6787_v3  ;;  %v776_v18 = vsub.f32 %v5010_v58, %v6785_v14  ;;  %v777_v22 = vsub.f32 %v5011_v42, %v6787_v3  ;;  %v775_v46 = vmul.f32 %v6787_v3, %v740_v47  ;;  %v5040_v58 = vld [vmem:[%s11266_s8] ss:$0 sm:$0xff]  ;;  %s6112_s8 = smov 16  }
 0x39a   :  { %v774_v35 = vmul.f32 %v6785_v14, %v738_v20  ;;  %v993_v6 = vmul.f32 0.25, %v6819_v60 }
 0x39b   :  { %v779_v26 = vmul.f32 %v777_v22, %v740_v47  ;;  %v778_v11 = vmul.f32 %v776_v18, %v738_v20  ;;  %v6828_v18 = vcvt.s32.f32 %v986_v2 }
 0x39c   :  { %v996_v22 = vfloor.f32 %v993_v6 }
 0x39d   :  { %v783_v31 = vrot.slane %v779_v26, 6  ;;  %v782_v17 = vrot.slane %v778_v11, 6  ;;  %11480 = vst [vmem:[#allocation13_spill] sm:$0xff] %v6828_v18  ;;  %v994_v26 = vmul.f32 0.25, %v6826_v12  ;;  %v6832_v11 = vadd.f32 0.5, %v6828_v18 }
 0x39f   :  { %v787_v40 = vsel %vm545_vm5, %v775_v46, %v783_v31  ;;  %v786_v37 = vsel %vm545_vm5, %v774_v35, %v782_v17  ;;  %v997_v46 = vfloor.f32 %v994_v26  ;;  %v995_v31 = vmul.f32 0.25, %v6832_v11 }
 0x3a0   :  { %5038 = vmatprep.mubr.msk.f32.mxu1 %vm541_vm4, %v787_v40  ;;  %vm999_vm4 = vcmp.eq.f32.partialorder %v6574_v24, %v996_v22 }
 0x3a1   :  { %856 = vmatmul.mubr.f32.vlgmr.msra.gmra.mxu1 %v786_v37  ;;  %v5044_v35 = vsel %vm999_vm4, 1.0, %v11280_v62  ;;  %vm1000_vm8 = vcmp.eq.f32.partialorder %v6574_v24, %v997_v46  ;;  %v998_v40 = vfloor.f32 %v995_v31 }
 0x3a2   :  { %5457 = vmatprep.mubr.msk.bf16.mxu1 %vm11380_vm2, %v11280_v62  ;;  %5454 = vmatpush3.bf16.msra.mxu1 %v5807_v51  ;;  %v1105_v51 = vmul.f32 4.0, %v996_v22 }
 0x3a3   :  { %5455 = vmatprep.subr.bf16.mxu1 %v11280_v62  ;;  %vm1001_vm9 = vcmp.eq.f32.partialorder %v6574_v24, %v998_v40 }
 0x3a6   :  { %5456 = vmatpush3.bf16.msra.mxu1 %v5808_v28 }
 0x3a7   :  { %5710 = vmatprep.subr.mxu1 %v11280_v62 }
 0x461   :  { %v857_v41 = vpop.f32.mrf.mxu1 }
 0x462   :  { %v892_v43 = vrot.slane %v857_v41, 6  ;;  %v5045_v41 = vsel %vm1000_vm8, 1.0, %v11280_v62 }
 0x463   :  { %v859_v21 = vpop.f32.mrf.mxu1 }
 0x464   :  { %v894_v47 = vsel %vm545_vm5, %v6727_v30, %v892_v43  ;;  %vm1018_vm5 = vcmask 1045504  }
 0x465   :  { %v898_v50 = vsel %vm897_vm6, %v894_v47, 0.0 }
 0x466   :  { %899 = vadd.xlane.f32.xlu1 %v898_v50  ;;  %v1107_v50 = vmul.f32 4.0, %v998_v40 }
 0x4ef   :  { %v900_v20 = vpop.xlane.xlu1 %899 }
 0x4f0   :  { %v901_v45 = vmul.f32 0.03125, %v900_v20  ;;  %v1103_v20 = vmul.f32 0.125, %v6766_v44 }
 0x4f2   :  { %v902_v48 = vsub.f32 %v894_v47, %v901_v45  ;;  %v5046_v47 = vsel %vm1001_vm9, 1.0, %v11280_v62  ;;  %v1106_v45 = vmul.f32 4.0, %v997_v46 }
 0x4f4   :  { %v903_v49 = vmul.f32 %v902_v48, %v902_v48  ;;  %v1109_v28 = vsub.f32 %v6821_v32, %v1106_v45  ;;  %v1980_v32 = vadd.s32 48, %v6430_v0 }
 0x4f6   :  { %v904_v53 = vsel %vm897_vm6, %v903_v49, 0.0  ;;  %v1104_v49 = vfloor.f32 %v1103_v20 }
 0x4f7   :  { %905 = vadd.xlane.f32.xlu0 %v904_v53 }
 0x4f8   :  { %vm1112_vm11 = vcmp.eq.f32.partialorder %v1104_v49, %v1109_v28 }
 0x580   :  { %v906_v30 = vpop.xlane.xlu0 %905 }
 0x581   :  { %v907_v1 = vmul.f32 0.03125, %v906_v30 }
 0x583   :  { %v908_v25 = vadd.f32 1e-05, %v907_v1 }
 0x585   :  { %5859 = vrsqrt.f32 %v908_v25 }
 0x592   :  { %v5860_v8 = vpop.eup %5859 }
 0x593   :  { %v910_v54 = vmul.f32 %v5860_v8, %v902_v48  ;;  %v1110_v48 = vsub.f32 %v6828_v18, %v1107_v50  ;;  %v1108_v8 = vsub.f32 %v6439_v5, %v1105_v51  ;;  %v1981_v5 = vadd.s32 56, %v6430_v0 }
 0x595   :  { %v917_v42 = vmul.f32 %v5039_v59, %v910_v54  ;;  %vm1113_vm10 = vcmp.eq.f32.partialorder %v1104_v49, %v1110_v48  ;;  %vm1111_vm12 = vcmp.eq.f32.partialorder %v1104_v49, %v1108_v8 }
 0x596   :  { %v6859_v25 = vsel %vm1113_vm10, 1.0, %v11280_v62 }
 0x597   :  { %v924_v7 = vadd.f32 %v5040_v58, %v917_v42  ;;  %v6867_v58 = vsel %vm1112_vm11, 1.0, %v11280_v62 }
 0x599   :  { %v925_v56 = vpack.c.bf16 %v924_v7, %v924_v7 }
 0x59b   :  { %5458 = vmatmul.mubr.msk.bf16.vlgmr.msra.gmra.mxu1 %vm11379_vm0, %v925_v56  ;;  %v6876_v56 = vsel %vm1111_vm12, 1.0, %v11280_v62 }
 0x59c   :  { %5502 = vmatprep.mubr.msk.f32.mxu1 %vm11380_vm2, %v11280_v62 }
 0x65b   :  { %v979_v17 = vpop.f32.mrf.mxu1 }
 0x65c   :  { %5462 = vmatpush3.msk.msra.mxu0 %vm1018_vm5, %v979_v17 }
 0x65d   :  { %v5459_v37 = vpop.f32.mrf.mxu1  ;;  %5464 = vmatmul.mubr.msk.f32.vlgmr.msra.gmra.mxu0 %vm1008_vm7, %v5044_v35  ;;  %5472 = vmatprep.subr.mxu0 %v11280_v62 }
 0x65e   :  { %5466 = vmatprep.mubr.msk.f32.mxu0 %vm11380_vm2, %v11280_v62 }
 0x65f   :  { %v982_v43 = vpop.f32.mrf.mxu1 }
 0x661   :  { %v5460_v21 = vpop.f32.mrf.mxu1  ;;  %5467 = vmatmul.mubr.msk.f32.gmra.mxu0 %vm1008_vm7, %v5045_v41 }
 0x662   :  { %5469 = vmatprep.mubr.msk.f32.mxu0 %vm11380_vm2, %v11280_v62 }
 0x665   :  { %5470 = vmatmul.mubr.msk.f32.gmra.mxu0 %vm1008_vm7, %v5046_v47 }
 0x666   :  { %5478 = vmatprep.mubr.msk.f32.mxu0 %vm11380_vm2, %v11280_v62 }
 0x71d   :  { %v6853_v24 = vpop.f32.mrf.mxu0 }
 0x71e   :  { %v1120_v29 = vmul.f32 %v6876_v56, %v6853_v24 }
 0x71f   :  { %v5465_v53 = vpop.f32.mrf.mxu0 }
 0x721   :  { %v6856_v30 = vpop.f32.mrf.mxu0 }
 0x722   :  { %v1121_v7 = vmul.f32 %v6867_v58, %v6856_v30 }
 0x723   :  { %v5468_v1 = vpop.f32.mrf.mxu0 }
 0x725   :  { %v6862_v59 = vpop.f32.mrf.mxu0 }
 0x726   :  { %v1122_v54 = vmul.f32 %v6859_v25, %v6862_v59 }
 0x727   :  { %v5471_v42 = vpop.f32.mrf.mxu0 }
 0x728   :  { %5473 = vmatpush3.xpose.msk.msra.mxu0 %vm11379_vm0, %v1122_v54  ;;  %5713 = vmatpush3.xpose.msk.msra.mxu1 %vm11379_vm0, %v1122_v54 }
 0x729   :  { %5474 = vmatprep.subr.mxu0 %v11280_v62  ;;  %5711 = vmatprep.subr.mxu1 %v11280_v62 }
 0x72c   :  { %5475 = vmatpush3.xpose.msk.msra.mxu0 %vm11379_vm0, %v1121_v7  ;;  %5714 = vmatpush3.xpose.msk.msra.mxu1 %vm11379_vm0, %v1121_v7 }
 0x72d   :  { %5476 = vmatprep.subr.mxu0 %v11280_v62  ;;  %5712 = vmatprep.subr.mxu1 %v11280_v62 }
 0x730   :  { %5477 = vmatpush3.xpose.msk.msra.mxu0 %vm11379_vm0, %v1120_v29  ;;  %5715 = vmatpush3.xpose.msk.msra.mxu1 %vm11379_vm0, %v1120_v29 }
 0x731   :  { %5529 = vmatprep.subr.mxu0 %v11280_v62  ;;  %5586 = vmatprep.subr.bf16.mxu1 %v11280_v62 }
 0x733   :  { %5479 = vmatmul.mubr.msk.f32.vlgmr.msra.gmra.mxu0 %vm11379_vm0, %v6725_v9  ;;  %5503 = vmatmul.mubr.msk.f32.vlgmr.msra.gmra.mxu1 %vm11379_vm0, %v6747_v15 }
 0x734   :  { %5481 = vmatprep.mubr.msk.f32.mxu0 %vm11380_vm2, %v11280_v62  ;;  %5505 = vmatprep.mubr.msk.f32.mxu1 %vm11380_vm2, %v11280_v62 }
 0x737   :  { %5482 = vmatmul.mubr.msk.f32.gmra.mxu0 %vm11379_vm0, %v6733_v52  ;;  %5506 = vmatmul.mubr.msk.f32.gmra.mxu1 %vm11379_vm0, %v6749_v13 }
 0x738   :  { %5484 = vmatprep.mubr.msk.f32.mxu0 %vm11380_vm2, %v11280_v62  ;;  %5508 = vmatprep.mubr.msk.f32.mxu1 %vm11380_vm2, %v11280_v62 }
 0x73b   :  { %5485 = vmatmul.mubr.msk.f32.gmra.mxu0 %vm11379_vm0, %v6735_v57  ;;  %5509 = vmatmul.mubr.msk.f32.gmra.mxu1 %vm11379_vm0, %v6751_v19 }
 0x73c   :  { %5487 = vmatprep.mubr.msk.f32.mxu0 %vm11380_vm2, %v11280_v62  ;;  %5511 = vmatprep.mubr.msk.f32.mxu1 %vm11380_vm2, %v11280_v62 }
 0x73f   :  { %5488 = vmatmul.mubr.msk.f32.gmra.mxu0 %vm11379_vm0, %v6737_v61  ;;  %5512 = vmatmul.mubr.msk.f32.gmra.mxu1 %vm11379_vm0, %v6753_v23 }
 0x740   :  { %5490 = vmatprep.mubr.msk.f32.mxu0 %vm11380_vm2, %v11280_v62  ;;  %5514 = vmatprep.mubr.msk.f32.mxu1 %vm11380_vm2, %v11280_v62 }
 0x743   :  { %5491 = vmatmul.mubr.msk.f32.gmra.mxu0 %vm11379_vm0, %v6739_v63  ;;  %5515 = vmatmul.mubr.msk.f32.gmra.mxu1 %vm11379_vm0, %v6755_v16 }
 0x744   :  { %5493 = vmatprep.mubr.msk.f32.mxu0 %vm11380_vm2, %v11280_v62  ;;  %5517 = vmatprep.mubr.msk.f32.mxu1 %vm11380_vm2, %v11280_v62 }
 0x747   :  { %5494 = vmatmul.mubr.msk.f32.gmra.mxu0 %vm11379_vm0, %v6741_v4  ;;  %5518 = vmatmul.mubr.msk.f32.gmra.mxu1 %vm11379_vm0, %v6757_v27 }
 0x748   :  { %5496 = vmatprep.mubr.msk.f32.mxu0 %vm11380_vm2, %v11280_v62  ;;  %5520 = vmatprep.mubr.msk.f32.mxu1 %vm11380_vm2, %v11280_v62 }
 0x74b   :  { %5497 = vmatmul.mubr.msk.f32.gmra.mxu0 %vm11379_vm0, %v6743_v38  ;;  %5521 = vmatmul.mubr.msk.f32.gmra.mxu1 %vm11379_vm0, %v6759_v39 }
 0x74c   :  { %5499 = vmatprep.mubr.msk.f32.mxu0 %vm11380_vm2, %v11280_v62  ;;  %5523 = vmatprep.mubr.msk.f32.mxu1 %vm11380_vm2, %v11280_v62 }
 0x74f   :  { %5500 = vmatmul.mubr.msk.f32.gmra.mxu0 %vm11379_vm0, %v6745_v10  ;;  %5524 = vmatmul.mubr.msk.f32.gmra.mxu1 %vm11379_vm0, %v6761_v33 }
 0x750   :  { %5526 = vmatprep.mubr.msk.f32.mxu1 %vm11380_vm2, %v11280_v62  ;;  %5535 = vmatprep.mubr.msk.f32.mxu0 %vm11380_vm2, %v11280_v62 }
 0x753   :  { %5527 = vmatmul.mubr.msk.f32.gmra.mxu1 %vm11379_vm0, %v6763_v36 }
 0x754   :  { %5590 = vmatprep.mubr.msk.bf16.mxu1 %vm11380_vm2, %v11280_v62 }
 0x7f3   :  { %v1264_v9 = vpop.f32.mrf.mxu0  ;;  %v1304_v52 = vpop.f32.mrf.mxu1 }
 0x7f4   :  { %v6956_v57 = vmul.f32 0.35355338, %v1264_v9  ;;  %v6962_v10 = vmul.f32 0.35355338, %v1304_v52 }
 0x7f5   :  { %v5480_v61 = vpop.f32.mrf.mxu0  ;;  %v5504_v63 = vpop.f32.mrf.mxu1 }
 0x7f6   :  { %1450 = vrot.lane.b32.xlu0 %v6956_v57, %s6110_s4  ;;  %1382 = vrot.lane.b32.xlu1 %v6956_v57, %s6111_s7 }
 0x7f7   :  { %v1269_v4 = vpop.f32.mrf.mxu0  ;;  %v1309_v38 = vpop.f32.mrf.mxu1 }
 0x7f8   :  { %v6968_v16 = vmul.f32 0.35355338, %v1269_v4  ;;  %v6970_v27 = vmul.f32 0.35355338, %v1309_v38 }
 0x7f9   :  { %v5483_v15 = vpop.f32.mrf.mxu0  ;;  %v5507_v13 = vpop.f32.mrf.mxu1 }
 0x7fa   :  { %1466 = vrot.lane.b32.xlu0 %v6962_v10, %s6110_s4  ;;  %1398 = vrot.lane.b32.xlu1 %v6962_v10, %s6111_s7 }
 0x7fb   :  { %v1274_v19 = vpop.f32.mrf.mxu0  ;;  %v1314_v23 = vpop.f32.mrf.mxu1 }
 0x7fc   :  { %v6976_v6 = vmul.f32 0.35355338, %v1274_v19  ;;  %v6982_v35 = vmul.f32 0.35355338, %v1314_v23 }
 0x7fd   :  { %v5486_v39 = vpop.f32.mrf.mxu0  ;;  %v5510_v33 = vpop.f32.mrf.mxu1 }
 0x7fe   :  { %1384 = vrot.lane.b32.xlu1 %v6968_v16, %s6111_s7  ;;  %1468 = vrot.lane.b32.xlu0 %v6970_v27, %s6110_s4 }
 0x7ff   :  { %v1279_v36 = vpop.f32.mrf.mxu0  ;;  %v1319_v2 = vpop.f32.mrf.mxu1 }
 0x800   :  { %v6988_v43 = vmul.f32 0.35355338, %v1279_v36  ;;  %v6994_v45 = vmul.f32 0.35355338, %v1319_v2 }
 0x801   :  { %v5489_v22 = vpop.f32.mrf.mxu0  ;;  %v5513_v26 = vpop.f32.mrf.mxu1 }
 0x802   :  { %1452 = vrot.lane.b32.xlu1 %v6968_v16, %s6110_s4  ;;  %1454 = vrot.lane.b32.xlu0 %v6976_v6, %s6110_s4 }
 0x803   :  { %v1284_v46 = vpop.f32.mrf.mxu0  ;;  %v1324_v31 = vpop.f32.mrf.mxu1 }
 0x804   :  { %v7000_v28 = vmul.f32 0.35355338, %v1284_v46  ;;  %v7006_v42 = vmul.f32 0.35355338, %v1324_v31 }
 0x805   :  { %v5492_v17 = vpop.f32.mrf.mxu0  ;;  %v5516_v40 = vpop.f32.mrf.mxu1 }
 0x806   :  { %1400 = vrot.lane.b32.xlu1 %v6970_v27, %s6111_s7  ;;  %1470 = vrot.lane.b32.xlu0 %v6982_v35, %s6110_s4 }
 0x807   :  { %v1289_v37 = vpop.f32.mrf.mxu0  ;;  %v1329_v41 = vpop.f32.mrf.mxu1 }
 0x808   :  { %v7012_v29 = vmul.f32 0.35355338, %v1289_v37  ;;  %v7018_v9 = vmul.f32 0.35355338, %v1329_v41 }
 0x809   :  { %v5495_v21 = vpop.f32.mrf.mxu0  ;;  %v5519_v47 = vpop.f32.mrf.mxu1 }
 0x80a   :  { %1386 = vrot.lane.b32.xlu1 %v6976_v6, %s6111_s7  ;;  %1456 = vrot.lane.b32.xlu0 %v6988_v43, %s6110_s4 }
 0x80b   :  { %v1294_v50 = vpop.f32.mrf.mxu0  ;;  %v1334_v20 = vpop.f32.mrf.mxu1 }
 0x80c   :  { %v7024_v52 = vmul.f32 0.35355338, %v1294_v50  ;;  %v7030_v61 = vmul.f32 0.35355338, %v1334_v20 }
 0x80d   :  { %v5498_v48 = vpop.f32.mrf.mxu0  ;;  %v5522_v49 = vpop.f32.mrf.mxu1 }
 0x80e   :  { %1402 = vrot.lane.b32.xlu1 %v6982_v35, %s6111_s7  ;;  %1472 = vrot.lane.b32.xlu0 %v6994_v45, %s6110_s4 }
 0x80f   :  { %v1299_v53 = vpop.f32.mrf.mxu0  ;;  %v1339_v51 = vpop.f32.mrf.mxu1 }
 0x810   :  { %v7036_v63 = vmul.f32 0.35355338, %v1299_v53  ;;  %v7042_v4 = vmul.f32 0.35355338, %v1339_v51 }
 0x811   :  { %v5501_v1 = vpop.f32.mrf.mxu0  ;;  %v5525_v8 = vpop.f32.mrf.mxu1 }
 0x812   :  { %1388 = vrot.lane.b32.xlu1 %v6988_v43, %s6111_s7  ;;  %1458 = vrot.lane.b32.xlu0 %v7000_v28, %s6110_s4 }
 0x813   :  { %v1344_v54 = vpop.f32.mrf.mxu1 }
 0x814   :  { %v7052_v38 = vmul.f32 0.35355338, %v1344_v54 }
 0x815   :  { %v5528_v7 = vpop.f32.mrf.mxu1 }
 0x816   :  { %1404 = vrot.lane.b32.xlu1 %v6994_v45, %s6111_s7  ;;  %1474 = vrot.lane.b32.xlu0 %v7006_v42, %s6110_s4 }
 0x81a   :  { %1390 = vrot.lane.b32.xlu1 %v7000_v28, %s6111_s7  ;;  %1460 = vrot.lane.b32.xlu0 %v7012_v29, %s6110_s4 }
 0x81e   :  { %1406 = vrot.lane.b32.xlu1 %v7006_v42, %s6111_s7  ;;  %1476 = vrot.lane.b32.xlu0 %v7018_v9, %s6110_s4 }
 0x822   :  { %1392 = vrot.lane.b32.xlu1 %v7012_v29, %s6111_s7  ;;  %1462 = vrot.lane.b32.xlu0 %v7024_v52, %s6110_s4 }
 0x826   :  { %1408 = vrot.lane.b32.xlu1 %v7018_v9, %s6111_s7  ;;  %1478 = vrot.lane.b32.xlu0 %v7030_v61, %s6110_s4 }
 0x82a   :  { %1394 = vrot.lane.b32.xlu1 %v7024_v52, %s6111_s7  ;;  %1464 = vrot.lane.b32.xlu0 %v7036_v63, %s6110_s4 }
 0x82e   :  { %1410 = vrot.lane.b32.xlu1 %v7030_v61, %s6111_s7  ;;  %1480 = vrot.lane.b32.xlu0 %v7042_v4, %s6110_s4 }
 0x832   :  { %1396 = vrot.lane.b32.xlu1 %v7036_v63, %s6111_s7 }
 0x836   :  { %1412 = vrot.lane.b32.xlu1 %v7042_v4, %s6111_s7 }
 0x83a   :  { %1414 = vrot.lane.b32.xlu1 %v7052_v38, %s6111_s7 }
 0x83e   :  { %1482 = vrot.lane.b32.xlu1 %v7052_v38, %s6110_s4 }
 0x868   :  { %v1451_v15 = vpop.permute.xlu0 %1450  ;;  %v1383_v13 = vpop.permute.xlu1 %1382 }
 0x869   :  { %v1433_v19 = vmax.f32 %v6956_v57, %v1383_v13 }
 0x86b   :  { %v7059_v23 = vmax.f32 %v1433_v19, %v1451_v15 }
 0x86c   :  { %v1467_v39 = vpop.permute.xlu0 %1466  ;;  %v1399_v33 = vpop.permute.xlu1 %1398 }
 0x86d   :  { %v1441_v36 = vmax.f32 %v6962_v10, %v1399_v33  ;;  %1688 = vrot.lane.b32.xlu0 %v7059_v23, %s6112_s8  ;;  %1586 = vrot.lane.b32.xlu1 %v7059_v23, %s6113_s2 }
 0x86f   :  { %v7066_v2 = vmax.f32 %v1441_v36, %v1467_v39 }
 0x870   :  { %v1385_v22 = vpop.permute.xlu1 %1384  ;;  %v1469_v26 = vpop.permute.xlu0 %1468 }
 0x871   :  { %1704 = vrot.lane.b32.xlu0 %v7066_v2, %s6112_s8  ;;  %1602 = vrot.lane.b32.xlu1 %v7066_v2, %s6113_s2  ;;  %v1434_v46 = vmax.f32 %v6968_v16, %v1385_v22 }
 0x874   :  { %v1453_v31 = vpop.permute.xlu1 %1452  ;;  %v1455_v17 = vpop.permute.xlu0 %1454 }
 0x875   :  { %v7073_v40 = vmax.f32 %v1434_v46, %v1453_v31 }
 0x877   :  { %1690 = vrot.lane.b32.xlu0 %v7073_v40, %s6112_s8  ;;  %1588 = vrot.lane.b32.xlu1 %v7073_v40, %s6113_s2 }
 0x878   :  { %v1401_v37 = vpop.permute.xlu1 %1400  ;;  %v1471_v41 = vpop.permute.xlu0 %1470 }
 0x879   :  { %v1442_v21 = vmax.f32 %v6970_v27, %v1401_v37 }
 0x87b   :  { %v7080_v47 = vmax.f32 %v1442_v21, %v1469_v26 }
 0x87c   :  { %v1387_v50 = vpop.permute.xlu1 %1386  ;;  %v1457_v20 = vpop.permute.xlu0 %1456 }
 0x87d   :  { %v1435_v48 = vmax.f32 %v6976_v6, %v1387_v50  ;;  %1706 = vrot.lane.b32.xlu0 %v7080_v47, %s6112_s8  ;;  %1604 = vrot.lane.b32.xlu1 %v7080_v47, %s6113_s2 }
 0x87f   :  { %v7087_v49 = vmax.f32 %v1435_v48, %v1455_v17 }
 0x880   :  { %v1403_v53 = vpop.permute.xlu1 %1402  ;;  %v1473_v51 = vpop.permute.xlu0 %1472 }
 0x881   :  { %v1443_v1 = vmax.f32 %v6982_v35, %v1403_v53  ;;  %1692 = vrot.lane.b32.xlu0 %v7087_v49, %s6112_s8  ;;  %1590 = vrot.lane.b32.xlu1 %v7087_v49, %s6113_s2 }
 0x883   :  { %v7094_v8 = vmax.f32 %v1443_v1, %v1471_v41 }
 0x884   :  { %v1389_v54 = vpop.permute.xlu1 %1388  ;;  %v1459_v7 = vpop.permute.xlu0 %1458 }
 0x885   :  { %v1436_v15 = vmax.f32 %v6988_v43, %v1389_v54  ;;  %1708 = vrot.lane.b32.xlu0 %v7094_v8, %s6112_s8  ;;  %1606 = vrot.lane.b32.xlu1 %v7094_v8, %s6113_s2 }
 0x887   :  { %v7101_v13 = vmax.f32 %v1436_v15, %v1457_v20 }
 0x888   :  { %v1405_v19 = vpop.permute.xlu1 %1404  ;;  %v1475_v39 = vpop.permute.xlu0 %1474 }
 0x889   :  { %11481 = vst [vmem:[#allocation14_spill] sm:$0xff] %v7101_v13  ;;  %v1444_v33 = vmax.f32 %v6994_v45, %v1405_v19  ;;  %1592 = vrot.lane.b32.xlu0 %v7101_v13, %s6113_s2 }
 0x88b   :  { %v7106_v36 = vmax.f32 %v1444_v33, %v1473_v51 }
 0x88c   :  { %v1391_v22 = vpop.permute.xlu1 %1390  ;;  %v1461_v46 = vpop.permute.xlu0 %1460 }
 0x88d   :  { %11482 = vst [vmem:[#allocation15_spill] sm:$0xff] %v7106_v36  ;;  %v1437_v26 = vmax.f32 %v7000_v28, %v1391_v22  ;;  %1694 = vrot.lane.b32.xlu0 %v7101_v13, %s6112_s8  ;;  %1608 = vrot.lane.b32.xlu1 %v7106_v36, %s6113_s2 }
 0x88f   :  { %v7113_v31 = vmax.f32 %v1437_v26, %v1459_v7  ;;  %v2005_v26 = vmul.f32 0.25, %v6766_v44 }
 0x890   :  { %v1407_v17 = vpop.permute.xlu1 %1406  ;;  %v1477_v21 = vpop.permute.xlu0 %1476 }
 0x891   :  { %11483 = vst [vmem:[#allocation16_spill] sm:$0xff] %v7113_v31  ;;  %v1445_v37 = vmax.f32 %v7006_v42, %v1407_v17  ;;  %1710 = vrot.lane.b32.xlu0 %v7106_v36, %s6112_s8  ;;  %1594 = vrot.lane.b32.xlu1 %v7113_v31, %s6113_s2 }
 0x893   :  { %v7120_v41 = vmax.f32 %v1445_v37, %v1475_v39  ;;  %v7155_v37 = vmul.f32 0.015384615, %v6819_v60 }
 0x894   :  { %v1393_v50 = vpop.permute.xlu1 %1392  ;;  %v1463_v1 = vpop.permute.xlu0 %1462 }
 0x895   :  { %11484 = vst [vmem:[#allocation17_spill] sm:$0xff] %v7120_v41  ;;  %v1438_v20 = vmax.f32 %v7012_v29, %v1393_v50  ;;  %1696 = vrot.lane.b32.xlu0 %v7113_v31, %s6112_s8  ;;  %1610 = vrot.lane.b32.xlu1 %v7120_v41, %s6113_s2  ;;  %11489 = vst [vmem:[#allocation22_spill] sm:$0xff] %v7155_v37 }
 0x897   :  { %v7127_v48 = vmax.f32 %v1438_v20, %v1461_v46  ;;  %v7150_v46 = vmul.f32 0.015384615, %v6826_v12 }
 0x898   :  { %v1409_v53 = vpop.permute.xlu1 %1408  ;;  %v1479_v39 = vpop.permute.xlu0 %1478 }
 0x899   :  { %v1446_v51 = vmax.f32 %v7018_v9, %v1409_v53  ;;  %1712 = vrot.lane.b32.xlu0 %v7120_v41, %s6112_s8  ;;  %1596 = vrot.lane.b32.xlu1 %v7127_v48, %s6113_s2  ;;  %11487 = vst [vmem:[#allocation20_spill] sm:$0xff] %v7150_v46  ;;  %v7162_v53 = vfloor.f32 %v2005_v26  ;;  %v11278_v44 = vfloor.f32 %v7150_v46  ;;  %v1978_v26 = vadd.s32 32, %v6430_v0 }
 0x89b   :  { %v7134_v54 = vmax.f32 %v1446_v51, %v1477_v21  ;;  %v11279_v51 = vfloor.f32 %v7155_v37  ;;  %vm2056_vm14 = vcmp.eq.f32.partialorder %v7162_v53, %v11278_v44  ;;  %v1992_v44 = vcvt.s32.f32 %v1978_v26 }
 0x89c   :  { %v1395_v7 = vpop.permute.xlu1 %1394  ;;  %v1465_v20 = vpop.permute.xlu0 %1464  ;;  %v1995_v37 = vcvt.s32.f32 %v1981_v5 }
 0x89d   :  { %11485 = vst [vmem:[#allocation18_spill] sm:$0xff] %v7134_v54  ;;  %v1439_v15 = vmax.f32 %v7024_v52, %v1395_v7  ;;  %1698 = vrot.lane.b32.xlu0 %v7127_v48, %s6112_s8  ;;  %1612 = vrot.lane.b32.xlu1 %v7134_v54, %s6113_s2  ;;  %vm2055_vm13 = vcmp.eq.f32.partialorder %v7162_v53, %v11279_v51 }
 0x89e   :  { %v7184_v7 = vsel %vm2055_vm13, 1.0, %v11280_v62 }
 0x89f   :  { %v7141_v19 = vmax.f32 %v1439_v15, %v1463_v1  ;;  %v5730_v1 = vpack.i.bf16 %v6867_v58, %v6859_v25  ;;  %11491 = vst [vmem:[#allocation24_spill] sm:$0xff] %v7184_v7  ;;  %v7187_v15 = vsel %vm2056_vm14, 1.0, %v11280_v62 }
 0x8a0   :  { %v1411_v33 = vpop.permute.xlu1 %1410  ;;  %11492 = vst [vmem:[#allocation25_spill] sm:$0xff] %v7187_v15 }
 0x8a1   :  { %11486 = vst [vmem:[#allocation19_spill] sm:$0xff] %v7141_v19  ;;  %v1447_v22 = vmax.f32 %v7030_v61, %v1411_v33  ;;  %1714 = vrot.lane.b32.xlu0 %v7134_v54, %s6112_s8  ;;  %1598 = vrot.lane.b32.xlu1 %v7141_v19, %s6113_s2  ;;  %v1977_v33 = vadd.s32 24, %v6430_v0 }
 0x8a3   :  { %v7152_v17 = vmax.f32 %v1447_v22, %v1479_v39  ;;  %v7191_v39 = vpack.i.bf16 %v7187_v15, %v7184_v7  ;;  %v1991_v22 = vcvt.s32.f32 %v1977_v33 }
 0x8a4   :  { %v1397_v21 = vpop.permute.xlu1 %1396 }
 0x8a5   :  { %11488 = vst [vmem:[#allocation21_spill] sm:$0xff] %v7152_v17  ;;  %v1440_v50 = vmax.f32 %v7036_v63, %v1397_v21  ;;  %1700 = vrot.lane.b32.xlu0 %v7141_v19, %s6112_s8  ;;  %1614 = vrot.lane.b32.xlu1 %v7152_v17, %s6113_s2  ;;  %v1979_v21 = vadd.s32 40, %v6430_v0 }
 0x8a7   :  { %v7165_v12 = vmax.f32 %v1440_v50, %v1465_v20  ;;  %v1481_v50 = vpop.permute.xlu0 %1480  ;;  %v1993_v51 = vcvt.s32.f32 %v1979_v21  ;;  %v1994_v21 = vcvt.s32.f32 %v1980_v32 }
 0x8a8   :  { %v1413_v60 = vpop.permute.xlu1 %1412 }
 0x8a9   :  { %11490 = vst [vmem:[#allocation23_spill] sm:$0xff] %v7165_v12  ;;  %1716 = vrot.lane.b32.xlu0 %v7152_v17, %s6112_s8  ;;  %1600 = vrot.lane.b32.xlu1 %v7165_v12, %s6113_s2  ;;  %v1448_v58 = vmax.f32 %v7042_v4, %v1413_v60  ;;  %v2008_v60 = vadd.f32 0.5, %v1992_v44  ;;  %v2009_v33 = vadd.f32 0.5, %v1993_v51  ;;  %v2010_v55 = vadd.f32 0.5, %v1994_v21 }
 0x8ab   :  { %v7199_v20 = vmax.f32 %v1448_v58, %v1481_v50  ;;  %v7213_v26 = vmul.f32 0.015384615, %v2009_v33  ;;  %v2011_v33 = vadd.f32 0.5, %v1995_v37  ;;  %v7229_v14 = vmul.f32 0.015384615, %v2010_v55 }
 0x8ac   :  { %v1415_v25 = vpop.permute.xlu1 %1414 }
 0x8ad   :  { %1702 = vrot.lane.b32.xlu0 %v7165_v12, %s6112_s8  ;;  %1126 = vrot.lane.b32.xlu1 %v6876_v56, %s6114_s3  ;;  %v2007_v56 = vadd.f32 0.5, %v1991_v22  ;;  %v1449_v18 = vmax.f32 %v7052_v38, %v1415_v25  ;;  %v7231_v3 = vmul.f32 0.015384615, %v2011_v33  ;;  %v11300_v15 = vfloor.f32 %v7229_v14 }
 0x8af   :  { %v11302_v7 = vfloor.f32 %v7231_v3 }
 0x8b0   :  { %v1483_v62 = vpop.permute.xlu1 %1482 }
 0x8b1   :  { %5731 = vrot.lane.b32.xlu0 %v5730_v1, %s6114_s3  ;;  %v7201_v1 = vmul.f32 0.015384615, %v2007_v56  ;;  %v7209_v58 = vmax.f32 %v1449_v18, %v1483_v62  ;;  %v7211_v56 = vmul.f32 0.015384615, %v2008_v60  ;;  %v1982_v62 = vadd.s32 64, %v6430_v0 }
 0x8b2   :  { %v1983_v18 = vadd.s32 72, %v6430_v0  ;;  %v11301_v60 = vfloor.f32 %v7213_v26  ;;  %v3338_v55 = vmul.f32 65.0, %v11302_v7 }
 0x8b3   :  { %v11290_v46 = vfloor.f32 %v7201_v1  ;;  %v11299_v50 = vfloor.f32 %v7211_v56 }
 0x8b4   :  { %v3336_v32 = vmul.f32 65.0, %v11301_v60 }
 0x8b5   :  { %5736 = vrot.lane.b32.xlu0 %v7191_v39, %s6113_s2  ;;  %v3334_v25 = vmul.f32 65.0, %v11290_v46  ;;  %v3335_v46 = vmul.f32 65.0, %v11299_v50  ;;  %v3337_v50 = vmul.f32 65.0, %v11300_v15 }
 0x8b7   :  { %v7220_v34 = vsub.f32 %v1991_v22, %v3334_v25  ;;  %v7233_v5 = vsub.f32 %v1992_v44, %v3335_v46  ;;  %v1996_v22 = vcvt.s32.f32 %v1982_v62  ;;  %v1997_v25 = vcvt.s32.f32 %v1983_v18 }
 0x8b8   :  { %v7243_v33 = vsub.f32 %v1994_v21, %v3337_v50  ;;  %v7247_v44 = vsub.f32 %v1995_v37, %v3338_v55 }
 0x8b9   :  { %1718 = vrot.lane.b32.xlu0 %v7199_v20, %s6112_s8  ;;  %11493 = vst [vmem:[#allocation26_spill] sm:$0xff] %v7220_v34  ;;  %11494 = vst [vmem:[#allocation27_spill] sm:$0xff] %v7233_v5  ;;  %v7235_v34 = vsub.f32 %v1993_v51, %v3336_v32  ;;  %v2012_v12 = vadd.f32 0.5, %v1996_v22  ;;  %v2013_v17 = vadd.f32 0.5, %v1997_v25 }
 0x8ba   :  { %11496 = vst [vmem:[#allocation29_spill] sm:$0xff] %v7243_v33  ;;  %11497 = vst [vmem:[#allocation30_spill] sm:$0xff] %v7247_v44 }
 0x8bb   :  { %11495 = vst [vmem:[#allocation28_spill] sm:$0xff] %v7235_v34  ;;  %v7245_v46 = vmul.f32 0.015384615, %v2012_v12  ;;  %v7249_v51 = vmul.f32 0.015384615, %v2013_v17 }
 0x8bd   :  { %1720 = vrot.lane.b32.xlu0 %v7209_v58, %s6112_s8  ;;  %v11305_v62 = vfloor.f32 %v7245_v46  ;;  %v11306_v18 = vfloor.f32 %v7249_v51 }
 0x8bf   :  { %v3339_v32 = vmul.f32 65.0, %v11305_v62  ;;  %v3340_v15 = vmul.f32 65.0, %v11306_v18 }
 0x8c1   :  { %v7257_v60 = vsub.f32 %v1996_v22, %v3339_v32  ;;  %v7259_v21 = vsub.f32 %v1997_v25, %v3340_v15 }
 0x8c3   :  { %11498 = vst [vmem:[#allocation31_spill] sm:$0xff] %v7257_v60  ;;  %11499 = vst [vmem:[#allocation32_spill] sm:$0xff] %v7259_v21 }
 0x8df   :  { %v1689_v12 = vpop.permute.xlu0 %1688  ;;  %v7262_v50 = vpop.permute.xlu1 %1586 }
 0x8e0   :  { %v1739_v37 = vsub.f32 %v6956_v57, %v1689_v12 }
 0x8e2   :  { %v1756_v17 = vmul.f32 1.442695, %v1739_v37 }
 0x8e3   :  { %v1705_v55 = vpop.permute.xlu0 %1704  ;;  %v7265_v33 = vpop.permute.xlu1 %1602 }
 0x8e4   :  { %5861 = vpow2.f32 %v1756_v17  ;;  %v1747_v7 = vsub.f32 %v6962_v10, %v1705_v55 }
 0x8e6   :  { %v1772_v44 = vmul.f32 1.442695, %v1747_v7 }
 0x8e8   :  { %5863 = vpow2.f32 %v1772_v44 }
 0x8e9   :  { %v1691_v62 = vpop.permute.xlu0 %1690  ;;  %v7268_v32 = vpop.permute.xlu1 %1588 }
 0x8ea   :  { %v1740_v22 = vsub.f32 %v6968_v16, %v1691_v62 }
 0x8ec   :  { %v1758_v15 = vmul.f32 1.442695, %v1740_v22 }
 0x8ee   :  { %5865 = vpow2.f32 %v1758_v15 }
 0x8ef   :  { %v1707_v25 = vpop.permute.xlu0 %1706  ;;  %v7270_v12 = vpop.permute.xlu1 %1604 }
 0x8f0   :  { %v1748_v37 = vsub.f32 %v6970_v27, %v1707_v25 }
 0x8f1   :  { %v7273_v18 = vpop.eup %5861 }
 0x8f2   :  { %11500 = vst [vmem:[#allocation33_spill] sm:$0xff] %v7273_v18  ;;  %v1774_v17 = vmul.f32 1.442695, %v1748_v37  ;;  %1892 = vrot.lane.b32.xlu0 %v7273_v18, %s6110_s4 }
 0x8f3   :  { %v1693_v7 = vpop.permute.xlu0 %1692  ;;  %v7280_v55 = vpop.permute.xlu1 %1590 }
 0x8f4   :  { %5867 = vpow2.f32 %v1774_v17  ;;  %v1741_v44 = vsub.f32 %v6976_v6, %v1693_v7 }
 0x8f5   :  { %v7278_v62 = vpop.eup %5863 }
 0x8f6   :  { %11501 = vst [vmem:[#allocation34_spill] sm:$0xff] %v7278_v62  ;;  %v1760_v22 = vmul.f32 1.442695, %v1741_v44  ;;  %1908 = vrot.lane.b32.xlu0 %v7278_v62, %s6110_s4 }
 0x8f7   :  { %v1709_v15 = vpop.permute.xlu0 %1708  ;;  %v7287_v60 = vpop.permute.xlu1 %1606 }
 0x8f8   :  { %5869 = vpow2.f32 %v1760_v22  ;;  %v1749_v25 = vsub.f32 %v6982_v35, %v1709_v15 }
 0x8fa   :  { %v1776_v37 = vmul.f32 1.442695, %v1749_v25 }
 0x8fb   :  { %v7285_v21 = vpop.eup %5865  ;;  %v7289_v17 = vpop.permute.xlu0 %1592 }
 0x8fc   :  { %11502 = vst [vmem:[#allocation35_spill] sm:$0xff] %v7285_v21  ;;  %5871 = vpow2.f32 %v1776_v37  ;;  %1894 = vrot.lane.b32.xlu0 %v7285_v21, %s6110_s4 }
 0x8ff   :  { %v1695_v7 = vpop.permute.xlu0 %1694  ;;  %v7293_v44 = vpop.permute.xlu1 %1608 }
 0x900   :  { %v1742_v34 = vsub.f32 %v6988_v43, %v1695_v7 }
 0x901   :  { %v7296_v5 = vpop.eup %5867 }
 0x902   :  { %11503 = vst [vmem:[#allocation36_spill] sm:$0xff] %v7296_v5  ;;  %v1762_v22 = vmul.f32 1.442695, %v1742_v34  ;;  %1910 = vrot.lane.b32.xlu0 %v7296_v5, %s6110_s4 }
 0x903   :  { %v1711_v15 = vpop.permute.xlu0 %1710  ;;  %v7300_v25 = vpop.permute.xlu1 %1594 }
 0x904   :  { %5873 = vpow2.f32 %v1762_v22  ;;  %v1750_v37 = vsub.f32 %v6994_v45, %v1711_v15 }
 0x905   :  { %v7303_v62 = vpop.eup %5869 }
 0x906   :  { %11504 = vst [vmem:[#allocation37_spill] sm:$0xff] %v7303_v62  ;;  %v1778_v21 = vmul.f32 1.442695, %v1750_v37  ;;  %1896 = vrot.lane.b32.xlu0 %v7303_v62, %s6110_s4 }
 0x907   :  { %v7307_v18 = vpop.permute.xlu0 %1696  ;;  %v7309_v7 = vpop.permute.xlu1 %1610 }
 0x908   :  { %5875 = vpow2.f32 %v1778_v21 }
 0x909   :  { %v7311_v34 = vpop.eup %5871 }
 0x90a   :  { %11505 = vst [vmem:[#allocation38_spill] sm:$0xff] %v7311_v34  ;;  %1912 = vrot.lane.b32.xlu0 %v7311_v34, %s6110_s4 }
 0x90b   :  { %v1713_v5 = vpop.permute.xlu0 %1712  ;;  %v1597_v22 = vpop.permute.xlu1 %1596 }
 0x90c   :  { %v1751_v15 = vsub.f32 %v7006_v42, %v1713_v5  ;;  %v1642_v19 = vsub.f32 %v7012_v29, %v1597_v22 }
 0x90e   :  { %v1780_v37 = vmul.f32 1.442695, %v1751_v15  ;;  %v1664_v62 = vmul.f32 1.442695, %v1642_v19 }
 0x90f   :  { %v1699_v54 = vpop.permute.xlu0 %1698 }
 0x910   :  { %5877 = vpow2.f32 %v1780_v37  ;;  %v1744_v41 = vsub.f32 %v7012_v29, %v1699_v54 }
 0x911   :  { %v7318_v31 = vpop.eup %5873  ;;  %5879 = vpow2.f32 %v1664_v62 }
 0x912   :  { %11506 = vst [vmem:[#allocation39_spill] sm:$0xff] %v7318_v31  ;;  %1898 = vrot.lane.b32.xlu0 %v7318_v31, %s6110_s4  ;;  %v1766_v34 = vmul.f32 1.442695, %v1744_v41  ;;  %v1637_v41 = vsub.f32 %v6956_v57, %v7262_v50 }
 0x913   :  { %v1715_v21 = vpop.permute.xlu0 %1714 }
 0x914   :  { %v1752_v36 = vsub.f32 %v7018_v9, %v1715_v21  ;;  %5881 = vpow2.f32 %v1766_v34 }
 0x915   :  { %v7323_v13 = vpop.eup %5875 }
 0x916   :  { %11507 = vst [vmem:[#allocation40_spill] sm:$0xff] %v7323_v13  ;;  %1914 = vrot.lane.b32.xlu0 %v7323_v13, %s6110_s4  ;;  %v1782_v19 = vmul.f32 1.442695, %v1752_v36 }
 0x917   :  { %v1701_v5 = vpop.permute.xlu0 %1700 }
 0x918   :  { %v1745_v54 = vsub.f32 %v7024_v52, %v1701_v5  ;;  %5883 = vpow2.f32 %v1782_v19  ;;  %v1654_v5 = vmul.f32 1.442695, %v1637_v41  ;;  %v1645_v19 = vsub.f32 %v6962_v10, %v7265_v33 }
 0x91a   :  { %v1768_v15 = vmul.f32 1.442695, %v1745_v54 }
 0x91b   :  { %v1717_v22 = vpop.permute.xlu0 %1716 }
 0x91c   :  { %v1753_v37 = vsub.f32 %v7030_v61, %v1717_v22  ;;  %5885 = vpow2.f32 %v1768_v15  ;;  %v1670_v15 = vmul.f32 1.442695, %v1645_v19  ;;  %v1639_v19 = vsub.f32 %v6976_v6, %v7280_v55 }
 0x91d   :  { %v7329_v31 = vpop.eup %5877 }
 0x91e   :  { %11508 = vst [vmem:[#allocation41_spill] sm:$0xff] %v7329_v31  ;;  %1916 = vrot.lane.b32.xlu0 %v7329_v31, %s6110_s4  ;;  %v1784_v21 = vmul.f32 1.442695, %v1753_v37  ;;  %v7336_v34 = vpop.eup %5879  ;;  %v1638_v37 = vsub.f32 %v6968_v16, %v7268_v32  ;;  %v7357_v32 = vmul.f32 0.015384615, %v6832_v11 }
 0x91f   :  { %v1703_v62 = vpop.permute.xlu0 %1702  ;;  %11509 = vst [vmem:[#allocation42_spill] sm:$0xff] %v7336_v34 }
 0x920   :  { %v1746_v36 = vsub.f32 %v7036_v63, %v1703_v62  ;;  %5887 = vpow2.f32 %v1784_v21  ;;  %v1656_v41 = vmul.f32 1.442695, %v1638_v37  ;;  %v1646_v21 = vsub.f32 %v6970_v27, %v7270_v12  ;;  %11512 = vst [vmem:[#allocation45_spill] sm:$0xff] %v7357_v32 }
 0x921   :  { %v7342_v13 = vpop.eup %5881  ;;  %5889 = vpow2.f32 %v1654_v5  ;;  %v11325_v12 = vfloor.f32 %v7357_v32 }
 0x922   :  { %1817 = vrot.lane.b32.xlu0 %v7336_v34, %s6111_s7  ;;  %v1770_v50 = vmul.f32 1.442695, %v1746_v36  ;;  %11510 = vst [vmem:[#allocation43_spill] sm:$0xff] %v7342_v13  ;;  %v1672_v5 = vmul.f32 1.442695, %v1646_v21  ;;  %v1640_v21 = vsub.f32 %v6988_v43, %v7289_v17  ;;  %v11519_v17 = vfloor.f32 %v7211_v56 }
 0x923   :  { %v5732_v54 = vpop.permute.xlu0 %5731  ;;  %vm2057_vm15 = vcmp.eq.f32.partialorder %v7162_v53, %v11325_v12 }
 0x924   :  { %v5733_v22 = vunpack.i.l.bf16 %v5732_v54  ;;  %5891 = vpow2.f32 %v1770_v50  ;;  %v1658_v50 = vmul.f32 1.442695, %v1639_v19  ;;  %v5734_v37 = vunpack.i.h.bf16 %v5732_v54 }
 0x925   :  { %v7350_v33 = vpop.eup %5883  ;;  %5893 = vpow2.f32 %v1670_v15  ;;  %vm2059_vm6 = vcmp.eq.f32.partialorder %v7162_v53, %v11519_v17  ;;  %v1660_v32 = vmul.f32 1.442695, %v1640_v21  ;;  %v11524_v21 = vfloor.f32 %v7231_v3 }
 0x926   :  { %v1137_v62 = vmul.f32 %v5733_v22, %v6862_v59  ;;  %1902 = vrot.lane.b32.xlu0 %v7342_v13, %s6110_s4  ;;  %11511 = vst [vmem:[#allocation44_spill] sm:$0xff] %v7350_v33  ;;  %5895 = vpow2.f32 %v1656_v41  ;;  %v1647_v22 = vsub.f32 %v6982_v35, %v7287_v60  ;;  %v1641_v17 = vsub.f32 %v7000_v28, %v7300_v25 }
 0x927   :  { %v7363_v36 = vpop.permute.xlu0 %5736  ;;  %5897 = vpow2.f32 %v1672_v5  ;;  %v11517_v5 = vmov 0.0   ;;  %vm2062_vm7 = vcmp.eq.f32.partialorder %v7162_v53, %v11524_v21  ;;  %v11527_v25 = vfloor.f32 %v7245_v46 }
 0x928   :  { %2489 = vrot.lane.b32.xlu1 %v1137_v62, %s6115_s23  ;;  %v11515_v62 = vfloor.f32 %v7201_v1  ;;  %5899 = vpow2.f32 %v1658_v50  ;;  %v1674_v60 = vmul.f32 1.442695, %v1647_v22  ;;  %v7397_v19 = vsel %vm2057_vm15, 1.0, %v11517_v5 }
 0x929   :  { %v7361_v59 = vpop.eup %5885  ;;  %v1136_v1 = vmul.f32 %v5734_v37, %v6856_v30  ;;  %v11520_v50 = vfloor.f32 %v7213_v26  ;;  %v7422_v56 = vsel %vm2059_vm6, 1.0, %v11517_v5  ;;  %v7450_v3 = vsel %vm2062_vm7, 1.0, %v11517_v5 }
 0x92a   :  { %1918 = vrot.lane.b32.xlu0 %v7350_v33, %s6110_s4  ;;  %11513 = vst [vmem:[#allocation46_spill] sm:$0xff] %v7361_v59  ;;  %vm2058_vm3 = vcmp.eq.f32.partialorder %v7162_v53, %v11515_v62  ;;  %5901 = vpow2.f32 %v1674_v60  ;;  %11521 = vst [vmem:[#allocation50_spill] sm:$0xff] %v7422_v56  ;;  %vm2063_vm8 = vcmp.eq.f32.partialorder %v7162_v53, %v11527_v25  ;;  %vm2446_vm15 = vcmask 64512  }
 0x92b   :  { %v1719_v55 = vpop.permute.xlu0 %1718  ;;  %v7400_v12 = vsel %vm2058_vm3, 1.0, %v11517_v5  ;;  %vm2060_vm4 = vcmp.eq.f32.partialorder %v7162_v53, %v11520_v50  ;;  %5903 = vpow2.f32 %v1660_v32  ;;  %11526 = vst [vmem:[#allocation53_spill] sm:$0xff] %v7450_v3  ;;  %v1743_v21 = vsub.f32 %v7000_v28, %v7307_v18 }
 0x92c   :  { %1616 = vrot.lane.b32.xlu1 %v7199_v20, %s6113_s2  ;;  %11518 = vst [vmem:[#allocation49_spill] sm:$0xff] %v7400_v12  ;;  %v1754_v62 = vsub.f32 %v7042_v4, %v1719_v55  ;;  %v7417_v30 = vpack.i.bf16 %v7400_v12, %v7397_v19  ;;  %v7425_v26 = vsel %vm2060_vm4, 1.0, %v11517_v5  ;;  %vm2464_vm3 = vcmask 130048  }
 0x92d   :  { %v7372_v11 = vpop.eup %5887  ;;  %11522 = vst [vmem:[#allocation51_spill] sm:$0xff] %v7425_v26  ;;  %v1764_v18 = vmul.f32 1.442695, %v1743_v21  ;;  %vm2494_vm6 = vcmask 195584   ;;  %vm11383_vm7 = vcmask 523264  }
 0x92e   :  { %1904 = vrot.lane.b32.xlu0 %v7361_v59, %s6110_s4  ;;  %11514 = vst [vmem:[#allocation47_spill] sm:$0xff] %v7372_v11  ;;  %v7378_v15 = vpop.eup %5889  ;;  %v1786_v37 = vmul.f32 1.442695, %v1754_v62  ;;  %v7442_v62 = vpack.i.bf16 %v7425_v26, %v7422_v56  ;;  %3308 = vst.msk [vmem:[#allocation2] sm:$0xff] %vm11383_vm7, %v11517_v5 }
 0x92f   :  { %v1721_v22 = vpop.permute.xlu0 %1720  ;;  %3309 = vst.msk [vmem:[#allocation2 + $0x8] sm:$0xff] %vm11383_vm7, %v11517_v5  ;;  %3328 = vst.msk [vmem:[#allocation2 + $0x92] sm:$0xff] %vm11383_vm7, %v11517_v5 }
 0x930   :  { %1618 = vrot.lane.b32.xlu1 %v7209_v58, %s6113_s2  ;;  %v1755_v60 = vsub.f32 %v7052_v38, %v1721_v22  ;;  %5905 = vpow2.f32 %v1786_v37  ;;  %v1613_v22 = vpop.permute.xlu1 %1612 }
 0x931   :  { %v7388_v41 = vpop.eup %5891 }
 0x932   :  { %1920 = vrot.lane.b32.xlu0 %v7372_v11, %s6110_s4  ;;  %11516 = vst [vmem:[#allocation48_spill] sm:$0xff] %v7388_v41  ;;  %v7394_v54 = vpop.eup %5893  ;;  %v1648_v11 = vsub.f32 %v6994_v45, %v7293_v44  ;;  %v11523_v44 = vfloor.f32 %v7229_v14  ;;  %v1788_v32 = vmul.f32 1.442695, %v1755_v60  ;;  %v7471_v60 = vsel %vm2063_vm8, 1.0, %v11517_v5 }
 0x933   :  { %v7419_v55 = vpop.eup %5895  ;;  %vm884_vm8 = vcmask 1031168  }
 0x934   :  { %1807 = vrot.lane.b32.xlu1 %v7378_v15, %s6111_s7  ;;  %vm2061_vm5 = vcmp.eq.f32.partialorder %v7162_v53, %v11523_v44  ;;  %v7444_v50 = vpop.eup %5897  ;;  %v1662_v44 = vmul.f32 1.442695, %v1641_v17 }
 0x935   :  { %v7447_v14 = vsel %vm2061_vm5, 1.0, %v11517_v5  ;;  %v7468_v46 = vpop.eup %5899 }
 0x936   :  { %1906 = vrot.lane.b32.xlu0 %v7388_v41, %s6110_s4  ;;  %11525 = vst [vmem:[#allocation52_spill] sm:$0xff] %v7447_v14  ;;  %v7466_v37 = vpack.i.bf16 %v7450_v3, %v7447_v14 }
 0x937   :  { %v7486_v25 = vpop.eup %5901 }
 0x938   :  { %1823 = vrot.lane.b32.xlu1 %v7394_v54, %s6111_s7  ;;  %11529 = vst [vmem:[#allocation54_spill] sm:$0xff] %v7486_v25 }
 0x93a   :  { %2487 = vrot.lane.b32.xlu0 %v1136_v1, %s6115_s23  ;;  %v1676_v1 = vmul.f32 1.442695, %v1648_v11  ;;  %v11528_v11 = vfloor.f32 %v7249_v51 }
 0x93c   :  { %1809 = vrot.lane.b32.xlu1 %v7419_v55, %s6111_s7  ;;  %vm2064_vm9 = vcmp.eq.f32.partialorder %v7162_v53, %v11528_v11  ;;  %5907 = vpow2.f32 %v1676_v1  ;;  %v1649_v1 = vsub.f32 %v7006_v42, %v7309_v7  ;;  %v1599_v11 = vpop.permute.xlu1 %1598  ;;  %v7493_v7 = vpop.eup %5903 }
 0x93d   :  { %v7474_v51 = vsel %vm2064_vm9, 1.0, %v11517_v5  ;;  %5909 = vpow2.f32 %v1788_v32  ;;  %11530 = vst [vmem:[#allocation55_spill] sm:$0xff] %v7493_v7  ;;  %v7497_v21 = vpop.eup %5905  ;;  %v1643_v3 = vsub.f32 %v7024_v52, %v1599_v11  ;;  %vm876_vm9 = vcmask 506880  }
 0x93e   :  { %5746 = vrot.lane.b32.xlu0 %v7417_v30, %s6113_s2  ;;  %5911 = vpow2.f32 %v1662_v44  ;;  %v7484_v17 = vpack.i.bf16 %v7474_v51, %v7471_v60  ;;  %v1678_v32 = vmul.f32 1.442695, %v1649_v1  ;;  %v1650_v44 = vsub.f32 %v7018_v9, %v1613_v22  ;;  %11531 = vst [vmem:[#allocation56_spill] sm:$0xff] %v7497_v21 }
 0x93f   :  { %5913 = vpow2.f32 %v1764_v18  ;;  %v1666_v1 = vmul.f32 1.442695, %v1643_v3 }
 0x940   :  { %1825 = vrot.lane.b32.xlu1 %v7444_v50, %s6111_s7  ;;  %v1615_v33 = vpop.permute.xlu1 %1614  ;;  %5915 = vpow2.f32 %v1678_v32  ;;  %v1680_v31 = vmul.f32 1.442695, %v1650_v44 }
 0x942   :  { %5756 = vrot.lane.b32.xlu0 %v7442_v62, %s6113_s2  ;;  %5917 = vpow2.f32 %v1680_v31 }
 0x943   :  { %5919 = vpow2.f32 %v1666_v1  ;;  %v1984_v1 = vadd.s32 80, %v6430_v0 }
 0x944   :  { %1811 = vrot.lane.b32.xlu1 %v7468_v46, %s6111_s7  ;;  %v1601_v11 = vpop.permute.xlu1 %1600 }
 0x946   :  { %5766 = vrot.lane.b32.xlu0 %v7466_v37, %s6113_s2 }
 0x948   :  { %1827 = vrot.lane.b32.xlu1 %v7486_v25, %s6111_s7  ;;  %v1651_v25 = vsub.f32 %v7030_v61, %v1615_v33  ;;  %v1127_v26 = vpop.permute.xlu1 %1126 }
 0x949   :  { %v7502_v18 = vpop.eup %5907 }
 0x94a   :  { %5776 = vrot.lane.b32.xlu0 %v7484_v17, %s6113_s2  ;;  %11532 = vst [vmem:[#allocation57_spill] sm:$0xff] %v7502_v18  ;;  %v7506_v22 = vpop.eup %5909  ;;  %v1682_v44 = vmul.f32 1.442695, %v1651_v25  ;;  %v1985_v25 = vadd.s32 88, %v6430_v0 }
 0x94b   :  { %11533 = vst [vmem:[#allocation58_spill] sm:$0xff] %v7506_v22  ;;  %v7511_v32 = vpop.eup %5911 }
 0x94c   :  { %1813 = vrot.lane.b32.xlu1 %v7493_v7, %s6111_s7  ;;  %11534 = vst [vmem:[#allocation59_spill] sm:$0xff] %v7511_v32  ;;  %5921 = vpow2.f32 %v1682_v44  ;;  %v1999_v44 = vcvt.s32.f32 %v1985_v25  ;;  %v1987_v25 = vadd.s32 104, %v6430_v0 }
 0x94e   :  { %1922 = vrot.lane.b32.xlu0 %v7497_v21, %s6110_s4  ;;  %v1644_v21 = vsub.f32 %v7036_v63, %v1601_v11  ;;  %v2001_v56 = vcvt.s32.f32 %v1987_v25 }
 0x950   :  { %1829 = vrot.lane.b32.xlu1 %v7502_v18, %s6111_s7  ;;  %v7516_v18 = vpop.eup %5913  ;;  %v1668_v31 = vmul.f32 1.442695, %v1644_v21 }
 0x951   :  { %11535 = vst [vmem:[#allocation60_spill] sm:$0xff] %v7516_v18  ;;  %v7520_v33 = vpop.eup %5915 }
 0x952   :  { %1924 = vrot.lane.b32.xlu0 %v7506_v22, %s6110_s4  ;;  %11536 = vst [vmem:[#allocation61_spill] sm:$0xff] %v7520_v33  ;;  %5923 = vpow2.f32 %v1668_v31  ;;  %v7524_v3 = vpop.eup %5917  ;;  %v1998_v22 = vcvt.s32.f32 %v1984_v1  ;;  %v2015_v31 = vadd.f32 0.5, %v1999_v44  ;;  %v1986_v1 = vadd.s32 96, %v6430_v0 }
 0x953   :  { %11537 = vst [vmem:[#allocation62_spill] sm:$0xff] %v7524_v3  ;;  %v7530_v11 = vpop.eup %5919 }
 0x954   :  { %1815 = vrot.lane.b32.xlu1 %v7511_v32, %s6111_s7  ;;  %11538 = vst [vmem:[#allocation63_spill] sm:$0xff] %v7530_v11  ;;  %v2000_v34 = vcvt.s32.f32 %v1986_v1  ;;  %v2017_v1 = vadd.f32 0.5, %v2001_v56 }
 0x956   :  { %v2016_v7 = vadd.f32 0.5, %v2000_v34 }
 0x958   :  { %1900 = vrot.lane.b32.xlu1 %v7516_v18, %s6110_s4 }
 0x959   :  { %v7534_v21 = vpop.eup %5921 }
 0x95a   :  { %11539 = vst [vmem:[#allocation64_spill] sm:$0xff] %v7534_v21 }
 0x95c   :  { %1831 = vrot.lane.b32.xlu1 %v7520_v33, %s6111_s7  ;;  %v2014_v33 = vadd.f32 0.5, %v1998_v22 }
 0x95e   :  { %v7542_v59 = vmul.f32 0.015384615, %v2014_v33 }
 0x95f   :  { %v7540_v14 = vpop.eup %5923 }
 0x960   :  { %1833 = vrot.lane.b32.xlu1 %v7524_v3, %s6111_s7  ;;  %11540 = vst [vmem:[#allocation65_spill] sm:$0xff] %v7540_v14  ;;  %v7544_v3 = vmul.f32 0.015384615, %v2015_v31  ;;  %v11351_v13 = vfloor.f32 %v7542_v59 }
 0x962   :  { %v3341_v33 = vmul.f32 65.0, %v11351_v13  ;;  %v7572_v13 = vmul.f32 0.015384615, %v2017_v1 }
 0x964   :  { %1819 = vrot.lane.b32.xlu1 %v7530_v11, %s6111_s7  ;;  %v7536_v41 = vpop.permute.xlu0 %1892  ;;  %v7563_v32 = vsub.f32 %v1998_v22, %v3341_v33 }
 0x966   :  { %11541 = vst [vmem:[#allocation66_spill] sm:$0xff] %v7563_v32 }
 0x968   :  { %1835 = vrot.lane.b32.xlu1 %v7534_v21, %s6111_s7  ;;  %v7550_v11 = vpop.permute.xlu0 %1908  ;;  %v11352_v21 = vfloor.f32 %v7544_v3 }
 0x96a   :  { %v3342_v31 = vmul.f32 65.0, %v11352_v21  ;;  %v1988_v21 = vadd.s32 112, %v6430_v0 }
 0x96c   :  { %1821 = vrot.lane.b32.xlu1 %v7540_v14, %s6111_s7  ;;  %v1135_v14 = vmul.f32 %v1127_v26, %v6853_v24  ;;  %v7565_v12 = vsub.f32 %v1999_v44, %v3342_v31  ;;  %v11354_v26 = vfloor.f32 %v7572_v13  ;;  %v2002_v22 = vcvt.s32.f32 %v1988_v21 }
 0x96d   :  { %v1523_v21 = vsub.f32 %v7012_v29, %v7127_v48  ;;  %v1518_v48 = vsub.f32 %v6956_v57, %v7059_v23 }
 0x96e   :  { %v7561_v18 = vpop.permute.xlu0 %1894  ;;  %11542 = vst [vmem:[#allocation67_spill] sm:$0xff] %v7565_v12 }
 0x970   :  { %5741 = vrot.lane.b32.xlu1 %v7191_v39, %s6112_s8  ;;  %v7570_v39 = vmul.f32 0.015384615, %v2016_v7  ;;  %v3344_v7 = vmul.f32 65.0, %v11354_v26 }
 0x972   :  { %v11353_v24 = vfloor.f32 %v7570_v39  ;;  %v7589_v31 = vsub.f32 %v2001_v56, %v3344_v7 }
 0x974   :  { %2485 = vrot.lane.b32.xlu1 %v1135_v14, %s6115_s23  ;;  %v7568_v25 = vpop.permute.xlu0 %1910  ;;  %v3343_v14 = vmul.f32 65.0, %v11353_v24  ;;  %11544 = vst [vmem:[#allocation69_spill] sm:$0xff] %v7589_v31  ;;  %v1545_v24 = vmul.f32 1.442695, %v1523_v21 }
 0x976   :  { %v7587_v33 = vsub.f32 %v2000_v34, %v3343_v14  ;;  %5925 = vpow2.f32 %v1545_v24 }
 0x978   :  { %5751 = vrot.lane.b32.xlu1 %v7417_v30, %s6112_s8  ;;  %v7579_v44 = vpop.permute.xlu0 %1896  ;;  %11543 = vst [vmem:[#allocation68_spill] sm:$0xff] %v7587_v33  ;;  %v2018_v30 = vadd.f32 0.5, %v2002_v22 }
 0x97c   :  { %5761 = vrot.lane.b32.xlu1 %v7442_v62, %s6112_s8  ;;  %v7595_v1 = vpop.permute.xlu0 %1912  ;;  %v7597_v62 = vmul.f32 0.015384615, %v2018_v30  ;;  %v1526_v30 = vsub.f32 %v6962_v10, %v7066_v2  ;;  %v1527_v10 = vsub.f32 %v6970_v27, %v7080_v47 }
 0x97e   :  { %v11357_v34 = vfloor.f32 %v7597_v62  ;;  %v1551_v33 = vmul.f32 1.442695, %v1526_v30 }
 0x980   :  { %5771 = vrot.lane.b32.xlu1 %v7466_v37, %s6112_s8  ;;  %v3345_v56 = vmul.f32 65.0, %v11357_v34 }
 0x982   :  { %v7606_v37 = vsub.f32 %v2002_v22, %v3345_v56  ;;  %v1519_v22 = vsub.f32 %v6968_v16, %v7073_v40  ;;  %v1553_v16 = vmul.f32 1.442695, %v1527_v10  ;;  %v1520_v40 = vsub.f32 %v6976_v6, %v7087_v49 }
 0x983   :  { %v5926_v21 = vpop.eup %5925 }
 0x984   :  { %5781 = vrot.lane.b32.xlu1 %v7484_v17, %s6112_s8  ;;  %v7601_v26 = vpop.permute.xlu0 %1898  ;;  %11545 = vst [vmem:[#allocation70_spill] sm:$0xff] %v7606_v37  ;;  %v1535_v17 = vmul.f32 1.442695, %v1518_v48  ;;  %v1537_v57 = vmul.f32 1.442695, %v1519_v22 }
 0x985   :  { %v1539_v27 = vmul.f32 1.442695, %v1520_v40 }
 0x986   :  { %5927 = vpow2.f32 %v1535_v17 }
 0x988   :  { %v7608_v14 = vpop.permute.xlu0 %1914 }
 0x990   :  { %v7610_v29 = vpop.permute.xlu0 %1916 }
 0x993   :  { %v5928_v30 = vpop.eup %5927 }
 0x994   :  { %v1818_v7 = vpop.permute.xlu0 %1817 }
 0x995   :  { %v1863_v31 = vadd.f32 %v5926_v21, %v1818_v7 }
 0x998   :  { %v1903_v24 = vpop.permute.xlu0 %1902 }
 0x999   :  { %v1948_v56 = vadd.f32 %v1903_v24, %v1863_v31 }
 0x99a   :  { %v2490_v34 = vpop.permute.xlu1 %2489 }
 0x99b   :  { %5929 = vrcp.f32 %v1948_v56  ;;  %5530 = vmatpush3.msra.mxu0 %v2490_v34 }
 0x99c   :  { %v7618_v12 = vpop.permute.xlu0 %1918  ;;  %5531 = vmatprep.subr.mxu0 %v11517_v5  ;;  %5931 = vpow2.f32 %v1551_v33  ;;  %v1528_v33 = vsub.f32 %v6982_v35, %v7094_v8 }
 0x99d   :  { %5933 = vpow2.f32 %v1537_v57  ;;  %v11546_v57 = vld [vmem:[#allocation14_spill] sm:$0xff] }
 0x99e   :  { %v1617_v23 = vpop.permute.xlu1 %1616  ;;  %v1555_v6 = vmul.f32 1.442695, %v1528_v33  ;;  %v1521_v10 = vsub.f32 %v6988_v43, %v11546_v57  ;;  %v1989_v43 = vadd.s32 120, %v6430_v0 }
 0x99f   :  { %v1652_v2 = vsub.f32 %v7042_v4, %v1617_v23 }
 0x9a0   :  { %v7624_v48 = vpop.permute.xlu0 %1904 }
 0x9a1   :  { %v1684_v31 = vmul.f32 1.442695, %v1652_v2 }
 0x9a2   :  { %v1619_v34 = vpop.permute.xlu1 %1618 }
 0x9a3   :  { %5935 = vpow2.f32 %v1684_v31  ;;  %v1653_v7 = vsub.f32 %v7052_v38, %v1619_v34  ;;  %v1541_v31 = vmul.f32 1.442695, %v1521_v10  ;;  %v11547_v34 = vld [vmem:[#allocation15_spill] sm:$0xff] }
 0x9a4   :  { %v7631_v17 = vpop.permute.xlu0 %1920  ;;  %5937 = vpow2.f32 %v1553_v16 }
 0x9a5   :  { %v1686_v47 = vmul.f32 1.442695, %v1653_v7  ;;  %v1529_v7 = vsub.f32 %v6994_v45, %v11547_v34 }
 0x9a6   :  { %v1808_v24 = vpop.permute.xlu1 %1807 }
 0x9a7   :  { %5939 = vpow2.f32 %v1686_v47  ;;  %v1858_v22 = vadd.f32 %v5928_v30, %v1808_v24  ;;  %v2003_v47 = vcvt.s32.f32 %v1989_v43 }
 0x9a8   :  { %v7633_v56 = vpop.eup %5929  ;;  %v7635_v49 = vpop.permute.xlu0 %1906  ;;  %5941 = vpow2.f32 %v1539_v27 }
 0x9a9   :  { %v1943_v35 = vadd.f32 %v7536_v41, %v1858_v22  ;;  %v7641_v8 = vmul.f32 %v7633_v56, %v5926_v21  ;;  %v7643_v23 = vpop.eup %5931  ;;  %v1557_v22 = vmul.f32 1.442695, %v1529_v7 }
 0x9aa   :  { %v1824_v2 = vpop.permute.xlu1 %1823  ;;  %v7650_v41 = vpop.eup %5933 }
 0x9ab   :  { %5943 = vrcp.f32 %v1943_v35  ;;  %v1866_v16 = vadd.f32 %v7643_v23, %v1824_v2  ;;  %v2019_v35 = vadd.f32 0.5, %v2003_v47  ;;  %v1990_v2 = vadd.s32 128, %v6430_v0 }
 0x9ac   :  { %5945 = vpow2.f32 %v1555_v6  ;;  %v2488_v40 = vpop.permute.xlu0 %2487  ;;  %v11548_v6 = vld [vmem:[#allocation16_spill] sm:$0xff] }
 0x9ad   :  { %v1951_v33 = vadd.f32 %v7550_v11, %v1866_v16  ;;  %5532 = vmatpush3.msra.mxu0 %v2488_v40  ;;  %v1522_v57 = vsub.f32 %v7000_v28, %v11548_v6 }
 0x9ae   :  { %v1810_v21 = vpop.permute.xlu1 %1809  ;;  %5533 = vmatprep.subr.mxu0 %v11517_v5 }
 0x9af   :  { %5947 = vrcp.f32 %v1951_v33  ;;  %v1859_v27 = vadd.f32 %v7650_v41, %v1810_v21  ;;  %v1543_v28 = vmul.f32 1.442695, %v1522_v57 }
 0x9b0   :  { %v7654_v24 = vpop.eup %5935  ;;  %5949 = vpow2.f32 %v1541_v31  ;;  %v7667_v31 = vmul.f32 0.015384615, %v2019_v35 }
 0x9b1   :  { %v1944_v45 = vadd.f32 %v7561_v18, %v1859_v27  ;;  %1837 = vrot.lane.b32.xlu1 %v7654_v24, %s6111_s7  ;;  %v7659_v11 = vpop.eup %5937  ;;  %v2004_v18 = vcvt.s32.f32 %v1990_v2 }
 0x9b2   :  { %v1826_v10 = vpop.permute.xlu1 %1825 }
 0x9b3   :  { %5951 = vrcp.f32 %v1944_v45  ;;  %v1867_v16 = vadd.f32 %v7659_v11, %v1826_v10  ;;  %v2020_v43 = vadd.f32 0.5, %v2004_v18  ;;  %v11549_v45 = vld [vmem:[#allocation17_spill] sm:$0xff]  ;;  %v11360_v10 = vfloor.f32 %v7667_v31 }
 0x9b4   :  { %v7665_v40 = vpop.eup %5939  ;;  %5953 = vpow2.f32 %v1557_v22  ;;  %v1530_v6 = vsub.f32 %v7006_v42, %v11549_v45 }
 0x9b5   :  { %v1952_v34 = vadd.f32 %v7568_v25, %v1867_v16  ;;  %1839 = vrot.lane.b32.xlu1 %v7665_v40, %s6111_s7  ;;  %v7672_v7 = vpop.eup %5941  ;;  %v3346_v2 = vmul.f32 65.0, %v11360_v10  ;;  %v7687_v16 = vmul.f32 0.015384615, %v2020_v43 }
 0x9b6   :  { %v1812_v33 = vpop.permute.xlu1 %1811 }
 0x9b7   :  { %5955 = vrcp.f32 %v1952_v34  ;;  %v1860_v21 = vadd.f32 %v7672_v7, %v1812_v33  ;;  %v1559_v33 = vmul.f32 1.442695, %v1530_v6  ;;  %v7690_v45 = vsub.f32 %v2003_v47, %v3346_v2 }
 0x9b8   :  { %v5944_v27 = vpop.eup %5943  ;;  %5957 = vpow2.f32 %v1543_v28  ;;  %v11359_v43 = vfloor.f32 %v7687_v16 }
 0x9b9   :  { %v7678_v22 = vpop.eup %5945  ;;  %v1945_v25 = vadd.f32 %v7579_v44, %v1860_v21  ;;  %2310 = vrot.lane.b32.xlu0 %v5944_v27, %s6112_s8  ;;  %2157 = vrot.lane.b32.xlu1 %v5944_v27, %s6113_s2  ;;  %v7683_v57 = vmul.f32 %v5944_v27, %v5928_v30  ;;  %11550 = vst [vmem:[#allocation14_spill] sm:$0xff] %v7690_v45  ;;  %v11551_v44 = vld [vmem:[#allocation18_spill] sm:$0xff] }
 0x9ba   :  { %v1828_v35 = vpop.permute.xlu1 %1827  ;;  %v1531_v21 = vsub.f32 %v7018_v9, %v11551_v44  ;;  %v3347_v9 = vmul.f32 65.0, %v11359_v43 }
 0x9bb   :  { %5959 = vrcp.f32 %v1945_v25  ;;  %v1868_v42 = vadd.f32 %v7678_v22, %v1828_v35 }
 0x9bc   :  { %v5948_v34 = vpop.eup %5947  ;;  %v1561_v35 = vmul.f32 1.442695, %v1531_v21  ;;  %v11554_v21 = vld [vmem:[#allocation21_spill] sm:$0xff] }
 0x9bd   :  { %v1953_v30 = vadd.f32 %v7595_v1, %v1868_v42  ;;  %2326 = vrot.lane.b32.xlu1 %v5948_v34, %s6112_s8  ;;  %2173 = vrot.lane.b32.xlu0 %v5948_v34, %s6113_s2  ;;  %v5950_v28 = vpop.eup %5949  ;;  %v7699_v25 = vmul.f32 %v5948_v34, %v7643_v23  ;;  %v11552_v1 = vld [vmem:[#allocation19_spill] sm:$0xff]  ;;  %v1532_v43 = vsub.f32 %v7030_v61, %v11554_v21 }
 0x9be   :  { %v1814_v27 = vpop.permute.xlu1 %1813  ;;  %v1524_v2 = vsub.f32 %v7024_v52, %v11552_v1  ;;  %v11555_v1 = vld [vmem:[#allocation23_spill] sm:$0xff] }
 0x9bf   :  { %5961 = vrcp.f32 %v1953_v30  ;;  %v1861_v6 = vadd.f32 %v5950_v28, %v1814_v27  ;;  %v7711_v30 = vsub.f32 %v2004_v18, %v3347_v9  ;;  %v1563_v9 = vmul.f32 1.442695, %v1532_v43 }
 0x9c0   :  { %v5952_v47 = vpop.eup %5951  ;;  %5963 = vpow2.f32 %v1559_v33  ;;  %v1547_v52 = vmul.f32 1.442695, %v1524_v2  ;;  %v1525_v61 = vsub.f32 %v7036_v63, %v11555_v1 }
 0x9c1   :  { %v1946_v42 = vadd.f32 %v7601_v26, %v1861_v6  ;;  %2312 = vrot.lane.b32.xlu0 %v5952_v47, %s6112_s8  ;;  %2159 = vrot.lane.b32.xlu1 %v5952_v47, %s6113_s2  ;;  %v7709_v23 = vmul.f32 %v5952_v47, %v7650_v41  ;;  %v5954_v34 = vpop.eup %5953  ;;  %11553 = vst [vmem:[#allocation15_spill] sm:$0xff] %v7711_v30 }
 0x9c2   :  { %v1830_v44 = vpop.permute.xlu1 %1829 }
 0x9c3   :  { %5965 = vrcp.f32 %v1946_v42  ;;  %v1869_v33 = vadd.f32 %v5954_v34, %v1830_v44 }
 0x9c4   :  { %v5956_v27 = vpop.eup %5955  ;;  %5967 = vpow2.f32 %v1561_v35 }
 0x9c5   :  { %v1954_v26 = vadd.f32 %v7608_v14, %v1869_v33  ;;  %2328 = vrot.lane.b32.xlu1 %v5956_v27, %s6112_s8  ;;  %2175 = vrot.lane.b32.xlu0 %v5956_v27, %s6113_s2  ;;  %v7719_v41 = vmul.f32 %v5956_v27, %v7659_v11  ;;  %v5958_v18 = vpop.eup %5957  ;;  %v1549_v33 = vmul.f32 1.442695, %v1525_v61 }
 0x9c6   :  { %v1816_v6 = vpop.permute.xlu1 %1815 }
 0x9c7   :  { %5969 = vrcp.f32 %v1954_v26  ;;  %v1862_v35 = vadd.f32 %v5958_v18, %v1816_v6 }
 0x9c8   :  { %v5960_v47 = vpop.eup %5959  ;;  %5971 = vpow2.f32 %v1547_v52 }
 0x9c9   :  { %2314 = vrot.lane.b32.xlu1 %v5960_v47, %s6112_s8  ;;  %2161 = vrot.lane.b32.xlu0 %v5960_v47, %s6113_s2  ;;  %v7726_v14 = vmul.f32 %v5960_v47, %v7672_v7  ;;  %5973 = vpow2.f32 %v1563_v9 }
 0x9ca   :  { %v1901_v2 = vpop.permute.xlu1 %1900 }
 0x9cb   :  { %v1947_v11 = vadd.f32 %v1901_v2, %v1862_v35 }
 0x9cc   :  { %v5962_v42 = vpop.eup %5961 }
 0x9cd   :  { %v5964_v44 = vpop.eup %5963  ;;  %5975 = vrcp.f32 %v1947_v11  ;;  %2330 = vrot.lane.b32.xlu1 %v5962_v42, %s6112_s8  ;;  %2177 = vrot.lane.b32.xlu0 %v5962_v42, %s6113_s2  ;;  %v7731_v63 = vmul.f32 %v5962_v42, %v7678_v22 }
 0x9ce   :  { %v1832_v43 = vpop.permute.xlu1 %1831  ;;  %5977 = vpow2.f32 %v1549_v33 }
 0x9cf   :  { %v1870_v27 = vadd.f32 %v5964_v44, %v1832_v43 }
 0x9d0   :  { %v5966_v21 = vpop.eup %5965 }
 0x9d1   :  { %v1955_v7 = vadd.f32 %v7610_v29, %v1870_v27  ;;  %2316 = vrot.lane.b32.xlu1 %v5966_v21, %s6112_s8  ;;  %2163 = vrot.lane.b32.xlu0 %v5966_v21, %s6113_s2  ;;  %v7736_v52 = vmul.f32 %v5966_v21, %v5950_v28  ;;  %v5968_v26 = vpop.eup %5967 }
 0x9d2   :  { %v1834_v6 = vpop.permute.xlu1 %1833 }
 0x9d3   :  { %5979 = vrcp.f32 %v1955_v7  ;;  %v1871_v47 = vadd.f32 %v5968_v26, %v1834_v6 }
 0x9d4   :  { %v5970_v9 = vpop.eup %5969 }
 0x9d5   :  { %v1956_v22 = vadd.f32 %v7618_v12, %v1871_v47  ;;  %v7739_v1 = vmul.f32 %v5970_v9, %v5954_v34  ;;  %v5972_v61 = vpop.eup %5971 }
 0x9d6   :  { %v1820_v35 = vpop.permute.xlu1 %1819  ;;  %v5974_v29 = vpop.eup %5973 }
 0x9d7   :  { %5981 = vrcp.f32 %v1956_v22  ;;  %v1864_v2 = vadd.f32 %v5972_v61, %v1820_v35 }
 0x9d9   :  { %v1949_v11 = vadd.f32 %v7624_v48, %v1864_v2 }
 0x9da   :  { %v5976_v42 = vpop.eup %5975  ;;  %v1836_v33 = vpop.permute.xlu1 %1835 }
 0x9db   :  { %5983 = vrcp.f32 %v1949_v11  ;;  %v1872_v28 = vadd.f32 %v5974_v29, %v1836_v33  ;;  %2318 = vrot.lane.b32.xlu1 %v5976_v42, %s6112_s8  ;;  %2165 = vrot.lane.b32.xlu0 %v5976_v42, %s6113_s2  ;;  %v7744_v43 = vmul.f32 %v5976_v42, %v5958_v18  ;;  %v5978_v34 = vpop.eup %5977  ;;  %v11558_v11 = vfloor.f32 %v7544_v3 }
 0x9dd   :  { %v1957_v12 = vadd.f32 %v7631_v17, %v1872_v28  ;;  %vm2066_vm12 = vcmp.eq.f32.partialorder %v7162_v53, %v11558_v11 }
 0x9de   :  { %v1822_v27 = vpop.permute.xlu1 %1821 }
 0x9df   :  { %5985 = vrcp.f32 %v1957_v12  ;;  %v1865_v21 = vadd.f32 %v5978_v34, %v1822_v27  ;;  %2320 = vrot.lane.b32.xlu1 %v7633_v56, %s6112_s8  ;;  %2167 = vrot.lane.b32.xlu0 %v7633_v56, %s6113_s2  ;;  %v11556_v56 = vfloor.f32 %v7597_v62  ;;  %v11560_v12 = vfloor.f32 %v7572_v13  ;;  %v7811_v13 = vpop.permute.xlu0 %5746 }
 0x9e0   :  { %v5980_v48 = vpop.eup %5979 }
 0x9e1   :  { %v1950_v7 = vadd.f32 %v7635_v49, %v1865_v21  ;;  %v7752_v6 = vmul.f32 %v5980_v48, %v5964_v44  ;;  %vm2069_vm10 = vcmp.eq.f32.partialorder %v7162_v53, %v11556_v56  ;;  %vm2068_vm14 = vcmp.eq.f32.partialorder %v7162_v53, %v11560_v12 }
 0x9e2   :  { %v7754_v47 = vpop.permute.xlu1 %5741  ;;  %v5088_v2 = vsel %vm2069_vm10, 1.0, %v11517_v5  ;;  %v1533_v21 = vsub.f32 %v7042_v4, %v7199_v20  ;;  %vm888_vm10 = vcmask 1040384  }
 0x9e3   :  { %5987 = vrcp.f32 %v1950_v7 }
 0x9e4   :  { %v5982_v18 = vpop.eup %5981 }
 0x9e5   :  { %v7756_v17 = vmul.f32 %v5982_v18, %v5968_v26  ;;  %v11557_v26 = vfloor.f32 %v7542_v59 }
 0x9e6   :  { %v2486_v22 = vpop.permute.xlu1 %2485 }
 0x9e7   :  { %5534 = vmatpush3.msra.mxu0 %v2486_v22  ;;  %vm2065_vm11 = vcmp.eq.f32.partialorder %v7162_v53, %v11557_v26  ;;  %v1534_v22 = vsub.f32 %v7052_v38, %v7209_v58 }
 0x9e8   :  { %v5984_v35 = vpop.eup %5983  ;;  %5626 = vmatprep.subr.bf16.mxu0 %v11517_v5  ;;  %v7776_v62 = vsel %vm2065_vm11, 1.0, %v11517_v5 }
 0x9e9   :  { %2322 = vrot.lane.b32.xlu1 %v5984_v35, %s6112_s8  ;;  %2169 = vrot.lane.b32.xlu0 %v5984_v35, %s6113_s2  ;;  %v7764_v49 = vmul.f32 %v5984_v35, %v5972_v61  ;;  %v7779_v61 = vsel %vm2066_vm12, 1.0, %v11517_v5  ;;  %v1567_v56 = vmul.f32 1.442695, %v1534_v22  ;;  %v5743_v22 = vunpack.i.l.bf16 %v7754_v47 }
 0x9ea   :  { %v5790_v59 = vpack.i.bf16 %v7779_v61, %v7776_v62 }
 0x9ec   :  { %v5986_v44 = vpop.eup %5985 }
 0x9ed   :  { %v2120_v42 = vmul.f32 %v5986_v44, %v5974_v29  ;;  %v11559_v29 = vfloor.f32 %v7570_v39  ;;  %v7815_v39 = vpop.permute.xlu1 %5751 }
 0x9ef   :  { %v7773_v33 = vmul.f32 %v5088_v2, %v2120_v42  ;;  %vm2067_vm13 = vcmp.eq.f32.partialorder %v7162_v53, %v11559_v29 }
 0x9f0   :  { %v5988_v28 = vpop.eup %5987  ;;  %v7798_v27 = vsel %vm2067_vm13, 1.0, %v11517_v5 }
 0x9f1   :  { %2324 = vrot.lane.b32.xlu1 %v5988_v28, %s6112_s8  ;;  %2171 = vrot.lane.b32.xlu0 %v5988_v28, %s6113_s2  ;;  %v7785_v3 = vmul.f32 %v5988_v28, %v5978_v34  ;;  %v7801_v34 = vsel %vm2068_vm14, 1.0, %v11517_v5  ;;  %v7823_v7 = vpop.permute.xlu1 %5761 }
 0x9f5   :  { %5791 = vrot.lane.b32.xlu1 %v5790_v59, %s6112_s8  ;;  %5786 = vrot.lane.b32.xlu0 %v5790_v59, %s6113_s2 }
 0x9f9   :  { %2332 = vrot.lane.b32.xlu1 %v5970_v9, %s6112_s8  ;;  %2179 = vrot.lane.b32.xlu0 %v5970_v9, %s6113_s2  ;;  %v5800_v9 = vpack.i.bf16 %v7801_v34, %v7798_v27 }
 0x9fd   :  { %2334 = vrot.lane.b32.xlu1 %v5980_v48, %s6112_s8  ;;  %2181 = vrot.lane.b32.xlu0 %v5980_v48, %s6113_s2  ;;  %v7821_v48 = vpop.permute.xlu0 %5756 }
 0xa01   :  { %5801 = vrot.lane.b32.xlu1 %v5800_v9, %s6112_s8  ;;  %5796 = vrot.lane.b32.xlu0 %v5800_v9, %s6113_s2  ;;  %v7827_v35 = vpop.permute.xlu0 %5766  ;;  %v5738_v9 = vunpack.i.l.bf16 %v7363_v36 }
 0xa05   :  { %2336 = vrot.lane.b32.xlu1 %v5982_v18, %s6112_s8  ;;  %2183 = vrot.lane.b32.xlu0 %v5982_v18, %s6113_s2  ;;  %v1565_v18 = vmul.f32 1.442695, %v1533_v21  ;;  %v7831_v26 = vpop.permute.xlu0 %5776 }
 0xa07   :  { %5989 = vpow2.f32 %v1565_v18 }
 0xa08   :  { %5991 = vpow2.f32 %v1567_v56  ;;  %v11561_v56 = vld [vmem:[#allocation33_spill] sm:$0xff] }
 0xa09   :  { %2338 = vrot.lane.b32.xlu1 %v5986_v44, %s6112_s8  ;;  %2185 = vrot.lane.b32.xlu0 %v5986_v44, %s6113_s2  ;;  %v7829_v44 = vpop.permute.xlu1 %5771  ;;  %v1923_v4 = vpop.permute.xlu0 %1922 }
 0xa0d   :  { %2406 = vrot.lane.b32.xlu1 %v5088_v2, %s6112_s8  ;;  %2270 = vrot.lane.b32.xlu0 %v5088_v2, %s6113_s2  ;;  %v7833_v2 = vpop.permute.xlu1 %5781  ;;  %v1925_v29 = vpop.permute.xlu0 %1924 }
 0xa0e   :  { %v5783_v32 = vunpack.i.l.bf16 %v7833_v2 }
 0xa14   :  { %v5990_v20 = vpop.eup %5989 }
 0xa15   :  { %v7835_v59 = vpop.eup %5991 }
 0xa23   :  { %v1838_v11 = vpop.permute.xlu1 %1837 }
 0xa24   :  { %v1873_v42 = vadd.f32 %v5990_v20, %v1838_v11 }
 0xa26   :  { %v1958_v28 = vadd.f32 %v1923_v4, %v1873_v42  ;;  %v11562_v42 = vld [vmem:[#allocation24_spill] sm:$0xff] }
 0xa27   :  { %v1840_v38 = vpop.permute.xlu1 %1839  ;;  %v2123_v0 = vmul.f32 %v11562_v42, %v7683_v57  ;;  %v11564_v57 = vfloor.f32 %v7667_v31 }
 0xa28   :  { %5993 = vrcp.f32 %v1958_v28  ;;  %v1874_v58 = vadd.f32 %v7835_v59, %v1840_v38 }
 0xa29   :  { %vm2070_vm4 = vcmp.eq.f32.partialorder %v7162_v53, %v11564_v57 }
 0xa2a   :  { %v1959_v12 = vadd.f32 %v1925_v29, %v1874_v58  ;;  %v5778_v29 = vunpack.i.l.bf16 %v7831_v26 }
 0xa2b   :  { %v2311_v21 = vpop.permute.xlu0 %2310  ;;  %v2158_v18 = vpop.permute.xlu1 %2157 }
 0xa2c   :  { %5995 = vrcp.f32 %v1959_v12  ;;  %v2361_v10 = vmul.f32 %v11561_v56, %v2311_v21  ;;  %v2208_v11 = vmul.f32 %v7378_v15, %v2158_v18  ;;  %v11563_v56 = vld [vmem:[#allocation34_spill] sm:$0xff] }
 0xa2e   :  { %v2429_v4 = vmul.f32 %v5743_v22, %v2361_v10  ;;  %v2293_v28 = vmul.f32 %v5738_v9, %v2208_v11  ;;  %v2131_v9 = vmul.f32 %v7471_v60, %v7699_v25  ;;  %v5739_v11 = vunpack.i.h.bf16 %v7363_v36  ;;  %v11566_v60 = vld [vmem:[#allocation25_spill] sm:$0xff] }
 0xa2f   :  { %v2174_v38 = vpop.permute.xlu0 %2173  ;;  %v2327_v58 = vpop.permute.xlu1 %2326  ;;  %v2124_v25 = vmul.f32 %v11566_v60, %v7709_v23  ;;  %v11567_v36 = vfloor.f32 %v7687_v16  ;;  %v5784_v23 = vunpack.i.h.bf16 %v7833_v2 }
 0xa30   :  { %v2447_v12 = vsel %vm2446_vm15, %v2123_v0, %v2293_v28  ;;  %v2216_v21 = vmul.f32 %v7394_v54, %v2174_v38  ;;  %v2369_v15 = vmul.f32 %v11563_v56, %v2327_v58  ;;  %v5744_v54 = vunpack.i.h.bf16 %v7754_v47 }
 0xa31   :  { %v2465_v10 = vsel %vm2464_vm3, %v2447_v12, %v2429_v4  ;;  %v11565_v4 = vld [vmem:[#allocation35_spill] sm:$0xff]  ;;  %v5089_v38 = vsel %vm2070_vm4, 1.0, %v11517_v5  ;;  %vm7869_vm5 = vcmp.eq.f32.partialorder %v7162_v53, %v11567_v36  ;;  %v5779_v56 = vunpack.i.h.bf16 %v7831_v26 }
 0xa32   :  { %v2301_v18 = vmul.f32 %v5778_v29, %v2216_v21  ;;  %v2437_v22 = vmul.f32 %v5783_v32, %v2369_v15  ;;  %5536 = vmatmul.mubr.msk.f32.vlgmr.msra.gmra.mxu0 %vm2494_vm6, %v2465_v10  ;;  %v11570_v10 = vld [vmem:[#allocation36_spill] sm:$0xff]  ;;  %v2132_v26 = vmul.f32 %v7474_v51, %v7719_v41 }
 0xa33   :  { %v2313_v0 = vpop.permute.xlu0 %2312  ;;  %v2160_v42 = vpop.permute.xlu1 %2159  ;;  %5538 = vmatprep.mubr.msk.f32.mxu0 %vm11380_vm2, %v11517_v5 }
 0xa34   :  { %v2362_v32 = vmul.f32 %v11565_v4, %v2313_v0  ;;  %v2209_v28 = vmul.f32 %v7419_v55, %v2160_v42  ;;  %v2455_v31 = vsel %vm2446_vm15, %v2131_v9, %v2301_v18  ;;  %v5748_v42 = vunpack.i.l.bf16 %v7811_v13 }
 0xa35   :  { %v5994_v29 = vpop.eup %5993  ;;  %v7874_v47 = vsel %vm2464_vm3, %v2455_v31, %v2437_v22  ;;  %v11571_v31 = vld [vmem:[#allocation37_spill] sm:$0xff] }
 0xa36   :  { %v2430_v12 = vmul.f32 %v5744_v54, %v2362_v32  ;;  %v2294_v55 = vmul.f32 %v5739_v11, %v2209_v28  ;;  %2340 = vrot.lane.b32.xlu1 %v5994_v29, %s6112_s8  ;;  %2187 = vrot.lane.b32.xlu0 %v5994_v29, %s6113_s2  ;;  %v2121_v21 = vmul.f32 %v5994_v29, %v5990_v20  ;;  %v5090_v20 = vsel %vm7869_vm5, 1.0, %v11517_v5 }
 0xa37   :  { %v2176_v16 = vpop.permute.xlu0 %2175  ;;  %v2329_v15 = vpop.permute.xlu1 %2328  ;;  %v5753_v54 = vunpack.i.l.bf16 %v7815_v39 }
 0xa38   :  { %v2217_v53 = vmul.f32 %v7444_v50, %v2176_v16  ;;  %v2370_v18 = vmul.f32 %v11570_v10, %v2329_v15  ;;  %v7882_v57 = vmul.f32 %v5089_v38, %v2121_v21  ;;  %v2448_v22 = vsel %vm2446_vm15, %v2124_v25, %v2294_v55  ;;  %v11573_v16 = vld [vmem:[#allocation39_spill] sm:$0xff] }
 0xa39   :  { %v5996_v9 = vpop.eup %5995  ;;  %v2466_v11 = vsel %vm2464_vm3, %v2448_v22, %v2430_v12 }
 0xa3a   :  { %v2302_v2 = vmul.f32 %v5779_v56, %v2217_v53  ;;  %v2438_v0 = vmul.f32 %v5784_v23, %v2370_v18  ;;  %2408 = vrot.lane.b32.xlu1 %v5089_v38, %s6112_s8  ;;  %2272 = vrot.lane.b32.xlu0 %v5089_v38, %s6113_s2  ;;  %v2122_v50 = vmul.f32 %v5996_v9, %v7835_v59  ;;  %v5749_v56 = vunpack.i.h.bf16 %v7811_v13  ;;  %v11574_v18 = vld [vmem:[#allocation49_spill] sm:$0xff] }
 0xa3b   :  { %5539 = vmatmul.mubr.msk.f32.gmra.mxu0 %vm2494_vm6, %v2466_v11  ;;  %v2162_v4 = vpop.permute.xlu0 %2161  ;;  %v2315_v32 = vpop.permute.xlu1 %2314  ;;  %v2126_v22 = vmul.f32 %v11574_v18, %v7736_v52 }
 0xa3c   :  { %v2210_v28 = vmul.f32 %v7468_v46, %v2162_v4  ;;  %v2363_v51 = vmul.f32 %v11571_v31, %v2315_v32  ;;  %5541 = vmatprep.mubr.msk.f32.mxu0 %vm11380_vm2, %v11517_v5  ;;  %v7901_v41 = vmul.f32 %v5090_v20, %v2122_v50  ;;  %v2456_v29 = vsel %vm2446_vm15, %v2132_v26, %v2302_v2  ;;  %v11575_v2 = vld [vmem:[#allocation59_spill] sm:$0xff]  ;;  %v11576_v50 = vld [vmem:[#allocation60_spill] sm:$0xff]  ;;  %v11577_v4 = vld [vmem:[#allocation50_spill] sm:$0xff] }
 0xa3d   :  { %v7905_v59 = vsel %vm2464_vm3, %v2456_v29, %v2438_v0  ;;  %v2125_v46 = vmul.f32 %v7397_v19, %v7726_v14  ;;  %v5754_v19 = vunpack.i.h.bf16 %v7815_v39  ;;  %v11572_v14 = vld [vmem:[#allocation55_spill] sm:$0xff]  ;;  %v5763_v26 = vunpack.i.l.bf16 %v7823_v7 }
 0xa3e   :  { %v2295_v38 = vmul.f32 %v5748_v42, %v2210_v28  ;;  %v2431_v60 = vmul.f32 %v5753_v54, %v2363_v51  ;;  %2342 = vrot.lane.b32.xlu1 %v5996_v9, %s6112_s8  ;;  %2189 = vrot.lane.b32.xlu0 %v5996_v9, %s6113_s2  ;;  %v2127_v32 = vmul.f32 %v11577_v4, %v7744_v43  ;;  %v5759_v28 = vunpack.i.h.bf16 %v7821_v48  ;;  %v11580_v43 = vld [vmem:[#allocation51_spill] sm:$0xff] }
 0xa3f   :  { %v7911_v25 = vpop.permute.xlu0 %2177  ;;  %v7913_v36 = vpop.permute.xlu1 %2330  ;;  %v5764_v29 = vunpack.i.h.bf16 %v7823_v7 }
 0xa40   :  { %v2449_v58 = vsel %vm2446_vm15, %v2125_v46, %v2295_v38  ;;  %v11578_v38 = vld [vmem:[#allocation42_spill] sm:$0xff]  ;;  %v11579_v46 = vld [vmem:[#allocation43_spill] sm:$0xff] }
 0xa41   :  { %v2467_v12 = vsel %vm2464_vm3, %v2449_v58, %v2431_v60 }
 0xa42   :  { %2410 = vrot.lane.b32.xlu1 %v5090_v20, %s6112_s8  ;;  %2274 = vrot.lane.b32.xlu0 %v5090_v20, %s6113_s2  ;;  %v5758_v20 = vunpack.i.l.bf16 %v7821_v48 }
 0xa43   :  { %5542 = vmatmul.mubr.msk.f32.gmra.mxu0 %vm2494_vm6, %v2467_v12  ;;  %v2164_v55 = vpop.permute.xlu0 %2163  ;;  %v2317_v21 = vpop.permute.xlu1 %2316 }
 0xa44   :  { %v2211_v23 = vmul.f32 %v11572_v14, %v2164_v55  ;;  %v2364_v15 = vmul.f32 %v11573_v16, %v2317_v21  ;;  %5544 = vmatprep.mubr.msk.f32.mxu0 %vm11380_vm2, %v11517_v5  ;;  %v5768_v16 = vunpack.i.l.bf16 %v7827_v35 }
 0xa46   :  { %v2296_v53 = vmul.f32 %v5749_v56, %v2211_v23  ;;  %v2432_v10 = vmul.f32 %v5754_v19, %v2364_v15  ;;  %v2128_v19 = vmul.f32 %v11580_v43, %v7641_v8  ;;  %v5773_v15 = vunpack.i.l.bf16 %v7829_v44  ;;  %v11588_v43 = vld [vmem:[#allocation57_spill] sm:$0xff] }
 0xa48   :  { %v2450_v9 = vsel %vm2446_vm15, %v2126_v22, %v2296_v53  ;;  %v11581_v53 = vld [vmem:[#allocation63_spill] sm:$0xff] }
 0xa49   :  { %v2468_v11 = vsel %vm2464_vm3, %v2450_v9, %v2432_v10  ;;  %v11582_v10 = vld [vmem:[#allocation46_spill] sm:$0xff] }
 0xa4a   :  { %5545 = vmatmul.mubr.msk.f32.gmra.mxu0 %vm2494_vm6, %v2468_v11  ;;  %v11583_v11 = vld [vmem:[#allocation52_spill] sm:$0xff] }
 0xa4b   :  { %5547 = vmatprep.mubr.msk.f32.mxu0 %vm11380_vm2, %v11517_v5 }
 0xa4d   :  { %v2166_v13 = vpop.permute.xlu0 %2165  ;;  %v2319_v39 = vpop.permute.xlu1 %2318 }
 0xa4e   :  { %v2212_v0 = vmul.f32 %v11575_v2, %v2166_v13  ;;  %v2365_v42 = vmul.f32 %v11576_v50, %v2319_v39  ;;  %v2129_v13 = vmul.f32 %v11583_v11, %v7764_v49  ;;  %v5774_v50 = vunpack.i.h.bf16 %v7829_v44 }
 0xa50   :  { %v2297_v52 = vmul.f32 %v5758_v20, %v2212_v0  ;;  %v2433_v54 = vmul.f32 %v5763_v26, %v2365_v42  ;;  %v5769_v0 = vunpack.i.h.bf16 %v7827_v35  ;;  %v11584_v42 = vld [vmem:[#allocation65_spill] sm:$0xff] }
 0xa51   :  { %v2168_v31 = vpop.permute.xlu0 %2167  ;;  %v2321_v51 = vpop.permute.xlu1 %2320 }
 0xa52   :  { %v2213_v60 = vmul.f32 %v11578_v38, %v2168_v31  ;;  %v2366_v58 = vmul.f32 %v11579_v46, %v2321_v51  ;;  %v2451_v12 = vsel %vm2446_vm15, %v2127_v32, %v2297_v52  ;;  %v11586_v51 = vld [vmem:[#allocation53_spill] sm:$0xff] }
 0xa53   :  { %v2469_v55 = vsel %vm2464_vm3, %v2451_v12, %v2433_v54  ;;  %v11585_v54 = vld [vmem:[#allocation48_spill] sm:$0xff] }
 0xa54   :  { %v2298_v21 = vmul.f32 %v5759_v28, %v2213_v60  ;;  %v2434_v56 = vmul.f32 %v5764_v29, %v2366_v58  ;;  %5548 = vmatmul.mubr.msk.f32.gmra.mxu0 %vm2494_vm6, %v2469_v55  ;;  %v2130_v29 = vmul.f32 %v11586_v51, %v7785_v3  ;;  %v11587_v58 = vld [vmem:[#allocation54_spill] sm:$0xff] }
 0xa55   :  { %5550 = vmatprep.mubr.msk.f32.mxu0 %vm11380_vm2, %v11517_v5  ;;  %v2218_v12 = vmul.f32 %v11587_v58, %v7911_v25 }
 0xa56   :  { %v2452_v48 = vsel %vm2446_vm15, %v2128_v19, %v2298_v21 }
 0xa57   :  { %v2470_v7 = vsel %vm2464_vm3, %v2452_v48, %v2434_v56 }
 0xa58   :  { %5551 = vmatmul.mubr.msk.f32.gmra.mxu0 %vm2494_vm6, %v2470_v7  ;;  %v11589_v7 = vld [vmem:[#allocation38_spill] sm:$0xff] }
 0xa59   :  { %5553 = vmatprep.mubr.msk.f32.mxu0 %vm11380_vm2, %v11517_v5 }
 0xa5b   :  { %v2170_v14 = vpop.permute.xlu0 %2169  ;;  %v2323_v23 = vpop.permute.xlu1 %2322 }
 0xa5c   :  { %v2214_v8 = vmul.f32 %v11581_v53, %v2170_v14  ;;  %v2367_v18 = vmul.f32 %v11582_v10, %v2323_v23  ;;  %v2371_v14 = vmul.f32 %v11589_v7, %v7913_v36  ;;  %v2133_v23 = vmul.f32 %v7776_v62, %v7731_v63  ;;  %v5809_v63 = vld [vmem:[%s11263_s5 + $0x8] sm:$0xff]   ;;  %v11591_v62 = vld [vmem:[#allocation61_spill] sm:$0xff] }
 0xa5d   :  { %5587 = vmatpush3.bf16.msra.mxu1 %v5809_v63 }
 0xa5e   :  { %v2299_v22 = vmul.f32 %v5768_v16, %v2214_v8  ;;  %v2435_v9 = vmul.f32 %v5773_v15, %v2367_v18  ;;  %v11590_v15 = vld [vmem:[#allocation40_spill] sm:$0xff]  ;;  %5588 = vmatprep.subr.bf16.mxu1 %v11517_v5 }
 0xa60   :  { %v2453_v39 = vsel %vm2446_vm15, %v2129_v13, %v2299_v22 }
 0xa61   :  { %v2471_v20 = vsel %vm2464_vm3, %v2453_v39, %v2435_v9  ;;  %v2134_v9 = vmul.f32 %v7779_v61, %v7739_v1  ;;  %v2135_v1 = vmul.f32 %v7798_v27, %v7752_v6  ;;  %v5810_v61 = vld [vmem:[%s11263_s5] sm:$0xff]   ;;  %v2136_v6 = vmul.f32 %v7801_v34, %v7756_v17  ;;  %s6118_s5 = smov 127  }
 0xa62   :  { %5554 = vmatmul.mubr.msk.f32.gmra.mxu0 %vm2494_vm6, %v2471_v20  ;;  %5589 = vmatpush3.bf16.msra.mxu1 %v5810_v61 }
 0xa63   :  { %v2172_v26 = vpop.permute.xlu0 %2171  ;;  %v2325_v2 = vpop.permute.xlu1 %2324  ;;  %5556 = vmatprep.mubr.msk.f32.mxu0 %vm11380_vm2, %v11517_v5  ;;  %5666 = vmatprep.subr.bf16.mxu1 %v11517_v5 }
 0xa64   :  { %v2215_v52 = vmul.f32 %v11584_v42, %v2172_v26  ;;  %v2368_v4 = vmul.f32 %v11585_v54, %v2325_v2 }
 0xa66   :  { %v2300_v49 = vmul.f32 %v5769_v0, %v2215_v52  ;;  %v2436_v32 = vmul.f32 %v5774_v50, %v2368_v4  ;;  %v11592_v50 = vld [vmem:[#allocation41_spill] sm:$0xff]  ;;  %v11593_v52 = vld [vmem:[#allocation62_spill] sm:$0xff] }
 0xa67   :  { %v5787_v28 = vpop.permute.xlu0 %5786  ;;  %v5792_v31 = vpop.permute.xlu1 %5791 }
 0xa68   :  { %v2454_v38 = vsel %vm2446_vm15, %v2130_v29, %v2300_v49  ;;  %v5788_v46 = vunpack.i.l.bf16 %v5787_v28  ;;  %v5793_v55 = vunpack.i.l.bf16 %v5792_v31  ;;  %v5789_v21 = vunpack.i.h.bf16 %v5787_v28 }
 0xa69   :  { %v2472_v60 = vsel %vm2464_vm3, %v2454_v38, %v2436_v32  ;;  %v5794_v25 = vunpack.i.h.bf16 %v5792_v31  ;;  %v11594_v32 = vld [vmem:[#allocation44_spill] sm:$0xff] }
 0xa6a   :  { %5557 = vmatmul.mubr.msk.f32.gmra.mxu0 %vm2494_vm6, %v2472_v60  ;;  %v2303_v56 = vmul.f32 %v5788_v46, %v2218_v12  ;;  %v2439_v16 = vmul.f32 %v5793_v55, %v2371_v14  ;;  %v11595_v46 = vld [vmem:[#allocation64_spill] sm:$0xff] }
 0xa6b   :  { %v2180_v35 = vpop.permute.xlu0 %2179  ;;  %v2333_v44 = vpop.permute.xlu1 %2332  ;;  %5559 = vmatprep.mubr.msk.f32.mxu0 %vm11380_vm2, %v11517_v5 }
 0xa6c   :  { %v2219_v3 = vmul.f32 %v11588_v43, %v2180_v35  ;;  %v2372_v53 = vmul.f32 %v11590_v15, %v2333_v44  ;;  %v2457_v18 = vsel %vm2446_vm15, %v2133_v23, %v2303_v56  ;;  %v11597_v23 = vld [vmem:[#allocation56_spill] sm:$0xff] }
 0xa6e   :  { %5560 = vmatmul.mubr.msk.f32.gmra.mxu0 %vm2494_vm6, %v7874_v47  ;;  %v2304_v8 = vmul.f32 %v5789_v21, %v2219_v3  ;;  %v2440_v11 = vmul.f32 %v5794_v25, %v2372_v53  ;;  %v11596_v21 = vld [vmem:[#allocation47_spill] sm:$0xff] }
 0xa6f   :  { %v2182_v19 = vpop.permute.xlu0 %2181  ;;  %v2335_v48 = vpop.permute.xlu1 %2334  ;;  %5562 = vmatprep.mubr.msk.f32.mxu0 %vm11380_vm2, %v11517_v5 }
 0xa70   :  { %v2220_v36 = vmul.f32 %v11591_v62, %v2182_v19  ;;  %v2458_v0 = vsel %vm2446_vm15, %v2134_v9, %v2304_v8  ;;  %v2373_v42 = vmul.f32 %v11592_v50, %v2335_v48 }
 0xa71   :  { %v2476_v31 = vsel %vm2464_vm3, %v2458_v0, %v2440_v11 }
 0xa72   :  { %5563 = vmatmul.mubr.msk.f32.gmra.mxu0 %vm2494_vm6, %v7905_v59  ;;  %v2475_v59 = vsel %vm2464_vm3, %v2457_v18, %v2439_v16 }
 0xa73   :  { %v5797_v47 = vpop.permute.xlu0 %5796  ;;  %v5802_v10 = vpop.permute.xlu1 %5801  ;;  %5565 = vmatprep.mubr.msk.f32.mxu0 %vm11380_vm2, %v11517_v5 }
 0xa74   :  { %v5798_v22 = vunpack.i.l.bf16 %v5797_v47  ;;  %v5803_v13 = vunpack.i.l.bf16 %v5802_v10  ;;  %v5799_v39 = vunpack.i.h.bf16 %v5797_v47  ;;  %v5804_v4 = vunpack.i.h.bf16 %v5802_v10 }
 0xa76   :  { %v2305_v20 = vmul.f32 %v5798_v22, %v2220_v36  ;;  %5566 = vmatmul.mubr.msk.f32.gmra.mxu0 %vm2494_vm6, %v2475_v59  ;;  %v2441_v49 = vmul.f32 %v5803_v13, %v2373_v42  ;;  %v11598_v22 = vld [vmem:[#allocation58_spill] sm:$0xff] }
 0xa77   :  { %v2184_v26 = vpop.permute.xlu0 %2183  ;;  %v2337_v2 = vpop.permute.xlu1 %2336  ;;  %5568 = vmatprep.mubr.msk.f32.mxu0 %vm11380_vm2, %v11517_v5 }
 0xa78   :  { %v2221_v54 = vmul.f32 %v11593_v52, %v2184_v26  ;;  %v2374_v28 = vmul.f32 %v11594_v32, %v2337_v2  ;;  %v2459_v60 = vsel %vm2446_vm15, %v2135_v1, %v2305_v20 }
 0xa79   :  { %v2477_v44 = vsel %vm2464_vm3, %v2459_v60, %v2441_v49 }
 0xa7a   :  { %v2306_v51 = vmul.f32 %v5799_v39, %v2221_v54  ;;  %5569 = vmatmul.mubr.msk.f32.gmra.mxu0 %vm2494_vm6, %v2476_v31  ;;  %v2442_v27 = vmul.f32 %v5804_v4, %v2374_v28 }
 0xa7b   :  { %v2186_v29 = vpop.permute.xlu0 %2185  ;;  %v2339_v38 = vpop.permute.xlu1 %2338  ;;  %5571 = vmatprep.mubr.msk.f32.mxu0 %vm11380_vm2, %v11517_v5 }
 0xa7c   :  { %v2222_v35 = vmul.f32 %v11595_v46, %v2186_v29  ;;  %v2460_v55 = vsel %vm2446_vm15, %v2136_v6, %v2306_v51  ;;  %v2375_v56 = vmul.f32 %v11596_v21, %v2339_v38 }
 0xa7d   :  { %v2478_v17 = vsel %vm2464_vm3, %v2460_v55, %v2442_v27 }
 0xa7e   :  { %5572 = vmatmul.mubr.msk.f32.gmra.mxu0 %vm2494_vm6, %v2477_v44 }
 0xa7f   :  { %v2271_v58 = vpop.permute.xlu0 %2270  ;;  %v2407_v12 = vpop.permute.xlu1 %2406  ;;  %5574 = vmatprep.mubr.msk.f32.mxu0 %vm11380_vm2, %v11517_v5 }
 0xa80   :  { %v2307_v43 = vmul.f32 %v2271_v58, %v2222_v35  ;;  %v2443_v3 = vmul.f32 %v2407_v12, %v2375_v56 }
 0xa82   :  { %v2461_v34 = vsel %vm2446_vm15, %v7773_v33, %v2307_v43  ;;  %5575 = vmatmul.mubr.msk.f32.gmra.mxu0 %vm2494_vm6, %v2478_v17 }
 0xa83   :  { %5577 = vmatprep.mubr.msk.f32.mxu0 %vm11380_vm2, %v11517_v5  ;;  %v2479_v19 = vsel %vm2464_vm3, %v2461_v34, %v2443_v3 }
 0xa86   :  { %5578 = vmatmul.mubr.msk.f32.gmra.mxu0 %vm2494_vm6, %v2479_v19 }
 0xa87   :  { %5580 = vmatprep.mubr.msk.f32.mxu0 %vm11380_vm2, %v11517_v5 }
 0xaa8   :  { %v2188_v48 = vpop.permute.xlu0 %2187  ;;  %v2341_v7 = vpop.permute.xlu1 %2340 }
 0xaa9   :  { %v2223_v14 = vmul.f32 %v7654_v24, %v2188_v48  ;;  %v2376_v25 = vmul.f32 %v11597_v23, %v2341_v7 }
 0xaac   :  { %v2273_v16 = vpop.permute.xlu0 %2272  ;;  %v2409_v33 = vpop.permute.xlu1 %2408 }
 0xaad   :  { %v2308_v15 = vmul.f32 %v2273_v16, %v2223_v14  ;;  %v2444_v53 = vmul.f32 %v2409_v33, %v2376_v25  ;;  %v8085_v16 = vld [vmem:[%s11264_s6] ss:$0 sm:$0xff] }
 0xaaf   :  { %v2462_v8 = vsel %vm2446_vm15, %v7882_v57, %v2308_v15 }
 0xab0   :  { %v2190_v47 = vpop.permute.xlu0 %2189  ;;  %v2343_v10 = vpop.permute.xlu1 %2342  ;;  %v2480_v18 = vsel %vm2464_vm3, %v2462_v8, %v2444_v53  ;;  %v6065_v8 = vld [vmem:[%s11470_s29] sm:$0xff] }
 0xab1   :  { %5581 = vmatmul.mubr.msk.f32.gmra.mxu0 %vm2494_vm6, %v2480_v18  ;;  %v2224_v24 = vmul.f32 %v7665_v40, %v2190_v47  ;;  %v2377_v63 = vmul.f32 %v11598_v22, %v2343_v10 }
 0xab2   :  { %5583 = vmatprep.mubr.msk.f32.mxu0 %vm11380_vm2, %v11517_v5 }
 0xab4   :  { %v2275_v62 = vpop.permute.xlu0 %2274  ;;  %v2411_v36 = vpop.permute.xlu1 %2410 }
 0xab5   :  { %v2309_v9 = vmul.f32 %v2275_v62, %v2224_v24  ;;  %v2445_v11 = vmul.f32 %v2411_v36, %v2377_v63  ;;  %v6066_v63 = vld [vmem:[%s11470_s29 + $0x8] sm:$0xff] }
 0xab7   :  { %v2463_v57 = vsel %vm2446_vm15, %v7901_v41, %v2309_v9 }
 0xab8   :  { %v2481_v13 = vsel %vm2464_vm3, %v2463_v57, %v2445_v11 }
 0xab9   :  { %5584 = vmatmul.mubr.msk.f32.gmra.mxu0 %vm2494_vm6, %v2481_v13  ;;  %v6067_v13 = vld [vmem:[%s11470_s29 + $0x10] sm:$0xff]  ;;  %vm11382_vm6 = vcmp.ge.f32.partialorder %v7690_v45, 0.5 }
 0xaba   :  { %5630 = vmatprep.mubr.msk.bf16.mxu0 %vm11380_vm2, %v11517_v5 }
 0xaf2   :  { %v2612_v59 = vpop.f32.mrf.mxu0 }
 0xaf4   :  { %v5537_v39 = vpop.f32.mrf.mxu0 }
 0xafb   :  { %v2617_v20 = vpop.f32.mrf.mxu0 }
 0xafc   :  { %v2696_v40 = vpack.c.bf16 %v2617_v20, %v2612_v59 }
 0xafd   :  { %v5540_v26 = vpop.f32.mrf.mxu0 }
 0xafe   :  { %5591 = vmatmul.mubr.msk.bf16.vlgmr.msra.gmra.mxu1 %vm11379_vm0, %v2696_v40 }
 0xaff   :  { %5594 = vmatprep.mubr.msk.bf16.mxu1 %vm11380_vm2, %v11517_v5 }
 0xb03   :  { %v2622_v2 = vpop.f32.mrf.mxu0 }
 0xb05   :  { %v5543_v0 = vpop.f32.mrf.mxu0 }
 0xb0a   :  { %v2627_v41 = vpop.f32.mrf.mxu0 }
 0xb0b   :  { %v2697_v50 = vpack.c.bf16 %v2627_v41, %v2622_v2  ;;  %v6068_v2 = vld [vmem:[%s11470_s29 + $0x18] sm:$0xff] }
 0xb0c   :  { %v5546_v42 = vpop.f32.mrf.mxu0 }
 0xb0d   :  { %5595 = vmatmul.mubr.msk.bf16.gmra.mxu1 %vm11379_vm0, %v2697_v50 }
 0xb0e   :  { %5598 = vmatprep.mubr.msk.bf16.mxu1 %vm11380_vm2, %v11517_v5 }
 0xb14   :  { %v2632_v52 = vpop.f32.mrf.mxu0 }
 0xb16   :  { %v5549_v54 = vpop.f32.mrf.mxu0 }
 0xb17   :  { %v6069_v54 = vld [vmem:[%s11470_s29 + $0x20] sm:$0xff] }
 0xb18   :  { %v2637_v1 = vpop.f32.mrf.mxu0 }
 0xb19   :  { %v2698_v61 = vpack.c.bf16 %v2637_v1, %v2632_v52 }
 0xb1a   :  { %v5552_v4 = vpop.f32.mrf.mxu0 }
 0xb1b   :  { %5599 = vmatmul.mubr.msk.bf16.gmra.mxu1 %vm11379_vm0, %v2698_v61 }
 0xb1c   :  { %5602 = vmatprep.mubr.msk.bf16.mxu1 %vm11380_vm2, %v11517_v5 }
 0xb22   :  { %v2642_v49 = vpop.f32.mrf.mxu0 }
 0xb24   :  { %v5555_v32 = vpop.f32.mrf.mxu0 }
 0xb2a   :  { %v2647_v28 = vpop.f32.mrf.mxu0 }
 0xb2b   :  { %v2699_v31 = vpack.c.bf16 %v2647_v28, %v2642_v49  ;;  %v6070_v28 = vld [vmem:[%s11470_s29 + $0x28] sm:$0xff] }
 0xb2c   :  { %v5558_v51 = vpop.f32.mrf.mxu0 }
 0xb2d   :  { %5603 = vmatmul.mubr.msk.bf16.gmra.mxu1 %vm11379_vm0, %v2699_v31 }
 0xb2e   :  { %v2652_v29 = vpop.f32.mrf.mxu0  ;;  %5606 = vmatprep.mubr.msk.bf16.mxu1 %vm11380_vm2, %v11517_v5 }
 0xb30   :  { %v5561_v38 = vpop.f32.mrf.mxu0 }
 0xb32   :  { %v2657_v60 = vpop.f32.mrf.mxu0 }
 0xb33   :  { %v2700_v6 = vpack.c.bf16 %v2657_v60, %v2652_v29 }
 0xb34   :  { %v5564_v27 = vpop.f32.mrf.mxu0 }
 0xb35   :  { %5607 = vmatmul.mubr.msk.bf16.gmra.mxu1 %vm11379_vm0, %v2700_v6  ;;  %v6071_v6 = vld [vmem:[%s11470_s29 + $0x30] sm:$0xff] }
 0xb36   :  { %v2662_v46 = vpop.f32.mrf.mxu0  ;;  %5610 = vmatprep.mubr.msk.bf16.mxu1 %vm11380_vm2, %v11517_v5 }
 0xb38   :  { %v5567_v35 = vpop.f32.mrf.mxu0 }
 0xb3a   :  { %v2667_v44 = vpop.f32.mrf.mxu0 }
 0xb3b   :  { %v2701_v58 = vpack.c.bf16 %v2667_v44, %v2662_v46 }
 0xb3c   :  { %v5570_v12 = vpop.f32.mrf.mxu0 }
 0xb3d   :  { %5611 = vmatmul.mubr.msk.bf16.gmra.mxu1 %vm11379_vm0, %v2701_v58  ;;  %v6072_v12 = vld [vmem:[%s11470_s29 + $0x38] sm:$0xff] }
 0xb3e   :  { %v2672_v55 = vpop.f32.mrf.mxu0  ;;  %5614 = vmatprep.mubr.msk.bf16.mxu1 %vm11380_vm2, %v11517_v5 }
 0xb40   :  { %v5573_v21 = vpop.f32.mrf.mxu0 }
 0xb42   :  { %v2677_v56 = vpop.f32.mrf.mxu0 }
 0xb43   :  { %v2702_v43 = vpack.c.bf16 %v2677_v56, %v2672_v55 }
 0xb44   :  { %v5576_v3 = vpop.f32.mrf.mxu0 }
 0xb45   :  { %5615 = vmatmul.mubr.msk.bf16.gmra.mxu1 %vm11379_vm0, %v2702_v43 }
 0xb46   :  { %v2682_v17 = vpop.f32.mrf.mxu0  ;;  %5618 = vmatprep.mubr.msk.bf16.mxu1 %vm11380_vm2, %v11517_v5 }
 0xb48   :  { %v5579_v34 = vpop.f32.mrf.mxu0 }
 0xb71   :  { %v2687_v19 = vpop.f32.mrf.mxu0 }
 0xb72   :  { %v2703_v48 = vpack.c.bf16 %v2687_v19, %v2682_v17  ;;  %v6073_v17 = vld [vmem:[%s11470_s29 + $0x40] sm:$0xff] }
 0xb73   :  { %v5582_v7 = vpop.f32.mrf.mxu0 }
 0xb74   :  { %5619 = vmatmul.mubr.msk.bf16.gmra.mxu1 %vm11379_vm0, %v2703_v48 }
 0xb75   :  { %5622 = vmatprep.mubr.msk.bf16.mxu1 %vm11380_vm2, %v11517_v5 }
 0xb79   :  { %v2692_v14 = vpop.f32.mrf.mxu0 }
 0xb7a   :  { %v2704_v23 = vpack.c.bf16 %v2692_v14, %v2692_v14 }
 0xb7b   :  { %v5585_v25 = vpop.f32.mrf.mxu0 }
 0xb7c   :  { %5623 = vmatmul.mubr.msk.bf16.gmra.mxu1 %vm11379_vm0, %v2704_v23  ;;  %v6074_v23 = vld [vmem:[%s11470_s29 + $0x48] sm:$0xff] }
 0xb7d   :  { %5674 = vmatprep.mubr.msk.bf16.mxu1 %vm11380_vm2, %v11517_v5 }
 0xbbe   :  { %v2789_v33 = vpop.f32.mrf.mxu1 }
 0xbbf   :  { %v2790_v15 = vadd.f32 %v8085_v16, %v2789_v33 }
 0xbc0   :  { %v5592_v53 = vpop.f32.mrf.mxu1 }
 0xbc1   :  { %v8091_v47 = vadd.f32 %v6065_v8, %v2790_v15 }
 0xbc2   :  { %v2792_v10 = vpop.f32.mrf.mxu1 }
 0xbc3   :  { %11599 = vst [vmem:[#allocation16_spill] sm:$0xff] %v8091_v47  ;;  %v2793_v18 = vadd.f32 %v8085_v16, %v2792_v10  ;;  %v2878_v24 = vsel %vm11379_vm0, %v8091_v47, 0.0  ;;  %v6075_v10 = vld [vmem:[%s11470_s29 + $0x50] sm:$0xff] }
 0xbc4   :  { %2879 = vadd.xlane.f32.xlu0 %v2878_v24  ;;  %v5593_v22 = vpop.f32.mrf.mxu1 }
 0xbc5   :  { %v8099_v62 = vadd.f32 %v6066_v63, %v2793_v18 }
 0xbc7   :  { %11600 = vst [vmem:[#allocation17_spill] sm:$0xff] %v8099_v62  ;;  %v2881_v36 = vsel %vm11379_vm0, %v8099_v62, 0.0 }
 0xbc8   :  { %2882 = vadd.xlane.f32.xlu1 %v2881_v36 }
 0xbcd   :  { %v2797_v9 = vpop.f32.mrf.mxu1 }
 0xbce   :  { %v2798_v11 = vadd.f32 %v8085_v16, %v2797_v9  ;;  %v6076_v9 = vld [vmem:[%s11470_s29 + $0x58] sm:$0xff] }
 0xbcf   :  { %v5596_v57 = vpop.f32.mrf.mxu1 }
 0xbd0   :  { %v8107_v59 = vadd.f32 %v6067_v13, %v2798_v11 }
 0xbd1   :  { %v2800_v39 = vpop.f32.mrf.mxu1 }
 0xbd2   :  { %11601 = vst [vmem:[#allocation18_spill] sm:$0xff] %v8107_v59  ;;  %v2801_v20 = vadd.f32 %v8085_v16, %v2800_v39  ;;  %v2884_v40 = vsel %vm11379_vm0, %v8107_v59, 0.0 }
 0xbd3   :  { %2885 = vadd.xlane.f32.xlu0 %v2884_v40  ;;  %v5597_v26 = vpop.f32.mrf.mxu1  ;;  %v6077_v40 = vld [vmem:[%s11470_s29 + $0x60] sm:$0xff] }
 0xbd4   :  { %v8115_v0 = vadd.f32 %v6068_v2, %v2801_v20 }
 0xbd6   :  { %11602 = vst [vmem:[#allocation19_spill] sm:$0xff] %v8115_v0  ;;  %v2887_v41 = vsel %vm11379_vm0, %v8115_v0, 0.0 }
 0xbd7   :  { %2888 = vadd.xlane.f32.xlu0 %v2887_v41 }
 0xbdb   :  { %v2805_v50 = vpop.f32.mrf.mxu1 }
 0xbdc   :  { %v2806_v42 = vadd.f32 %v8085_v16, %v2805_v50 }
 0xbdd   :  { %v5600_v52 = vpop.f32.mrf.mxu1 }
 0xbde   :  { %v8123_v1 = vadd.f32 %v6069_v54, %v2806_v42  ;;  %v6078_v52 = vld [vmem:[%s11470_s29 + $0x68] sm:$0xff] }
 0xbdf   :  { %v2808_v61 = vpop.f32.mrf.mxu1 }
 0xbe0   :  { %11603 = vst [vmem:[#allocation21_spill] sm:$0xff] %v8123_v1  ;;  %v2809_v4 = vadd.f32 %v8085_v16, %v2808_v61  ;;  %v2890_v49 = vsel %vm11379_vm0, %v8123_v1, 0.0 }
 0xbe1   :  { %2891 = vadd.xlane.f32.xlu0 %v2890_v49  ;;  %v5601_v32 = vpop.f32.mrf.mxu1 }
 0xbe2   :  { %v8131_v31 = vadd.f32 %v6070_v28, %v2809_v4  ;;  %v6079_v28 = vld [vmem:[%s11470_s29 + $0x70] sm:$0xff] }
 0xbe4   :  { %11604 = vst [vmem:[#allocation23_spill] sm:$0xff] %v8131_v31  ;;  %v2893_v51 = vsel %vm11379_vm0, %v8131_v31, 0.0 }
 0xbe5   :  { %2894 = vadd.xlane.f32.xlu1 %v2893_v51 }
 0xbed   :  { %v2813_v29 = vpop.f32.mrf.mxu1 }
 0xbee   :  { %v2814_v38 = vadd.f32 %v8085_v16, %v2813_v29 }
 0xbef   :  { %v5604_v60 = vpop.f32.mrf.mxu1 }
 0xbf0   :  { %v8139_v27 = vadd.f32 %v6071_v6, %v2814_v38 }
 0xbf1   :  { %v2816_v46 = vpop.f32.mrf.mxu1 }
 0xbf2   :  { %11605 = vst [vmem:[#allocation33_spill] sm:$0xff] %v8139_v27  ;;  %v2817_v35 = vadd.f32 %v8085_v16, %v2816_v46  ;;  %v2896_v44 = vsel %vm11379_vm0, %v8139_v27, 0.0  ;;  %v6080_v46 = vld [vmem:[%s11470_s29 + $0x78] sm:$0xff] }
 0xbf3   :  { %2897 = vadd.xlane.f32.xlu0 %v2896_v44  ;;  %v5605_v58 = vpop.f32.mrf.mxu1 }
 0xbf4   :  { %v8147_v55 = vadd.f32 %v6072_v12, %v2817_v35 }
 0xbf5   :  { %v2821_v21 = vpop.f32.mrf.mxu1 }
 0xbf6   :  { %11606 = vst [vmem:[#allocation24_spill] sm:$0xff] %v8147_v55  ;;  %v2822_v56 = vadd.f32 %v8085_v16, %v2821_v21  ;;  %v2899_v43 = vsel %vm11379_vm0, %v8147_v55, 0.0 }
 0xbf7   :  { %2900 = vadd.xlane.f32.xlu1 %v2899_v43  ;;  %v5608_v3 = vpop.f32.mrf.mxu1 }
 0xbf8   :  { %v8155_v34 = vadd.f32 %v6073_v17, %v2822_v56  ;;  %v6081_v56 = vld [vmem:[%s11470_s29 + $0x80] sm:$0x3] }
 0xbf9   :  { %v2824_v19 = vpop.f32.mrf.mxu1 }
 0xbfa   :  { %11607 = vst [vmem:[#allocation34_spill] sm:$0xff] %v8155_v34  ;;  %v2825_v48 = vadd.f32 %v8085_v16, %v2824_v19  ;;  %v2902_v7 = vsel %vm11379_vm0, %v8155_v34, 0.0 }
 0xbfb   :  { %2903 = vadd.xlane.f32.xlu0 %v2902_v7  ;;  %v5609_v14 = vpop.f32.mrf.mxu1 }
 0xbfc   :  { %v8163_v25 = vadd.f32 %v6074_v23, %v2825_v48 }
 0xbfd   :  { %v2829_v33 = vpop.f32.mrf.mxu1 }
 0xbfe   :  { %11608 = vst [vmem:[#allocation35_spill] sm:$0xff] %v8163_v25  ;;  %v2830_v15 = vadd.f32 %v8085_v16, %v2829_v33  ;;  %v2905_v53 = vsel %vm11379_vm0, %v8163_v25, 0.0 }
 0xbff   :  { %2906 = vadd.xlane.f32.xlu1 %v2905_v53  ;;  %v5612_v8 = vpop.f32.mrf.mxu1 }
 0xc00   :  { %v8171_v18 = vadd.f32 %v6075_v10, %v2830_v15 }
 0xc01   :  { %v2832_v24 = vpop.f32.mrf.mxu1 }
 0xc02   :  { %11609 = vst [vmem:[#allocation25_spill] sm:$0xff] %v8171_v18  ;;  %v2833_v22 = vadd.f32 %v8085_v16, %v2832_v24  ;;  %v2908_v63 = vsel %vm11379_vm0, %v8171_v18, 0.0 }
 0xc03   :  { %2909 = vadd.xlane.f32.xlu0 %v2908_v63  ;;  %v5613_v36 = vpop.f32.mrf.mxu1 }
 0xc04   :  { %v8179_v11 = vadd.f32 %v6076_v9, %v2833_v22 }
 0xc05   :  { %v2837_v57 = vpop.f32.mrf.mxu1 }
 0xc06   :  { %11610 = vst [vmem:[#allocation36_spill] sm:$0xff] %v8179_v11  ;;  %v2838_v13 = vadd.f32 %v8085_v16, %v2837_v57  ;;  %v2911_v39 = vsel %vm11379_vm0, %v8179_v11, 0.0 }
 0xc07   :  { %2912 = vadd.xlane.f32.xlu1 %v2911_v39  ;;  %v5616_v20 = vpop.f32.mrf.mxu1 }
 0xc08   :  { %v8187_v26 = vadd.f32 %v6077_v40, %v2838_v13 }
 0xc09   :  { %v2840_v2 = vpop.f32.mrf.mxu1 }
 0xc0a   :  { %11611 = vst [vmem:[#allocation37_spill] sm:$0xff] %v8187_v26  ;;  %v2841_v41 = vadd.f32 %v8085_v16, %v2840_v2  ;;  %v2914_v50 = vsel %vm11379_vm0, %v8187_v26, 0.0 }
 0xc0b   :  { %2915 = vadd.xlane.f32.xlu0 %v2914_v50  ;;  %v5617_v42 = vpop.f32.mrf.mxu1 }
 0xc0c   :  { %v8195_v54 = vadd.f32 %v6078_v52, %v2841_v41 }
 0xc0e   :  { %11612 = vst [vmem:[#allocation55_spill] sm:$0xff] %v8195_v54  ;;  %v2917_v61 = vsel %vm11379_vm0, %v8195_v54, 0.0 }
 0xc0f   :  { %2918 = vadd.xlane.f32.xlu1 %v2917_v61 }
 0xc34   :  { %v2845_v4 = vpop.f32.mrf.mxu1 }
 0xc35   :  { %v2846_v49 = vadd.f32 %v8085_v16, %v2845_v4 }
 0xc36   :  { %v5620_v32 = vpop.f32.mrf.mxu1 }
 0xc37   :  { %v8203_v51 = vadd.f32 %v6079_v28, %v2846_v49  ;;  %v5811_v28 = vld [vmem:[%s11269_s11 + $0x8] sm:$0xff]  }
 0xc38   :  { %v2848_v29 = vpop.f32.mrf.mxu1  ;;  %5627 = vmatpush3.bf16.msra.mxu0 %v5811_v28 }
 0xc39   :  { %11613 = vst [vmem:[#allocation39_spill] sm:$0xff] %v8203_v51  ;;  %v2849_v38 = vadd.f32 %v8085_v16, %v2848_v29  ;;  %v2920_v60 = vsel %vm11379_vm0, %v8203_v51, 0.0  ;;  %5628 = vmatprep.subr.bf16.mxu0 %v11517_v5 }
 0xc3a   :  { %2921 = vadd.xlane.f32.xlu0 %v2920_v60  ;;  %v5621_v6 = vpop.f32.mrf.mxu1 }
 0xc3b   :  { %v8211_v35 = vadd.f32 %v6080_v46, %v2849_v38  ;;  %v5812_v38 = vld [vmem:[%s11269_s11] sm:$0xff]   ;;  %s6116_s11 = smov 62  }
 0xc3c   :  { %v2853_v44 = vpop.f32.mrf.mxu1  ;;  %5629 = vmatpush3.bf16.msra.mxu0 %v5812_v38 }
 0xc3d   :  { %11614 = vst [vmem:[#allocation49_spill] sm:$0xff] %v8211_v35  ;;  %v2854_v58 = vadd.f32 %v8085_v16, %v2853_v44  ;;  %v2923_v12 = vsel %vm11379_vm0, %v8211_v35, 0.0 }
 0xc3e   :  { %2924 = vadd.xlane.f32.xlu1 %v2923_v12  ;;  %v5624_v21 = vpop.f32.mrf.mxu1 }
 0xc3f   :  { %v8219_v43 = vadd.f32 %v6081_v56, %v2854_v58 }
 0xc40   :  { %v2856_v3 = vpop.f32.mrf.mxu1 }
 0xc41   :  { %11615 = vst [vmem:[#allocation59_spill] sm:$0xff] %v8219_v43  ;;  %v2926_v17 = vsel %vm11373_vm1, %v8219_v43, 0.0 }
 0xc42   :  { %2927 = vadd.xlane.f32.xlu0 %v2926_v17  ;;  %v5625_v19 = vpop.f32.mrf.mxu1 }
 0xc4d   :  { %v2880_v48 = vpop.xlane.xlu0 %2879 }
 0xc4e   :  { %v2929_v7 = vmul.f32 0.03125, %v2880_v48 }
 0xc50   :  { %v8224_v16 = vsub.f32 %v8091_v47, %v2929_v7 }
 0xc51   :  { %v2883_v14 = vpop.xlane.xlu1 %2882 }
 0xc52   :  { %v2930_v23 = vmul.f32 0.03125, %v2883_v14  ;;  %v2963_v33 = vmul.f32 %v8224_v16, %v8224_v16 }
 0xc54   :  { %v8229_v15 = vsub.f32 %v8099_v62, %v2930_v23  ;;  %v2980_v53 = vsel %vm11379_vm0, %v2963_v33, 0.0 }
 0xc55   :  { %2981 = vadd.xlane.f32.xlu1 %v2980_v53 }
 0xc56   :  { %v2964_v8 = vmul.f32 %v8229_v15, %v8229_v15 }
 0xc58   :  { %v2983_v10 = vsel %vm11379_vm0, %v2964_v8, 0.0 }
 0xc59   :  { %2984 = vadd.xlane.f32.xlu0 %v2983_v10 }
 0xc5c   :  { %v2886_v24 = vpop.xlane.xlu0 %2885 }
 0xc5d   :  { %v2931_v22 = vmul.f32 0.03125, %v2886_v24 }
 0xc5f   :  { %v8236_v63 = vsub.f32 %v8107_v59, %v2931_v22 }
 0xc60   :  { %v2889_v36 = vpop.xlane.xlu0 %2888 }
 0xc61   :  { %v2932_v9 = vmul.f32 0.03125, %v2889_v36  ;;  %v2965_v57 = vmul.f32 %v8236_v63, %v8236_v63 }
 0xc63   :  { %v8241_v13 = vsub.f32 %v8115_v0, %v2932_v9  ;;  %v2986_v39 = vsel %vm11379_vm0, %v2965_v57, 0.0 }
 0xc64   :  { %2987 = vadd.xlane.f32.xlu1 %v2986_v39 }
 0xc65   :  { %v2966_v20 = vmul.f32 %v8241_v13, %v8241_v13 }
 0xc67   :  { %v2989_v40 = vsel %vm11379_vm0, %v2966_v20, 0.0 }
 0xc68   :  { %2990 = vadd.xlane.f32.xlu0 %v2989_v40 }
 0xc6a   :  { %v2892_v2 = vpop.xlane.xlu0 %2891 }
 0xc6b   :  { %v2933_v41 = vmul.f32 0.03125, %v2892_v2 }
 0xc6d   :  { %v8248_v50 = vsub.f32 %v8123_v1, %v2933_v41 }
 0xc6e   :  { %v2895_v42 = vpop.xlane.xlu1 %2894 }
 0xc6f   :  { %v2934_v52 = vmul.f32 0.03125, %v2895_v42  ;;  %v2967_v61 = vmul.f32 %v8248_v50, %v8248_v50 }
 0xc71   :  { %v8253_v4 = vsub.f32 %v8131_v31, %v2934_v52  ;;  %v2992_v49 = vsel %vm11379_vm0, %v2967_v61, 0.0 }
 0xc72   :  { %2993 = vadd.xlane.f32.xlu1 %v2992_v49 }
 0xc73   :  { %v2968_v32 = vmul.f32 %v8253_v4, %v8253_v4 }
 0xc75   :  { %v2995_v29 = vsel %vm11379_vm0, %v2968_v32, 0.0 }
 0xc76   :  { %2996 = vadd.xlane.f32.xlu0 %v2995_v29 }
 0xc7c   :  { %v2898_v60 = vpop.xlane.xlu0 %2897 }
 0xc7d   :  { %v2935_v6 = vmul.f32 0.03125, %v2898_v60 }
 0xc7f   :  { %v8267_v46 = vsub.f32 %v8139_v27, %v2935_v6 }
 0xc80   :  { %v2901_v44 = vpop.xlane.xlu1 %2900 }
 0xc81   :  { %v2936_v58 = vmul.f32 0.03125, %v2901_v44  ;;  %v2969_v12 = vmul.f32 %v8267_v46, %v8267_v46 }
 0xc83   :  { %v8272_v21 = vsub.f32 %v8147_v55, %v2936_v58  ;;  %v2998_v56 = vsel %vm11379_vm0, %v2969_v12, 0.0 }
 0xc84   :  { %v2904_v3 = vpop.xlane.xlu0 %2903  ;;  %2999 = vadd.xlane.f32.xlu1 %v2998_v56 }
 0xc85   :  { %v2937_v17 = vmul.f32 0.03125, %v2904_v3  ;;  %v2970_v19 = vmul.f32 %v8272_v21, %v8272_v21 }
 0xc87   :  { %v8278_v48 = vsub.f32 %v8155_v34, %v2937_v17  ;;  %v3001_v7 = vsel %vm11379_vm0, %v2970_v19, 0.0 }
 0xc88   :  { %v2907_v14 = vpop.xlane.xlu1 %2906  ;;  %3002 = vadd.xlane.f32.xlu0 %v3001_v7 }
 0xc89   :  { %v2938_v23 = vmul.f32 0.03125, %v2907_v14  ;;  %v2971_v33 = vmul.f32 %v8278_v48, %v8278_v48 }
 0xc8b   :  { %v8284_v53 = vsub.f32 %v8163_v25, %v2938_v23  ;;  %v3004_v8 = vsel %vm11379_vm0, %v2971_v33, 0.0  ;;  %v3728_v25 = vld [vmem:[#allocation2 + $0x8] sm:$0xff] }
 0xc8c   :  { %v2910_v10 = vpop.xlane.xlu0 %2909  ;;  %3005 = vadd.xlane.f32.xlu1 %v3004_v8 }
 0xc8d   :  { %v2939_v24 = vmul.f32 0.03125, %v2910_v10  ;;  %v2972_v22 = vmul.f32 %v8284_v53, %v8284_v53 }
 0xc8f   :  { %v8290_v36 = vsub.f32 %v8171_v18, %v2939_v24  ;;  %v3007_v9 = vsel %vm11379_vm0, %v2972_v22, 0.0 }
 0xc90   :  { %v2913_v57 = vpop.xlane.xlu1 %2912  ;;  %3008 = vadd.xlane.f32.xlu0 %v3007_v9 }
 0xc91   :  { %v2940_v39 = vmul.f32 0.03125, %v2913_v57  ;;  %v2973_v20 = vmul.f32 %v8290_v36, %v8290_v36 }
 0xc93   :  { %v8296_v40 = vsub.f32 %v8179_v11, %v2940_v39  ;;  %v3010_v2 = vsel %vm11379_vm0, %v2973_v20, 0.0 }
 0xc94   :  { %v2916_v41 = vpop.xlane.xlu0 %2915  ;;  %3011 = vadd.xlane.f32.xlu1 %v3010_v2 }
 0xc95   :  { %v2941_v42 = vmul.f32 0.03125, %v2916_v41  ;;  %v2974_v52 = vmul.f32 %v8296_v40, %v8296_v40 }
 0xc97   :  { %v8302_v61 = vsub.f32 %v8187_v26, %v2941_v42  ;;  %v3013_v49 = vsel %vm11379_vm0, %v2974_v52, 0.0  ;;  %v11616_v42 = vld [vmem:[#allocation11_spill] sm:$0xff] }
 0xc98   :  { %v2919_v32 = vpop.xlane.xlu1 %2918  ;;  %3014 = vadd.xlane.f32.xlu0 %v3013_v49  ;;  %v11617_v49 = vld [vmem:[#allocation10_spill] sm:$0xff] }
 0xc99   :  { %v2942_v28 = vmul.f32 0.03125, %v2919_v32  ;;  %v2975_v29 = vmul.f32 %v8302_v61, %v8302_v61  ;;  %v11618_v32 = vld [vmem:[#allocation8_spill] sm:$0xff] }
 0xc9b   :  { %v8308_v38 = vsub.f32 %v8195_v54, %v2942_v28  ;;  %v3016_v60 = vsel %vm11379_vm0, %v2975_v29, 0.0  ;;  %v11619_v28 = vld [vmem:[#allocation9_spill] sm:$0xff]  ;;  %v11651_v54 = vld [vmem:[#allocation6_spill] sm:$0xff] }
 0xc9c   :  { %3017 = vadd.xlane.f32.xlu1 %v3016_v60  ;;  %v3675_v26 = vsub.s32 0, %v11651_v54  ;;  %v3764_v11 = vsub.s32 1, %v11651_v54 }
 0xc9d   :  { %v2976_v6 = vmul.f32 %v8308_v38, %v8308_v38 }
 0xc9f   :  { %v3019_v44 = vsel %vm11379_vm0, %v2976_v6, 0.0 }
 0xca0   :  { %3020 = vadd.xlane.f32.xlu0 %v3019_v44 }
 0xcc3   :  { %v2922_v58 = vpop.xlane.xlu0 %2921 }
 0xcc4   :  { %v2943_v12 = vmul.f32 0.03125, %v2922_v58 }
 0xcc6   :  { %v8315_v56 = vsub.f32 %v8203_v51, %v2943_v12 }
 0xcc7   :  { %v2925_v3 = vpop.xlane.xlu1 %2924 }
 0xcc8   :  { %v2944_v17 = vmul.f32 0.03125, %v2925_v3  ;;  %v2977_v19 = vmul.f32 %v8315_v56, %v8315_v56  ;;  %v8348_v3 = vld [vmem:[%s11267_s9] ss:$0 sm:$0xff] }
 0xcca   :  { %v8320_v7 = vsub.f32 %v8211_v35, %v2944_v17  ;;  %v3022_v14 = vsel %vm11379_vm0, %v2977_v19, 0.0 }
 0xccb   :  { %3023 = vadd.xlane.f32.xlu1 %v3022_v14  ;;  %v2928_v23 = vpop.xlane.xlu0 %2927 }
 0xccc   :  { %v2945_v33 = vmul.f32 0.03125, %v2928_v23  ;;  %v2978_v8 = vmul.f32 %v8320_v7, %v8320_v7 }
 0xcce   :  { %v8326_v10 = vsub.f32 %v8219_v43, %v2945_v33  ;;  %v3025_v24 = vsel %vm11379_vm0, %v2978_v8, 0.0  ;;  %v8355_v8 = vld [vmem:[%s11268_s10] ss:$0 sm:$0xff] }
 0xccf   :  { %3026 = vadd.xlane.f32.xlu0 %v3025_v24  ;;  %v11647_v43 = vld [vmem:[#allocation69_spill] sm:$0xff] }
 0xcd0   :  { %v2979_v22 = vmul.f32 %v8326_v10, %v8326_v10  ;;  %v5147_v35 = vadd.f32 -1.0, %v11647_v43 }
 0xcd2   :  { %v3028_v9 = vsel %vm11373_vm1, %v2979_v22, 0.0  ;;  %v8586_v31 = vmax.f32 %v5147_v35, 0.0 }
 0xcd3   :  { %3029 = vadd.xlane.f32.xlu1 %v3028_v9 }
 0xcde   :  { %v2982_v57 = vpop.xlane.xlu1 %2981 }
 0xcdf   :  { %v3031_v39 = vmul.f32 0.03125, %v2982_v57 }
 0xce1   :  { %v3048_v20 = vadd.f32 1e-05, %v3031_v39 }
 0xce2   :  { %v2985_v2 = vpop.xlane.xlu0 %2984 }
 0xce3   :  { %5997 = vrsqrt.f32 %v3048_v20  ;;  %v3032_v41 = vmul.f32 0.03125, %v2985_v2 }
 0xce4   :  { %874 = vrot.lane.b32.xlu1 %v11616_v42, %s6116_s11 }
 0xce5   :  { %v3049_v52 = vadd.f32 1e-05, %v3032_v41  ;;  %872 = vrot.lane.b32.xlu0 %v11617_v49, %s6116_s11 }
 0xce7   :  { %5999 = vrsqrt.f32 %v3049_v52 }
 0xce8   :  { %880 = vrot.lane.b32.xlu1 %v11618_v32, %s6117_s27 }
 0xce9   :  { %862 = vrot.lane.b32.xlu0 %v11617_v49, %s6118_s5 }
 0xcec   :  { %882 = vrot.lane.b32.xlu1 %v11619_v28, %s6117_s27 }
 0xced   :  { %v2988_v29 = vpop.xlane.xlu1 %2987 }
 0xcee   :  { %v3033_v60 = vmul.f32 0.03125, %v2988_v29 }
 0xcf0   :  { %v5998_v6 = vpop.eup %5997  ;;  %v3050_v44 = vadd.f32 1e-05, %v3033_v60  ;;  %866 = vrot.lane.b32.xlu1 %v11618_v32, %s6119_s28 }
 0xcf1   :  { %v3082_v58 = vmul.f32 %v5998_v6, %v8224_v16  ;;  %v2991_v12 = vpop.xlane.xlu0 %2990 }
 0xcf2   :  { %6001 = vrsqrt.f32 %v3050_v44  ;;  %v3034_v17 = vmul.f32 0.03125, %v2991_v12 }
 0xcf3   :  { %v3105_v23 = vmul.f32 %v8348_v3, %v3082_v58 }
 0xcf4   :  { %v6000_v19 = vpop.eup %5999  ;;  %v3051_v14 = vadd.f32 1e-05, %v3034_v17 }
 0xcf5   :  { %v3083_v33 = vmul.f32 %v6000_v19, %v8229_v15  ;;  %v3128_v24 = vadd.f32 %v8355_v8, %v3105_v23 }
 0xcf6   :  { %6003 = vrsqrt.f32 %v3051_v14 }
 0xcf7   :  { %v3106_v16 = vmul.f32 %v8348_v3, %v3083_v33 }
 0xcf9   :  { %v3129_v22 = vadd.f32 %v8355_v8, %v3106_v16 }
 0xcfb   :  { %v2994_v9 = vpop.xlane.xlu1 %2993  ;;  %v3145_v57 = vpack.c.bf16 %v3129_v22, %v3128_v24 }
 0xcfc   :  { %v3035_v39 = vmul.f32 0.03125, %v2994_v9 }
 0xcfd   :  { %5631 = vmatmul.mubr.msk.bf16.vlgmr.msra.gmra.mxu0 %vm11379_vm0, %v3145_v57 }
 0xcfe   :  { %v3052_v20 = vadd.f32 1e-05, %v3035_v39  ;;  %5634 = vmatprep.mubr.msk.bf16.mxu0 %vm11380_vm2, %v11517_v5 }
 0xcff   :  { %v6002_v15 = vpop.eup %6001  ;;  %v2997_v2 = vpop.xlane.xlu0 %2996 }
 0xd00   :  { %6005 = vrsqrt.f32 %v3052_v20  ;;  %v3036_v41 = vmul.f32 0.03125, %v2997_v2  ;;  %v3084_v42 = vmul.f32 %v6002_v15, %v8236_v63 }
 0xd02   :  { %v3053_v52 = vadd.f32 1e-05, %v3036_v41  ;;  %v3107_v28 = vmul.f32 %v8348_v3, %v3084_v42 }
 0xd03   :  { %v6004_v49 = vpop.eup %6003 }
 0xd04   :  { %6007 = vrsqrt.f32 %v3053_v52  ;;  %v3085_v32 = vmul.f32 %v6004_v49, %v8241_v13  ;;  %v3130_v60 = vadd.f32 %v8355_v8, %v3107_v28 }
 0xd06   :  { %v3108_v29 = vmul.f32 %v8348_v3, %v3085_v32 }
 0xd08   :  { %v3131_v6 = vadd.f32 %v8355_v8, %v3108_v29 }
 0xd0a   :  { %v3146_v44 = vpack.c.bf16 %v3131_v6, %v3130_v60 }
 0xd0c   :  { %5635 = vmatmul.mubr.msk.bf16.gmra.mxu0 %vm11379_vm0, %v3146_v44 }
 0xd0d   :  { %v6006_v58 = vpop.eup %6005  ;;  %5638 = vmatprep.mubr.msk.bf16.mxu0 %vm11380_vm2, %v11517_v5  ;;  %v3000_v63 = vpop.xlane.xlu1 %2999 }
 0xd0e   :  { %v3086_v12 = vmul.f32 %v6006_v58, %v8248_v50  ;;  %v3037_v17 = vmul.f32 0.03125, %v3000_v63 }
 0xd10   :  { %v3054_v19 = vadd.f32 1e-05, %v3037_v17  ;;  %v3109_v33 = vmul.f32 %v8348_v3, %v3086_v12 }
 0xd11   :  { %v6008_v13 = vpop.eup %6007  ;;  %v3003_v14 = vpop.xlane.xlu0 %3002 }
 0xd12   :  { %v3087_v23 = vmul.f32 %v6008_v13, %v8253_v4  ;;  %6009 = vrsqrt.f32 %v3054_v19  ;;  %v3038_v16 = vmul.f32 0.03125, %v3003_v14  ;;  %v3132_v57 = vadd.f32 %v8355_v8, %v3109_v33 }
 0xd14   :  { %v3110_v24 = vmul.f32 %v8348_v3, %v3087_v23  ;;  %v3055_v22 = vadd.f32 1e-05, %v3038_v16 }
 0xd15   :  { %v3006_v9 = vpop.xlane.xlu1 %3005 }
 0xd16   :  { %v3133_v39 = vadd.f32 %v8355_v8, %v3110_v24  ;;  %6011 = vrsqrt.f32 %v3055_v22  ;;  %v3039_v50 = vmul.f32 0.03125, %v3006_v9 }
 0xd18   :  { %v3147_v20 = vpack.c.bf16 %v3133_v39, %v3132_v57  ;;  %v3056_v15 = vadd.f32 1e-05, %v3039_v50 }
 0xd19   :  { %v3009_v2 = vpop.xlane.xlu0 %3008 }
 0xd1a   :  { %5639 = vmatmul.mubr.msk.bf16.gmra.mxu0 %vm11379_vm0, %v3147_v20  ;;  %6013 = vrsqrt.f32 %v3056_v15  ;;  %v3040_v4 = vmul.f32 0.03125, %v3009_v2 }
 0xd1b   :  { %5642 = vmatprep.mubr.msk.bf16.mxu0 %vm11380_vm2, %v11517_v5 }
 0xd1c   :  { %v3057_v41 = vadd.f32 1e-05, %v3040_v4 }
 0xd1d   :  { %v3012_v42 = vpop.xlane.xlu1 %3011 }
 0xd1e   :  { %6015 = vrsqrt.f32 %v3057_v41  ;;  %v3041_v52 = vmul.f32 0.03125, %v3012_v42 }
 0xd1f   :  { %v6010_v49 = vpop.eup %6009 }
 0xd20   :  { %v3058_v32 = vadd.f32 1e-05, %v3041_v52  ;;  %v3088_v28 = vmul.f32 %v6010_v49, %v8267_v46 }
 0xd21   :  { %v3015_v29 = vpop.xlane.xlu0 %3014 }
 0xd22   :  { %6017 = vrsqrt.f32 %v3058_v32  ;;  %v3042_v60 = vmul.f32 0.03125, %v3015_v29  ;;  %v3111_v63 = vmul.f32 %v8348_v3, %v3088_v28 }
 0xd23   :  { %v6012_v6 = vpop.eup %6011 }
 0xd24   :  { %v3059_v44 = vadd.f32 1e-05, %v3042_v60  ;;  %v3089_v58 = vmul.f32 %v6012_v6, %v8272_v21  ;;  %v3134_v46 = vadd.f32 %v8355_v8, %v3111_v63 }
 0xd25   :  { %v3018_v12 = vpop.xlane.xlu1 %3017 }
 0xd26   :  { %6019 = vrsqrt.f32 %v3059_v44  ;;  %v3043_v17 = vmul.f32 0.03125, %v3018_v12  ;;  %v3112_v13 = vmul.f32 %v8348_v3, %v3089_v58 }
 0xd27   :  { %v6014_v19 = vpop.eup %6013 }
 0xd28   :  { %v3090_v14 = vmul.f32 %v6014_v19, %v8278_v48  ;;  %v3060_v23 = vadd.f32 1e-05, %v3043_v17  ;;  %v3135_v33 = vadd.f32 %v8355_v8, %v3112_v13 }
 0xd29   :  { %v3021_v16 = vpop.xlane.xlu0 %3020 }
 0xd2a   :  { %6021 = vrsqrt.f32 %v3060_v23  ;;  %v3044_v24 = vmul.f32 0.03125, %v3021_v16  ;;  %v3148_v22 = vpack.c.bf16 %v3135_v33, %v3134_v46  ;;  %v3113_v39 = vmul.f32 %v8348_v3, %v3090_v14 }
 0xd2b   :  { %v6016_v21 = vpop.eup %6015 }
 0xd2c   :  { %v3091_v9 = vmul.f32 %v6016_v21, %v8284_v53  ;;  %v3061_v57 = vadd.f32 1e-05, %v3044_v24  ;;  %5643 = vmatmul.mubr.msk.bf16.gmra.mxu0 %vm11379_vm0, %v3148_v22  ;;  %v3136_v15 = vadd.f32 %v8355_v8, %v3113_v39  ;;  %v11620_v24 = vld [vmem:[#allocation22_spill] sm:$0xff]  ;;  %v11622_v39 = vld [vmem:[#allocation7_spill] sm:$0xff] }
 0xd2d   :  { %5646 = vmatprep.mubr.msk.bf16.mxu0 %vm11380_vm2, %v11517_v5  ;;  %v11621_v22 = vfloor.f32 %v11620_v24 }
 0xd2e   :  { %6023 = vrsqrt.f32 %v3061_v57  ;;  %v3114_v48 = vmul.f32 %v8348_v3, %v3091_v9 }
 0xd2f   :  { %v6018_v50 = vpop.eup %6017  ;;  %v3331_v21 = vmul.f32 65.0, %v11621_v22 }
 0xd30   :  { %v3092_v20 = vmul.f32 %v6018_v50, %v8290_v36  ;;  %v3137_v2 = vadd.f32 %v8355_v8, %v3114_v48 }
 0xd31   :  { %v8420_v48 = vsub.f32 %v11622_v39, %v3331_v21  ;;  %v5149_v39 = vadd.f32 -1.0, %v7690_v45 }
 0xd32   :  { %v3149_v4 = vpack.c.bf16 %v3137_v2, %v3136_v15  ;;  %v3115_v42 = vmul.f32 %v8348_v3, %v3092_v20  ;;  %v11624_v20 = vld [vmem:[#allocation20_spill] sm:$0xff] }
 0xd33   :  { %v6020_v53 = vpop.eup %6019  ;;  %11623 = vst [vmem:[#allocation60_spill] sm:$0xff] %v8420_v48  ;;  %v11625_v15 = vfloor.f32 %v11624_v20  ;;  %vm11401_vm12 = vcmp.ge.f32.partialorder %v8420_v48, 0.5 }
 0xd34   :  { %v3093_v41 = vmul.f32 %v6020_v53, %v8296_v40  ;;  %5647 = vmatmul.mubr.msk.bf16.gmra.mxu0 %vm11379_vm0, %v3149_v4  ;;  %v3138_v32 = vadd.f32 %v8355_v8, %v3115_v42  ;;  %v5134_v42 = vadd.f32 -1.0, %v8420_v48 }
 0xd35   :  { %5650 = vmatprep.mubr.msk.bf16.mxu0 %vm11380_vm2, %v11517_v5  ;;  %v3332_v2 = vmul.f32 65.0, %v11625_v15 }
 0xd36   :  { %v3116_v52 = vmul.f32 %v8348_v3, %v3093_v41 }
 0xd37   :  { %v6022_v49 = vpop.eup %6021 }
 0xd38   :  { %v3094_v36 = vmul.f32 %v6022_v49, %v8302_v61  ;;  %v3139_v28 = vadd.f32 %v8355_v8, %v3116_v52  ;;  %v11626_v49 = vld [vmem:[#allocation12_spill] sm:$0xff] }
 0xd3a   :  { %v3150_v29 = vpack.c.bf16 %v3139_v28, %v3138_v32  ;;  %v3117_v6 = vmul.f32 %v8348_v3, %v3094_v36  ;;  %v8427_v36 = vsub.f32 %v11626_v49, %v3332_v2  ;;  %v5150_v2 = vadd.f32 -1.0, %v7711_v30 }
 0xd3b   :  { %v6024_v60 = vpop.eup %6023  ;;  %v11730_v30 = vmov 0 }
 0xd3c   :  { %v3095_v40 = vmul.f32 %v6024_v60, %v8308_v38  ;;  %5651 = vmatmul.mubr.msk.bf16.gmra.mxu0 %vm11379_vm0, %v3150_v29  ;;  %v3140_v58 = vadd.f32 %v8355_v8, %v3117_v6  ;;  %11627 = vst [vmem:[#allocation50_spill] sm:$0xff] %v8427_v36  ;;  %v11628_v6 = vld [vmem:[#allocation45_spill] sm:$0xff] }
 0xd3d   :  { %5654 = vmatprep.mubr.msk.bf16.mxu0 %vm11380_vm2, %v11517_v5 }
 0xd3e   :  { %v3118_v44 = vmul.f32 %v8348_v3, %v3095_v40 }
 0xd40   :  { %v3141_v61 = vadd.f32 %v8355_v8, %v3118_v44 }
 0xd42   :  { %v3151_v63 = vpack.c.bf16 %v3141_v61, %v3140_v58 }
 0xd44   :  { %5655 = vmatmul.mubr.msk.bf16.gmra.mxu0 %vm11379_vm0, %v3151_v63 }
 0xd45   :  { %5658 = vmatprep.mubr.msk.bf16.mxu0 %vm11380_vm2, %v11517_v5 }
 0xd54   :  { %v3024_v38 = vpop.xlane.xlu1 %3023 }
 0xd55   :  { %v3045_v12 = vmul.f32 0.03125, %v3024_v38 }
 0xd57   :  { %v3062_v17 = vadd.f32 1e-05, %v3045_v12  ;;  %v8436_v12 = vmax.f32 %v5134_v42, 0.0  ;;  %v8463_v42 = vmax.f32 %v5149_v39, 0.0 }
 0xd58   :  { %v3027_v13 = vpop.xlane.xlu0 %3026 }
 0xd59   :  { %6025 = vrsqrt.f32 %v3062_v17  ;;  %v3046_v19 = vmul.f32 0.03125, %v3027_v13  ;;  %v3416_v24 = vadd.f32 0.5, %v8436_v12  ;;  %11634 = vst [vmem:[#allocation51_spill] sm:$0xff] %v8463_v42  ;;  %vm3501_vm11 = vcmp.ge.f32.partialorder %v8436_v12, 8.0 }
 0xd5a   :  { %vm8513_vm14 = vmand %vm11401_vm12, %vm3501_vm11  ;;  %vm3533_vm15 = vcmp.lt.f32.partialorder %v8463_v42, 56.0  ;;  %vm3518_vm1 = vcmp.lt.f32.partialorder %v8436_v12, 56.0 }
 0xd5b   :  { %v3063_v14 = vadd.f32 1e-05, %v3046_v19 }
 0xd5c   :  { %v3030_v23 = vpop.xlane.xlu1 %3029  ;;  %v873_v50 = vpop.permute.xlu0 %872 }
 0xd5d   :  { %6027 = vrsqrt.f32 %v3063_v14  ;;  %v3047_v46 = vmul.f32 0.03125, %v3030_v23  ;;  %v11630_v23 = vld [vmem:[#allocation13_spill] sm:$0xff] }
 0xd5f   :  { %v3064_v33 = vadd.f32 1e-05, %v3047_v46 }
 0xd60   :  { %v875_v16 = vpop.permute.xlu1 %874  ;;  %v863_v60 = vpop.permute.xlu0 %862 }
 0xd61   :  { %6029 = vrsqrt.f32 %v3064_v33  ;;  %v877_v29 = vsel %vm876_vm9, %v873_v50, %v875_v16  ;;  %vm11402_vm9 = vcmp.ge.f32.partialorder %v8427_v36, 0.5 }
 0xd64   :  { %v881_v9 = vpop.permute.xlu1 %880 }
 0xd66   :  { %v6026_v57 = vpop.eup %6025 }
 0xd67   :  { %v3096_v4 = vmul.f32 %v6026_v57, %v8315_v56  ;;  %v11629_v56 = vfloor.f32 %v11628_v6  ;;  %v3433_v57 = vmul.f32 0.125, %v3416_v24  ;;  %v8473_v6 = vmax.f32 %v5150_v2, 0.0 }
 0xd68   :  { %v883_v53 = vpop.permute.xlu1 %882 }
 0xd69   :  { %v885_v52 = vsel %vm884_vm8, %v881_v9, %v883_v53  ;;  %v3119_v28 = vmul.f32 %v8348_v3, %v3096_v4  ;;  %v3333_v44 = vmul.f32 65.0, %v11629_v56  ;;  %v5148_v9 = vadd.f32 -1.0, %v7606_v37  ;;  %v11633_v53 = vld [vmem:[#allocation26_spill] sm:$0xff]  ;;  %11637 = vst [vmem:[#allocation63_spill] sm:$0xff] %v8473_v6  ;;  %vm8541_vm8 = vmand %vm11382_vm6, %vm3533_vm15 }
 0xd6a   :  { %v6028_v41 = vpop.eup %6027  ;;  %v887_v58 = vsel %vm11383_vm7, %v877_v29, %v885_v52  ;;  %v3450_v4 = vfloor.f32 %v3433_v57  ;;  %v11635_v52 = vld [vmem:[#allocation27_spill] sm:$0xff]  ;;  %v11636_v29 = vld [vmem:[#allocation28_spill] sm:$0xff]  ;;  %v8605_v35 = vsel %vm8541_vm8, 1.0, %v11517_v5  ;;  %v4317_v37 = vsub.s32 6, %v11651_v54 }
 0xd6b   :  { %v3097_v32 = vmul.f32 %v6028_v41, %v8320_v7  ;;  %v5135_v7 = vadd.f32 -1.0, %v8427_v36  ;;  %v3142_v19 = vadd.f32 %v8355_v8, %v3119_v28  ;;  %v8443_v46 = vsub.f32 %v11630_v23, %v3333_v44  ;;  %v5813_v28 = vld [vmem:[%s11273_s15 + $0x18] sm:$0xff]   ;;  %11661 = vst [vmem:[#allocation65_spill] sm:$0xff] %v8605_v35 }
 0xd6c   :  { %v867_v40 = vpop.permute.xlu1 %866  ;;  %v8459_v15 = vmax.f32 %v5148_v9, 0.0  ;;  %v5137_v41 = vadd.f32 -1.0, %v11633_v53  ;;  %v5138_v49 = vadd.f32 -1.0, %v11635_v52  ;;  %v3467_v56 = vmul.f32 8.0, %v3450_v4  ;;  %5667 = vmatpush3.bf16.msra.mxu1 %v5813_v28  ;;  %v11641_v23 = vld [vmem:[#allocation32_spill] sm:$0xff]  ;;  %v11642_v4 = vld [vmem:[#allocation66_spill] sm:$0xff] }
 0xd6d   :  { %v870_v61 = vsel %vm11383_vm7, %v863_v60, %v867_v40  ;;  %v3120_v63 = vmul.f32 %v8348_v3, %v3097_v32  ;;  %11631 = vst [vmem:[#allocation42_spill] sm:$0xff] %v8443_v46  ;;  %v8447_v22 = vmax.f32 %v5135_v7, 0.0  ;;  %v5139_v60 = vadd.f32 -1.0, %v11636_v29  ;;  %5668 = vmatprep.subr.bf16.mxu1 %v11517_v5 }
 0xd6e   :  { %v6030_v38 = vpop.eup %6029  ;;  %v889_v17 = vsel %vm888_vm10, %v870_v61, %v887_v58  ;;  %11632 = vst [vmem:[#allocation43_spill] sm:$0xff] %v8459_v15  ;;  %v3430_v40 = vadd.f32 0.5, %v8459_v15  ;;  %v8475_v44 = vmax.f32 %v5137_v41, 0.0  ;;  %v3431_v58 = vadd.f32 0.5, %v8463_v42 }
 0xd6f   :  { %v3098_v13 = vmul.f32 %v6030_v38, %v8326_v10  ;;  %v3143_v14 = vadd.f32 %v8355_v8, %v3120_v63  ;;  %890 = vst [vmem:[#allocation3] sm:$0x3] %v889_v17  ;;  %v5136_v10 = vadd.f32 -1.0, %v8443_v46  ;;  %v11638_v63 = vld [vmem:[#allocation29_spill] sm:$0xff]  ;;  %v11639_v17 = vld [vmem:[#allocation30_spill] sm:$0xff]  ;;  %v8485_v24 = vmax.f32 %v5139_v60, 0.0 }
 0xd70   :  { %v5140_v38 = vadd.f32 -1.0, %v11638_v63  ;;  %v5141_v7 = vadd.f32 -1.0, %v11639_v17  ;;  %v8489_v9 = vsub.f32 %v8436_v12, %v3467_v56  ;;  %v3448_v57 = vmul.f32 0.125, %v3431_v58  ;;  %v11644_v56 = vld [vmem:[#allocation68_spill] sm:$0xff] }
 0xd71   :  { %v3152_v33 = vpack.c.bf16 %v3143_v14, %v3142_v19  ;;  %v3121_v16 = vmul.f32 %v8348_v3, %v3098_v13  ;;  %v3417_v3 = vadd.f32 0.5, %v8447_v22  ;;  %v8457_v50 = vmax.f32 %v5136_v10, 0.0  ;;  %v11640_v19 = vld [vmem:[#allocation31_spill] sm:$0xff] }
 0xd72   :  { %v8481_v13 = vmax.f32 %v5138_v49, 0.0  ;;  %v5142_v14 = vadd.f32 -1.0, %v11640_v19  ;;  %v3447_v10 = vmul.f32 0.125, %v3430_v40  ;;  %v8495_v2 = vmax.f32 %v5141_v7, 0.0  ;;  %v5814_v40 = vld [vmem:[%s11273_s15 + $0x10] sm:$0xff]  }
 0xd73   :  { %5659 = vmatmul.mubr.msk.bf16.gmra.mxu0 %vm11379_vm0, %v3152_v33  ;;  %v3144_v21 = vadd.f32 %v8355_v8, %v3121_v16  ;;  %v3434_v8 = vmul.f32 0.125, %v3417_v3  ;;  %v3418_v32 = vadd.f32 0.5, %v8457_v50  ;;  %v5143_v33 = vadd.f32 -1.0, %v11641_v23  ;;  %5669 = vmatpush3.bf16.msra.mxu1 %v5814_v40 }
 0xd74   :  { %5662 = vmatprep.mubr.msk.bf16.mxu0 %vm11380_vm2, %v11517_v5  ;;  %v3419_v3 = vadd.f32 0.5, %v8475_v44  ;;  %v5144_v41 = vadd.f32 -1.0, %v11642_v4  ;;  %v5146_v58 = vadd.f32 -1.0, %v11644_v56  ;;  %vm11395_vm13 = vcmp.ge.f32.partialorder %v8489_v9, 1.0  ;;  %5670 = vmatprep.subr.bf16.mxu1 %v11517_v5 }
 0xd75   :  { %v3153_v20 = vpack.c.bf16 %v3144_v21, %v3144_v21  ;;  %v3451_v61 = vfloor.f32 %v3434_v8  ;;  %v3435_v16 = vmul.f32 0.125, %v3418_v32  ;;  %v3432_v21 = vadd.f32 0.5, %v8473_v6  ;;  %v11643_v8 = vld [vmem:[#allocation67_spill] sm:$0xff]  ;;  %vm3588_vm5 = vmand %vm8513_vm14, %vm11395_vm13 }
 0xd76   :  { %v5145_v49 = vadd.f32 -1.0, %v11643_v8  ;;  %v8499_v32 = vmax.f32 %v5142_v14, 0.0  ;;  %v8501_v28 = vmax.f32 %v5143_v33, 0.0  ;;  %v3465_v14 = vfloor.f32 %v3448_v57 }
 0xd77   :  { %v3468_v39 = vmul.f32 8.0, %v3451_v61  ;;  %v3452_v60 = vfloor.f32 %v3435_v16  ;;  %v3464_v61 = vfloor.f32 %v3447_v10  ;;  %v3436_v16 = vmul.f32 0.125, %v3419_v3 }
 0xd78   :  { %v8521_v10 = vmax.f32 %v5144_v41, 0.0  ;;  %vm3502_vm3 = vcmp.ge.f32.partialorder %v8447_v22, 8.0  ;;  %vm11396_vm4 = vcmp.lt.f32.partialorder %v8489_v9, 7.0  ;;  %v8535_v3 = vmax.f32 %v5146_v58, 0.0 }
 0xd79   :  { %v8519_v33 = vsub.f32 %v8447_v22, %v3468_v39  ;;  %v3469_v57 = vmul.f32 8.0, %v3452_v60  ;;  %v3420_v39 = vadd.f32 0.5, %v8481_v13  ;;  %v3481_v41 = vmul.f32 8.0, %v3464_v61  ;;  %vm8552_vm11 = vmand %vm11402_vm9, %vm3502_vm3  ;;  %v5815_v61 = vld [vmem:[%s11273_s15 + $0x8] sm:$0xff]  }
 0xd7a   :  { %v3482_v51 = vmul.f32 8.0, %v3465_v14  ;;  %v3453_v58 = vfloor.f32 %v3436_v16  ;;  %v5168_v14 = vsel %vm8513_vm14, 1.0, %v11517_v5  ;;  %vm8568_vm15 = vmand %vm8513_vm14, %vm11396_vm4  ;;  %v3639_v16 = vld [vmem:[#allocation2 + $0x7] sm:$0xff]  ;;  %v3421_v27 = vadd.f32 0.5, %v8485_v24  ;;  %5671 = vmatpush3.bf16.msra.mxu1 %v5815_v61 }
 0xd7b   :  { %5663 = vmatmul.mubr.msk.bf16.gmra.mxu0 %vm11379_vm0, %v3153_v20  ;;  %v8493_v20 = vmax.f32 %v5140_v38, 0.0  ;;  %v3449_v38 = vmul.f32 0.125, %v3432_v21  ;;  %v8523_v21 = vmax.f32 %v5145_v49, 0.0  ;;  %v11648_v49 = vmov 0  ;;  %5672 = vmatprep.subr.bf16.mxu1 %v11517_v5 }
 0xd7c   :  { %v11649_v49 = vsel %vm8541_vm8, 4294967295, %v11648_v49  ;;  %vm11394_vm10 = vcmp.ge.f32.partialorder %v8519_v33, 1.0  ;;  %vm11389_vm3 = vcmp.lt.f32.partialorder %v8519_v33, 7.0  ;;  %v8583_v7 = vsub.f32 %v8457_v50, %v3469_v57 }
 0xd7d   :  { %11650 = vst [vmem:[#allocation46_spill] sm:$0xff] %v11649_v49  ;;  %v3466_v40 = vfloor.f32 %v3449_v38  ;;  %v5151_v38 = vsel %vm3588_vm5, 1.0, %v11517_v5  ;;  %vm8577_vm5 = vmand %vm11401_vm12, %vm11395_vm13  ;;  %v3437_v55 = vmul.f32 0.125, %v3420_v39  ;;  %vm11397_vm0 = vcmp.ge.f32.partialorder %v8443_v46, 0.5  ;;  %v8610_v39 = vld [vmem:[%s11271_s13] sm:$0xff] }
 0xd7e   :  { %vm8592_vm14 = vmand %vm8552_vm11, %vm11394_vm10  ;;  %vm3503_vm2 = vcmp.ge.f32.partialorder %v8457_v50, 8.0  ;;  %v8600_v57 = vsub.f32 %v8459_v15, %v3481_v41  ;;  %v3470_v59 = vmul.f32 8.0, %v3453_v58  ;;  %v8630_v62 = vsub.f32 %v8463_v42, %v3482_v51 }
 0xd7f   :  { %v3483_v1 = vmul.f32 8.0, %v3466_v40  ;;  %v4084_v40 = vsub.s32 4, %v11651_v54  ;;  %vm8617_vm6 = vmand %vm8552_vm11, %vm11389_vm3  ;;  %v3656_v47 = vmul.f32 %v5151_v38, %v3639_v16  ;;  %v8633_v35 = vrot.slane %v8610_v39, %v3675_v26  ;;  %v5816_v16 = vld [vmem:[%s11273_s15] sm:$0xff]  }
 0xd80   :  { %11660 = vst [vmem:[#allocation52_spill] sm:$0xff] %v8600_v57  ;;  %vm8625_vm7 = vmand %vm11402_vm9, %vm11394_vm10  ;;  %v3745_v49 = vmul.f32 %v5168_v14, %v3728_v25  ;;  %v8644_v45 = vrot.slane %v8610_v39, %v3764_v11  ;;  %v11670_v26 = vmov 0  ;;  %v3454_v25 = vfloor.f32 %v3437_v55  ;;  %5673 = vmatpush3.bf16.msra.mxu1 %v5816_v16 }
 0xd81   :  { %11666 = vst [vmem:[#allocation48_spill] sm:$0xff] %v8630_v62  ;;  %vm8639_vm3 = vmand %vm11401_vm12, %vm3518_vm1  ;;  %v3438_v51 = vmul.f32 0.125, %v3421_v27  ;;  %v8656_v12 = vsub.f32 %v8473_v6, %v3483_v1  ;;  %vm3519_vm10 = vcmp.lt.f32.partialorder %v8447_v22, 56.0  ;;  %v3422_v58 = vadd.f32 0.5, %v8493_v20 }
 0xd82   :  { %11669 = vst [vmem:[#allocation53_spill] sm:$0xff] %v8644_v45  ;;  %vm8651_vm13 = vmand %vm11397_vm0, %vm3503_vm2  ;;  %vm11412_vm2 = vcmp.lt.f32.partialorder %v8583_v7, 7.0  ;;  %v8672_v27 = vsel %vm11401_vm12, 1.0, %v11517_v5  ;;  %v8675_v1 = vrot.slane %v8610_v39, %v4084_v40  ;;  %v8680_v55 = vsel %vm11402_vm9, 1.0, %v11517_v5 }
 0xd83   :  { %v11671_v26 = vsel %vm8651_vm13, 4294967295, %v11670_v26  ;;  %11672 = vst [vmem:[#allocation54_spill] sm:$0xff] %v8656_v12  ;;  %vm8662_vm1 = vmand %vm11401_vm12, %vm11396_vm4  ;;  %vm11677_vm4 = vcmp.ge.f32.partialorder %v8489_v9, 1.0  ;;  %v8691_v14 = vsub.f32 %v8475_v44, %v3470_v59  ;;  %v8699_v40 = vsel %vm8568_vm15, 1.0, %v11517_v5 }
 0xd84   :  { %11675 = vst [vmem:[#allocation57_spill] sm:$0xff] %v8675_v1  ;;  %11676 = vst [vmem:[#allocation38_spill] sm:$0xff] %v8680_v55  ;;  %v3887_v12 = vsub.s32 2, %v11651_v54  ;;  %v3995_v6 = vsub.s32 3, %v11651_v54  ;;  %v11681_v59 = vmov 0  ;;  %v3677_v62 = vmul.f32 %v8633_v35, %v3656_v47 }
 0xd85   :  { %vm8686_vm0 = vmand %vm8639_vm3, %vm11677_vm4  ;;  %vm11680_vm4 = vcmp.ge.f32.partialorder %v8583_v7, 1.0  ;;  %v3766_v18 = vmul.f32 %v8644_v45, %v3745_v49  ;;  %v11683_v42 = vmov 0  ;;  %v3471_v57 = vmul.f32 8.0, %v3454_v25 }
 0xd86   :  { %vm8707_vm12 = vmand %vm8651_vm13, %vm11680_vm4  ;;  %vm11685_vm4 = vcmp.ge.f32.partialorder %v8427_v36, 0.5  ;;  %v3455_v47 = vfloor.f32 %v3438_v51  ;;  %v8733_v49 = vsel %vm8577_vm5, 1.0, %v11517_v5  ;;  %v8738_v15 = vsel %vm8552_vm11, 1.0, %v11517_v5 }
 0xd87   :  { %v11682_v59 = vsel %vm8707_vm12, 4294967295, %v11681_v59  ;;  %vm8718_vm15 = vmand %vm8651_vm13, %vm11412_vm2  ;;  %vm11688_vm2 = vcmp.ge.f32.partialorder %v8583_v7, 1.0  ;;  %vm11417_vm9 = vcmp.ge.f32.partialorder %v11633_v53, 0.5  ;;  %v3439_v25 = vmul.f32 0.125, %v3422_v58 }
 0xd88   :  { %v11684_v42 = vsel %vm8718_vm15, 4294967295, %v11683_v42  ;;  %vm8726_vm8 = vmand %vm11685_vm4, %vm3519_vm10  ;;  %vm11689_vm10 = vcmp.ge.f32.partialorder %v8443_v46, 0.5  ;;  %vm11421_vm5 = vcmp.ge.f32.partialorder %v8691_v14, 1.0  ;;  %vm11420_vm13 = vcmp.lt.f32.partialorder %v8691_v14, 7.0 }
 0xd89   :  { %vm8744_vm4 = vmand %vm11689_vm10, %vm11688_vm2  ;;  %vm11692_vm11 = vcmp.ge.f32.partialorder %v8475_v44, 8.0  ;;  %v3423_v60 = vadd.f32 0.5, %v8495_v2  ;;  %v8762_v51 = vrot.slane %v8610_v39, %v3887_v12  ;;  %v8765_v58 = vrot.slane %v8610_v39, %v3995_v6 }
 0xd8a   :  { %vm8756_vm12 = vmand %vm11417_vm9, %vm11692_vm11  ;;  %v4192_v16 = vsub.s32 5, %v11651_v54  ;;  %vm11696_vm2 = vcmp.lt.f32.partialorder %v8519_v33, 7.0  ;;  %vm11697_vm10 = vcmp.ge.f32.partialorder %v8427_v36, 0.5  ;;  %v8777_v1 = vadd.f32 %v3766_v18, %v3677_v62 }
 0xd8b   :  { %11695 = vst [vmem:[#allocation40_spill] sm:$0xff] %v8765_v58  ;;  %vm8773_vm11 = vmand %vm11697_vm10, %vm11696_vm2  ;;  %v8782_v12 = vsel %vm8592_vm14, 1.0, %v11517_v5  ;;  %vm11701_vm9 = vcmp.ge.f32.partialorder %v8519_v33, 1.0  ;;  %vm11704_vm2 = vcmp.lt.f32.partialorder %v8489_v9, 7.0  ;;  %v8801_v0 = vsub.f32 %v8481_v13, %v3471_v57 }
 0xd8c   :  { %11700 = vst [vmem:[#allocation61_spill] sm:$0xff] %v8777_v1  ;;  %vm8788_vm15 = vmand %vm8726_vm8, %vm11701_vm9  ;;  %v3472_v18 = vmul.f32 8.0, %v3455_v47  ;;  %v8806_v36 = vsel %vm8617_vm6, 1.0, %v11517_v5  ;;  %v8811_v58 = vsel %vm8625_vm7, 1.0, %v11517_v5  ;;  %v11709_v9 = vmov 0 }
 0xd8d   :  { %vm8796_vm10 = vmand %vm8639_vm3, %vm11704_vm2  ;;  %11707 = vst [vmem:[#allocation41_spill] sm:$0xff] %v8806_v36  ;;  %v11711_v57 = vmov 0  ;;  %vm11713_vm6 = vcmp.lt.f32.partialorder %v8457_v50, 56.0  ;;  %vm11714_vm7 = vcmp.ge.f32.partialorder %v8443_v46, 0.5  ;;  %v3456_v41 = vfloor.f32 %v3439_v25 }
 0xd8e   :  { %11708 = vst [vmem:[#allocation62_spill] sm:$0xff] %v8811_v58  ;;  %vm8817_vm9 = vmand %vm8756_vm12, %vm11421_vm5  ;;  %v3424_v47 = vadd.f32 0.5, %v8499_v32  ;;  %v8841_v58 = vsel %vm8662_vm1, 1.0, %v11517_v5  ;;  %v11719_v50 = vmov 0  ;;  %v3440_v25 = vmul.f32 0.125, %v3423_v60 }
 0xd8f   :  { %v11710_v9 = vsel %vm8817_vm9, 4294967295, %v11709_v9  ;;  %vm8825_vm14 = vmand %vm8756_vm12, %vm11420_vm13  ;;  %11717 = vst [vmem:[#allocation44_spill] sm:$0xff] %v8841_v58  ;;  %vm11718_vm13 = vcmp.ge.f32.partialorder %v11633_v53, 0.5  ;;  %v8854_v36 = vrot.slane %v8610_v39, %v4192_v16  ;;  %v8857_v11 = vrot.slane %v8610_v39, %v4317_v37 }
 0xd90   :  { %v11712_v57 = vsel %vm8825_vm14, 4294967295, %v11711_v57  ;;  %vm8833_vm2 = vmand %vm11714_vm7, %vm11713_vm6  ;;  %vm3505_vm7 = vcmp.ge.f32.partialorder %v8481_v13, 8.0  ;;  %v8862_v58 = vsel %vm8639_vm3, 1.0, %v11517_v5  ;;  %vm11725_vm1 = vcmp.ge.f32.partialorder %v8443_v46, 0.5 }
 0xd91   :  { %vm8847_vm14 = vmand %vm11718_vm13, %vm11421_vm5  ;;  %11721 = vst [vmem:[#allocation64_spill] sm:$0xff] %v8854_v36  ;;  %vm11724_vm13 = vcmp.lt.f32.partialorder %v8583_v7, 7.0  ;;  %v11726_v45 = vmov 0  ;;  %v8876_v37 = vsel %vm8686_vm0, 1.0, %v11517_v5  ;;  %vm11729_vm6 = vcmp.ge.f32.partialorder %v8583_v7, 1.0 }
 0xd92   :  { %v11720_v50 = vsel %vm8847_vm14, 4294967295, %v11719_v50  ;;  %11722 = vst [vmem:[#allocation47_spill] sm:$0xff] %v8857_v11  ;;  %11723 = vst [vmem:[#allocation56_spill] sm:$0xff] %v8862_v58  ;;  %vm3521_vm14 = vcmp.lt.f32.partialorder %v8475_v44, 56.0  ;;  %v8889_v60 = vsub.f32 %v8485_v24, %v3472_v18  ;;  %vm11732_vm0 = vcmp.ge.f32.partialorder %v11635_v52, 0.5 }
 0xd93   :  { %vm8869_vm5 = vmand %vm11725_vm1, %vm11724_vm13  ;;  %11728 = vst [vmem:[#allocation58_spill] sm:$0xff] %v8876_v37  ;;  %v11733_v38 = vmov 0  ;;  %v3473_v16 = vmul.f32 8.0, %v3456_v41  ;;  %v3441_v1 = vmul.f32 0.125, %v3424_v47  ;;  %v3425_v11 = vadd.f32 0.5, %v8501_v28 }
 0xd94   :  { %v11727_v45 = vsel %vm8869_vm5, 4294967295, %v11726_v45  ;;  %vm8882_vm3 = vmand %vm8833_vm2, %vm11729_vm6  ;;  %vm11735_vm6 = vnez %v11682_v59  ;;  %vm11736_vm13 = vnez %v11671_v26  ;;  %vm11738_vm1 = vcmp.lt.f32.partialorder %v8519_v33, 7.0 }
 0xd95   :  { %v11731_v30 = vsel %vm8882_vm3, 4294967295, %v11730_v30  ;;  %vm8894_vm5 = vmand %vm11732_vm0, %vm3505_vm7  ;;  %v8902_v58 = vsel %vm11735_vm6, 1.0, %v11517_v5  ;;  %v8907_v18 = vsel %vm11736_vm13, 1.0, %v11517_v5  ;;  %v11739_v36 = vmov 0 }
 0xd96   :  { %v11734_v38 = vsel %vm8894_vm5, 4294967295, %v11733_v38  ;;  %11737 = vst [vmem:[#allocation11_spill] sm:$0xff] %v8907_v18  ;;  %vm8913_vm7 = vmand %vm8726_vm8, %vm11738_vm1  ;;  %v3457_v41 = vfloor.f32 %v3440_v25  ;;  %vm11741_vm6 = vnez %v11684_v42  ;;  %v8926_v26 = vsel %vm8744_vm4, 1.0, %v11517_v5 }
 0xd97   :  { %v11740_v36 = vsel %vm8913_vm7, 4294967295, %v11739_v36  ;;  %v8921_v59 = vsel %vm11741_vm6, 1.0, %v11517_v5  ;;  %11743 = vst [vmem:[#allocation8_spill] sm:$0xff] %v8926_v26  ;;  %vm11744_vm13 = vcmp.ge.f32.partialorder %v8443_v46, 0.5  ;;  %vm11746_vm1 = vcmp.ge.f32.partialorder %v11633_v53, 0.5 }
 0xd98   :  { %11742 = vst [vmem:[#allocation10_spill] sm:$0xff] %v8921_v59  ;;  %v8931_v33 = vsel %vm11744_vm13, 1.0, %v11517_v5  ;;  %v8936_v47 = vsel %vm11746_vm1, 1.0, %v11517_v5  ;;  %vm11748_vm6 = vmmov %vm11746_vm1  ;;  %vm11751_vm4 = vcmp.ge.f32.partialorder %v8801_v0, 1.0  ;;  %v11752_v22 = vmov 0 }
 0xd99   :  { %11745 = vst [vmem:[#allocation9_spill] sm:$0xff] %v8931_v33  ;;  %11747 = vst [vmem:[#allocation22_spill] sm:$0xff] %v8936_v47  ;;  %vm11754_vm13 = vcmp.lt.f32.partialorder %v8801_v0, 7.0  ;;  %v11755_v44 = vmov 0  ;;  %v11759_v25 = vmov 0  ;;  %vm11432_vm9 = vcmp.ge.f32.partialorder %v8889_v60, 1.0 }
 0xd9a   :  { %vm8942_vm0 = vmand %vm11748_vm6, %vm3521_vm14  ;;  %vm11758_vm6 = vcmp.ge.f32.partialorder %v11635_v52, 0.5  ;;  %v3426_v46 = vadd.f32 0.5, %v8521_v10  ;;  %v11766_v59 = vmov 0  ;;  %v8992_v47 = vsub.f32 %v8493_v20, %v3473_v16 }
 0xd9b   :  { %vm8950_vm7 = vmand %vm8894_vm5, %vm11751_vm4  ;;  %v3458_v33 = vfloor.f32 %v3441_v1  ;;  %v3442_v37 = vmul.f32 0.125, %v3425_v11  ;;  %v3474_v16 = vmul.f32 8.0, %v3457_v41  ;;  %v9012_v1 = vsel %vm8788_vm15, 1.0, %v11517_v5 }
 0xd9c   :  { %v11753_v22 = vsel %vm8950_vm7, 4294967295, %v11752_v22  ;;  %vm8958_vm1 = vmand %vm8894_vm5, %vm11754_vm13  ;;  %vm3522_vm7 = vcmp.lt.f32.partialorder %v8481_v13, 56.0  ;;  %vm11761_vm13 = vcmp.lt.f32.partialorder %v8691_v14, 7.0  ;;  %v9017_v55 = vsel %vm8796_vm10, 1.0, %v11517_v5 }
 0xd9d   :  { %v11756_v44 = vsel %vm8958_vm1, 4294967295, %v11755_v44  ;;  %vm11757_vm14 = vmmov %vm11751_vm4  ;;  %vm11429_vm4 = vcmp.ge.f32.partialorder %v11636_v29, 0.5  ;;  %vm11762_vm1 = vcmp.ge.f32.partialorder %v11633_v53, 0.5  ;;  %v8997_v53 = vsel %vm8773_vm11, 1.0, %v11517_v5 }
 0xd9e   :  { %vm8966_vm3 = vmand %vm11758_vm6, %vm11757_vm14  ;;  %vm11430_vm14 = vcmp.lt.f32.partialorder %v8889_v60, 7.0  ;;  %vm11765_vm6 = vcmp.ge.f32.partialorder %v8485_v24, 8.0  ;;  %11768 = vst [vmem:[#allocation7_spill] sm:$0xff] %v8997_v53  ;;  %v9022_v11 = vsel %vm8756_vm12, 1.0, %v11517_v5  ;;  %v9027_v53 = vsel %vm8726_vm8, 1.0, %v11517_v5 }
 0xd9f   :  { %v11760_v25 = vsel %vm8966_vm3, 4294967295, %v11759_v25  ;;  %vm8978_vm5 = vmand %vm11762_vm1, %vm11761_vm13  ;;  %vm11769_vm1 = vcmp.ge.f32.partialorder %v8691_v14, 1.0  ;;  %11772 = vst [vmem:[#allocation20_spill] sm:$0xff] %v9022_v11  ;;  %vm11774_vm11 = vcmp.lt.f32.partialorder %v8583_v7, 7.0  ;;  %vm11777_vm10 = vnez %v11710_v9 }
 0xda0   :  { %vm8987_vm3 = vmand %vm11429_vm4, %vm11765_vm6  ;;  %11773 = vst [vmem:[#allocation12_spill] sm:$0xff] %v9027_v53  ;;  %v9040_v62 = vsel %vm11777_vm10, 1.0, %v11517_v5  ;;  %vm11779_vm12 = vnez %v11712_v57  ;;  %vm11781_vm8 = vnez %v11720_v50  ;;  %v11785_v9 = vmov 0 }
 0xda1   :  { %v11767_v59 = vsel %vm8987_vm3, 4294967295, %v11766_v59  ;;  %vm9003_vm13 = vmand %vm8942_vm0, %vm11769_vm1  ;;  %11778 = vst [vmem:[#allocation45_spill] sm:$0xff] %v9040_v62  ;;  %v9045_v34 = vsel %vm11779_vm12, 1.0, %v11517_v5  ;;  %v9050_v48 = vsel %vm11781_vm8, 1.0, %v11517_v5  ;;  %vm11787_vm10 = vcmp.ge.f32.partialorder %v11635_v52, 0.5 }
 0xda2   :  { %vm9033_vm15 = vmand %vm8833_vm2, %vm11774_vm11  ;;  %11780 = vst [vmem:[#allocation13_spill] sm:$0xff] %v9045_v34  ;;  %v3443_v50 = vmul.f32 0.125, %v3426_v46  ;;  %vm11790_vm8 = vnez %v11727_v45  ;;  %v11797_v46 = vmov 0  ;;  %v3475_v45 = vmul.f32 8.0, %v3458_v33 }
 0xda3   :  { %11782 = vst [vmem:[#allocation6_spill] sm:$0xff] %v9050_v48  ;;  %vm9056_vm1 = vmand %vm8987_vm3, %vm11432_vm9  ;;  %v9079_v41 = vsel %vm11790_vm8, 1.0, %v11517_v5  ;;  %v11793_v48 = vmov 0  ;;  %v3459_v13 = vfloor.f32 %v3442_v37  ;;  %vm11799_vm8 = vcmp.lt.f32.partialorder %v8801_v0, 7.0 }
 0xda4   :  { %vm9064_vm11 = vmand %vm8987_vm3, %vm11430_vm14  ;;  %11791 = vst [vmem:[#allocation71_spill] sm:$0xff] %v9079_v41  ;;  %vm11792_vm14 = vcmp.ge.f32.partialorder %v11636_v29, 0.5  ;;  %vm11800_vm3 = vcmp.ge.f32.partialorder %v11635_v52, 0.5  ;;  %v11801_v41 = vmov 0  ;;  %v9109_v34 = vsub.f32 %v8495_v2, %v3474_v16 }
 0xda5   :  { %v11786_v9 = vsel %vm9064_vm11, 4294967295, %v11785_v9  ;;  %vm9072_vm12 = vmand %vm11787_vm10, %vm3522_vm7  ;;  %vm11795_vm7 = vcmp.ge.f32.partialorder %v8493_v20, 8.0  ;;  %vm11796_vm10 = vcmp.ge.f32.partialorder %v11638_v63, 0.5  ;;  %v3427_v53 = vadd.f32 0.5, %v8523_v21 }
 0xda6   :  { %vm9085_vm6 = vmand %vm11792_vm14, %vm11432_vm9  ;;  %v9120_v33 = vsel %vm11800_vm3, 1.0, %v11517_v5  ;;  %v9125_v11 = vsel %vm8833_vm2, 1.0, %v11517_v5  ;;  %v11808_v16 = vmov 0  ;;  %vm11813_vm2 = vnez %v11740_v36 }
 0xda7   :  { %v11794_v48 = vsel %vm9085_vm6, 4294967295, %v11793_v48  ;;  %vm9094_vm11 = vmand %vm11796_vm10, %vm11795_vm7  ;;  %vm11803_vm7 = vnez %v11731_v30  ;;  %11805 = vst [vmem:[#allocation73_spill] sm:$0xff] %v9120_v33  ;;  %vm11807_vm10 = vcmp.ge.f32.partialorder %v8801_v0, 1.0  ;;  %v11811_v30 = vmov 0 }
 0xda8   :  { %v11798_v46 = vsel %vm9094_vm11, 4294967295, %v11797_v46  ;;  %vm9102_vm14 = vmand %vm11800_vm3, %vm11799_vm8  ;;  %v9115_v37 = vsel %vm11803_vm7, 1.0, %v11517_v5  ;;  %11806 = vst [vmem:[#allocation74_spill] sm:$0xff] %v9125_v11  ;;  %vm11810_vm7 = vcmp.lt.f32.partialorder %v8691_v14, 7.0  ;;  %v9147_v61 = vsel %vm11813_vm2, 1.0, %v11517_v5 }
 0xda9   :  { %v11802_v41 = vsel %vm9102_vm14, 4294967295, %v11801_v41  ;;  %11804 = vst [vmem:[#allocation72_spill] sm:$0xff] %v9115_v37  ;;  %vm9131_vm8 = vmand %vm9072_vm12, %vm11807_vm10  ;;  %vm11815_vm10 = vnez %v11734_v38  ;;  %vm11817_vm4 = vcmp.ge.f32.partialorder %v8992_v47, 1.0  ;;  %v11818_v14 = vmov 0 }
 0xdaa   :  { %v11809_v16 = vsel %vm9131_vm8, 4294967295, %v11808_v16  ;;  %vm9139_vm9 = vmand %vm8942_vm0, %vm11810_vm7  ;;  %11814 = vst [vmem:[#allocation75_spill] sm:$0xff] %v9147_v61  ;;  %v9152_v52 = vsel %vm11815_vm10, 1.0, %v11517_v5  ;;  %v3460_v33 = vfloor.f32 %v3443_v50  ;;  %vm11820_vm2 = vcmp.ge.f32.partialorder %v11636_v29, 0.5 }
 0xdab   :  { %v11812_v30 = vsel %vm9139_vm9, 4294967295, %v11811_v30  ;;  %11816 = vst [vmem:[#allocation76_spill] sm:$0xff] %v9152_v52  ;;  %vm9158_vm7 = vmand %vm9094_vm11, %vm11817_vm4  ;;  %v9166_v36 = vsel %vm11820_vm2, 1.0, %v11517_v5  ;;  %vm11822_vm9 = vcmp.lt.f32.partialorder %v8992_v47, 7.0  ;;  %v11823_v38 = vmov 0 }
 0xdac   :  { %v11819_v14 = vsel %vm9158_vm7, 4294967295, %v11818_v14  ;;  %11821 = vst [vmem:[#allocation77_spill] sm:$0xff] %v9166_v36  ;;  %vm9172_vm10 = vmand %vm9094_vm11, %vm11822_vm9  ;;  %vm11825_vm4 = vcmp.lt.f32.partialorder %v8485_v24, 56.0  ;;  %vm11435_vm3 = vcmp.ge.f32.partialorder %v11639_v17, 0.5  ;;  %v9186_v50 = vsub.f32 %v8499_v32, %v3475_v45 }
 0xdad   :  { %v11824_v38 = vsel %vm9172_vm10, 4294967295, %v11823_v38  ;;  %vm11826_vm7 = vmmov %vm11820_vm2  ;;  %v3476_v36 = vmul.f32 8.0, %v3459_v13  ;;  %vm11829_vm2 = vcmp.ge.f32.partialorder %v8992_v47, 1.0  ;;  %vm11830_vm9 = vcmp.ge.f32.partialorder %v11638_v63, 0.5 }
 0xdae   :  { %vm9180_vm8 = vmand %vm11826_vm7, %vm11825_vm4  ;;  %vm11833_vm4 = vcmp.ge.f32.partialorder %v8495_v2, 8.0  ;;  %v11834_v24 = vmov 0  ;;  %v3444_v45 = vmul.f32 0.125, %v3427_v53  ;;  %vm11840_vm7 = vnez %v11760_v25 }
 0xdaf   :  { %vm9192_vm11 = vmand %vm11830_vm9, %vm11829_vm2  ;;  %vm11836_vm2 = vnez %v11753_v22  ;;  %vm11838_vm9 = vnez %v11756_v44  ;;  %v9220_v37 = vsel %vm11840_vm7, 1.0, %v11517_v5  ;;  %v9225_v62 = vsel %vm8942_vm0, 1.0, %v11517_v5 }
 0xdb0   :  { %vm9202_vm14 = vmand %vm11435_vm3, %vm11833_vm4  ;;  %v9210_v13 = vsel %vm11836_vm2, 1.0, %v11517_v5  ;;  %v9215_v61 = vsel %vm11838_vm9, 1.0, %v11517_v5  ;;  %11841 = vst [vmem:[#allocation80_spill] sm:$0xff] %v9220_v37  ;;  %vm11843_vm4 = vcmp.lt.f32.partialorder %v8889_v60, 7.0  ;;  %vm11844_vm2 = vcmp.ge.f32.partialorder %v11636_v29, 0.5 }
 0xdb1   :  { %v11835_v24 = vsel %vm9202_vm14, 4294967295, %v11834_v24  ;;  %11837 = vst [vmem:[#allocation78_spill] sm:$0xff] %v9210_v13  ;;  %11839 = vst [vmem:[#allocation79_spill] sm:$0xff] %v9215_v61  ;;  %v11845_v53 = vmov 0  ;;  %vm11847_vm9 = vcmp.lt.f32.partialorder %v8493_v20, 56.0  ;;  %vm11848_vm3 = vcmp.ge.f32.partialorder %v11638_v63, 0.5 }
 0xdb2   :  { %11842 = vst [vmem:[#allocation81_spill] sm:$0xff] %v9225_v62  ;;  %vm9231_vm6 = vmand %vm11844_vm2, %vm11843_vm4  ;;  %v9246_v42 = vsel %vm8978_vm5, 1.0, %v11517_v5  ;;  %vm11852_vm0 = vcmp.ge.f32.partialorder %v8889_v60, 1.0  ;;  %v11853_v44 = vmov 0  ;;  %vm11855_vm4 = vcmp.lt.f32.partialorder %v8801_v0, 7.0 }
 0xdb3   :  { %v11846_v53 = vsel %vm9231_vm6, 4294967295, %v11845_v53  ;;  %vm9239_vm10 = vmand %vm11848_vm3, %vm11847_vm9  ;;  %11851 = vst [vmem:[#allocation82_spill] sm:$0xff] %v9246_v42  ;;  %v11856_v20 = vmov 0  ;;  %v3477_v26 = vmul.f32 8.0, %v3460_v33  ;;  %v9269_v25 = vsel %vm9003_vm13, 1.0, %v11517_v5 }
 0xdb4   :  { %vm9252_vm7 = vmand %vm9180_vm8, %vm11852_vm0  ;;  %11858 = vst [vmem:[#allocation83_spill] sm:$0xff] %v9269_v25  ;;  %vm11859_vm9 = vcmp.ge.f32.partialorder %v9109_v34, 1.0  ;;  %v11860_v0 = vmov 0  ;;  %v11863_v29 = vmov 0  ;;  %vm11866_vm13 = vcmp.ge.f32.partialorder %v11639_v17, 0.5 }
 0xdb5   :  { %v11854_v44 = vsel %vm9252_vm7, 4294967295, %v11853_v44  ;;  %vm9260_vm3 = vmand %vm9072_vm12, %vm11855_vm4  ;;  %vm11862_vm4 = vcmp.lt.f32.partialorder %v9109_v34, 7.0  ;;  %vm11874_vm6 = vcmp.ge.f32.partialorder %v11640_v19, 0.5  ;;  %v11875_v62 = vmov 0 }
 0xdb6   :  { %v11857_v20 = vsel %vm9260_vm3, 4294967295, %v11856_v20  ;;  %vm9275_vm0 = vmand %vm9202_vm14, %vm11859_vm9  ;;  %v9314_v25 = vsub.f32 %v8501_v28, %v3476_v36  ;;  %v9319_v42 = vsel %vm9033_vm15, 1.0, %v11517_v5  ;;  %v11879_v37 = vmov 0 }
 0xdb7   :  { %v11861_v0 = vsel %vm9275_vm0, 4294967295, %v11860_v0  ;;  %vm9283_vm2 = vmand %vm9202_vm14, %vm11862_vm4  ;;  %vm11870_vm0 = vcmp.ge.f32.partialorder %v11638_v63, 0.5  ;;  %vm11439_vm4 = vcmp.ge.f32.partialorder %v9186_v50, 1.0  ;;  %vm11873_vm14 = vcmp.ge.f32.partialorder %v8499_v32, 8.0  ;;  %11877 = vst [vmem:[#allocation84_spill] sm:$0xff] %v9319_v42 }
 0xdb8   :  { %v11864_v29 = vsel %vm9283_vm2, 4294967295, %v11863_v29  ;;  %vm11865_vm5 = vmmov %vm11859_vm9  ;;  %vm11869_vm9 = vcmp.lt.f32.partialorder %v8992_v47, 7.0  ;;  %v3461_v61 = vfloor.f32 %v3444_v45  ;;  %v3428_v13 = vadd.f32 0.5, %v8535_v3 }
 0xdb9   :  { %vm9291_vm3 = vmand %vm11866_vm13, %vm11865_vm5  ;;  %v9334_v36 = vsel %vm9056_vm1, 1.0, %v11517_v5  ;;  %vm11881_vm15 = vnez %v11767_v59  ;;  %v11886_v45 = vmov 0  ;;  %vm11888_vm1 = vcmp.lt.f32.partialorder %v8495_v2, 56.0 }
 0xdba   :  { %vm9299_vm7 = vmand %vm11870_vm0, %vm11869_vm9  ;;  %vm11878_vm0 = vcmp.ge.f32.partialorder %v8992_v47, 1.0  ;;  %v9339_v6 = vsel %vm11881_vm15, 1.0, %v11517_v5  ;;  %vm11885_vm9 = vcmp.lt.f32.partialorder %v8889_v60, 7.0  ;;  %v11896_v2 = vmov 0 }
 0xdbb   :  { %vm9309_vm5 = vmand %vm11874_vm6, %vm11873_vm14  ;;  %11882 = vst [vmem:[#allocation85_spill] sm:$0xff] %v9339_v6  ;;  %vm11883_vm14 = vnez %v11786_v9  ;;  %vm11889_vm6 = vcmp.ge.f32.partialorder %v11639_v17, 0.5  ;;  %v9391_v9 = vsub.f32 %v8521_v10, %v3477_v26  ;;  %v11907_v26 = vmov 0 }
 0xdbc   :  { %v11876_v62 = vsel %vm9309_vm5, 4294967295, %v11875_v62  ;;  %vm9325_vm13 = vmand %vm9239_vm10, %vm11878_vm0  ;;  %v9344_v42 = vsel %vm11883_vm14, 1.0, %v11517_v5  ;;  %vm11892_vm14 = vnez %v11794_v48  ;;  %v11899_v48 = vmov 0 }
 0xdbd   :  { %v11880_v37 = vsel %vm9325_vm13, 4294967295, %v11879_v37  ;;  %11884 = vst [vmem:[#allocation86_spill] sm:$0xff] %v9344_v42  ;;  %vm9350_vm0 = vmand %vm9180_vm8, %vm11885_vm9  ;;  %v9366_v60 = vsel %vm11892_vm14, 1.0, %v11517_v5  ;;  %vm11894_vm9 = vnez %v11802_v41  ;;  %v9396_v41 = vsel %vm9072_vm12, 1.0, %v11517_v5 }
 0xdbe   :  { %v11887_v45 = vsel %vm9350_vm0, 4294967295, %v11886_v45  ;;  %vm9358_vm2 = vmand %vm11889_vm6, %vm11888_vm1  ;;  %11893 = vst [vmem:[#allocation87_spill] sm:$0xff] %v9366_v60  ;;  %v9371_v7 = vsel %vm11894_vm9, 1.0, %v11517_v5  ;;  %vm11898_vm1 = vcmp.lt.f32.partialorder %v9186_v50, 7.0  ;;  %vm11902_vm9 = vcmp.ge.f32.partialorder %v11640_v19, 0.5 }
 0xdbf   :  { %11895 = vst [vmem:[#allocation88_spill] sm:$0xff] %v9371_v7  ;;  %vm9377_vm6 = vmand %vm9309_vm5, %vm11439_vm4  ;;  %v11903_v7 = vmov 0  ;;  %vm11906_vm14 = vcmp.ge.f32.partialorder %v11639_v17, 0.5  ;;  %vm11909_vm0 = vcmp.ge.f32.partialorder %v8501_v28, 8.0  ;;  %vm11910_vm13 = vcmp.ge.f32.partialorder %v11641_v23, 0.5 }
 0xdc0   :  { %v11897_v2 = vsel %vm9377_vm6, 4294967295, %v11896_v2  ;;  %vm9385_vm15 = vmand %vm9309_vm5, %vm11898_vm1  ;;  %11901 = vst [vmem:[#allocation89_spill] sm:$0xff] %v9396_v41  ;;  %vm11905_vm1 = vcmp.lt.f32.partialorder %v9109_v34, 7.0  ;;  %vm11917_vm12 = vcmp.ge.f32.partialorder %v9109_v34, 1.0  ;;  %v11918_v42 = vmov 0 }
 0xdc1   :  { %v11900_v48 = vsel %vm9385_vm15, 4294967295, %v11899_v48  ;;  %vm9402_vm6 = vmand %vm11902_vm9, %vm11439_vm4  ;;  %vm11921_vm4 = vcmp.ge.f32.partialorder %v11640_v19, 0.5  ;;  %v11958_v11 = vmov 0  ;;  %v9644_v33 = vsel %vm9239_vm10, 1.0, %v11517_v5 }
 0xdc2   :  { %v11904_v7 = vsel %vm9402_vm6, 4294967295, %v11903_v7  ;;  %vm9410_vm15 = vmand %vm11906_vm14, %vm11905_vm1  ;;  %vm11913_vm14 = vnez %v11809_v16  ;;  %vm11915_vm1 = vnez %v11812_v30  ;;  %v3445_v30 = vmul.f32 0.125, %v3428_v13  ;;  %11988 = vst [vmem:[#allocation102_spill] sm:$0xff] %v9644_v33 }
 0xdc3   :  { %v11908_v26 = vsel %vm9410_vm15, 4294967295, %v11907_v26  ;;  %vm9420_vm9 = vmand %vm11910_vm13, %vm11909_vm0  ;;  %v9428_v41 = vsel %vm11913_vm14, 1.0, %v11517_v5  ;;  %v9433_v60 = vsel %vm11915_vm1, 1.0, %v11517_v5  ;;  %vm11920_vm0 = vcmp.lt.f32.partialorder %v8499_v32, 56.0 }
 0xdc4   :  { %11914 = vst [vmem:[#allocation90_spill] sm:$0xff] %v9428_v41  ;;  %11916 = vst [vmem:[#allocation91_spill] sm:$0xff] %v9433_v60  ;;  %v3478_v41 = vmul.f32 8.0, %v3461_v61  ;;  %vm11924_vm14 = vnez %v11819_v14  ;;  %vm11926_vm1 = vcmp.ge.f32.partialorder %v11638_v63, 0.5  ;;  %v11929_v61 = vmov 0 }
 0xdc5   :  { %vm9439_vm13 = vmand %vm9358_vm2, %vm11917_vm12  ;;  %v9454_v60 = vsel %vm11924_vm14, 1.0, %v11517_v5  ;;  %vm11925_vm12 = vnez %v11798_v46  ;;  %v9464_v32 = vsel %vm11926_vm1, 1.0, %v11517_v5  ;;  %vm11935_vm1 = vcmp.ge.f32.partialorder %v9314_v25, 1.0 }
 0xdc6   :  { %v11919_v42 = vsel %vm9439_vm13, 4294967295, %v11918_v42  ;;  %vm9447_vm5 = vmand %vm11921_vm4, %vm11920_vm0  ;;  %v9459_v6 = vsel %vm11925_vm12, 1.0, %v11517_v5  ;;  %11927 = vst [vmem:[#allocation92_spill] sm:$0xff] %v9464_v32  ;;  %vm11928_vm4 = vcmp.lt.f32.partialorder %v8992_v47, 7.0  ;;  %vm11931_vm13 = vnez %v11824_v38 }
 0xdc7   :  { %vm9470_vm0 = vmand %vm9239_vm10, %vm11928_vm4  ;;  %v9478_v46 = vsel %vm11931_vm13, 1.0, %v11517_v5  ;;  %vm11933_vm12 = vcmp.ge.f32.partialorder %v11639_v17, 0.5  ;;  %vm11938_vm14 = vcmp.lt.f32.partialorder %v9314_v25, 7.0  ;;  %v11939_v38 = vmov 0 }
 0xdc8   :  { %v11930_v61 = vsel %vm9470_vm0, 4294967295, %v11929_v61  ;;  %11932 = vst [vmem:[#allocation93_spill] sm:$0xff] %v9478_v46  ;;  %v9483_v14 = vsel %vm11933_vm12, 1.0, %v11517_v5  ;;  %vm9489_vm4 = vmand %vm9420_vm9, %vm11935_vm1  ;;  %vm11941_vm15 = vcmp.ge.f32.partialorder %v8521_v10, 8.0  ;;  %vm11942_vm6 = vcmp.ge.f32.partialorder %v11642_v4, 0.5 }
 0xdc9   :  { %11934 = vst [vmem:[#allocation94_spill] sm:$0xff] %v9483_v14  ;;  %vm9497_vm0 = vmand %vm9420_vm9, %vm11938_vm14  ;;  %v9514_v17 = vsel %vm9192_vm11, 1.0, %v11517_v5  ;;  %v9519_v63 = vsel %vm9180_vm8, 1.0, %v11517_v5  ;;  %vm11947_vm14 = vcmp.ge.f32.partialorder %v11640_v19, 0.5  ;;  %vm11953_vm11 = vcmp.lt.f32.partialorder %v9186_v50, 7.0 }
 0xdca   :  { %v11940_v38 = vsel %vm9497_vm0, 4294967295, %v11939_v38  ;;  %vm9507_vm1 = vmand %vm11942_vm6, %vm11941_vm15  ;;  %11945 = vst [vmem:[#allocation95_spill] sm:$0xff] %v9514_v17  ;;  %v9524_v46 = vsel %vm11947_vm14, 1.0, %v11517_v5  ;;  %vm11949_vm15 = vcmp.ge.f32.partialorder %v9314_v25, 1.0  ;;  %vm11950_vm6 = vcmp.ge.f32.partialorder %v11641_v23, 0.5 }
 0xdcb   :  { %11946 = vst [vmem:[#allocation96_spill] sm:$0xff] %v9519_v63  ;;  %11948 = vst [vmem:[#allocation97_spill] sm:$0xff] %v9524_v46  ;;  %vm11957_vm8 = vcmp.ge.f32.partialorder %v9186_v50, 1.0  ;;  %v11963_v19 = vmov 0  ;;  %v9565_v17 = vsub.f32 %v8523_v21, %v3478_v41  ;;  %v3462_v46 = vfloor.f32 %v3445_v30 }
 0xdcc   :  { %vm9530_vm12 = vmand %vm11950_vm6, %vm11949_vm15  ;;  %vm11960_vm6 = vnez %v11846_v53  ;;  %v3429_v32 = vadd.f32 0.5, %v8586_v31  ;;  %vm11969_vm15 = vcmp.ge.f32.partialorder %v9391_v9, 1.0  ;;  %v11970_v41 = vmov 0 }
 0xdcd   :  { %vm11954_vm13 = vmmov %vm11947_vm14  ;;  %v9554_v63 = vsel %vm11960_vm6, 1.0, %v11517_v5  ;;  %vm11966_vm6 = vnez %v11857_v20  ;;  %v9613_v30 = vsel %vm9291_vm3, 1.0, %v11517_v5  ;;  %vm11995_vm10 = vnez %v11887_v45 }
 0xdce   :  { %vm9538_vm0 = vmand %vm11954_vm13, %vm11953_vm11  ;;  %11961 = vst [vmem:[#allocation98_spill] sm:$0xff] %v9554_v63  ;;  %vm11962_vm13 = vcmp.lt.f32.partialorder %v9109_v34, 7.0  ;;  %v9576_v34 = vsel %vm11966_vm6, 1.0, %v11517_v5  ;;  %v9668_v22 = vsel %vm11995_vm10, 1.0, %v11517_v5  ;;  %v3446_v33 = vmul.f32 0.125, %v3429_v32 }
 0xdcf   :  { %vm9546_vm14 = vmand %vm9447_vm5, %vm11957_vm8  ;;  %vm11965_vm8 = vnez %v11854_v44  ;;  %11967 = vst [vmem:[#allocation99_spill] sm:$0xff] %v9576_v34  ;;  %v11973_v44 = vmov 0  ;;  %v9618_v34 = vsel %vm9299_vm7, 1.0, %v11517_v5  ;;  %vm11986_vm7 = vnez %v11880_v37  ;;  %v9663_v37 = vld [vmem:[%s11270_s12] ss:$0 sm:$0xff] }
 0xdd0   :  { %v11959_v11 = vsel %vm9546_vm14, 4294967295, %v11958_v11  ;;  %vm9560_vm11 = vmand %vm9358_vm2, %vm11962_vm13  ;;  %v9571_v53 = vsel %vm11965_vm8, 1.0, %v11517_v5  ;;  %vm11968_vm13 = vnez %v11835_v24  ;;  %vm11972_vm8 = vcmp.lt.f32.partialorder %v9391_v9, 7.0  ;;  %11977 = vst [vmem:[#allocation100_spill] sm:$0xff] %v9618_v34 }
 0xdd1   :  { %v11964_v19 = vsel %vm9560_vm11, 4294967295, %v11963_v19  ;;  %v9581_v63 = vsel %vm11968_vm13, 1.0, %v11517_v5  ;;  %vm9587_vm11 = vmand %vm9507_vm1, %vm11969_vm15  ;;  %vm11975_vm13 = vnez %v11861_v0  ;;  %vm11976_vm15 = vnez %v11864_v29  ;;  %11996 = vst [vmem:[#allocation104_spill] sm:$0xff] %v9668_v22 }
 0xdd2   :  { %v11971_v41 = vsel %vm9587_vm11, 4294967295, %v11970_v41  ;;  %vm9595_vm14 = vmand %vm9507_vm1, %vm11972_vm8  ;;  %v9603_v24 = vsel %vm11975_vm13, 1.0, %v11517_v5  ;;  %v9608_v20 = vsel %vm11976_vm15, 1.0, %v11517_v5  ;;  %vm11978_vm8 = vcmp.ge.f32.partialorder %v9391_v9, 1.0 }
 0xdd3   :  { %v11974_v44 = vsel %vm9595_vm14, 4294967295, %v11973_v44  ;;  %vm11979_vm13 = vcmp.ge.f32.partialorder %v11642_v4, 0.5  ;;  %vm11982_vm15 = vcmp.lt.f32.partialorder %v8501_v28, 56.0  ;;  %vm11983_vm14 = vcmp.ge.f32.partialorder %v11641_v23, 0.5 }
 0xdd4   :  { %vm9624_vm6 = vmand %vm11979_vm13, %vm11978_vm8  ;;  %v9639_v18 = vsel %vm11986_vm7, 1.0, %v11517_v5  ;;  %vm12002_vm10 = vnez %v11876_v62  ;;  %vm12004_vm7 = vnez %v11900_v48  ;;  %v9775_v57 = vsel %vm9489_vm4, 1.0, %v11517_v5 }
 0xdd5   :  { %vm9632_vm11 = vmand %vm11983_vm14, %vm11982_vm15  ;;  %11987 = vst [vmem:[#allocation101_spill] sm:$0xff] %v9639_v18  ;;  %vm11444_vm15 = vcmp.ge.f32.partialorder %v11643_v8, 0.5  ;;  %v9687_v45 = vsel %vm12002_vm10, 1.0, %v11517_v5  ;;  %v9692_v22 = vsel %vm12004_vm7, 1.0, %v11517_v5  ;;  %vm12009_vm10 = vnez %v11904_v7 }
 0xdd6   :  { %vm11989_vm3 = vmmov %vm11983_vm14  ;;  %vm11991_vm14 = vcmp.lt.f32.partialorder %v9314_v25, 7.0  ;;  %12003 = vst [vmem:[#allocation106_spill] sm:$0xff] %v9687_v45  ;;  %v9706_v62 = vsel %vm12009_vm10, 1.0, %v11517_v5  ;;  %vm12011_vm7 = vnez %v11908_v26  ;;  %v12017_v7 = vmov 0 }
 0xdd7   :  { %v9649_v28 = vsel %vm11989_vm3, 1.0, %v11517_v5  ;;  %vm11992_vm8 = vmmov %vm11989_vm3  ;;  %vm11997_vm3 = vcmp.ge.f32.partialorder %v8523_v21, 8.0  ;;  %12005 = vst [vmem:[#allocation107_spill] sm:$0xff] %v9692_v22  ;;  %v9711_v48 = vsel %vm12011_vm7, 1.0, %v11517_v5  ;;  %vm12021_vm7 = vnez %v11930_v61 }
 0xdd8   :  { %11990 = vst [vmem:[#allocation103_spill] sm:$0xff] %v9649_v28  ;;  %vm9655_vm13 = vmand %vm11992_vm8, %vm11991_vm14  ;;  %v3479_v28 = vmul.f32 8.0, %v3462_v46  ;;  %vm12000_vm8 = vnez %v11897_v2  ;;  %v3238_v2 = vpop.f32.mrf.mxu0  ;;  %v9716_v46 = vsel %vm9358_vm2, 1.0, %v11517_v5  ;;  %vm12019_vm2 = vnez %v11919_v42 }
 0xdd9   :  { %vm9675_vm14 = vmand %vm11444_vm15, %vm11997_vm3  ;;  %v9682_v18 = vsel %vm12000_vm8, 1.0, %v11517_v5  ;;  %vm12006_vm3 = vcmp.ge.f32.partialorder %v9314_v25, 1.0  ;;  %12010 = vst [vmem:[#allocation108_spill] sm:$0xff] %v9706_v62  ;;  %vm12016_vm8 = vcmp.lt.f32.partialorder %v9186_v50, 7.0  ;;  %v9732_v26 = vadd.f32 %v9663_v37, %v3238_v2 }
 0xdda   :  { %12001 = vst [vmem:[#allocation105_spill] sm:$0xff] %v9682_v18  ;;  %vm9698_vm15 = vmand %vm9632_vm11, %vm12006_vm3  ;;  %vm12014_vm3 = vcmp.ge.f32.partialorder %v11642_v4, 0.5  ;;  %v9737_v59 = vsel %vm12019_vm2, 1.0, %v11517_v5  ;;  %v5632_v2 = vpop.f32.mrf.mxu0  ;;  %v9756_v42 = vsel %vm9420_vm9, 1.0, %v11517_v5  ;;  %vm12027_vm2 = vcmp.lt.f32.partialorder %v9565_v17, 7.0 }
 0xddb   :  { %12012 = vst [vmem:[#allocation109_spill] sm:$0xff] %v9711_v48  ;;  %12013 = vst [vmem:[#allocation110_spill] sm:$0xff] %v9716_v46  ;;  %v9721_v22 = vsel %vm12014_vm3, 1.0, %v11517_v5  ;;  %v12028_v61 = vmov 0  ;;  %v9768_v46 = vsub.f32 %v8535_v3, %v3479_v28  ;;  %vm12032_vm9 = vnez %v11940_v38  ;;  %v12157_v48 = vld [vmem:[#allocation72_spill] sm:$0xff] }
 0xddc   :  { %12015 = vst [vmem:[#allocation111_spill] sm:$0xff] %v9721_v22  ;;  %vm9727_vm10 = vmand %vm9447_vm5, %vm12016_vm8  ;;  %v9742_v22 = vsel %vm12021_vm7, 1.0, %v11517_v5  ;;  %vm12023_vm8 = vcmp.ge.f32.partialorder %v9565_v17, 1.0  ;;  %v9780_v2 = vsel %vm12032_vm9, 1.0, %v11517_v5  ;;  %vm12035_vm3 = vcmp.ge.f32.partialorder %v11643_v8, 0.5  ;;  %v3241_v47 = vpop.f32.mrf.mxu0 }
 0xddd   :  { %v12018_v7 = vsel %vm9727_vm10, 4294967295, %v12017_v7  ;;  %12020 = vst [vmem:[#allocation112_spill] sm:$0xff] %v9737_v59  ;;  %12022 = vst [vmem:[#allocation113_spill] sm:$0xff] %v9742_v22  ;;  %v3463_v22 = vfloor.f32 %v3446_v33  ;;  %vm3513_vm4 = vcmp.ge.f32.partialorder %v8535_v3, 8.0  ;;  %v9799_v38 = vsel %vm9530_vm12, 1.0, %v11517_v5 }
 0xdde   :  { %vm9749_vm10 = vmand %vm9675_vm14, %vm12023_vm8  ;;  %12026 = vst [vmem:[#allocation114_spill] sm:$0xff] %v9756_v42  ;;  %vm12030_vm8 = vcmask 523264   ;;  %vm12045_vm9 = vcmp.lt.f32.partialorder %v8521_v10, 56.0  ;;  %vm12046_vm12 = vcmp.ge.f32.partialorder %v11642_v4, 0.5  ;;  %v9825_v52 = vadd.f32 %v9663_v37, %v3241_v47 }
 0xddf   :  { %vm9762_vm7 = vmand %vm9675_vm14, %vm12027_vm2  ;;  %3310 = vst.msk [vmem:[#allocation2 + $0x10] sm:$0xff] %vm12030_vm8, %v9732_v26  ;;  %vm12034_vm2 = vcmp.ge.f32.partialorder %v9565_v17, 1.0  ;;  %v9835_v16 = vsel %vm9507_vm1, 1.0, %v11517_v5  ;;  %vm12060_vm1 = vnez %v11974_v44  ;;  %v9879_v44 = vsel %vm9655_vm13, 1.0, %v11517_v5 }
 0xde0   :  { %v12029_v61 = vsel %vm9762_vm7, 4294967295, %v12028_v61  ;;  %12031 = vst [vmem:[#allocation115_spill] sm:$0xff] %v9775_v57  ;;  %12033 = vst [vmem:[#allocation116_spill] sm:$0xff] %v9780_v2  ;;  %v9804_v2 = vsel %vm9538_vm0, 1.0, %v11517_v5  ;;  %vm12049_vm0 = vnez %v11964_v19  ;;  %v5633_v19 = vpop.f32.mrf.mxu0  ;;  %v9898_v34 = vsel %vm9698_vm15, 1.0, %v11517_v5 }
 0xde1   :  { %vm9786_vm7 = vmand %vm12035_vm3, %vm12034_vm2  ;;  %12040 = vst [vmem:[#allocation118_spill] sm:$0xff] %v9799_v38  ;;  %v3480_v19 = vmul.f32 8.0, %v3463_v22  ;;  %v9892_v22 = vsel %vm9632_vm11, 1.0, %v11517_v5  ;;  %vm12073_vm13 = vnez %v12018_v7  ;;  %vm3564_vm15 = vcmp.lt.f32.partialorder %v9768_v46, 7.0 }
 0xde2   :  { %vm12038_vm8 = vmmov %vm12035_vm3  ;;  %12041 = vst [vmem:[#allocation119_spill] sm:$0xff] %v9804_v2  ;;  %vm12042_vm3 = vnez %v11959_v11  ;;  %v9830_v11 = vsel %vm12049_vm0, 1.0, %v11517_v5  ;;  %vm3547_vm0 = vcmp.ge.f32.partialorder %v9768_v46, 1.0  ;;  %v9903_v0 = vsel %vm12073_vm13, 1.0, %v11517_v5  ;;  %v12220_v46 = vld [vmem:[#allocation14_spill] sm:$0xff] }
 0xde3   :  { %v9793_v33 = vsel %vm12038_vm8, 1.0, %v11517_v5  ;;  %v9809_v42 = vsel %vm12042_vm3, 1.0, %v11517_v5  ;;  %vm9820_vm2 = vmand %vm12046_vm12, %vm12045_vm9  ;;  %12050 = vst [vmem:[#allocation122_spill] sm:$0xff] %v9830_v11  ;;  %vm12056_vm9 = vcmp.ge.f32.partialorder %v11644_v56, 0.5  ;;  %v9922_v32 = vsel %vm9749_vm10, 1.0, %v11517_v5 }
 0xde4   :  { %12039 = vst [vmem:[#allocation117_spill] sm:$0xff] %v9793_v33  ;;  %12043 = vst [vmem:[#allocation120_spill] sm:$0xff] %v9809_v42  ;;  %v9814_v33 = vsel %vm9447_vm5, 1.0, %v11517_v5  ;;  %vm12052_vm5 = vcmp.lt.f32.partialorder %v9391_v9, 7.0  ;;  %v9848_v47 = vsel %vm12056_vm9, 1.0, %v11517_v5  ;;  %v9955_v10 = vsel %vm9820_vm2, 1.0, %v11517_v5 }
 0xde5   :  { %12044 = vst [vmem:[#allocation121_spill] sm:$0xff] %v9814_v33  ;;  %12051 = vst [vmem:[#allocation123_spill] sm:$0xff] %v9835_v16  ;;  %v9858_v33 = vsel %vm12060_vm1, 1.0, %v11517_v5  ;;  %vm12076_vm1 = vcmp.lt.f32.partialorder %v9314_v25, 7.0  ;;  %v9932_v25 = vsel %vm9786_vm7, 1.0, %v11517_v5  ;;  %vm12091_vm7 = vcmp.ge.f32.partialorder %v11644_v56, 0.5 }
 0xde6   :  { %vm12053_vm8 = vmmov %vm12046_vm12  ;;  %12057 = vst [vmem:[#allocation124_spill] sm:$0xff] %v9848_v47  ;;  %vm12058_vm12 = vnez %v11971_v41  ;;  %v9874_v41 = vsel %vm9624_vm6, 1.0, %v11517_v5  ;;  %vm3529_vm6 = vcmp.lt.f32.partialorder %v8523_v21, 56.0  ;;  %v3640_v50 = vld [vmem:[#allocation2 + $0xf] sm:$0xff]  ;;  %v12120_v42 = vld [vmem:[#allocation58_spill] sm:$0xff] }
 0xde7   :  { %vm9841_vm3 = vmand %vm12053_vm8, %vm12052_vm5  ;;  %v9853_v13 = vsel %vm12058_vm12, 1.0, %v11517_v5  ;;  %12061 = vst [vmem:[#allocation126_spill] sm:$0xff] %v9858_v33  ;;  %vm12068_vm12 = vcmp.ge.f32.partialorder %v9391_v9, 1.0 }
 0xde8   :  { %12059 = vst [vmem:[#allocation125_spill] sm:$0xff] %v9853_v13  ;;  %vm12062_vm5 = vmmov %vm12056_vm9  ;;  %vm12065_vm9 = vcmask 523264   ;;  %v9937_v29 = vsel %vm9841_vm3, 1.0, %v11517_v5 }
 0xde9   :  { %vm9865_vm8 = vmand %vm12062_vm5, %vm3513_vm4  ;;  %3311 = vst.msk [vmem:[#allocation2 + $0x18] sm:$0xff] %vm12065_vm9, %v9825_v52  ;;  %vm12080_vm9 = vnez %v12029_v61  ;;  %v3851_v61 = vld [vmem:[#allocation2 + $0x9] sm:$0xff] }
 0xdea   :  { %12066 = vst [vmem:[#allocation127_spill] sm:$0xff] %v9874_v41  ;;  %12067 = vst [vmem:[#allocation128_spill] sm:$0xff] %v9879_v44  ;;  %v9908_v44 = vsel %vm9675_vm14, 1.0, %v11517_v5  ;;  %v9927_v23 = vsel %vm12080_vm9, 1.0, %v11517_v5  ;;  %vm3378_vm14 = vcmp.ge.f32.partialorder %v11647_v43, 0.5  ;;  %vm12113_vm9 = vcmp.ge.f32.partialorder %v9565_v17, 1.0 }
 0xdeb   :  { %vm9885_vm4 = vmand %vm9820_vm2, %vm12068_vm12  ;;  %12071 = vst [vmem:[#allocation129_spill] sm:$0xff] %v9892_v22  ;;  %vm3514_vm12 = vcmp.ge.f32.partialorder %v8586_v31, 8.0  ;;  %v10018_v21 = vsel %vm3378_vm14, 1.0, %v11517_v5 }
 0xdec   :  { %12072 = vst [vmem:[#allocation130_spill] sm:$0xff] %v9898_v34  ;;  %12074 = vst [vmem:[#allocation131_spill] sm:$0xff] %v9903_v0  ;;  %v9950_v28 = vsel %vm9885_vm4, 1.0, %v11517_v5  ;;  %v12104_v0 = vld [vmem:[#allocation41_spill] sm:$0xff] }
 0xded   :  { %12075 = vst [vmem:[#allocation132_spill] sm:$0xff] %v9908_v44  ;;  %vm9914_vm5 = vmand %vm9632_vm11, %vm12076_vm1  ;;  %v3976_v44 = vmul.f32 %v8733_v49, %v3640_v50 }
 0xdee   :  { %12079 = vst [vmem:[#allocation133_spill] sm:$0xff] %v9922_v32  ;;  %12081 = vst [vmem:[#allocation134_spill] sm:$0xff] %v9927_v23  ;;  %v3729_v23 = vld [vmem:[#allocation2 + $0x10] sm:$0xff]  ;;  %v3657_v32 = vmul.f32 %v8782_v12, %v3640_v50  ;;  %v12094_v12 = vld [vmem:[#allocation53_spill] sm:$0xff] }
 0xdef   :  { %12082 = vst [vmem:[#allocation135_spill] sm:$0xff] %v9932_v25  ;;  %12083 = vst [vmem:[#allocation136_spill] sm:$0xff] %v9937_v29  ;;  %v9959_v29 = vsub.f32 %v8586_v31, %v3480_v19  ;;  %v3868_v25 = vmul.f32 %v8699_v40, %v3851_v61  ;;  %v3746_v33 = vmul.f32 %v8738_v15, %v3729_v23  ;;  %v9974_v19 = vsel %vm9914_vm5, 1.0, %v11517_v5  ;;  %v12130_v15 = vld [vmem:[#allocation9_spill] sm:$0xff] }
 0xdf0   :  { %vm9943_vm11 = vmand %vm9865_vm8, %vm3547_vm0  ;;  %12086 = vst [vmem:[#allocation137_spill] sm:$0xff] %v9950_v28  ;;  %v9979_v40 = vsel %vm9865_vm8, 1.0, %v11517_v5  ;;  %v3678_v49 = vmul.f32 %v8633_v35, %v3657_v32  ;;  %v3641_v50 = vld [vmem:[#allocation2 + $0x17] sm:$0xff]  ;;  %v12099_v32 = vsub.s32 7, %v11651_v54  ;;  %v12105_v54 = vld [vmem:[#allocation62_spill] sm:$0xff] }
 0xdf1   :  { %12087 = vst [vmem:[#allocation138_spill] sm:$0xff] %v9955_v10  ;;  %12088 = vst [vmem:[#allocation139_spill] sm:$0xff] %v9959_v29  ;;  %v4065_v10 = vmul.f32 %v8672_v27, %v9732_v26  ;;  %v3889_v27 = vmul.f32 %v8762_v51, %v3868_v25  ;;  %v3767_v22 = vmul.f32 %v12094_v12, %v3746_v33  ;;  %v9996_v4 = vsel %vm9943_vm11, 1.0, %v11517_v5  ;;  %v3852_v61 = vld [vmem:[#allocation2 + $0x11] sm:$0xff] }
 0xdf2   :  { %vm3812_vm10 = vmand %vm9865_vm8, %vm3564_vm15  ;;  %12089 = vst [vmem:[#allocation140_spill] sm:$0xff] %v9974_v19  ;;  %vm12096_vm8 = vcmp.ge.f32.partialorder %v11643_v8, 0.5  ;;  %v3730_v25 = vld [vmem:[#allocation2 + $0x18] sm:$0xff]  ;;  %v10009_v33 = vrot.slane %v8610_v39, %v12099_v32  ;;  %vm3548_vm13 = vcmp.ge.f32.partialorder %v9959_v29, 1.0  ;;  %v3869_v34 = vmul.f32 %v12104_v0, %v3852_v61  ;;  %v3246_v39 = vpop.f32.mrf.mxu0  ;;  %v12136_v32 = vld [vmem:[#allocation47_spill] sm:$0xff] }
 0xdf3   :  { %12090 = vst [vmem:[#allocation141_spill] sm:$0xff] %v9979_v40  ;;  %vm9985_vm3 = vmand %vm12091_vm7, %vm3547_vm0  ;;  %v10012_v7 = vsel %vm3812_vm10, 1.0, %v11517_v5  ;;  %v12102_v40 = vld [vmem:[#allocation61_spill] sm:$0xff]  ;;  %v3977_v41 = vmul.f32 %v12105_v54, %v3641_v50  ;;  %v3784_v54 = vadd.f32 %v3767_v22, %v3678_v49  ;;  %v4298_v2 = vmul.f32 %v12120_v42, %v3641_v50  ;;  %v12126_v22 = vld [vmem:[#allocation64_spill] sm:$0xff] }
 0xdf4   :  { %12095 = vst [vmem:[#allocation53_spill] sm:$0xff] %v9996_v4  ;;  %vm10002_vm4 = vmand %vm12096_vm8, %vm3529_vm6  ;;  %v3906_v19 = vadd.f32 %v3889_v27, %v12102_v40  ;;  %v12103_v4 = vld [vmem:[#allocation40_spill] sm:$0xff]  ;;  %vm12106_vm6 = vcmp.lt.f32.partialorder %v9565_v17, 7.0  ;;  %v10035_v40 = vadd.f32 %v9663_v37, %v3246_v39  ;;  %v3890_v8 = vmul.f32 %v8762_v51, %v3869_v34 }
 0xdf5   :  { %12100 = vst [vmem:[#allocation142_spill] sm:$0xff] %v10012_v7  ;;  %12101 = vst [vmem:[#allocation143_spill] sm:$0xff] %v10018_v21  ;;  %v3997_v28 = vmul.f32 %v12103_v4, %v3976_v44  ;;  %v12110_v7 = vld [vmem:[#allocation57_spill] sm:$0xff]  ;;  %v12111_v21 = vld [vmem:[#allocation44_spill] sm:$0xff]  ;;  %v3658_v44 = vmul.f32 %v8902_v58, %v3641_v50  ;;  %vm12121_vm7 = vcmask 523264   ;;  %v10064_v34 = vsel %vm9985_vm3, 1.0, %v11517_v5 }
 0xdf6   :  { %vm12107_vm1 = vmmov %vm12096_vm8  ;;  %v4086_v11 = vmul.f32 %v12110_v7, %v4065_v10  ;;  %v4173_v16 = vmul.f32 %v12111_v21, %v3852_v61  ;;  %12112 = vst [vmem:[#allocation61_spill] sm:$0xff] %v10035_v40  ;;  %v12116_v10 = vld [vmem:[#allocation11_spill] sm:$0xff]  ;;  %v5636_v61 = vpop.f32.mrf.mxu0  ;;  %v12119_v21 = vld [vmem:[#allocation38_spill] sm:$0xff]  ;;  %vm12123_vm8 = vcmp.lt.f32.partialorder %v9391_v9, 7.0  ;;  %v3907_v42 = vadd.f32 %v3890_v8, %v3784_v54 }
 0xdf7   :  { %vm10028_vm5 = vmand %vm12107_vm1, %vm12106_vm6  ;;  %v4014_v27 = vadd.f32 %v3997_v28, %v3906_v19  ;;  %v3747_v13 = vmul.f32 %v12116_v10, %v3730_v25  ;;  %v4066_v39 = vmul.f32 %v12119_v21, %v9825_v52  ;;  %3312 = vst.msk [vmem:[#allocation2 + $0x20] sm:$0xff] %vm12121_vm7, %v10035_v40  ;;  %vm3565_vm6 = vcmp.lt.f32.partialorder %v9959_v29, 7.0  ;;  %v12135_v54 = vld [vmem:[#allocation56_spill] sm:$0xff]  ;;  %v12240_v29 = vld [vmem:[#allocation106_spill] sm:$0xff] }
 0xdf8   :  { %vm10042_vm11 = vmand %vm10002_vm4, %vm12113_vm9  ;;  %12122 = vst [vmem:[#allocation40_spill] sm:$0xff] %v10064_v34  ;;  %v3998_v49 = vmul.f32 %v12103_v4, %v3977_v41  ;;  %v4194_v50 = vmul.f32 %v12126_v22, %v4173_v16  ;;  %v3249_v10 = vpop.f32.mrf.mxu0  ;;  %vm12127_vm3 = vcmp.ge.f32.partialorder %v11644_v56, 0.5  ;;  %v3679_v14 = vmul.f32 %v8633_v35, %v3658_v44  ;;  %v12147_v16 = vld [vmem:[#allocation10_spill] sm:$0xff]  ;;  %v12152_v34 = vld [vmem:[#allocation20_spill] sm:$0xff] }
 0xdf9   :  { %vm10052_vm10 = vmand %vm3378_vm14, %vm3514_vm12  ;;  %v4103_v19 = vadd.f32 %v4086_v11, %v4014_v27  ;;  %v4067_v61 = vmul.f32 %v12130_v15, %v10035_v40  ;;  %v10089_v8 = vadd.f32 %v9663_v37, %v3249_v10  ;;  %v10094_v11 = vsel %vm10028_vm5, 1.0, %v11517_v5  ;;  %v12153_v40 = vld [vmem:[#allocation12_spill] sm:$0xff] }
 0xdfa   :  { %vm10070_vm12 = vmand %vm9820_vm2, %vm12123_vm8  ;;  %12132 = vst [vmem:[#allocation62_spill] sm:$0xff] %v10094_v11  ;;  %v4015_v41 = vadd.f32 %v3998_v49, %v3907_v42  ;;  %v3768_v27 = vmul.f32 %v12094_v12, %v3747_v13  ;;  %v4390_v21 = vmul.f32 %v12135_v54, %v3730_v25  ;;  %v5637_v10 = vpop.f32.mrf.mxu0  ;;  %vm3530_vm9 = vcmp.lt.f32.partialorder %v8535_v3, 56.0  ;;  %v12137_v42 = vld [vmem:[#allocation22_spill] sm:$0xff] }
 0xdfb   :  { %vm10081_vm1 = vmand %vm12127_vm3, %vm3564_vm15  ;;  %12131 = vst [vmem:[#allocation41_spill] sm:$0xff] %v10089_v8  ;;  %v4211_v44 = vadd.f32 %v4194_v50, %v4103_v19  ;;  %v4319_v15 = vmul.f32 %v12136_v32, %v4298_v2  ;;  %v4068_v19 = vmul.f32 %v12137_v42, %v10089_v8  ;;  %v10119_v13 = vsel %vm10042_vm11, 1.0, %v11517_v5  ;;  %v12140_v49 = vld [vmem:[#allocation70_spill] sm:$0xff]  ;;  %v12141_v50 = vld [vmem:[#allocation43_spill] sm:$0xff] }
 0xdfc   :  { %vm10100_vm2 = vmand %vm10052_vm10, %vm3548_vm13  ;;  %3313 = vst.msk [vmem:[#allocation2 + $0x28] sm:$0xff] %vm12121_vm7, %v10089_v8  ;;  %v10124_v25 = vsel %vm10002_vm4, 1.0, %v11517_v5  ;;  %vm3379_vm8 = vcmp.ge.f32.partialorder %v12140_v49, 0.5  ;;  %vm3515_vm3 = vcmp.ge.f32.partialorder %v12141_v50, 8.0  ;;  %v4087_v2 = vmul.f32 %v12110_v7, %v4066_v39 }
 0xdfd   :  { %vm3813_vm5 = vmand %vm10052_vm10, %vm3565_vm6  ;;  %12138 = vst [vmem:[#allocation57_spill] sm:$0xff] %v10119_v13  ;;  %v10132_v54 = vsel %vm10070_vm12, 1.0, %v11517_v5  ;;  %v10137_v0 = vsel %vm10052_vm10, 1.0, %v11517_v5  ;;  %v10142_v10 = vsel %vm10081_vm1, 1.0, %v11517_v5  ;;  %v4336_v42 = vadd.f32 %v4319_v15, %v4211_v44  ;;  %v12148_v15 = vld [vmem:[#allocation8_spill] sm:$0xff] }
 0xdfe   :  { %12139 = vst [vmem:[#allocation44_spill] sm:$0xff] %v10124_v25  ;;  %12142 = vst [vmem:[#allocation11_spill] sm:$0xff] %v10132_v54  ;;  %v4088_v25 = vmul.f32 %v12110_v7, %v4067_v61  ;;  %v10148_v39 = vsel %vm10100_vm2, 1.0, %v11517_v5  ;;  %v10151_v28 = vsel %vm3813_vm5, 1.0, %v11517_v5  ;;  %v4104_v54 = vadd.f32 %v4087_v2, %v4015_v41  ;;  %v3642_v58 = vld [vmem:[#allocation2 + $0x1f] sm:$0xff] }
 0xdff   :  { %12143 = vst [vmem:[#allocation38_spill] sm:$0xff] %v10137_v0  ;;  %12144 = vst [vmem:[#allocation58_spill] sm:$0xff] %v10142_v10  ;;  %v3785_v13 = vadd.f32 %v3768_v27, %v3679_v14  ;;  %v3853_v0 = vld [vmem:[#allocation2 + $0x19] sm:$0xff]  ;;  %v4411_v11 = vmul.f32 %v10009_v33, %v4390_v21  ;;  %v10155_v10 = vmul.f32 %v12110_v7, %v4068_v19  ;;  %v10160_v61 = vld [vmem:[%s11271_s13 + $0x8] ss:$0 sm:$0xff]  ;;  %vm12158_vm10 = vcmp.ge.f32.partialorder %v11644_v56, 0.5 }
 0xe00   :  { %12145 = vst [vmem:[#allocation64_spill] sm:$0xff] %v10148_v39  ;;  %12146 = vst [vmem:[#allocation9_spill] sm:$0xff] %v10151_v28  ;;  %v3731_v9 = vld [vmem:[#allocation2 + $0x20] sm:$0xff]  ;;  %v3870_v44 = vmul.f32 %v12147_v16, %v3853_v0  ;;  %v3978_v39 = vmul.f32 %v12148_v15, %v3642_v58  ;;  %v12149_v28 = vld [vmem:[#allocation7_spill] sm:$0xff]  ;;  %v4299_v14 = vmul.f32 %v9012_v1, %v3642_v58 }
 0xe01   :  { %v4174_v41 = vmul.f32 %v12149_v28, %v3853_v0  ;;  %v12150_v27 = vld [vmem:[#allocation52_spill] sm:$0xff]  ;;  %v4498_v21 = vmul.f32 %v9017_v55, %v3853_v0  ;;  %v12151_v2 = vld [vmem:[#allocation45_spill] sm:$0xff]  ;;  %v3748_v38 = vmul.f32 %v12152_v34, %v3731_v9  ;;  %v4391_v8 = vmul.f32 %v12153_v40, %v3731_v9  ;;  %v3254_v34 = vpop.f32.mrf.mxu0  ;;  %vm10193_vm12 = vmand %vm12158_vm10, %vm3530_vm9 }
 0xe02   :  { %vm3549_vm11 = vcmp.ge.f32.partialorder %v12150_v27, 1.0  ;;  %v3659_v19 = vmul.f32 %v12151_v2, %v3642_v58  ;;  %v3891_v47 = vmul.f32 %v8762_v51, %v3870_v44  ;;  %v3999_v16 = vmul.f32 %v12103_v4, %v3978_v39  ;;  %v10181_v39 = vld [vmem:[%s11272_s14] ss:$0 sm:$0xff]  ;;  %vm10205_vm1 = vmand %vm3378_vm14, %vm3548_vm13 }
 0xe03   :  { %v4195_v15 = vmul.f32 %v12126_v22, %v4174_v41  ;;  %v4428_v57 = vadd.f32 %v4411_v11, %v4336_v42  ;;  %v4320_v28 = vmul.f32 %v12136_v32, %v4299_v14  ;;  %v4519_v1 = vmul.f32 %v10160_v61, %v4498_v21  ;;  %v3643_v59 = vld [vmem:[#allocation2 + $0x27] sm:$0xff]  ;;  %v12154_v9 = vld [vmem:[#allocation13_spill] sm:$0xff]  ;;  %v5640_v62 = vpop.f32.mrf.mxu0  ;;  %vm10216_vm2 = vmand %vm3379_vm8, %vm3515_vm3 }
 0xe04   :  { %v3680_v55 = vmul.f32 %v8633_v35, %v3659_v19  ;;  %v3769_v0 = vmul.f32 %v12094_v12, %v3748_v38  ;;  %v3854_v58 = vld [vmem:[#allocation2 + $0x21] sm:$0xff]  ;;  %v3908_v2 = vadd.f32 %v3891_v47, %v3785_v13  ;;  %v12156_v14 = vld [vmem:[#allocation71_spill] sm:$0xff]  ;;  %v4300_v19 = vmul.f32 %v12157_v48, %v3643_v59  ;;  %vm10228_vm9 = vmand %vm10193_vm12, %vm3547_vm0 }
 0xe05   :  { %v4212_v40 = vadd.f32 %v4195_v15, %v4104_v54  ;;  %v3871_v11 = vmul.f32 %v12154_v9, %v3854_v58  ;;  %v12155_v42 = vld [vmem:[#allocation6_spill] sm:$0xff]  ;;  %v4536_v41 = vadd.f32 %v4519_v1, %v4428_v57  ;;  %v4175_v21 = vmul.f32 %v12156_v14, %v3854_v58  ;;  %vm12171_vm5 = vmmov %vm12121_vm7 }
 0xe06   :  { %v3979_v44 = vmul.f32 %v12155_v42, %v3643_v59  ;;  %v4412_v38 = vmul.f32 %v10009_v33, %v4391_v8  ;;  %v4016_v45 = vadd.f32 %v3999_v16, %v3908_v2  ;;  %v3786_v13 = vadd.f32 %v3769_v0, %v3680_v55  ;;  %v3732_v15 = vld [vmem:[#allocation2 + $0x28] sm:$0xff]  ;;  %vm3602_vm0 = vmand %vm10216_vm2, %vm3549_vm11 }
 0xe07   :  { %v4337_v47 = vadd.f32 %v4320_v28, %v4212_v40  ;;  %v3892_v54 = vmul.f32 %v8762_v51, %v3871_v11  ;;  %v4560_v57 = vadd.f32 %v10181_v39, %v4536_v41  ;;  %v4196_v62 = vmul.f32 %v12126_v22, %v4175_v21  ;;  %v12161_v8 = vld [vmem:[#allocation75_spill] sm:$0xff]  ;;  %v3257_v28 = vpop.f32.mrf.mxu0  ;;  %v12167_v42 = vld [vmem:[#allocation78_spill] sm:$0xff]  ;;  %vm12176_vm10 = vmmov %vm12171_vm5 }
 0xe08   :  { %v4000_v48 = vmul.f32 %v12103_v4, %v3979_v44  ;;  %v4499_v16 = vmul.f32 %v12161_v8, %v3854_v58  ;;  %v4105_v1 = vadd.f32 %v4088_v25, %v4016_v45  ;;  %v10210_v2 = vadd.f32 %v9663_v37, %v3254_v34  ;;  %v12168_v45 = vld [vmem:[#allocation76_spill] sm:$0xff] }
 0xe09   :  { %v3909_v55 = vadd.f32 %v3892_v54, %v3786_v13  ;;  %v4429_v0 = vadd.f32 %v4412_v38, %v4337_v47  ;;  %v4321_v40 = vmul.f32 %v12136_v32, %v4300_v19  ;;  %v3660_v44 = vmul.f32 %v12167_v42, %v3643_v59  ;;  %v5641_v41 = vpop.f32.mrf.mxu0  ;;  %v12172_v19 = vld [vmem:[#allocation74_spill] sm:$0xff] }
 0xe0a   :  { %12164 = vst [vmem:[#allocation56_spill] sm:$0xff] %v10210_v2  ;;  %v4520_v11 = vmul.f32 %v10160_v61, %v4499_v16  ;;  %v3749_v25 = vmul.f32 %v12168_v45, %v3732_v15  ;;  %v4213_v21 = vadd.f32 %v4196_v62, %v4105_v1  ;;  %3314 = vst.msk [vmem:[#allocation2 + $0x30] sm:$0xff] %vm12171_vm5, %v10210_v2  ;;  %vm12174_vm7 = vcmp.lt.f32.partialorder %v9565_v17, 7.0  ;;  %v12177_v17 = vld [vmem:[#allocation77_spill] sm:$0xff] }
 0xe0b   :  { %v4017_v14 = vadd.f32 %v4000_v48, %v3909_v55  ;;  %v4392_v38 = vmul.f32 %v12172_v19, %v3732_v15  ;;  %v10236_v59 = vadd.f32 %v9663_v37, %v3257_v28  ;;  %vm4456_vm3 = vmand %vm10002_vm4, %vm12174_vm7  ;;  %v3681_v13 = vmul.f32 %v8633_v35, %v3660_v44  ;;  %v12175_v48 = vld [vmem:[#allocation73_spill] sm:$0xff]  ;;  %v12186_v44 = vld [vmem:[#allocation50_spill] sm:$0xff] }
 0xe0c   :  { %v4537_v47 = vadd.f32 %v4520_v11, %v4429_v0  ;;  %v3770_v54 = vmul.f32 %v12094_v12, %v3749_v25  ;;  %v4069_v62 = vmul.f32 %v12175_v48, %v10210_v2  ;;  %v10258_v8 = vsel %vm10205_vm1, 1.0, %v11517_v5  ;;  %vm3937_vm1 = vmand %vm3379_vm8, %vm3549_vm11 }
 0xe0d   :  { %12173 = vst [vmem:[#allocation47_spill] sm:$0xff] %v10236_v59  ;;  %v4106_v15 = vadd.f32 %v10155_v10, %v4017_v14  ;;  %3315 = vst.msk [vmem:[#allocation2 + $0x38] sm:$0xff] %vm12176_vm10, %v10236_v59  ;;  %v4070_v23 = vmul.f32 %v12177_v17, %v10236_v59  ;;  %v10263_v16 = vsel %vm10228_vm9, 1.0, %v11517_v5  ;;  %v4338_v28 = vadd.f32 %v4321_v40, %v4213_v21  ;;  %v12180_v10 = vld [vmem:[#allocation60_spill] sm:$0xff] }
 0xe0e   :  { %12178 = vst [vmem:[#allocation22_spill] sm:$0xff] %v10258_v8  ;;  %12179 = vst [vmem:[#allocation10_spill] sm:$0xff] %v10263_v16  ;;  %v4561_v1 = vadd.f32 %v10181_v39, %v4537_v47  ;;  %vm12181_vm4 = vcmp.ge.f32.partialorder %v12180_v10, 0.5  ;;  %v10272_v0 = vsel %vm4456_vm3, 1.0, %v11517_v5  ;;  %v4413_v3 = vmul.f32 %v10009_v33, %v4392_v38  ;;  %v12195_v10 = vld [vmem:[#allocation83_spill] sm:$0xff]  ;;  %v12203_v59 = vld [vmem:[#allocation88_spill] sm:$0xff] }
 0xe0f   :  { %v10269_v55 = vsel %vm12181_vm4, %v4560_v57, %v9732_v26  ;;  %12182 = vst [vmem:[#allocation8_spill] sm:$0xff] %v10272_v0  ;;  %v10276_v11 = vsel %vm3602_vm0, 1.0, %v11517_v5  ;;  %v10281_v42 = vsel %vm10216_vm2, 1.0, %v11517_v5  ;;  %v10290_v26 = vsel %vm10193_vm12, 1.0, %v11517_v5  ;;  %vm10338_vm3 = vmand %vm3378_vm14, %vm3565_vm6  ;;  %v3262_v0 = vpop.f32.mrf.mxu0 }
 0xe10   :  { %12183 = vst [vmem:[#allocation7_spill] sm:$0xff] %v10276_v11  ;;  %12184 = vst [vmem:[#allocation45_spill] sm:$0xff] %v10281_v42  ;;  %v3787_v57 = vadd.f32 %v3770_v54, %v3681_v13  ;;  %v4090_v40 = vmul.f32 %v12110_v7, %v4069_v62  ;;  %vm12187_vm9 = vcmp.ge.f32.partialorder %v12186_v44, 0.5  ;;  %v4628_v25 = vmul.f32 %v10269_v55, %v10269_v55  ;;  %v12192_v54 = vld [vmem:[#allocation79_spill] sm:$0xff]  ;;  %v12193_v62 = vld [vmem:[#allocation80_spill] sm:$0xff] }
 0xe11   :  { %12185 = vst [vmem:[#allocation20_spill] sm:$0xff] %v10290_v26  ;;  %v10296_v45 = vsel %vm12187_vm9, %v4561_v1, %v9825_v52  ;;  %v10301_v41 = vmul.f32 %v12110_v7, %v4070_v23  ;;  %v10304_v34 = vmul.f32 0.5, %v10269_v55  ;;  %vm3531_vm5 = vcmp.lt.f32.partialorder %v8586_v31, 56.0  ;;  %v3644_v14 = vld [vmem:[#allocation2 + $0x2f] sm:$0xff]  ;;  %v12194_v23 = vld [vmem:[#allocation82_spill] sm:$0xff]  ;;  %v5644_v18 = vpop.f32.mrf.mxu0 }
 0xe12   :  { %vm3566_vm7 = vcmp.lt.f32.partialorder %v12150_v27, 7.0  ;;  %v3855_v21 = vld [vmem:[#allocation2 + $0x29] sm:$0xff]  ;;  %v10309_v38 = vmul.f32 0.5, %v10296_v45  ;;  %v10311_v52 = vadd.f32 %v4413_v3, %v4338_v28  ;;  %v10314_v47 = vsel %vm3937_vm1, 1.0, %v11517_v5  ;;  %v12196_v3 = vld [vmem:[#allocation85_spill] sm:$0xff] }
 0xe13   :  { %12188 = vst [vmem:[#allocation12_spill] sm:$0xff] %v10304_v34  ;;  %v3733_v19 = vld [vmem:[#allocation2 + $0x30] sm:$0xff]  ;;  %12190 = vst [vmem:[#allocation6_spill] sm:$0xff] %v10314_v47  ;;  %v10319_v13 = vsel %vm3379_vm8, 1.0, %v11517_v5  ;;  %v3872_v48 = vmul.f32 %v12192_v54, %v3855_v21  ;;  %v3980_v17 = vmul.f32 %v12193_v62, %v3644_v14  ;;  %v4176_v1 = vmul.f32 %v12194_v23, %v3855_v21 }
 0xe14   :  { %12189 = vst [vmem:[#allocation13_spill] sm:$0xff] %v10309_v38  ;;  %12191 = vst [vmem:[#allocation71_spill] sm:$0xff] %v10319_v13  ;;  %v4301_v44 = vmul.f32 %v12195_v10, %v3644_v14  ;;  %v3645_v56 = vld [vmem:[#allocation2 + $0x37] sm:$0xff]  ;;  %v3661_v28 = vmul.f32 %v9334_v36, %v3644_v14  ;;  %v3750_v50 = vmul.f32 %v12196_v3, %v3733_v19  ;;  %v12200_v14 = vld [vmem:[#allocation51_spill] sm:$0xff]  ;;  %v12209_v18 = vmov 0  ;;  %v3265_v36 = vpop.f32.mrf.mxu0 }
 0xe15   :  { %v3856_v26 = vld [vmem:[#allocation2 + $0x31] sm:$0xff]  ;;  %v4629_v47 = vmul.f32 %v10296_v45, %v10296_v45  ;;  %v4645_v49 = vmul.f32 %v4628_v25, %v10269_v55  ;;  %v3893_v13 = vmul.f32 %v8762_v51, %v3872_v48  ;;  %v4001_v54 = vmul.f32 %v12103_v4, %v3980_v17  ;;  %v12201_v10 = vld [vmem:[#allocation86_spill] sm:$0xff]  ;;  %vm3814_vm10 = vmand %vm10216_vm2, %vm3566_vm7 }
 0xe16   :  { %v4197_v62 = vmul.f32 %v12126_v22, %v4176_v1  ;;  %v12197_v23 = vld [vmem:[#allocation84_spill] sm:$0xff]  ;;  %vm3516_vm0 = vcmp.ge.f32.partialorder %v12200_v14, 8.0  ;;  %v4322_v25 = vmul.f32 %v12136_v32, %v4301_v44  ;;  %v3682_v48 = vmul.f32 %v8633_v35, %v3661_v28  ;;  %v12204_v28 = vld [vmem:[#allocation90_spill] sm:$0xff]  ;;  %vm10373_vm2 = vmand %vm3378_vm14, %vm3531_vm5 }
 0xe17   :  { %v4500_v42 = vmul.f32 %v12197_v23, %v3855_v21  ;;  %v3771_v17 = vmul.f32 %v12094_v12, %v3750_v50  ;;  %v3873_v1 = vmul.f32 %v12201_v10, %v3856_v26  ;;  %v3910_v21 = vadd.f32 %v3893_v13, %v3787_v57  ;;  %v12202_v23 = vld [vmem:[#allocation87_spill] sm:$0xff]  ;;  %v12205_v50 = vld [vmem:[#allocation81_spill] sm:$0xff]  ;;  %vm4258_vm1 = vmand %vm10373_vm2, %vm3548_vm13 }
 0xe18   :  { %v4214_v3 = vadd.f32 %v4197_v62, %v4106_v15  ;;  %v3981_v11 = vmul.f32 %v12202_v23, %v3645_v56  ;;  %v4177_v2 = vmul.f32 %v12203_v59, %v3856_v26  ;;  %v4302_v8 = vmul.f32 %v12204_v28, %v3645_v56  ;;  %v3734_v10 = vld [vmem:[#allocation2 + $0x38] sm:$0xff]  ;;  %v12208_v13 = vld [vmem:[#allocation91_spill] sm:$0xff]  ;;  %vm4457_vm13 = vmand %vm10193_vm12, %vm3564_vm15 }
 0xe19   :  { %v3788_v16 = vadd.f32 %v3771_v17, %v3682_v48  ;;  %v3894_v44 = vmul.f32 %v8762_v51, %v3873_v1  ;;  %v4393_v38 = vmul.f32 %v12205_v50, %v3733_v19  ;;  %v4018_v34 = vadd.f32 %v4001_v54, %v3910_v21 }
 0xe1a   :  { %v4339_v27 = vadd.f32 %v4322_v25, %v4214_v3  ;;  %v10357_v58 = vsel %vm3814_vm10, 1.0, %v11517_v5  ;;  %v10362_v15 = vsel %vm10338_vm3, 1.0, %v11517_v5  ;;  %v4002_v57 = vmul.f32 %v12103_v4, %v3981_v11  ;;  %v12216_v3 = vld [vmem:[#allocation94_spill] sm:$0xff] }
 0xe1b   :  { %12206 = vst [vmem:[#allocation72_spill] sm:$0xff] %v10357_v58  ;;  %12207 = vst [vmem:[#allocation75_spill] sm:$0xff] %v10362_v15  ;;  %v3911_v59 = vadd.f32 %v3894_v44, %v3788_v16  ;;  %v4501_v62 = vmul.f32 %v12208_v13, %v3856_v26  ;;  %v10367_v48 = vadd.f32 %v9663_v37, %v3262_v0  ;;  %v12210_v18 = vsel %vm10373_vm2, 4294967295, %v12209_v18  ;;  %v12285_v15 = vld [vmem:[#allocation131_spill] sm:$0xff] }
 0xe1c   :  { %12211 = vst [vmem:[#allocation78_spill] sm:$0xff] %v12210_v18  ;;  %v4107_v19 = vadd.f32 %v4090_v40, %v4018_v34  ;;  %v4198_v54 = vmul.f32 %v12126_v22, %v4177_v2  ;;  %v3662_v16 = vmul.f32 %v9454_v60, %v3645_v56  ;;  %v3751_v11 = vmul.f32 %v9459_v6, %v3734_v10  ;;  %v12213_v56 = vld [vmem:[#allocation89_spill] sm:$0xff]  ;;  %v5645_v6 = vpop.f32.mrf.mxu0 }
 0xe1d   :  { %v4521_v26 = vmul.f32 %v10160_v61, %v4500_v42  ;;  %v4323_v0 = vmul.f32 %v12136_v32, %v4302_v8  ;;  %v4414_v31 = vmul.f32 %v10009_v33, %v4393_v38  ;;  %vm12212_vm4 = vcmask 523264   ;;  %v12214_v38 = vld [vmem:[#allocation92_spill] sm:$0xff] }
 0xe1e   :  { %3316 = vst.msk [vmem:[#allocation2 + $0x40] sm:$0xff] %vm12212_vm4, %v10367_v48  ;;  %v10386_v25 = vadd.f32 %v9663_v37, %v3265_v36  ;;  %v4019_v40 = vadd.f32 %v4002_v57, %v3911_v59  ;;  %v4215_v34 = vadd.f32 %v4198_v54, %v4107_v19  ;;  %v4522_v2 = vmul.f32 %v10160_v61, %v4501_v62  ;;  %vm12215_vm9 = vmmov %vm12212_vm4  ;;  %v3270_v44 = vpop.f32.mrf.mxu0  ;;  %v12219_v19 = vld [vmem:[#allocation48_spill] sm:$0xff] }
 0xe1f   :  { %v4394_v60 = vmul.f32 %v12213_v56, %v3734_v10  ;;  %v3683_v8 = vmul.f32 %v8633_v35, %v3662_v16  ;;  %v3772_v42 = vmul.f32 %v12094_v12, %v3751_v11  ;;  %v4071_v17 = vmul.f32 %v12214_v38, %v10367_v48  ;;  %vm12225_vm3 = vmmov %vm12212_vm4 }
 0xe20   :  { %3317 = vst.msk [vmem:[#allocation2 + $0x48] sm:$0xff] %vm12215_vm9, %v10386_v25  ;;  %v4646_v1 = vmul.f32 %v4629_v47, %v10296_v45  ;;  %v4340_v21 = vadd.f32 %v4323_v0, %v4215_v34  ;;  %v4072_v23 = vmul.f32 %v12216_v3, %v10386_v25  ;;  %v4662_v28 = vmul.f32 0.044715, %v4645_v49  ;;  %v5648_v62 = vpop.f32.mrf.mxu0  ;;  %v12227_v0 = vld [vmem:[#allocation97_spill] sm:$0xff]  ;;  %vm12249_vm10 = vmmov %vm12225_vm3 }
 0xe21   :  { %v4431_v50 = vadd.f32 %v4414_v31, %v4339_v27  ;;  %v10408_v10 = vadd.f32 %v9663_v37, %v3270_v44  ;;  %v4538_v57 = vadd.f32 %v4521_v26, %v10311_v52  ;;  %v10412_v47 = vsel %vm4258_vm1, 1.0, %v11517_v5  ;;  %vm12255_vm4 = vmmov %vm12225_vm3 }
 0xe22   :  { %v4663_v59 = vmul.f32 0.044715, %v4646_v1  ;;  %12218 = vst [vmem:[#allocation74_spill] sm:$0xff] %v10412_v47  ;;  %v4415_v13 = vmul.f32 %v10009_v33, %v4394_v60  ;;  %v4679_v49 = vadd.f32 %v4662_v28, %v10269_v55  ;;  %vm3550_vm5 = vcmp.ge.f32.partialorder %v12219_v19, 1.0  ;;  %v10437_v34 = vpop.f32.mrf.mxu0  ;;  %v12229_v60 = vld [vmem:[#allocation95_spill] sm:$0xff]  ;;  %vm12258_vm1 = vmmov %vm12225_vm3 }
 0xe23   :  { %12217 = vst [vmem:[#allocation76_spill] sm:$0xff] %v10408_v10  ;;  %v4539_v27 = vadd.f32 %v4522_v2, %v4431_v50  ;;  %vm12221_vm15 = vcmp.ge.f32.partialorder %v12220_v46, 0.5  ;;  %v12222_v9 = vmov 0  ;;  %v4108_v52 = vadd.f32 %v10301_v41, %v4019_v40  ;;  %3318 = vst.msk [vmem:[#allocation2 + $0x50] sm:$0xff] %vm12225_vm3, %v10408_v10  ;;  %v12228_v2 = vld [vmem:[#allocation93_spill] sm:$0xff]  ;;  %v12290_v46 = vld [vmem:[#allocation136_spill] sm:$0xff] }
 0xe24   :  { %vm10421_vm12 = vmand %vm12221_vm15, %vm3516_vm0  ;;  %v3789_v54 = vadd.f32 %v3772_v42, %v3683_v8  ;;  %v4092_v16 = vmul.f32 %v12110_v7, %v4071_v17  ;;  %v10430_v55 = vsel %vm4457_vm13, 1.0, %v11517_v5  ;;  %v4093_v26 = vmul.f32 %v12110_v7, %v4072_v23  ;;  %v12230_v8 = vld [vmem:[#allocation98_spill] sm:$0xff]  ;;  %v5649_v44 = vpop.f32.mrf.mxu0 }
 0xe25   :  { %v12223_v9 = vsel %vm10421_vm12, 4294967295, %v12222_v9  ;;  %12226 = vst [vmem:[#allocation77_spill] sm:$0xff] %v10430_v55  ;;  %v3646_v11 = vld [vmem:[#allocation2 + $0x3f] sm:$0xff]  ;;  %v10435_v31 = vmul.f32 %v12227_v0, %v10408_v10  ;;  %v10440_v41 = vadd.f32 %v4663_v59, %v10296_v45  ;;  %v10442_v40 = vadd.f32 %v4415_v13, %v4340_v21  ;;  %vm10454_vm0 = vmand %vm10421_vm12, %vm3550_vm5  ;;  %v12241_v10 = vld [vmem:[#allocation107_spill] sm:$0xff] }
 0xe26   :  { %12224 = vst [vmem:[#allocation73_spill] sm:$0xff] %v12223_v9  ;;  %v3857_v36 = vld [vmem:[#allocation2 + $0x39] sm:$0xff]  ;;  %v3982_v6 = vmul.f32 %v12229_v60, %v3646_v11  ;;  %v10448_v38 = vadd.f32 %v10181_v39, %v4538_v57  ;;  %v4303_v45 = vmul.f32 %v9571_v53, %v3646_v11  ;;  %v3663_v21 = vmul.f32 %v9603_v24, %v3646_v11  ;;  %v12233_v57 = vld [vmem:[#allocation99_spill] sm:$0xff]  ;;  %vm12260_vm9 = vmmov %vm12258_vm1 }
 0xe27   :  { %v3735_v14 = vld [vmem:[#allocation2 + $0x40] sm:$0xff]  ;;  %v3874_v56 = vmul.f32 %v12228_v2, %v3857_v36  ;;  %v4178_v42 = vmul.f32 %v12230_v8, %v3857_v36  ;;  %v10461_v28 = vmul.f32 0.7978846, %v4679_v49  ;;  %v4502_v13 = vmul.f32 %v12233_v57, %v3857_v36  ;;  %v3736_v44 = vld [vmem:[#allocation2 + $0x48] sm:$0xff]  ;;  %vm12266_vm15 = vmmov %vm12258_vm1 }
 0xe28   :  { %v3647_v1 = vld [vmem:[#allocation2 + $0x47] sm:$0xff]  ;;  %v3752_v3 = vmul.f32 %v9581_v63, %v3735_v14  ;;  %v10467_v62 = vadd.f32 %v10181_v39, %v4539_v27  ;;  %v3684_v53 = vmul.f32 %v8633_v35, %v3663_v21  ;;  %v3278_v63 = vpop.f32.mrf.mxu0  ;;  %v10475_v49 = vsel %vm10454_vm0, 1.0, %v11517_v5  ;;  %v12236_v21 = vld [vmem:[#allocation100_spill] sm:$0xff]  ;;  %vm12314_vm0 = vmmov %vm12258_vm1 }
 0xe29   :  { %v3858_v23 = vld [vmem:[#allocation2 + $0x41] sm:$0xff]  ;;  %v3895_v50 = vmul.f32 %v8762_v51, %v3874_v56  ;;  %v4199_v59 = vmul.f32 %v12126_v22, %v4178_v42  ;;  %12234 = vst [vmem:[#allocation60_spill] sm:$0xff] %v10475_v49  ;;  %v4003_v2 = vmul.f32 %v12103_v4, %v3982_v6  ;;  %v3983_v36 = vmul.f32 %v9613_v30, %v3647_v1  ;;  %v12235_v56 = vld [vmem:[#allocation96_spill] sm:$0xff] }
 0xe2a   :  { %v3773_v0 = vmul.f32 %v12094_v12, %v3752_v3  ;;  %v3875_v24 = vmul.f32 %v9608_v20, %v3858_v23  ;;  %v4395_v27 = vmul.f32 %v12235_v56, %v3735_v14  ;;  %v4324_v60 = vmul.f32 %v12136_v32, %v4303_v45  ;;  %v3648_v3 = vld [vmem:[#allocation2 + $0x4f] sm:$0xff]  ;;  %v5652_v17 = vpop.f32.mrf.mxu0  ;;  %v12237_v6 = vld [vmem:[#allocation101_spill] sm:$0xff] }
 0xe2b   :  { %v3912_v11 = vadd.f32 %v3895_v50, %v3789_v54  ;;  %v4179_v20 = vmul.f32 %v12236_v21, %v3858_v23  ;;  %v3859_v57 = vld [vmem:[#allocation2 + $0x49] sm:$0xff]  ;;  %v4216_v18 = vadd.f32 %v4199_v59, %v4108_v52  ;;  %v10484_v54 = vmul.f32 %v10160_v61, %v4502_v13  ;;  %v12238_v45 = vld [vmem:[#allocation104_spill] sm:$0xff] }
 0xe2c   :  { %v3790_v8 = vadd.f32 %v3773_v0, %v3684_v53  ;;  %v3896_v42 = vmul.f32 %v8762_v51, %v3875_v24  ;;  %v4304_v30 = vmul.f32 %v12237_v6, %v3647_v1  ;;  %v4004_v14 = vmul.f32 %v12103_v4, %v3983_v36  ;;  %v12239_v0 = vld [vmem:[#allocation105_spill] sm:$0xff]  ;;  %v3281_v56 = vpop.f32.mrf.mxu0 }
 0xe2d   :  { %v4020_v43 = vadd.f32 %v4003_v2, %v3912_v11  ;;  %v4503_v53 = vmul.f32 %v12238_v45, %v3858_v23  ;;  %v3664_v24 = vmul.f32 %v12239_v0, %v3647_v1  ;;  %v3753_v49 = vmul.f32 %v12240_v29, %v3736_v44  ;;  %v12242_v11 = vld [vmem:[#allocation108_spill] sm:$0xff] }
 0xe2e   :  { %v3913_v50 = vadd.f32 %v3896_v42, %v3790_v8  ;;  %v3876_v17 = vmul.f32 %v12241_v10, %v3859_v57  ;;  %v3984_v52 = vmul.f32 %v12242_v11, %v3648_v3  ;;  %v4200_v13 = vmul.f32 %v12126_v22, %v4179_v20  ;;  %v5653_v8 = vpop.f32.mrf.mxu0  ;;  %v12243_v20 = vld [vmem:[#allocation109_spill] sm:$0xff] }
 0xe2f   :  { %v4109_v21 = vadd.f32 %v4092_v16, %v4020_v43  ;;  %v10495_v2 = vmul.f32 %v10009_v33, %v4395_v27  ;;  %v3685_v36 = vmul.f32 %v8633_v35, %v3664_v24  ;;  %v10498_v23 = vadd.f32 %v4324_v60, %v4216_v18  ;;  %v3737_v27 = vld [vmem:[#allocation2 + $0x50] sm:$0xff] }
 0xe30   :  { %v4021_v59 = vadd.f32 %v4004_v14, %v3913_v50  ;;  %v4325_v1 = vmul.f32 %v12136_v32, %v4304_v30  ;;  %v3774_v43 = vmul.f32 %v12094_v12, %v3753_v49  ;;  %v3897_v29 = vmul.f32 %v8762_v51, %v3876_v17  ;;  %v3286_v50 = vpop.f32.mrf.mxu0  ;;  %v12245_v60 = vld [vmem:[#allocation112_spill] sm:$0xff]  ;;  %v12247_v24 = vld [vmem:[#allocation115_spill] sm:$0xff] }
 0xe31   :  { %v4217_v16 = vadd.f32 %v4200_v13, %v4109_v21  ;;  %v10504_v42 = vmul.f32 %v10160_v61, %v4503_v53  ;;  %v4180_v6 = vmul.f32 %v12243_v20, %v3859_v57  ;;  %v4005_v45 = vmul.f32 %v12103_v4, %v3984_v52  ;;  %v12246_v53 = vld [vmem:[#allocation102_spill] sm:$0xff] }
 0xe32   :  { %v4110_v10 = vadd.f32 %v4093_v26, %v4021_v59  ;;  %v3791_v14 = vadd.f32 %v3774_v43, %v3685_v36  ;;  %v4094_v18 = vmul.f32 %v12110_v7, %v10435_v31  ;;  %v10512_v49 = vadd.f32 %v9663_v37, %v10437_v34  ;;  %v5656_v17 = vpop.f32.mrf.mxu0  ;;  %v12248_v59 = vld [vmem:[#allocation113_spill] sm:$0xff]  ;;  %v12250_v31 = vld [vmem:[#allocation114_spill] sm:$0xff]  ;;  %v12251_v34 = vld [vmem:[#allocation103_spill] sm:$0xff] }
 0xe33   :  { %v4201_v26 = vmul.f32 %v12126_v22, %v4180_v6  ;;  %v4305_v30 = vmul.f32 %v12245_v60, %v3648_v3  ;;  %v4396_v0 = vmul.f32 %v12246_v53, %v3736_v44  ;;  %v3665_v21 = vmul.f32 %v12247_v24, %v3648_v3  ;;  %v12252_v20 = vld [vmem:[#allocation110_spill] sm:$0xff] }
 0xe34   :  { %12244 = vst [vmem:[#allocation50_spill] sm:$0xff] %v10512_v49  ;;  %v3914_v11 = vadd.f32 %v3897_v29, %v3791_v14  ;;  %v4504_v13 = vmul.f32 %v12248_v59, %v3859_v57  ;;  %3319 = vst.msk [vmem:[#allocation2 + $0x58] sm:$0xff] %vm12249_vm10, %v10512_v49  ;;  %v3754_v52 = vmul.f32 %v12250_v31, %v3737_v27  ;;  %v3289_v3 = vpop.f32.mrf.mxu0  ;;  %6031 = vtanh.f32 %v10461_v28  ;;  %v12263_v31 = vld [vmem:[#allocation41_spill] sm:$0xff]  ;;  %v12268_v28 = vld [vmem:[#allocation42_spill] sm:$0xff] }
 0xe35   :  { %v4074_v36 = vmul.f32 %v12251_v34, %v10512_v49  ;;  %v10524_v8 = vadd.f32 %v4325_v1, %v4217_v16  ;;  %v4218_v43 = vadd.f32 %v4201_v26, %v4110_v10  ;;  %v4397_v6 = vmul.f32 %v12252_v20, %v3737_v27  ;;  %v12259_v26 = vld [vmem:[#allocation117_spill] sm:$0xff] }
 0xe36   :  { %v10528_v44 = vadd.f32 %v9663_v37, %v3278_v63  ;;  %v4022_v29 = vadd.f32 %v4005_v45, %v3914_v11  ;;  %v3686_v57 = vmul.f32 %v8633_v35, %v3665_v21  ;;  %v3775_v14 = vmul.f32 %v12094_v12, %v3754_v52  ;;  %v12256_v63 = vld [vmem:[#allocation111_spill] sm:$0xff]  ;;  %v5657_v27 = vpop.f32.mrf.mxu0  ;;  %v12283_v49 = vld [vmem:[#allocation121_spill] sm:$0xff] }
 0xe37   :  { %v10533_v60 = vadd.f32 %v9663_v37, %v3281_v56  ;;  %v4326_v53 = vmul.f32 %v12136_v32, %v4305_v30  ;;  %v10537_v1 = vmul.f32 %v10009_v33, %v4396_v0  ;;  %v10544_v16 = vadd.f32 %v9663_v37, %v3286_v50  ;;  %v12261_v50 = vld [vmem:[#allocation124_spill] sm:$0xff] }
 0xe38   :  { %12253 = vst [vmem:[#allocation79_spill] sm:$0xff] %v10528_v44  ;;  %3320 = vst.msk [vmem:[#allocation2 + $0x60] sm:$0xff] %vm12255_vm4, %v10528_v44  ;;  %v4075_v10 = vmul.f32 %v12256_v63, %v10528_v44  ;;  %v10547_v45 = vmul.f32 %v10160_v61, %v4504_v13  ;;  %v4095_v56 = vmul.f32 %v12110_v7, %v4074_v36  ;;  %v4697_v0 = vmul.f32 0.7978846, %v10440_v41  ;;  %v12264_v41 = vld [vmem:[#allocation26_spill] sm:$0xff] }
 0xe39   :  { %12254 = vst [vmem:[#allocation80_spill] sm:$0xff] %v10533_v60  ;;  %12257 = vst [vmem:[#allocation82_spill] sm:$0xff] %v10544_v16  ;;  %v4076_v30 = vmul.f32 %v12259_v26, %v10533_v60  ;;  %v10555_v24 = vadd.f32 %v4326_v53, %v4218_v43  ;;  %v10558_v21 = vmul.f32 %v10009_v33, %v4397_v6  ;;  %vm12265_vm13 = vcmp.ge.f32.partialorder %v12264_v41, 0.5  ;;  %v12274_v26 = vld [vmem:[#allocation125_spill] sm:$0xff] }
 0xe3a   :  { %3321 = vst.msk [vmem:[#allocation2 + $0x68] sm:$0xff] %vm12258_vm1, %v10533_v60  ;;  %v4077_v17 = vmul.f32 %v12261_v50, %v10544_v16  ;;  %v10565_v11 = vadd.f32 %v9663_v37, %v3289_v3  ;;  %v4111_v59 = vadd.f32 %v4094_v18, %v4022_v29  ;;  %v3792_v13 = vadd.f32 %v3775_v14, %v3686_v57  ;;  %v12267_v37 = vld [vmem:[#allocation61_spill] sm:$0xff]  ;;  %v12271_v29 = vld [vmem:[#allocation118_spill] sm:$0xff]  ;;  %v12272_v14 = vld [vmem:[#allocation119_spill] sm:$0xff] }
 0xe3b   :  { %3322 = vst.msk [vmem:[#allocation2 + $0x70] sm:$0xff] %vm12260_vm9, %v10544_v16  ;;  %v10572_v52 = vsel %vm12265_vm13, %v10467_v62, %v12263_v31  ;;  %v3649_v34 = vld [vmem:[#allocation2 + $0x57] sm:$0xff]  ;;  %v4096_v20 = vmul.f32 %v12110_v7, %v4075_v10  ;;  %v10576_v6 = vmul.f32 %v12110_v7, %v4076_v30  ;;  %6033 = vtanh.f32 %v4697_v0  ;;  %v12275_v0 = vld [vmem:[#allocation123_spill] sm:$0xff] }
 0xe3c   :  { %12262 = vst [vmem:[#allocation83_spill] sm:$0xff] %v10565_v11  ;;  %v3860_v36 = vld [vmem:[#allocation2 + $0x51] sm:$0xff]  ;;  %3323 = vst.msk [vmem:[#allocation2 + $0x78] sm:$0xff] %vm12266_vm15, %v10565_v11  ;;  %vm12269_vm3 = vcmp.ge.f32.partialorder %v12268_v28, 0.5  ;;  %v3985_v57 = vmul.f32 %v12271_v29, %v3649_v34  ;;  %v10590_v63 = vmul.f32 %v12110_v7, %v4077_v17  ;;  %v3666_v30 = vmul.f32 %v12274_v26, %v3649_v34 }
 0xe3d   :  { %v3738_v43 = vld [vmem:[#allocation2 + $0x58] sm:$0xff]  ;;  %v10584_v18 = vsel %vm12269_vm3, %v10448_v38, %v12267_v37  ;;  %v4181_v53 = vmul.f32 %v12272_v14, %v3860_v36  ;;  %v12276_v31 = vld [vmem:[#allocation143_spill] sm:$0xff]  ;;  %v12277_v37 = vld [vmem:[#allocation122_spill] sm:$0xff]  ;;  %v10605_v17 = vmul.f32 0.5, %v10572_v52  ;;  %vm12317_vm10 = vmmov 0  }
 0xe3e   :  { %v12270_v62 = vld [vmem:[#allocation116_spill] sm:$0xff]  ;;  %v3755_v50 = vmul.f32 %v12275_v0, %v3738_v43  ;;  %v10597_v41 = vmul.f32 %v12276_v31, %v10565_v11  ;;  %v4505_v28 = vmul.f32 %v12277_v37, %v3860_v36  ;;  %v10602_v14 = vmul.f32 0.5, %v10584_v18  ;;  %v12280_v0 = vld [vmem:[#allocation126_spill] sm:$0xff]  ;;  %vm12329_vm3 = vmmov %vm12314_vm0 }
 0xe3f   :  { %v3877_v3 = vmul.f32 %v12270_v62, %v3860_v36  ;;  %v12273_v10 = vld [vmem:[#allocation120_spill] sm:$0xff]  ;;  %v3650_v62 = vld [vmem:[#allocation2 + $0x5f] sm:$0xff]  ;;  %12279 = vst [vmem:[#allocation84_spill] sm:$0xff] %v10605_v17  ;;  %v12281_v36 = vld [vmem:[#allocation127_spill] sm:$0xff]  ;;  %vm3567_vm9 = vcmp.lt.f32.partialorder %v12219_v19, 7.0 }
 0xe40   :  { %v4306_v27 = vmul.f32 %v12273_v10, %v3649_v34  ;;  %v3861_v29 = vld [vmem:[#allocation2 + $0x59] sm:$0xff]  ;;  %12278 = vst [vmem:[#allocation85_spill] sm:$0xff] %v10602_v14  ;;  %v4006_v34 = vmul.f32 %v12103_v4, %v3985_v57  ;;  %v3687_v10 = vmul.f32 %v8633_v35, %v3666_v30  ;;  %v3776_v26 = vmul.f32 %v12094_v12, %v3755_v50 }
 0xe41   :  { %v3898_v38 = vmul.f32 %v8762_v51, %v3877_v3  ;;  %v3878_v31 = vmul.f32 %v12280_v0, %v3861_v29  ;;  %v4202_v3 = vmul.f32 %v12126_v22, %v4181_v53  ;;  %v3986_v37 = vmul.f32 %v12281_v36, %v3650_v62  ;;  %v12282_v16 = vld [vmem:[#allocation128_spill] sm:$0xff]  ;;  %v3739_v55 = vld [vmem:[#allocation2 + $0x60] sm:$0xff] }
 0xe42   :  { %v4182_v60 = vmul.f32 %v12282_v16, %v3861_v29  ;;  %v4327_v44 = vmul.f32 %v12136_v32, %v4306_v27  ;;  %v3793_v14 = vadd.f32 %v3776_v26, %v3687_v10  ;;  %v4398_v57 = vmul.f32 %v12283_v49, %v3738_v43  ;;  %v3862_v30 = vld [vmem:[#allocation2 + $0x61] sm:$0xff]  ;;  %v12287_v43 = vld [vmem:[#allocation132_spill] sm:$0xff] }
 0xe43   :  { %v3915_v11 = vadd.f32 %v3898_v38, %v3792_v13  ;;  %v3899_v17 = vmul.f32 %v8762_v51, %v3878_v31  ;;  %v4219_v50 = vadd.f32 %v4202_v3, %v4111_v59  ;;  %v10618_v0 = vmul.f32 %v10160_v61, %v4505_v28  ;;  %v12284_v13 = vld [vmem:[#allocation130_spill] sm:$0xff]  ;;  %v12286_v10 = vld [vmem:[#allocation133_spill] sm:$0xff]  ;;  %v12289_v3 = vld [vmem:[#allocation135_spill] sm:$0xff] }
 0xe44   :  { %v4307_v53 = vmul.f32 %v12284_v13, %v3650_v62  ;;  %v3651_v38 = vld [vmem:[#allocation2 + $0x67] sm:$0xff]  ;;  %v4007_v16 = vmul.f32 %v12103_v4, %v3986_v37  ;;  %v4506_v27 = vmul.f32 %v12285_v15, %v3861_v29  ;;  %v3667_v26 = vmul.f32 %v12286_v10, %v3650_v62 }
 0xe45   :  { %v4023_v47 = vadd.f32 %v4006_v34, %v3915_v11  ;;  %v3916_v36 = vadd.f32 %v3899_v17, %v3793_v14  ;;  %v4203_v49 = vmul.f32 %v12126_v22, %v4182_v60  ;;  %v3756_v58 = vmul.f32 %v12287_v43, %v3739_v55  ;;  %v12288_v11 = vld [vmem:[#allocation134_spill] sm:$0xff] }
 0xe46   :  { %v3879_v59 = vmul.f32 %v12288_v11, %v3862_v30  ;;  %v3688_v28 = vmul.f32 %v8633_v35, %v3667_v26  ;;  %v3987_v13 = vmul.f32 %v12289_v3, %v3651_v38  ;;  %v4183_v14 = vmul.f32 %v12290_v46, %v3862_v30  ;;  %v3740_v60 = vld [vmem:[#allocation2 + $0x68] sm:$0xff]  ;;  %v12295_v11 = vld [vmem:[#allocation53_spill] sm:$0xff] }
 0xe47   :  { %v4112_v31 = vadd.f32 %v4095_v56, %v4023_v47  ;;  %v4024_v34 = vadd.f32 %v4007_v16, %v3916_v36  ;;  %v10631_v37 = vmul.f32 %v10009_v33, %v4398_v57  ;;  %v3777_v15 = vmul.f32 %v12094_v12, %v3756_v58  ;;  %v6032_v56 = vpop.eup %6031  ;;  %v3863_v10 = vld [vmem:[#allocation2 + $0x69] sm:$0xff] }
 0xe48   :  { %v3900_v47 = vmul.f32 %v8762_v51, %v3879_v59  ;;  %v10635_v62 = vadd.f32 %v4327_v44, %v4219_v50  ;;  %v4328_v36 = vmul.f32 %v12136_v32, %v4307_v53  ;;  %v10639_v16 = vmul.f32 %v10160_v61, %v4506_v27  ;;  %v6034_v46 = vpop.eup %6033  ;;  %v3652_v58 = vld [vmem:[#allocation2 + $0x6f] sm:$0xff]  ;;  %v12297_v53 = vld [vmem:[#allocation141_spill] sm:$0xff] }
 0xe49   :  { %v4220_v17 = vadd.f32 %v4203_v49, %v4112_v31  ;;  %12291 = vst [vmem:[#allocation51_spill] sm:$0xff] %v10631_v37  ;;  %v4113_v29 = vadd.f32 %v4096_v20, %v4024_v34  ;;  %v3794_v26 = vadd.f32 %v3777_v15, %v3688_v28  ;;  %v12293_v31 = vld [vmem:[#allocation137_spill] sm:$0xff]  ;;  %v3668_v59 = vmul.f32 %v12295_v11, %v3651_v38  ;;  %v12296_v20 = vld [vmem:[#allocation140_spill] sm:$0xff]  ;;  %v12298_v15 = vld [vmem:[#allocation142_spill] sm:$0xff] }
 0xe4a   :  { %12292 = vst [vmem:[#allocation86_spill] sm:$0xff] %v10639_v16  ;;  %v4308_v57 = vmul.f32 %v12293_v31, %v3651_v38  ;;  %v12294_v49 = vld [vmem:[#allocation129_spill] sm:$0xff]  ;;  %v4008_v3 = vmul.f32 %v12103_v4, %v3987_v13  ;;  %v4204_v44 = vmul.f32 %v12126_v22, %v4183_v14  ;;  %v4507_v50 = vmul.f32 %v12296_v20, %v3862_v30  ;;  %v12300_v11 = vld [vmem:[#allocation62_spill] sm:$0xff]  ;;  %v3741_v20 = vld [vmem:[#allocation2 + $0x70] sm:$0xff] }
 0xe4b   :  { %v4399_v43 = vmul.f32 %v12294_v49, %v3739_v55  ;;  %v3757_v34 = vmul.f32 %v12297_v53, %v3740_v60  ;;  %v10648_v27 = vadd.f32 %v4328_v36, %v4220_v17  ;;  %v3917_v9 = vadd.f32 %v3900_v47, %v3794_v26  ;;  %v12299_v49 = vld [vmem:[#allocation40_spill] sm:$0xff]  ;;  %v12303_v26 = vld [vmem:[#allocation57_spill] sm:$0xff] }
 0xe4c   :  { %v3689_v28 = vmul.f32 %v8633_v35, %v3668_v59  ;;  %v3880_v31 = vmul.f32 %v12298_v15, %v3863_v10  ;;  %v4221_v16 = vadd.f32 %v4204_v44, %v4113_v29  ;;  %v3988_v38 = vmul.f32 %v12299_v49, %v3652_v58  ;;  %v12304_v59 = vld [vmem:[#allocation138_spill] sm:$0xff]  ;;  %v3864_v53 = vld [vmem:[#allocation2 + $0x71] sm:$0xff] }
 0xe4d   :  { %v3778_v55 = vmul.f32 %v12094_v12, %v3757_v34  ;;  %v4184_v13 = vmul.f32 %v12300_v11, %v3863_v10  ;;  %v4025_v37 = vadd.f32 %v4008_v3, %v3917_v9  ;;  %v4329_v14 = vmul.f32 %v12136_v32, %v4308_v57  ;;  %v12305_v15 = vld [vmem:[#allocation11_spill] sm:$0xff] }
 0xe4e   :  { %v10657_v30 = vmul.f32 %v10009_v33, %v4399_v43  ;;  %v3901_v17 = vmul.f32 %v8762_v51, %v3880_v31  ;;  %v10661_v47 = vmul.f32 %v10160_v61, %v4507_v50  ;;  %v4309_v29 = vmul.f32 %v12303_v26, %v3652_v58  ;;  %v10669_v50 = vld [vmem:[#allocation2 + $0x77] sm:$0xff]  ;;  %v12307_v26 = vld [vmem:[#allocation38_spill] sm:$0xff] }
 0xe4f   :  { %v3795_v36 = vadd.f32 %v3778_v55, %v3689_v28  ;;  %v4400_v44 = vmul.f32 %v12304_v59, %v3740_v60  ;;  %v4114_v34 = vadd.f32 %v10576_v6, %v4025_v37  ;;  %v4009_v9 = vmul.f32 %v12103_v4, %v3988_v38  ;;  %v12306_v28 = vld [vmem:[#allocation64_spill] sm:$0xff] }
 0xe50   :  { %12301 = vst [vmem:[#allocation87_spill] sm:$0xff] %v10657_v30  ;;  %12302 = vst [vmem:[#allocation88_spill] sm:$0xff] %v10661_v47  ;;  %v4205_v57 = vmul.f32 %v12126_v22, %v4184_v13  ;;  %v4730_v43 = vadd.f32 1.0, %v6032_v56  ;;  %v4508_v31 = vmul.f32 %v12305_v15, %v3863_v10  ;;  %v4731_v49 = vadd.f32 1.0, %v6034_v46  ;;  %v12308_v47 = vld [vmem:[#allocation9_spill] sm:$0xff]  ;;  %v12309_v38 = vld [vmem:[#allocation12_spill] sm:$0xff] }
 0xe51   :  { %v3918_v3 = vadd.f32 %v3901_v17, %v3795_v36  ;;  %v3669_v55 = vmul.f32 %v12306_v28, %v3652_v58  ;;  %v10672_v11 = vadd.f32 %v4329_v14, %v4221_v16  ;;  %v3758_v59 = vmul.f32 %v12307_v26, %v3741_v20  ;;  %v12310_v13 = vld [vmem:[#allocation13_spill] sm:$0xff]  ;;  %v12311_v58 = vld [vmem:[#allocation22_spill] sm:$0xff]  ;;  %v12316_v26 = vld [vmem:[#allocation8_spill] sm:$0xff] }
 0xe52   :  { %v4222_v60 = vadd.f32 %v4205_v57, %v4114_v34  ;;  %v3881_v6 = vmul.f32 %v12308_v47, %v3864_v53  ;;  %v4747_v30 = vmul.f32 %v4730_v43, %v12309_v38  ;;  %v4748_v56 = vmul.f32 %v4731_v49, %v12310_v13 }
 0xe53   :  { %v4026_v37 = vadd.f32 %v4009_v9, %v3918_v3  ;;  %v3690_v17 = vmul.f32 %v8633_v35, %v3669_v55  ;;  %v4330_v10 = vmul.f32 %v12136_v32, %v4309_v29  ;;  %v10681_v46 = vmul.f32 %v10009_v33, %v4400_v44  ;;  %v12312_v9 = vld [vmem:[#allocation58_spill] sm:$0xff] }
 0xe54   :  { %v3779_v16 = vmul.f32 %v12094_v12, %v3758_v59  ;;  %v3989_v14 = vmul.f32 %v12311_v58, %v10669_v50  ;;  %v10687_v36 = vmul.f32 %v10160_v61, %v4508_v31  ;;  %v4764_v47 = vpack.c.bf16 %v4748_v56, %v4747_v30  ;;  %v12313_v44 = vld [vmem:[#allocation10_spill] sm:$0xff] }
 0xe55   :  { %v3902_v34 = vmul.f32 %v8762_v51, %v3881_v6  ;;  %v4185_v57 = vmul.f32 %v12312_v9, %v3864_v53  ;;  %v4115_v43 = vadd.f32 %v10590_v63, %v4026_v37  ;;  %v10692_v3 = vadd.f32 %v4330_v10, %v4222_v60  ;;  %v12321_v9 = vld [vmem:[#allocation47_spill] sm:$0xff] }
 0xe56   :  { %v4099_v29 = vmul.f32 %v12110_v7, %v10597_v41  ;;  %v4310_v15 = vmul.f32 %v12313_v44, %v10669_v50  ;;  %5675 = vmatmul.mubr.msk.bf16.vlgmr.msra.gmra.mxu1 %vm12314_vm0, %v4764_v47  ;;  %v3796_v49 = vadd.f32 %v3779_v16, %v3690_v17  ;;  %v4630_v30 = vmul.f32 %v10584_v18, %v10584_v18  ;;  %v12315_v41 = vld [vmem:[#allocation44_spill] sm:$0xff] }
 0xe57   :  { %v4631_v31 = vmul.f32 %v10572_v52, %v10572_v52  ;;  %v4433_v63 = vadd.f32 %v10495_v2, %v10498_v23  ;;  %v4010_v28 = vmul.f32 %v12103_v4, %v3989_v14  ;;  %v4206_v55 = vmul.f32 %v12126_v22, %v4185_v57  ;;  %5678 = vmatprep.mubr.msk.bf16.mxu1 %vm12317_vm10, %v11517_v5  ;;  %v12322_v57 = vld [vmem:[#allocation28_spill] sm:$0xff] }
 0xe58   :  { %v4401_v60 = vmul.f32 %v12315_v41, %v3741_v20  ;;  %v4509_v59 = vmul.f32 %v12316_v26, %v3864_v53  ;;  %v3919_v6 = vadd.f32 %v3902_v34, %v3796_v49  ;;  %v4647_v37 = vmul.f32 %v4630_v30, %v10584_v18  ;;  %v3294_v26 = vpop.f32.mrf.mxu0 }
 0xe59   :  { %v4648_v38 = vmul.f32 %v4631_v31, %v10572_v52  ;;  %v4540_v13 = vadd.f32 %v10484_v54, %v10442_v40  ;;  %v4331_v2 = vmul.f32 %v12136_v32, %v4310_v15  ;;  %v4541_v23 = vadd.f32 %v10504_v42, %v4433_v63  ;;  %v12326_v63 = vld [vmem:[#allocation7_spill] sm:$0xff] }
 0xe5a   :  { %v4434_v20 = vadd.f32 %v10537_v1, %v10524_v8  ;;  %v4435_v53 = vadd.f32 %v10558_v21, %v10555_v24  ;;  %v4223_v56 = vadd.f32 %v4206_v55, %v4115_v43  ;;  %v4664_v17 = vmul.f32 0.044715, %v4647_v37  ;;  %v12318_v24 = vld [vmem:[#allocation56_spill] sm:$0xff]  ;;  %v12319_v21 = vld [vmem:[#allocation27_spill] sm:$0xff]  ;;  %v12327_v37 = vld [vmem:[#allocation30_spill] sm:$0xff] }
 0xe5b   :  { %v4665_v10 = vmul.f32 0.044715, %v4648_v38  ;;  %v4564_v16 = vadd.f32 %v10181_v39, %v4540_v13  ;;  %v10723_v58 = vmul.f32 %v10009_v33, %v4401_v60  ;;  %v4565_v40 = vadd.f32 %v10181_v39, %v4541_v23 }
 0xe5c   :  { %v4542_v54 = vadd.f32 %v10547_v45, %v4434_v20  ;;  %v4543_v42 = vadd.f32 %v10618_v0, %v4435_v53  ;;  %v4027_v14 = vadd.f32 %v4010_v28, %v3919_v6  ;;  %v4681_v8 = vadd.f32 %v4664_v17, %v10584_v18  ;;  %v5660_v20 = vpop.f32.mrf.mxu0  ;;  %v12330_v17 = vld [vmem:[#allocation45_spill] sm:$0xff] }
 0xe5d   :  { %v4682_v1 = vadd.f32 %v4665_v10, %v10572_v52  ;;  %vm12320_vm4 = vcmp.ge.f32.partialorder %v12319_v21, 0.5  ;;  %v10734_v34 = vmul.f32 %v10160_v61, %v4509_v59  ;;  %vm12323_vm1 = vcmp.ge.f32.partialorder %v12322_v57, 0.5  ;;  %v12324_v61 = vld [vmem:[#allocation29_spill] sm:$0xff]  ;;  %v12332_v21 = vld [vmem:[#allocation71_spill] sm:$0xff] }
 0xe5e   :  { %v4598_v47 = vsel %vm12320_vm4, %v4564_v16, %v12318_v24  ;;  %v4599_v43 = vsel %vm12323_vm1, %v4565_v40, %v12321_v9  ;;  %v4566_v45 = vadd.f32 %v10181_v39, %v4542_v54  ;;  %v10740_v0 = vadd.f32 %v4331_v2, %v4223_v56  ;;  %v3742_v59 = vld [vmem:[#allocation2 + $0x78] sm:$0xff]  ;;  %vm12338_vm4 = vmmov %vm12329_vm3 }
 0xe5f   :  { %v4632_v44 = vmul.f32 %v4598_v47, %v4598_v47  ;;  %v4698_v15 = vmul.f32 0.7978846, %v4681_v8  ;;  %v4699_v18 = vmul.f32 0.7978846, %v4682_v1  ;;  %v4633_v49 = vmul.f32 %v4599_v43, %v4599_v43  ;;  %v3297_v8 = vpop.f32.mrf.mxu0  ;;  %v12333_v9 = vld [vmem:[#allocation20_spill] sm:$0xff]  ;;  %vm10803_vm1 = vmand %vm10421_vm12, %vm3567_vm9 }
 0xe60   :  { %v4567_v30 = vadd.f32 %v10181_v39, %v4543_v42  ;;  %vm12325_vm13 = vcmp.ge.f32.partialorder %v12324_v61, 0.5  ;;  %v3670_v28 = vmul.f32 %v12326_v63, %v10669_v50  ;;  %v10749_v55 = vadd.f32 %v4099_v29, %v4027_v14  ;;  %v12331_v42 = vld [vmem:[#allocation51_spill] sm:$0xff] }
 0xe61   :  { %v4649_v52 = vmul.f32 %v4632_v44, %v4598_v47  ;;  %v4600_v31 = vsel %vm12325_vm13, %v4566_v45, %v10367_v48  ;;  %6035 = vtanh.f32 %v4698_v15  ;;  %v4650_v41 = vmul.f32 %v4633_v49, %v4599_v43  ;;  %v10757_v48 = vld [vmem:[%s11270_s12] ss:$0 sm:$0xff]  ;;  %v5661_v49 = vpop.f32.mrf.mxu0  ;;  %v12336_v63 = vld [vmem:[#allocation43_spill] sm:$0xff] }
 0xe62   :  { %v4634_v60 = vmul.f32 %v4600_v31, %v4600_v31  ;;  %6037 = vtanh.f32 %v4699_v18  ;;  %vm12328_vm15 = vcmp.ge.f32.partialorder %v12327_v37, 0.5  ;;  %v10760_v50 = vadd.f32 %v10757_v48, %v3294_v26  ;;  %v12334_v18 = vld [vmem:[#allocation87_spill] sm:$0xff]  ;;  %v12354_v49 = vld [vmem:[#allocation50_spill] sm:$0xff] }
 0xe63   :  { %v4666_v6 = vmul.f32 0.044715, %v4649_v52  ;;  %v4601_v38 = vsel %vm12328_vm15, %v4567_v30, %v10386_v25  ;;  %v10762_v29 = vmul.f32 0.5, %v4598_v47  ;;  %v4667_v13 = vmul.f32 0.044715, %v4650_v41 }
 0xe64   :  { %v4635_v2 = vmul.f32 %v4601_v38, %v4601_v38  ;;  %v4651_v23 = vmul.f32 %v4634_v60, %v4600_v31  ;;  %v10764_v53 = vmul.f32 0.5, %v4599_v43  ;;  %3324 = vst.msk [vmem:[#allocation2 + $0x80] sm:$0xff] %vm12329_vm3, %v10760_v50  ;;  %v3691_v25 = vmul.f32 %v8633_v35, %v3670_v28  ;;  %v12337_v60 = vld [vmem:[#allocation88_spill] sm:$0xff] }
 0xe65   :  { %v4683_v56 = vadd.f32 %v4666_v6, %v4598_v47  ;;  %v3759_v10 = vmul.f32 %v12330_v17, %v3742_v59  ;;  %v4684_v16 = vadd.f32 %v4667_v13, %v4599_v43  ;;  %v4436_v14 = vadd.f32 %v12331_v42, %v10635_v62  ;;  %v12335_v62 = vld [vmem:[#allocation86_spill] sm:$0xff] }
 0xe66   :  { %v4652_v40 = vmul.f32 %v4635_v2, %v4601_v38  ;;  %v4668_v54 = vmul.f32 0.044715, %v4651_v23  ;;  %v4079_v47 = vmul.f32 %v12332_v21, %v10760_v50  ;;  %v4402_v57 = vmul.f32 %v12333_v9, %v3742_v59  ;;  %v10786_v59 = vpop.f32.mrf.mxu0  ;;  %v12351_v9 = vld [vmem:[#allocation76_spill] sm:$0xff] }
 0xe67   :  { %v4700_v1 = vmul.f32 0.7978846, %v4683_v56  ;;  %v3780_v24 = vmul.f32 %v12094_v12, %v3759_v10  ;;  %v4701_v44 = vmul.f32 0.7978846, %v4684_v16  ;;  %v4437_v43 = vadd.f32 %v12334_v18, %v10648_v27  ;;  %v12342_v10 = vld [vmem:[#allocation14_spill] sm:$0xff] }
 0xe68   :  { %v4669_v45 = vmul.f32 0.044715, %v4652_v40  ;;  %v4685_v15 = vadd.f32 %v4668_v54, %v4600_v31  ;;  %v10778_v52 = vmul.f32 0.5, %v4600_v31  ;;  %v4544_v30 = vadd.f32 %v12335_v62, %v4436_v14  ;;  %v5664_v40 = vpop.f32.mrf.mxu0  ;;  %v12346_v54 = vld [vmem:[#allocation72_spill] sm:$0xff]  ;;  %v12347_v14 = vld [vmem:[#allocation6_spill] sm:$0xff] }
 0xe69   :  { %6039 = vtanh.f32 %v4700_v1  ;;  %v10782_v61 = vadd.f32 %v10757_v48, %v3297_v8  ;;  %vm3532_vm0 = vcmp.lt.f32.partialorder %v12336_v63, 56.0  ;;  %v4545_v26 = vadd.f32 %v12337_v60, %v4437_v43  ;;  %v12348_v1 = vld [vmem:[#allocation75_spill] sm:$0xff]  ;;  %v12355_v62 = vld [vmem:[#allocation32_spill] sm:$0xff]  ;;  %v10848_v16 = vld [vmem:[%s11271_s13 + $0x8] ss:$0 sm:$0xff] }
 0xe6a   :  { %6041 = vtanh.f32 %v4701_v44  ;;  %v4686_v28 = vadd.f32 %v4669_v45, %v4601_v38  ;;  %v4702_v41 = vmul.f32 0.7978846, %v4685_v15  ;;  %v10788_v6 = vmul.f32 0.5, %v4601_v38  ;;  %v3305_v15 = vpop.f32.mrf.mxu0 }
 0xe6b   :  { %v10791_v27 = vmul.f32 %v12110_v7, %v4079_v47  ;;  %v10794_v31 = vmul.f32 %v10009_v33, %v4402_v57  ;;  %v4568_v37 = vadd.f32 %v10181_v39, %v4544_v30  ;;  %3325 = vst.msk [vmem:[#allocation2 + $0x88] sm:$0xff] %vm12338_vm4, %v10782_v61  ;;  %v3654_v23 = vld [vmem:[#allocation2 + $0x7f] sm:$0xff]  ;;  %v3797_v20 = vadd.f32 %v3780_v24, %v3691_v25  ;;  %v12352_v57 = vld [vmem:[#allocation31_spill] sm:$0xff] }
 0xe6c   :  { %v4703_v38 = vmul.f32 0.7978846, %v4686_v28  ;;  %6043 = vtanh.f32 %v4702_v41  ;;  %v3865_v56 = vld [vmem:[#allocation2 + $0x79] sm:$0xff]  ;;  %v4569_v17 = vadd.f32 %v10181_v39, %v4545_v26  ;;  %vm12343_vm13 = vcmp.ge.f32.partialorder %v12342_v10, 0.5  ;;  %v12349_v47 = vld [vmem:[#allocation74_spill] sm:$0xff] }
 0xe6d   :  { %vm10812_vm15 = vmand %vm12343_vm13, %vm3550_vm5  ;;  %v3882_v42 = vmul.f32 %v12346_v54, %v3865_v56  ;;  %v3990_v8 = vmul.f32 %v12347_v14, %v3654_v23  ;;  %v4186_v21 = vmul.f32 %v12348_v1, %v3865_v56  ;;  %v4311_v25 = vmul.f32 %v12349_v47, %v3654_v23  ;;  %v12350_v24 = vld [vmem:[#allocation77_spill] sm:$0xff]  ;;  %v12358_v1 = vld [vmem:[#allocation60_spill] sm:$0xff] }
 0xe6e   :  { %6045 = vtanh.f32 %v4703_v38  ;;  %v4510_v39 = vmul.f32 %v12350_v24, %v3865_v56  ;;  %vm12353_vm3 = vcmp.ge.f32.partialorder %v12352_v57, 0.5  ;;  %v5183_v45 = vsel %vm10421_vm12, 1.0, %v11517_v5  ;;  %v6036_v18 = vpop.eup %6035  ;;  %v10831_v28 = vld [vmem:[#allocation2 + $0x80] sm:$0xff]  ;;  %vm12357_vm12 = vmmov %vm12343_vm13 }
 0xe6f   :  { %v4602_v44 = vsel %vm12353_vm3, %v4568_v37, %v12351_v9  ;;  %v3903_v43 = vmul.f32 %v8762_v51, %v3882_v42  ;;  %vm12356_vm4 = vcmp.ge.f32.partialorder %v12355_v62, 0.5  ;;  %v5200_v41 = vsel %vm10803_vm1, 1.0, %v11517_v5  ;;  %v6038_v26 = vpop.eup %6037  ;;  %vm10866_vm1 = vmand %vm3379_vm8, %vm3566_vm7 }
 0xe70   :  { %v4603_v30 = vsel %vm12356_vm4, %v4569_v17, %v12354_v49  ;;  %v5217_v60 = vsel %vm10812_vm15, 1.0, %v11517_v5  ;;  %v4732_v37 = vadd.f32 1.0, %v6036_v18  ;;  %v4011_v13 = vmul.f32 %v12103_v4, %v3990_v8  ;;  %v5665_v17 = vpop.f32.mrf.mxu0  ;;  %vm10877_vm15 = vmand %vm3379_vm8, %vm3532_vm0 }
 0xe71   :  { %v4207_v38 = vmul.f32 %v12126_v22, %v4186_v21  ;;  %v5234_v56 = vsel %vm12357_vm12, 1.0, %v11517_v5  ;;  %v4733_v40 = vadd.f32 1.0, %v6038_v26  ;;  %v3920_v54 = vadd.f32 %v3903_v43, %v3797_v20  ;;  %v12359_v20 = vld [vmem:[#allocation85_spill] sm:$0xff]  ;;  %vm4259_vm0 = vmand %vm10877_vm15, %vm3549_vm11 }
 0xe72   :  { %v4332_v2 = vmul.f32 %v12136_v32, %v4311_v25  ;;  %v4636_v42 = vmul.f32 %v4602_v44, %v4602_v44  ;;  %v10851_v14 = vmul.f32 %v10848_v16, %v4510_v39  ;;  %v4637_v8 = vmul.f32 %v4603_v30, %v4603_v30  ;;  %v10855_v24 = vld [vmem:[#allocation2 + $0x81] sm:$0xff]  ;;  %v12360_v25 = vld [vmem:[#allocation84_spill] sm:$0xff]  ;;  %vm10913_vm11 = vmand %vm10373_vm2, %vm3565_vm6 }
 0xe73   :  { %v3671_v21 = vmul.f32 %v12358_v1, %v3654_v23  ;;  %v3760_v47 = vmul.f32 %v5183_v45, %v10831_v28  ;;  %v3974_v9 = vld [vmem:[#allocation2 + $0x87] sm:$0xff]  ;;  %v4749_v57 = vmul.f32 %v4732_v37, %v12359_v20  ;;  %v4750_v15 = vmul.f32 %v4733_v40, %v12360_v25  ;;  %vm10933_vm6 = vmand %vm10877_vm15, %vm3566_vm7 }
 0xe74   :  { %v4028_v18 = vadd.f32 %v4011_v13, %v3920_v54  ;;  %v4653_v43 = vmul.f32 %v4636_v42, %v4602_v44  ;;  %v4654_v49 = vmul.f32 %v4637_v8, %v4603_v30  ;;  %v3883_v26 = vmul.f32 %v5200_v41, %v10855_v24  ;;  %v12365_v37 = vld [vmem:[#allocation63_spill] sm:$0xff] }
 0xe75   :  { %v3692_v62 = vmul.f32 %v8633_v35, %v3671_v21  ;;  %v3781_v39 = vmul.f32 %v12094_v12, %v3760_v47  ;;  %vm3517_vm13 = vcmp.ge.f32.partialorder %v12365_v37, 8.0  ;;  %v4765_v40 = vpack.c.bf16 %v4750_v15, %v4749_v57  ;;  %v12368_v25 = vld [vmem:[#allocation15_spill] sm:$0xff] }
 0xe76   :  { %v10871_v13 = vmul.f32 0.5, %v4602_v44  ;;  %v4670_v54 = vmul.f32 0.044715, %v4653_v43  ;;  %v3991_v42 = vmul.f32 %v5217_v60, %v3974_v9  ;;  %v6040_v8 = vpop.eup %6039  ;;  %v10881_v1 = vmul.f32 0.5, %v4603_v30 }
 0xe77   :  { %v4671_v21 = vmul.f32 0.044715, %v4654_v49  ;;  %v3798_v47 = vadd.f32 %v3781_v39, %v3692_v62  ;;  %v3904_v20 = vmul.f32 %v8762_v51, %v3883_v26  ;;  %v6042_v57 = vpop.eup %6041  ;;  %vm3381_vm3 = vcmp.ge.f32.partialorder %v12368_v25, 0.5 }
 0xe78   :  { %vm12369_vm4 = vcmask 523264   ;;  %v4734_v60 = vadd.f32 1.0, %v6040_v8  ;;  %v4224_v63 = vadd.f32 %v4207_v38, %v10749_v55  ;;  %v4687_v15 = vadd.f32 %v4670_v54, %v4602_v44  ;;  %vm10967_vm7 = vmand %vm3381_vm3, %vm3517_vm13 }
 0xe79   :  { %5679 = vmatmul.mubr.msk.bf16.gmra.mxu1 %vm12369_vm4, %v4765_v40  ;;  %v5250_v43 = vsel %vm10866_vm1, 1.0, %v11517_v5  ;;  %v4735_v49 = vadd.f32 1.0, %v6042_v57  ;;  %v4117_v62 = vadd.f32 %v10791_v27, %v4028_v18  ;;  %v4688_v39 = vadd.f32 %v4671_v21, %v4603_v30  ;;  %v6044_v40 = vpop.eup %6043  ;;  %vm4135_vm1 = vmand %vm12357_vm12, %vm3567_vm9 }
 0xe7a   :  { %5682 = vmatprep.mubr.msk.bf16.mxu1 %vm12317_vm10, %v11517_v5  ;;  %v3921_v26 = vadd.f32 %v3904_v20, %v3798_v47  ;;  %v4704_v55 = vmul.f32 0.7978846, %v4687_v15  ;;  %v4012_v44 = vmul.f32 %v12103_v4, %v3991_v42  ;;  %v4080_v38 = vmul.f32 %v5234_v56, %v10782_v61 }
 0xe7b   :  { %v4187_v45 = vmul.f32 %v5250_v43, %v10855_v24  ;;  %v4751_v54 = vmul.f32 %v4734_v60, %v10762_v29  ;;  %v4752_v8 = vmul.f32 %v4735_v49, %v10764_v53  ;;  %v4736_v27 = vadd.f32 1.0, %v6044_v40  ;;  %v6046_v18 = vpop.eup %6045 }
 0xe7c   :  { %v4705_v30 = vmul.f32 0.7978846, %v4688_v39  ;;  %v10906_v21 = vadd.f32 %v4332_v2, %v4224_v63  ;;  %6047 = vtanh.f32 %v4704_v55  ;;  %v4029_v42 = vadd.f32 %v4012_v44, %v3921_v26  ;;  %v12374_v2 = vld [vmem:[#allocation46_spill] sm:$0xff] }
 0xe7d   :  { %v5267_v56 = vsel %vm4259_vm0, 1.0, %v11517_v5  ;;  %v4766_v53 = vpack.c.bf16 %v4752_v8, %v4751_v54  ;;  %v4737_v57 = vadd.f32 1.0, %v6046_v18  ;;  %v4208_v60 = vmul.f32 %v12126_v22, %v4187_v45  ;;  %v4387_v63 = vld [vmem:[#allocation2 + $0x88] sm:$0xff] }
 0xe7e   :  { %6049 = vtanh.f32 %v4705_v30  ;;  %vm12375_vm4 = vnez %v12374_v2  ;;  %v4101_v15 = vmul.f32 %v12110_v7, %v4080_v38  ;;  %v10924_v43 = vsel %vm4135_vm1, 1.0, %v11517_v5  ;;  %v12381_v30 = vld [vmem:[#allocation54_spill] sm:$0xff] }
 0xe7f   :  { %vm4260_vm12 = vmand %vm12375_vm4, %vm3550_vm5  ;;  %v4312_v49 = vmul.f32 %v5267_v56, %v3974_v9  ;;  %v5283_v39 = vsel %vm10373_vm2, 1.0, %v11517_v5  ;;  %v4753_v40 = vmul.f32 %v4736_v27, %v10778_v52  ;;  %v4754_v55 = vmul.f32 %v4737_v57, %v10788_v6  ;;  %v3655_v18 = vld [vmem:[#allocation2 + $0x87] sm:$0x3]  ;;  %v3867_v56 = vld [vmem:[#allocation2 + $0x89] sm:$0x3] }
 0xe80   :  { %v4225_v44 = vadd.f32 %v4208_v60, %v4117_v62  ;;  %v5284_v9 = vsel %vm10877_vm15, 1.0, %v11517_v5  ;;  %vm4460_vm2 = vmand %vm12375_vm4, %vm3567_vm9  ;;  %vm12378_vm5 = vcmask 523264   ;;  %v10947_v17 = vadd.f32 %v4101_v15, %v4029_v42 }
 0xe81   :  { %5683 = vmatmul.mubr.msk.bf16.gmra.mxu1 %vm12378_vm5, %v4766_v53  ;;  %v10950_v38 = vsel %vm4260_vm12, 1.0, %v11517_v5  ;;  %v4404_v52 = vmul.f32 %v5284_v9, %v4387_v63  ;;  %v5300_v6 = vsel %vm10913_vm11, 1.0, %v11517_v5  ;;  %v4767_v41 = vpack.c.bf16 %v4754_v55, %v4753_v40  ;;  %v4297_v55 = vld [vmem:[#allocation2 + $0x97] sm:$0x3] }
 0xe82   :  { %5686 = vmatprep.mubr.msk.bf16.mxu1 %vm12317_vm10, %v11517_v5  ;;  %v4333_v19 = vmul.f32 %v12136_v32, %v4312_v49  ;;  %v4403_v62 = vmul.f32 %v5283_v39, %v10831_v28  ;;  %v10961_v45 = vadd.f32 %v10757_v48, %v10786_v59  ;;  %v10974_v8 = vsel %vm10933_vm6, 1.0, %v11517_v5  ;;  %v3744_v48 = vld [vmem:[#allocation2 + $0x88] sm:$0x3] }
 0xe83   :  { %v10977_v27 = vsel %vm4460_vm2, 1.0, %v11517_v5  ;;  %vm3326_vm9 = vcmask 517120   ;;  %vm3329_vm15 = vcmask 521216   ;;  %v4511_v28 = vmul.f32 %v5300_v6, %v10855_v24  ;;  %vm12382_vm2 = vmmov %vm12378_vm5 }
 0xe84   :  { %v4350_v59 = vadd.f32 %v4333_v19, %v4225_v44  ;;  %3327 = vst.msk [vmem:[#allocation2 + $0x90] sm:$0x3] %vm3326_vm9, %v10961_v45  ;;  %vm3551_vm13 = vcmp.ge.f32.partialorder %v12381_v30, 1.0  ;;  %vm3568_vm0 = vcmp.lt.f32.partialorder %v12381_v30, 7.0  ;;  %v4425_v42 = vmul.f32 %v10009_v33, %v4404_v52  ;;  %v11044_v44 = vld [vmem:[%s11272_s14] ss:$0 sm:$0xff] }
 0xe85   :  { %3330 = vst.msk [vmem:[#allocation2 + $0x9a] sm:$0x3f] %vm3329_vm15, %v11517_v5  ;;  %vm3534_vm1 = vcmp.lt.f32.partialorder %v12365_v37, 56.0  ;;  %vm3604_vm11 = vmand %vm10967_vm7, %vm3551_vm13  ;;  %v5184_v24 = vsel %vm10967_vm7, 1.0, %v11517_v5  ;;  %v4438_v47 = vadd.f32 %v10681_v46, %v10672_v11  ;;  %v5235_v53 = vsel %vm3381_vm3, 1.0, %v11517_v5  ;;  %s6120_s14 = smov [#allocation3]  }
 0xe86   :  { %v5167_v20 = vsel %vm3604_vm11, 1.0, %v11517_v5  ;;  %v3761_v29 = vmul.f32 %v5184_v24, %v3744_v48  ;;  %vm3816_vm4 = vmand %vm10967_vm7, %vm3568_vm0  ;;  %v4439_v57 = vadd.f32 %v10723_v58, %v10692_v3  ;;  %v4424_v60 = vmul.f32 %v10009_v33, %v4403_v62  ;;  %s4985_s28 = sshll.u32 %s6120_s14, 4  ;;  %s4986_s28 = int_to_ptr.vmem [resolvable:$true] %s4985_s28 }
 0xe87   :  { %v3672_v2 = vmul.f32 %v5167_v20, %v3655_v18  ;;  %v5201_v11 = vsel %vm3816_vm4, 1.0, %v11517_v5  ;;  %vm3939_vm12 = vmand %vm3381_vm3, %vm3551_vm13  ;;  %v4546_v46 = vadd.f32 %v10687_v36, %v4438_v47  ;;  %v11012_v63 = vadd.f32 %v4425_v42, %v4350_v59  ;;  %s6085_s30 = scalar_lea.vmem %s4986_s28, 32  ;;  %p6090_p1 = scmp.lt.s32.totalorder %s4986_s28, %s4986_s28 }
 0xe88   :  { %v4532_v15 = vmul.f32 %v10848_v16, %v4511_v28  ;;  %v3782_v49 = vmul.f32 %v12094_v12, %v3761_v29  ;;  %v3884_v39 = vmul.f32 %v5201_v11, %v3867_v56  ;;  %vm4136_vm6 = vmand %vm3381_vm3, %vm3568_vm0  ;;  %v5218_v58 = vsel %vm3939_vm12, 1.0, %v11517_v5  ;;  %p6086_p0 = scmp.ne.s32.totalorder %s4986_s28, %s6085_s30  ;;  %p6091_p2 = scmp.lt.s32.totalorder %s6085_s30, %s6085_s30 }
 0xe89   :  { %5687 = vmatmul.mubr.msk.bf16.gmra.mxu1 %vm12382_vm2, %v4767_v41  ;;  %v3693_v3 = vmul.f32 %v8633_v35, %v3672_v2  ;;  %v4081_v36 = vmul.f32 %v5235_v53, %v10961_v45  ;;  %v5252_v26 = vsel %vm4136_vm6, 1.0, %v11517_v5  ;;  %vm11029_vm5 = vmand %vm3381_vm3, %vm3534_vm1  ;;  %v6048_v40 = vpop.eup %6047  ;;  %v4547_v37 = vadd.f32 %v10734_v34, %v4439_v57  ;;  %v12386_v2 = vld [vmem:[#allocation66_spill] sm:$0xff] }
 0xe8a   :  { %5690 = vmatprep.mubr.msk.bf16.mxu1 %vm12317_vm10, %v11517_v5  ;;  %v3905_v35 = vmul.f32 %v8762_v51, %v3884_v39  ;;  %vm4261_vm7 = vmand %vm11029_vm5, %vm3551_vm13  ;;  %v4570_v9 = vadd.f32 %v11044_v44, %v4546_v46  ;;  %v4440_v52 = vadd.f32 %v10794_v31, %v10740_v0  ;;  %v4738_v51 = vadd.f32 1.0, %v6048_v40  ;;  %v4389_v31 = vld [vmem:[#allocation2 + $0x98] sm:$0x3]  ;;  %p6092_p3 = por %p6091_p2, %p6090_p1 }
 0xe8b   :  { %v6050_v6 = vpop.eup %6049  ;;  %v3799_v41 = vadd.f32 %v3782_v49, %v3693_v3  ;;  %v3975_v19 = vld [vmem:[#allocation2 + $0x8f] sm:$0x3]  ;;  %v4172_v62 = vld [vmem:[#allocation2 + $0x91] sm:$0x3]  ;;  %v5269_v54 = vsel %vm4261_vm7, 1.0, %v11517_v5  ;;  %vm4461_vm9 = vmand %vm11029_vm5, %vm3568_vm0  ;;  %v4441_v34 = vadd.f32 %v4424_v60, %v10906_v21  ;;  %v5286_v0 = vsel %vm11029_vm5, 1.0, %v11517_v5 }
 0xe8c   :  { %v4739_v48 = vadd.f32 1.0, %v6050_v6  ;;  %v3992_v59 = vmul.f32 %v5218_v58, %v3975_v19  ;;  %v4189_v28 = vmul.f32 %v5252_v26, %v4172_v62  ;;  %v4102_v42 = vmul.f32 %v12110_v7, %v4081_v36  ;;  %v4497_v29 = vld [vmem:[#allocation2 + $0x99] sm:$0x3]  ;;  %v12385_v60 = vld [vmem:[#allocation79_spill] sm:$0xff]  ;;  %vm12391_vm0 = vmmov %vm12382_vm2  ;;  %p6093_p4 = pnand %p6092_p3, %p6086_p0 }
 0xe8d   :  { %v3922_v18 = vadd.f32 %v3905_v35, %v3799_v41  ;;  %v4314_v24 = vmul.f32 %v5269_v54, %v4297_v55  ;;  %v4548_v56 = vadd.f32 %v10851_v14, %v4440_v52  ;;  %v4755_v30 = vmul.f32 %v4738_v51, %v10871_v13  ;;  %v4296_v49 = vld [vmem:[#allocation2 + $0x8f] sm:$0xff]  ;;  %vm12401_vm11 = vmmov %vm12391_vm0 }
 0xe8e   :  { %v4756_v47 = vmul.f32 %v4739_v48, %v10881_v1  ;;  %v4013_v21 = vmul.f32 %v12103_v4, %v3992_v59  ;;  %v5303_v20 = vsel %vm4461_vm9, 1.0, %v11517_v5  ;;  %v4406_v53 = vmul.f32 %v5286_v0, %v4389_v31  ;;  %v4171_v4 = vld [vmem:[#allocation2 + $0x89] sm:$0xff]  ;;  %v12388_v3 = vld [vmem:[#allocation80_spill] sm:$0xff]  ;;  %vm12402_vm4 = vmmov %vm12391_vm0 }
 0xe8f   :  { %v4571_v57 = vadd.f32 %v11044_v44, %v4547_v37  ;;  %vm12387_vm15 = vcmp.ge.f32.partialorder %v12386_v2, 0.5  ;;  %v4549_v7 = vadd.f32 %v4532_v15, %v4441_v34  ;;  %v4210_v13 = vmul.f32 %v12126_v22, %v4189_v28  ;;  %v12389_v58 = vld [vmem:[#allocation67_spill] sm:$0xff]  ;;  %v12392_v37 = vld [vmem:[#allocation82_spill] sm:$0xff] }
 0xe90   :  { %v11068_v11 = vsel %vm12387_vm15, %v4570_v9, %v12385_v60  ;;  %v4768_v46 = vpack.c.bf16 %v4756_v47, %v4755_v30  ;;  %v4030_v14 = vadd.f32 %v4013_v21, %v3922_v18  ;;  %v4514_v39 = vmul.f32 %v5303_v20, %v4497_v29  ;;  %v12393_v9 = vld [vmem:[#allocation68_spill] sm:$0xff]  ;;  %v12395_v6 = vld [vmem:[#allocation83_spill] sm:$0xff]  ;;  %v12397_v20 = vld [vmem:[#allocation65_spill] sm:$0xff] }
 0xe91   :  { %v4638_v1 = vmul.f32 %v11068_v11, %v11068_v11  ;;  %vm12390_vm13 = vcmp.ge.f32.partialorder %v12389_v58, 0.5  ;;  %v4572_v26 = vadd.f32 %v11044_v44, %v4548_v56  ;;  %v4573_v12 = vadd.f32 %v11044_v44, %v4549_v7  ;;  %v4388_v28 = vld [vmem:[#allocation2 + $0x90] sm:$0xff] }
 0xe92   :  { %v11076_v36 = vsel %vm12390_vm13, %v4571_v57, %v12388_v3  ;;  %5691 = vmatmul.mubr.msk.bf16.gmra.mxu1 %vm12391_vm0, %v4768_v46  ;;  %v4119_v15 = vadd.f32 %v4102_v42, %v4030_v14  ;;  %v4335_v40 = vmul.f32 %v12136_v32, %v4314_v24  ;;  %vm12394_vm1 = vcmp.ge.f32.partialorder %v12393_v9, 0.5 }
 0xe93   :  { %v4639_v35 = vmul.f32 %v11076_v36, %v11076_v36  ;;  %v4655_v55 = vmul.f32 %v4638_v1, %v11068_v11  ;;  %5694 = vmatprep.mubr.msk.bf16.mxu1 %vm12317_vm10, %v11517_v5  ;;  %v11090_v52 = vsel %vm12394_vm1, %v4572_v26, %v12392_v37  ;;  %v11095_v41 = vsel %vm3378_vm14, %v4573_v12, %v12395_v6 }
 0xe94   :  { %v4188_v19 = vmul.f32 %v10924_v43, %v4171_v4  ;;  %v4313_v62 = vmul.f32 %v10950_v38, %v4296_v49  ;;  %v4227_v54 = vadd.f32 %v4210_v13, %v4119_v15  ;;  %v4427_v34 = vmul.f32 %v10009_v33, %v4406_v53  ;;  %v4496_v53 = vld [vmem:[#allocation2 + $0x91] sm:$0xff] }
 0xe95   :  { %v4656_v48 = vmul.f32 %v4639_v35, %v11076_v36  ;;  %v4672_v59 = vmul.f32 0.044715, %v4655_v55  ;;  %v4535_v0 = vmul.f32 %v10848_v16, %v4514_v39  ;;  %v4640_v31 = vmul.f32 %v11090_v52, %v11090_v52 }
 0xe96   :  { %v4641_v18 = vmul.f32 %v11095_v41, %v11095_v41  ;;  %v4209_v42 = vmul.f32 %v12126_v22, %v4188_v19  ;;  %v4352_v43 = vadd.f32 %v4335_v40, %v4227_v54  ;;  %v4334_v56 = vmul.f32 %v12136_v32, %v4313_v62 }
 0xe97   :  { %v4673_v24 = vmul.f32 0.044715, %v4656_v48  ;;  %v4689_v38 = vadd.f32 %v4672_v59, %v11068_v11  ;;  %v4657_v30 = vmul.f32 %v4640_v31, %v11090_v52  ;;  %v4405_v29 = vmul.f32 %v12397_v20, %v4388_v28 }
 0xe98   :  { %v4658_v47 = vmul.f32 %v4641_v18, %v11095_v41  ;;  %v4226_v21 = vadd.f32 %v4209_v42, %v10947_v17  ;;  %v4444_v57 = vadd.f32 %v4427_v34, %v4352_v43  ;;  %v4512_v22 = vmul.f32 %v10974_v8, %v4171_v4 }
 0xe99   :  { %v4690_v60 = vadd.f32 %v4673_v24, %v11076_v36  ;;  %v4706_v2 = vmul.f32 0.7978846, %v4689_v38  ;;  %v4674_v7 = vmul.f32 0.044715, %v4657_v30  ;;  %v4426_v32 = vmul.f32 %v10009_v33, %v4405_v29 }
 0xe9a   :  { %v4675_v46 = vmul.f32 0.044715, %v4658_v47  ;;  %v4351_v14 = vadd.f32 %v4334_v56, %v4226_v21  ;;  %v4552_v13 = vadd.f32 %v4535_v0, %v4444_v57  ;;  %v4513_v49 = vmul.f32 %v10977_v27, %v4496_v53 }
 0xe9b   :  { %v4707_v1 = vmul.f32 0.7978846, %v4690_v60  ;;  %6051 = vtanh.f32 %v4706_v2  ;;  %v4691_v17 = vadd.f32 %v4674_v7, %v11090_v52  ;;  %v4533_v58 = vmul.f32 %v10848_v16, %v4512_v22 }
 0xe9c   :  { %v4692_v39 = vadd.f32 %v4675_v46, %v11095_v41  ;;  %v4443_v3 = vadd.f32 %v4426_v32, %v4351_v14  ;;  %v4576_v26 = vadd.f32 %v11044_v44, %v4552_v13  ;;  %v4534_v8 = vmul.f32 %v10848_v16, %v4513_v49 }
 0xe9d   :  { %6053 = vtanh.f32 %v4707_v1  ;;  %v4708_v4 = vmul.f32 0.7978846, %v4691_v17  ;;  %v4550_v33 = vadd.f32 %v4533_v58, %v11012_v63  ;;  %vm12398_vm14 = vcmp.ge.f32.partialorder %v12342_v10, 0.5 }
 0xe9e   :  { %v4709_v12 = vmul.f32 0.7978846, %v4692_v39  ;;  %v4610_v27 = vsel %vm3381_vm3, %v4576_v26, %v10961_v45  ;;  %v4551_v15 = vadd.f32 %v4534_v8, %v4443_v3  ;;  %v4621_v23 = vmul.f32 0.5, %v11068_v11  ;;  %vm12400_vm3 = vmmov %vm12391_vm0 }
 0xe9f   :  { %v4644_v40 = vmul.f32 %v4610_v27, %v4610_v27  ;;  %6055 = vtanh.f32 %v4708_v4  ;;  %v4574_v35 = vadd.f32 %v11044_v44, %v4550_v33  ;;  %v4623_v30 = vmul.f32 0.5, %v11090_v52 }
 0xea0   :  { %6057 = vtanh.f32 %v4709_v12  ;;  %v4575_v55 = vadd.f32 %v11044_v44, %v4551_v15  ;;  %v4624_v47 = vmul.f32 0.5, %v11095_v41  ;;  %v4627_v32 = vmul.f32 0.5, %v4610_v27 }
 0xea1   :  { %v4661_v37 = vmul.f32 %v4644_v40, %v4610_v27  ;;  %v4608_v16 = vsel %vm3379_vm8, %v4574_v35, %v10760_v50  ;;  %v4622_v50 = vmul.f32 0.5, %v11076_v36  ;;  %vm12399_vm8 = vmmov %vm12391_vm0 }
 0xea2   :  { %v4609_v63 = vsel %vm12398_vm14, %v4575_v55, %v10782_v61  ;;  %v4642_v9 = vmul.f32 %v4608_v16, %v4608_v16  ;;  %v4625_v57 = vmul.f32 0.5, %v4608_v16 }
 0xea3   :  { %v4678_v25 = vmul.f32 0.044715, %v4661_v37  ;;  %v4643_v45 = vmul.f32 %v4609_v63, %v4609_v63  ;;  %v4626_v41 = vmul.f32 0.5, %v4609_v63 }
 0xea4   :  { %v4659_v6 = vmul.f32 %v4642_v9, %v4608_v16 }
 0xea5   :  { %v4660_v51 = vmul.f32 %v4643_v45, %v4609_v63  ;;  %v4695_v54 = vadd.f32 %v4678_v25, %v4610_v27 }
 0xea6   :  { %v4676_v19 = vmul.f32 0.044715, %v4659_v6 }
 0xea7   :  { %v4677_v34 = vmul.f32 0.044715, %v4660_v51  ;;  %v4712_v61 = vmul.f32 0.7978846, %v4695_v54 }
 0xea8   :  { %v6052_v62 = vpop.eup %6051  ;;  %v4693_v44 = vadd.f32 %v4676_v19, %v4608_v16 }
 0xea9   :  { %v4740_v48 = vadd.f32 1.0, %v6052_v62  ;;  %v4694_v28 = vadd.f32 %v4677_v34, %v4609_v63 }
 0xeaa   :  { %v6054_v59 = vpop.eup %6053  ;;  %v4710_v10 = vmul.f32 0.7978846, %v4693_v44 }
 0xeab   :  { %v4741_v0 = vadd.f32 1.0, %v6054_v59  ;;  %v4711_v31 = vmul.f32 0.7978846, %v4694_v28  ;;  %v4757_v42 = vmul.f32 %v4740_v48, %v4621_v23 }
 0xeac   :  { %v6056_v18 = vpop.eup %6055  ;;  %6059 = vtanh.f32 %v4710_v10 }
 0xead   :  { %v4758_v43 = vmul.f32 %v4741_v0, %v4622_v50  ;;  %v6058_v24 = vpop.eup %6057  ;;  %v4742_v38 = vadd.f32 1.0, %v6056_v18  ;;  %6061 = vtanh.f32 %v4711_v31 }
 0xeae   :  { %v4743_v21 = vadd.f32 1.0, %v6058_v24  ;;  %6063 = vtanh.f32 %v4712_v61 }
 0xeaf   :  { %v4769_v56 = vpack.c.bf16 %v4758_v43, %v4757_v42  ;;  %v4759_v11 = vmul.f32 %v4742_v38, %v4623_v30 }
 0xeb0   :  { %v4760_v36 = vmul.f32 %v4743_v21, %v4624_v47 }
 0xeb1   :  { %5695 = vmatmul.mubr.msk.bf16.gmra.mxu1 %vm12399_vm8, %v4769_v56 }
 0xeb2   :  { %5698 = vmatprep.mubr.msk.bf16.mxu1 %vm12317_vm10, %v11517_v5  ;;  %v4770_v20 = vpack.c.bf16 %v4760_v36, %v4759_v11 }
 0xeb9   :  { %5699 = vmatmul.mubr.msk.bf16.gmra.mxu1 %vm12400_vm3, %v4770_v20  ;;  %v6060_v29 = vpop.eup %6059 }
 0xeba   :  { %5702 = vmatprep.mubr.msk.bf16.mxu1 %vm12317_vm10, %v11517_v5  ;;  %v6062_v53 = vpop.eup %6061  ;;  %v4744_v52 = vadd.f32 1.0, %v6060_v29 }
 0xebb   :  { %v4745_v60 = vadd.f32 1.0, %v6062_v53  ;;  %v6064_v2 = vpop.eup %6063 }
 0xebc   :  { %v4761_v22 = vmul.f32 %v4744_v52, %v4625_v57  ;;  %v4746_v14 = vadd.f32 1.0, %v6064_v2 }
 0xebd   :  { %v4762_v7 = vmul.f32 %v4745_v60, %v4626_v41 }
 0xebe   :  { %v4763_v13 = vmul.f32 %v4746_v14, %v4627_v32 }
 0xebf   :  { %v4771_v46 = vpack.c.bf16 %v4762_v7, %v4761_v22 }
 0xec0   :  { %v4772_v1 = vpack.c.bf16 %v4763_v13, %v4763_v13 }
 0xec1   :  { %5703 = vmatmul.mubr.msk.bf16.gmra.mxu1 %vm12401_vm11, %v4771_v46 }
 0xec2   :  { %5706 = vmatprep.mubr.msk.bf16.mxu1 %vm12317_vm10, %v11517_v5 }
 0xec9   :  { %5707 = vmatmul.mubr.msk.bf16.gmra.mxu1 %vm12402_vm4, %v4772_v1 }
 0xeca   :  { %6096 = shalt.err (!%p6093_p4)
}
 0xecb   :  { %4988 = dma.vmem_to_hbm [thread:$0]  %s4986_s28, 32, %s11276_s18, [#allocation4]   ;;  %v11154_v5 = vld [vmem:[%s11274_s16] ss:$0 sm:$0xff]  ;;  %v12403_v3 = vld [vmem:[#allocation16_spill] sm:$0xff]  ;;  %vm12404_vm10 = vcmask 261120  }
 0xecc   :  { %v12405_v12 = vld [vmem:[#allocation17_spill] sm:$0xff]  ;;  %vm12406_vm12 = vmmov %vm12404_vm10  ;;  %v12407_v35 = vld [vmem:[#allocation18_spill] sm:$0xff] }
 0xecd   :  { %vm12408_vm6 = vmmov %vm12404_vm10  ;;  %v12409_v9 = vld [vmem:[#allocation19_spill] sm:$0xff]  ;;  %v12411_v19 = vld [vmem:[#allocation21_spill] sm:$0xff] }
 0xece   :  { %vm12410_vm2 = vmmov %vm12408_vm6  ;;  %v12413_v44 = vld [vmem:[#allocation23_spill] sm:$0xff]  ;;  %v12415_v0 = vld [vmem:[#allocation33_spill] sm:$0xff] }
 0xecf   :  { %vm12412_vm5 = vmmov %vm12410_vm2  ;;  %v12417_v42 = vld [vmem:[#allocation24_spill] sm:$0xff]  ;;  %v12419_v30 = vld [vmem:[#allocation34_spill] sm:$0xff] }
 0xed0   :  { %vm12414_vm7 = vmmov %vm12410_vm2  ;;  %v12421_v20 = vld [vmem:[#allocation35_spill] sm:$0xff]  ;;  %v12423_v41 = vld [vmem:[#allocation25_spill] sm:$0xff] }
 0xed1   :  { %vm12416_vm9 = vmmov %vm12410_vm2  ;;  %v12425_v46 = vld [vmem:[#allocation36_spill] sm:$0xff] }
 0xed2   :  { %vm12418_vm15 = vmmov %vm12410_vm2 }
 0xed3   :  { %vm12420_vm13 = vmmov %vm12410_vm2 }
 0xed4   :  { %vm12422_vm0 = vmmov %vm12410_vm2 }
 0xed5   :  { %vm12424_vm1 = vmmov %vm12422_vm0 }
 0xed6   :  { %vm12426_vm14 = vmmov %vm12422_vm0 }
 0xed7   :  { %vm12428_vm8 = vmmov %vm12422_vm0 }
 0xed8   :  { %vm12430_vm3 = vmmov %vm12422_vm0 }
 0xed9   :  { %vm12432_vm11 = vmmov %vm12422_vm0 }
 0xeda   :  { %vm12434_vm4 = vmmov %vm12422_vm0 }
 0xf16   :  { %v4873_v49 = vpop.f32.mrf.mxu1 }
 0xf17   :  { %v4874_v17 = vadd.f32 %v11154_v5, %v4873_v49  ;;  %v12427_v49 = vld [vmem:[#allocation37_spill] sm:$0xff] }
 0xf18   :  { %v5676_v39 = vpop.f32.mrf.mxu1 }
 0xf19   :  { %v4943_v58 = vadd.f32 %v4874_v17, %v12403_v3 }
 0xf1a   :  { %v4876_v26 = vpop.f32.mrf.mxu1 }
 0xf1b   :  { %4960 = vst.msk [vmem:[%s11275_s17] sm:$0xff] %vm12404_vm10, %v4943_v58  ;;  %v4877_v8 = vadd.f32 %v11154_v5, %v4876_v26  ;;  %v12429_v26 = vld [vmem:[#allocation55_spill] sm:$0xff]  ;;  %vm12436_vm10 = vcmask 254976  }
 0xf1c   :  { %v5677_v4 = vpop.f32.mrf.mxu1 }
 0xf1d   :  { %v4944_v33 = vadd.f32 %v4877_v8, %v12405_v12 }
 0xf1f   :  { %4961 = vst.msk [vmem:[%s11275_s17 + $0x8] sm:$0xff] %vm12406_vm12, %v4944_v33 }
 0xf39   :  { %v4881_v27 = vpop.f32.mrf.mxu1 }
 0xf3a   :  { %v4882_v15 = vadd.f32 %v11154_v5, %v4881_v27  ;;  %v12431_v27 = vld [vmem:[#allocation39_spill] sm:$0xff] }
 0xf3b   :  { %v5680_v40 = vpop.f32.mrf.mxu1 }
 0xf3c   :  { %v4945_v55 = vadd.f32 %v4882_v15, %v12407_v35 }
 0xf3d   :  { %v4884_v37 = vpop.f32.mrf.mxu1 }
 0xf3e   :  { %4962 = vst.msk [vmem:[%s11275_s17 + $0x10] sm:$0xff] %vm12408_vm6, %v4945_v55  ;;  %v4885_v16 = vadd.f32 %v11154_v5, %v4884_v37  ;;  %v12433_v37 = vld [vmem:[#allocation49_spill] sm:$0xff] }
 0xf3f   :  { %v5681_v63 = vpop.f32.mrf.mxu1 }
 0xf40   :  { %v4946_v25 = vadd.f32 %v4885_v16, %v12409_v9 }
 0xf41   :  { %v4889_v45 = vpop.f32.mrf.mxu1 }
 0xf42   :  { %4963 = vst.msk [vmem:[%s11275_s17 + $0x18] sm:$0xff] %vm12410_vm2, %v4946_v25  ;;  %v4890_v6 = vadd.f32 %v11154_v5, %v4889_v45  ;;  %v12435_v45 = vld [vmem:[#allocation59_spill] sm:$0xff] }
 0xf43   :  { %v5684_v51 = vpop.f32.mrf.mxu1 }
 0xf44   :  { %v4947_v62 = vadd.f32 %v4890_v6, %v12411_v19 }
 0xf45   :  { %v4892_v54 = vpop.f32.mrf.mxu1 }
 0xf46   :  { %4964 = vst.msk [vmem:[%s11275_s17 + $0x20] sm:$0xff] %vm12412_vm5, %v4947_v62  ;;  %v4893_v34 = vadd.f32 %v11154_v5, %v4892_v54 }
 0xf47   :  { %v5685_v48 = vpop.f32.mrf.mxu1 }
 0xf48   :  { %v4948_v59 = vadd.f32 %v4893_v34, %v12413_v44 }
 0xf49   :  { %v4897_v28 = vpop.f32.mrf.mxu1 }
 0xf4a   :  { %4965 = vst.msk [vmem:[%s11275_s17 + $0x28] sm:$0xff] %vm12414_vm7, %v4948_v59  ;;  %v4898_v23 = vadd.f32 %v11154_v5, %v4897_v28 }
 0xf4b   :  { %v5688_v50 = vpop.f32.mrf.mxu1 }
 0xf4c   :  { %v4949_v10 = vadd.f32 %v4898_v23, %v12415_v0 }
 0xf4d   :  { %v4900_v61 = vpop.f32.mrf.mxu1 }
 0xf4e   :  { %4966 = vst.msk [vmem:[%s11275_s17 + $0x30] sm:$0xff] %vm12416_vm9, %v4949_v10  ;;  %v4901_v31 = vadd.f32 %v11154_v5, %v4900_v61 }
 0xf4f   :  { %v5689_v18 = vpop.f32.mrf.mxu1 }
 0xf50   :  { %v4950_v43 = vadd.f32 %v4901_v31, %v12417_v42 }
 0xf52   :  { %4967 = vst.msk [vmem:[%s11275_s17 + $0x38] sm:$0xff] %vm12418_vm15, %v4950_v43  ;;  %v4905_v24 = vpop.f32.mrf.mxu1 }
 0xf53   :  { %v4906_v38 = vadd.f32 %v11154_v5, %v4905_v24 }
 0xf54   :  { %v5692_v56 = vpop.f32.mrf.mxu1 }
 0xf55   :  { %v4951_v47 = vadd.f32 %v4906_v38, %v12419_v30 }
 0xf56   :  { %v4908_v21 = vpop.f32.mrf.mxu1 }
 0xf57   :  { %4968 = vst.msk [vmem:[%s11275_s17 + $0x40] sm:$0xff] %vm12420_vm13, %v4951_v47  ;;  %v4909_v11 = vadd.f32 %v11154_v5, %v4908_v21 }
 0xf58   :  { %v5693_v36 = vpop.f32.mrf.mxu1 }
 0xf59   :  { %v4952_v29 = vadd.f32 %v4909_v11, %v12421_v20 }
 0xf5b   :  { %4969 = vst.msk [vmem:[%s11275_s17 + $0x48] sm:$0xff] %vm12422_vm0, %v4952_v29 }
 0xf71   :  { %v4913_v53 = vpop.f32.mrf.mxu1 }
 0xf72   :  { %v4914_v52 = vadd.f32 %v11154_v5, %v4913_v53 }
 0xf73   :  { %v5696_v57 = vpop.f32.mrf.mxu1 }
 0xf74   :  { %v4953_v60 = vadd.f32 %v4914_v52, %v12423_v41 }
 0xf75   :  { %v4916_v2 = vpop.f32.mrf.mxu1 }
 0xf76   :  { %4970 = vst.msk [vmem:[%s11275_s17 + $0x50] sm:$0xff] %vm12424_vm1, %v4953_v60  ;;  %v4917_v22 = vadd.f32 %v11154_v5, %v4916_v2 }
 0xf77   :  { %v5697_v7 = vpop.f32.mrf.mxu1 }
 0xf78   :  { %v4954_v14 = vadd.f32 %v4917_v22, %v12425_v46 }
 0xf79   :  { %v4921_v32 = vpop.f32.mrf.mxu1 }
 0xf7a   :  { %4971 = vst.msk [vmem:[%s11275_s17 + $0x58] sm:$0xff] %vm12426_vm14, %v4954_v14  ;;  %v4922_v13 = vadd.f32 %v11154_v5, %v4921_v32 }
 0xf7b   :  { %v5700_v1 = vpop.f32.mrf.mxu1 }
 0xf7c   :  { %v4955_v17 = vadd.f32 %v4922_v13, %v12427_v49 }
 0xf7d   :  { %v4924_v39 = vpop.f32.mrf.mxu1 }
 0xf7e   :  { %4972 = vst.msk [vmem:[%s11275_s17 + $0x60] sm:$0xff] %vm12428_vm8, %v4955_v17  ;;  %v4925_v3 = vadd.f32 %v11154_v5, %v4924_v39 }
 0xf7f   :  { %v5701_v58 = vpop.f32.mrf.mxu1 }
 0xf80   :  { %v4956_v8 = vadd.f32 %v4925_v3, %v12429_v26 }
 0xf81   :  { %v4929_v4 = vpop.f32.mrf.mxu1 }
 0xf82   :  { %4973 = vst.msk [vmem:[%s11275_s17 + $0x68] sm:$0xff] %vm12430_vm3, %v4956_v8  ;;  %v4930_v12 = vadd.f32 %v11154_v5, %v4929_v4 }
 0xf83   :  { %v5704_v33 = vpop.f32.mrf.mxu1 }
 0xf84   :  { %v4957_v15 = vadd.f32 %v4930_v12, %v12431_v27 }
 0xf85   :  { %v4932_v40 = vpop.f32.mrf.mxu1 }
 0xf86   :  { %4974 = vst.msk [vmem:[%s11275_s17 + $0x70] sm:$0xff] %vm12432_vm11, %v4957_v15  ;;  %v4933_v35 = vadd.f32 %v11154_v5, %v4932_v40 }
 0xf87   :  { %v5705_v55 = vpop.f32.mrf.mxu1 }
 0xf88   :  { %v4958_v16 = vadd.f32 %v4933_v35, %v12433_v37 }
 0xf89   :  { %v4937_v63 = vpop.f32.mrf.mxu1 }
 0xf8a   :  { %4975 = vst.msk [vmem:[%s11275_s17 + $0x78] sm:$0xff] %vm12434_vm4, %v4958_v16  ;;  %v4938_v9 = vadd.f32 %v11154_v5, %v4937_v63 }
 0xf8b   :  { %v5708_v25 = vpop.f32.mrf.mxu1 }
 0xf8c   :  { %v4959_v6 = vadd.f32 %v4938_v9, %v12435_v45 }
 0xf8d   :  { %v4940_v51 = vpop.f32.mrf.mxu1 }
 0xf8e   :  { %4976 = vst.msk [vmem:[%s11275_s17 + $0x80] sm:$0x3] %vm12436_vm10, %v4959_v6 }
 0xf8f   :  { %v5709_v19 = vpop.f32.mrf.mxu1 }
 0xf90   :  { %6105 = dma.done.wait [#allocation4], 32  }
 0xf91   :  { %6106 = vsyncadd [#allocation4], 4294967264 }
 0xf92   :  { %4994 = vsyncpa [#allocation4], 1 }

</bundles_post_ra>
